<compile_context>
chip_gen: v7x
topology: tpu7x:2x2x1
jax: 0.10.0
libtpu: 0.0.40
codegen_flags: <defaults>
</compile_context>

<pallas_src>
import jax
import jax.numpy as jnp
from jax import lax
from jax.experimental import pallas as pl
from jax.experimental.pallas import tpu as pltpu


def _gating_level_kernel(x1_ref, x2_ref, wg1_ref, wg2_ref, bg_ref,
                         wc1_ref, wc2_ref, bc_ref, out_ref, p1_ref, p2_ref):
    """One (batch element, output-channel tile) step of one pyramid level.

    x1_ref, x2_ref : (1, H, W, C)  bf16 unpadded previous / present features
    wg1_ref,wg2_ref: (9, C, 2)     bf16 fused [conv_previous|conv_present] gate
                                   conv, split into its input-channel halves
    bg_ref         : (1, 2)        f32 gate bias
    wc1_ref,wc2_ref: (9, C, TN)    bf16 final conv halves, one TN output tile
    bc_ref         : (1, TN)       f32
    out_ref        : (1, H, W, TN) f32
    p1_ref, p2_ref : (H+2, W+2, C) f32 VMEM scratch with the zero-padded gated
                                   features (persist across the j axis)
    """
    H, W, C = x1_ref.shape[1], x1_ref.shape[2], x1_ref.shape[3]
    TN = out_ref.shape[3]
    j = pl.program_id(1)

    # ---- j == 0: padded inputs, gate conv, gated features -------------------
    @pl.when(j == 0)
    def _():
        # Zero only the 1-pixel border strips; the interior is overwritten.
        zrow = jnp.zeros((1, W + 2, C), p1_ref.dtype)
        zcol = jnp.zeros((H, 1, C), p1_ref.dtype)
        for p_ref in (p1_ref, p2_ref):
            p_ref[0:1, :, :] = zrow
            p_ref[H + 1:H + 2, :, :] = zrow
            p_ref[1:H + 1, 0:1, :] = zcol
            p_ref[1:H + 1, W + 1:W + 2, :] = zcol

        x1 = x1_ref[0].astype(jnp.float32)          # (H, W, C)
        x2 = x2_ref[0].astype(jnp.float32)
        p1_ref[1:H + 1, 1:W + 1, :] = x1
        p2_ref[1:H + 1, 1:W + 1, :] = x2

        # Gate conv (2C -> 2) as 9 shifted matmuls, one per input stream, no
        # lane concat.  NOTE: only 2 MXU output columns are used; revisit with
        # a VPU/XLU reduction only if profiling shows this on the MXU critical
        # path.
        def gate_row(dh, acc):
            for dw in range(3):                      # static sublane offsets
                t = dh * 3 + dw
                a1 = p1_ref[pl.ds(dh, H), dw:dw + W, :]
                a2 = p2_ref[pl.ds(dh, H), dw:dw + W, :]
                a1 = a1.reshape(H * W, C).astype(jnp.bfloat16)
                a2 = a2.reshape(H * W, C).astype(jnp.bfloat16)
                acc = acc + jnp.dot(a1, wg1_ref[t],
                                    preferred_element_type=jnp.float32)
                acc = acc + jnp.dot(a2, wg2_ref[t],
                                    preferred_element_type=jnp.float32)
            return acc

        acc_g = lax.fori_loop(0, 3, gate_row,
                              jnp.zeros((H * W, 2), jnp.float32), unroll=True)
        gate = jax.nn.sigmoid(acc_g + bg_ref[...])   # (H*W, 2) f32

        # Apply gates; write the gated features straight back into the padded
        # scratch interiors (two channel halves -> no concat, aligned lanes).
        x1g = x1.reshape(H * W, C) * gate[:, 0:1]
        x2g = x2.reshape(H * W, C) * gate[:, 1:2]
        p1_ref[1:H + 1, 1:W + 1, :] = x1g.reshape(H, W, C)
        p2_ref[1:H + 1, 1:W + 1, :] = x2g.reshape(H, W, C)

    # ---- every j: final conv (2C -> TN) + ReLU ------------------------------
    def conv_row(dh, acc):
        for dw in range(3):
            t = dh * 3 + dw
            g1 = p1_ref[pl.ds(dh, H), dw:dw + W, :]
            g2 = p2_ref[pl.ds(dh, H), dw:dw + W, :]
            g1 = g1.reshape(H * W, C).astype(jnp.bfloat16)
            g2 = g2.reshape(H * W, C).astype(jnp.bfloat16)
            acc = acc + jnp.dot(g1, wc1_ref[t],
                                preferred_element_type=jnp.float32)
            acc = acc + jnp.dot(g2, wc2_ref[t],
                                preferred_element_type=jnp.float32)
        return acc

    acc = lax.fori_loop(0, 3, conv_row,
                        jnp.zeros((H * W, TN), jnp.float32), unroll=True)
    out = jnp.maximum(acc + bc_ref[...], 0.0)
    out_ref[0] = out.reshape(H, W, TN).astype(out_ref.dtype)


def gating_level(x_pre, x_cur, w_prev, b_prev, w_pres, b_pres,
                 w_conv, b_conv, *, cout_tile=256):
    """x_pre, x_cur: (N, H, W, C) float32 NHWC.  Conv weights in HWIO."""
    N, H, W, C = x_pre.shape
    TN = min(C, cout_tile)          # output-channel tile of the final conv
    J = pl.cdiv(C, TN)

    # bf16 operands for HBM/DMA/MXU; accumulation / bias / sigmoid stay f32.
    x1 = x_pre.astype(jnp.bfloat16)
    x2 = x_cur.astype(jnp.bfloat16)

    # Fuse the two 1-channel gate convs into one 2C->2 conv and split every
    # conv weight into its "previous" / "present" input-channel halves.
    wg = jnp.concatenate([w_prev, w_pres], axis=-1).reshape(9, 2 * C, 2)
    wg1 = wg[:, :C, :].astype(jnp.bfloat16)
    wg2 = wg[:, C:, :].astype(jnp.bfloat16)
    bg = jnp.concatenate([b_prev, b_pres]).reshape(1, 2).astype(jnp.float32)

    wc = w_conv.reshape(9, 2 * C, C)
    wc1 = wc[:, :C, :].astype(jnp.bfloat16)
    wc2 = wc[:, C:, :].astype(jnp.bfloat16)
    bc = b_conv.reshape(1, C).astype(jnp.float32)

    return pl.pallas_call(
        _gating_level_kernel,
        out_shape=jax.ShapeDtypeStruct((N, H, W, C), jnp.float32),
        grid_spec=pltpu.PrefetchScalarGridSpec(
            num_scalar_prefetch=0,
            grid=(N, J),
            in_specs=[
                pl.BlockSpec((1, H, W, C), lambda n, j: (n, 0, 0, 0)),
                pl.BlockSpec((1, H, W, C), lambda n, j: (n, 0, 0, 0)),
                # NOTE: the weight/bias specs below are grid-invariant; they
                # could additionally use pipeline_mode=pl.Buffered(1) to drop
                # their second pipeline buffer on VMEM-tight chips (v7x).
                pl.BlockSpec((9, C, 2), lambda n, j: (0, 0, 0)),
                pl.BlockSpec((9, C, 2), lambda n, j: (0, 0, 0)),
                pl.BlockSpec((1, 2), lambda n, j: (0, 0)),
                pl.BlockSpec((9, C, TN), lambda n, j: (0, 0, j)),
                pl.BlockSpec((9, C, TN), lambda n, j: (0, 0, j)),
                pl.BlockSpec((1, TN), lambda n, j: (0, j)),
            ],
            out_specs=pl.BlockSpec((1, H, W, TN), lambda n, j: (n, 0, 0, j)),
            scratch_shapes=[
                pltpu.VMEM((H + 2, W + 2, C), jnp.float32),
                pltpu.VMEM((H + 2, W + 2, C), jnp.float32),
            ],
        ),
        compiler_params=pltpu.CompilerParams(
            dimension_semantics=("parallel", "arbitrary"),
            vmem_limit_bytes=64 * 1024 * 1024),
    )(x1, x2, wg1, wg2, bg, wc1, wc2, bc)


def gating_forward(x_pre_list, x_list, params):
    """Pallas equivalent of Gating.forward.  Inputs/outputs are NHWC lists."""
    outs = []
    for feat1, feat2, p in zip(x_pre_list, x_list, params):
        outs.append(gating_level(feat1, feat2,
                                 p["w_prev"], p["b_prev"],
                                 p["w_pres"], p["b_pres"],
                                 p["w_conv"], p["b_conv"]))
    return outs


# ------------------------- pure-JAX reference -------------------------------
def _conv3x3_ref(x, w_hwio, b):
    y = jax.lax.conv_general_dilated(
        x, w_hwio, window_strides=(1, 1), padding="SAME",
        dimension_numbers=("NHWC", "HWIO", "NHWC"))
    return y + b


def gating_forward_ref(x_pre_list, x_list, params):
    outs = []
    for feat1, feat2, p in zip(x_pre_list, x_list, params):
        cat = jnp.concatenate([feat1, feat2], axis=-1)
        pw = jax.nn.sigmoid(_conv3x3_ref(cat, p["w_prev"], p["b_prev"]))
        pr = jax.nn.sigmoid(_conv3x3_ref(cat, p["w_pres"], p["b_pres"]))
        gated = jnp.concatenate([feat1 * pw, feat2 * pr], axis=-1)
        outs.append(jax.nn.relu(_conv3x3_ref(gated, p["w_conv"], p["b_conv"])))
    return outs


# ------------------------------- demo ----------------------------------------
if __name__ == "__main__":
    key = jax.random.PRNGKey(0)

    # Small synthetic configuration (module default is (512,1024,...); small
    # channel counts / spatial sizes for the demo).
    in_channels = (4, 8)
    spatials = (16, 8)
    N = 2

    x_pre_list, x_list, params = [], [], []
    for i, (C, S) in enumerate(zip(in_channels, spatials)):
        key, k1, k2, k3, k4, k5 = jax.random.split(key, 6)
        x_pre_list.append(jax.random.normal(k1, (N, S, S, C), jnp.float32))
        x_list.append(jax.random.normal(k2, (N, S, S, C), jnp.float32))
        params.append({
            # HWIO conv weights, deterministic synthetic init (no checkpoint)
            "w_prev": 0.1 * jax.random.normal(k3, (3, 3, 2 * C, 1), jnp.float32),
            "b_prev": jnp.zeros((1,), jnp.float32),
            "w_pres": 0.1 * jax.random.normal(k4, (3, 3, 2 * C, 1), jnp.float32),
            "b_pres": jnp.zeros((1,), jnp.float32),
            "w_conv": 0.1 * jax.random.normal(k5, (3, 3, 2 * C, C), jnp.float32),
            "b_conv": jnp.zeros((C,), jnp.float32),
        })

    outs = gating_forward(x_pre_list, x_list, params)
    outs = [jax.block_until_ready(o) for o in outs]

    refs = gating_forward_ref(x_pre_list, x_list, params)
    for o, r in zip(outs, refs):
        assert o.shape == r.shape and o.dtype == r.dtype
        # bf16 matmul operands (f32 accumulation) -> slightly looser tolerance.
        assert jnp.allclose(o, r, rtol=5e-2, atol=5e-2), (
            float(jnp.max(jnp.abs(o - r))))

    print("KERNEL_OK")
</pallas_src>

<mosaic_0001>
module attributes {stable_mosaic.version = 11 : i64} {
  func.func @_gating_level_kernel(%arg0: i32, %arg1: i32, %arg2: memref<1x16x16x4xbf16, #tpu.memory_space<vmem>>, %arg3: memref<1x16x16x4xbf16, #tpu.memory_space<vmem>>, %arg4: memref<9x4x2xbf16, #tpu.memory_space<vmem>>, %arg5: memref<9x4x2xbf16, #tpu.memory_space<vmem>>, %arg6: memref<1x2xf32, #tpu.memory_space<vmem>>, %arg7: memref<9x4x4xbf16, #tpu.memory_space<vmem>>, %arg8: memref<9x4x4xbf16, #tpu.memory_space<vmem>>, %arg9: memref<1x4xf32, #tpu.memory_space<vmem>>, %arg10: memref<1x16x16x4xf32, #tpu.memory_space<vmem>>, %arg11: memref<18x18x4xf32, #tpu.memory_space<vmem>>, %arg12: memref<18x18x4xf32, #tpu.memory_space<vmem>>) attributes {dimension_semantics = [#tpu.dimension_semantics<parallel>, #tpu.dimension_semantics<arbitrary>], iteration_bounds = array<i64: 2, 1>, scalar_prefetch = 0 : i64, scratch_operands = 2 : i64, tpu.core_type = #tpu.core_type<tc>, window_params = [{transform_indices = @transform_0, window_bounds = array<i64: 1, 16, 16, 4>}, {transform_indices = @transform_1, window_bounds = array<i64: 1, 16, 16, 4>}, {pipeline_mode = #tpu.pipeline_mode<synchronous>, transform_indices = @transform_2, window_bounds = array<i64: 9, 4, 2>}, {pipeline_mode = #tpu.pipeline_mode<synchronous>, transform_indices = @transform_3, window_bounds = array<i64: 9, 4, 2>}, {pipeline_mode = #tpu.pipeline_mode<synchronous>, transform_indices = @transform_4, window_bounds = array<i64: 1, 2>}, {transform_indices = @transform_5, window_bounds = array<i64: 9, 4, 4>}, {transform_indices = @transform_6, window_bounds = array<i64: 9, 4, 4>}, {transform_indices = @transform_7, window_bounds = array<i64: 1, 4>}, {transform_indices = @transform_8, window_bounds = array<i64: 1, 16, 16, 4>}]} {
    %c0_i32 = arith.constant 0 : i32
    %0 = arith.cmpi eq, %arg1, %c0_i32 : i32
    %1 = arith.extui %0 : i1 to i32
    %c0_i32_0 = arith.constant 0 : i32
    %2 = arith.cmpi ne, %1, %c0_i32_0 : i32
    scf.if %2 {
      %cst_114 = arith.constant 0.000000e+00 : f32
      %193 = vector.broadcast %cst_114 : f32 to vector<1x18x4xf32>
      %cst_115 = arith.constant 0.000000e+00 : f32
      %194 = vector.broadcast %cst_115 : f32 to vector<16x1x4xf32>
      %c0_116 = arith.constant 0 : index
      %c0_117 = arith.constant 0 : index
      %c0_118 = arith.constant 0 : index
      %195 = vector.load %arg11[%c0_116, %c0_117, %c0_118] : memref<18x18x4xf32, #tpu.memory_space<vmem>>, vector<1x18x4xf32>
      tpu.vector_store %arg11[%c0_116, %c0_117, %c0_118], %193 {strides = array<i32>} : memref<18x18x4xf32, #tpu.memory_space<vmem>>, vector<1x18x4xf32>,
      %c17 = arith.constant 17 : index
      %c0_119 = arith.constant 0 : index
      %c0_120 = arith.constant 0 : index
      %196 = vector.load %arg11[%c17, %c0_119, %c0_120] : memref<18x18x4xf32, #tpu.memory_space<vmem>>, vector<1x18x4xf32>
      tpu.vector_store %arg11[%c17, %c0_119, %c0_120], %193 {strides = array<i32>} : memref<18x18x4xf32, #tpu.memory_space<vmem>>, vector<1x18x4xf32>,
      %c1_121 = arith.constant 1 : index
      %c0_122 = arith.constant 0 : index
      %c0_123 = arith.constant 0 : index
      %197 = vector.load %arg11[%c1_121, %c0_122, %c0_123] : memref<18x18x4xf32, #tpu.memory_space<vmem>>, vector<16x1x4xf32>
      tpu.vector_store %arg11[%c1_121, %c0_122, %c0_123], %194 {strides = array<i32>} : memref<18x18x4xf32, #tpu.memory_space<vmem>>, vector<16x1x4xf32>,
      %c1_124 = arith.constant 1 : index
      %c17_125 = arith.constant 17 : index
      %c0_126 = arith.constant 0 : index
      %198 = vector.load %arg11[%c1_124, %c17_125, %c0_126] : memref<18x18x4xf32, #tpu.memory_space<vmem>>, vector<16x1x4xf32>
      tpu.vector_store %arg11[%c1_124, %c17_125, %c0_126], %194 {strides = array<i32>} : memref<18x18x4xf32, #tpu.memory_space<vmem>>, vector<16x1x4xf32>,
      %c0_127 = arith.constant 0 : index
      %c0_128 = arith.constant 0 : index
      %c0_129 = arith.constant 0 : index
      %199 = vector.load %arg12[%c0_127, %c0_128, %c0_129] : memref<18x18x4xf32, #tpu.memory_space<vmem>>, vector<1x18x4xf32>
      tpu.vector_store %arg12[%c0_127, %c0_128, %c0_129], %193 {strides = array<i32>} : memref<18x18x4xf32, #tpu.memory_space<vmem>>, vector<1x18x4xf32>,
      %c17_130 = arith.constant 17 : index
      %c0_131 = arith.constant 0 : index
      %c0_132 = arith.constant 0 : index
      %200 = vector.load %arg12[%c17_130, %c0_131, %c0_132] : memref<18x18x4xf32, #tpu.memory_space<vmem>>, vector<1x18x4xf32>
      tpu.vector_store %arg12[%c17_130, %c0_131, %c0_132], %193 {strides = array<i32>} : memref<18x18x4xf32, #tpu.memory_space<vmem>>, vector<1x18x4xf32>,
      %c1_133 = arith.constant 1 : index
      %c0_134 = arith.constant 0 : index
      %c0_135 = arith.constant 0 : index
      %201 = vector.load %arg12[%c1_133, %c0_134, %c0_135] : memref<18x18x4xf32, #tpu.memory_space<vmem>>, vector<16x1x4xf32>
      tpu.vector_store %arg12[%c1_133, %c0_134, %c0_135], %194 {strides = array<i32>} : memref<18x18x4xf32, #tpu.memory_space<vmem>>, vector<16x1x4xf32>,
      %c1_136 = arith.constant 1 : index
      %c17_137 = arith.constant 17 : index
      %c0_138 = arith.constant 0 : index
      %202 = vector.load %arg12[%c1_136, %c17_137, %c0_138] : memref<18x18x4xf32, #tpu.memory_space<vmem>>, vector<16x1x4xf32>
      tpu.vector_store %arg12[%c1_136, %c17_137, %c0_138], %194 {strides = array<i32>} : memref<18x18x4xf32, #tpu.memory_space<vmem>>, vector<16x1x4xf32>,
      %c0_139 = arith.constant 0 : index
      %c0_140 = arith.constant 0 : index
      %c0_141 = arith.constant 0 : index
      %c0_142 = arith.constant 0 : index
      %203 = vector.load %arg2[%c0_139, %c0_140, %c0_141, %c0_142] : memref<1x16x16x4xbf16, #tpu.memory_space<vmem>>, vector<1x16x16x4xbf16>
      %204 = vector.shape_cast %203 : vector<1x16x16x4xbf16> to vector<16x16x4xbf16>
      %205 = arith.extf %204 : vector<16x16x4xbf16> to vector<16x16x4xf32>
      %c0_143 = arith.constant 0 : index
      %c0_144 = arith.constant 0 : index
      %c0_145 = arith.constant 0 : index
      %c0_146 = arith.constant 0 : index
      %206 = vector.load %arg3[%c0_143, %c0_144, %c0_145, %c0_146] : memref<1x16x16x4xbf16, #tpu.memory_space<vmem>>, vector<1x16x16x4xbf16>
      %207 = vector.shape_cast %206 : vector<1x16x16x4xbf16> to vector<16x16x4xbf16>
      %208 = arith.extf %207 : vector<16x16x4xbf16> to vector<16x16x4xf32>
      %c1_147 = arith.constant 1 : index
      %c1_148 = arith.constant 1 : index
      %c0_149 = arith.constant 0 : index
      %209 = vector.load %arg11[%c1_147, %c1_148, %c0_149] : memref<18x18x4xf32, #tpu.memory_space<vmem>>, vector<16x16x4xf32>
      tpu.vector_store %arg11[%c1_147, %c1_148, %c0_149], %205 {strides = array<i32>} : memref<18x18x4xf32, #tpu.memory_space<vmem>>, vector<16x16x4xf32>,
      %c1_150 = arith.constant 1 : index
      %c1_151 = arith.constant 1 : index
      %c0_152 = arith.constant 0 : index
      %210 = vector.load %arg12[%c1_150, %c1_151, %c0_152] : memref<18x18x4xf32, #tpu.memory_space<vmem>>, vector<16x16x4xf32>
      tpu.vector_store %arg12[%c1_150, %c1_151, %c0_152], %208 {strides = array<i32>} : memref<18x18x4xf32, #tpu.memory_space<vmem>>, vector<16x16x4xf32>,
      %cst_153 = arith.constant 0.000000e+00 : f32
      %211 = vector.broadcast %cst_153 : f32 to vector<256x2xf32>
      %c0_i32_154 = arith.constant 0 : i32
      %c3_i32_155 = arith.constant 3 : i32
      %212 = arith.muli %c0_i32_154, %c3_i32_155 : i32
      %c0_i32_156 = arith.constant 0 : i32
      %213 = arith.addi %212, %c0_i32_156 : i32
      %214 = arith.index_cast %c0_i32_154 : i32 to index
      %c0_157 = arith.constant 0 : index
      %c0_158 = arith.constant 0 : index
      %215 = vector.load %arg11[%214, %c0_157, %c0_158] : memref<18x18x4xf32, #tpu.memory_space<vmem>>, vector<16x16x4xf32>
      %216 = arith.index_cast %c0_i32_154 : i32 to index
      %c0_159 = arith.constant 0 : index
      %c0_160 = arith.constant 0 : index
      %217 = vector.load %arg12[%216, %c0_159, %c0_160] : memref<18x18x4xf32, #tpu.memory_space<vmem>>, vector<16x16x4xf32>
      %218 = vector.shape_cast %215 : vector<16x16x4xf32> to vector<256x4xf32>
      %219 = arith.truncf %218 : vector<256x4xf32> to vector<256x4xbf16>
      %220 = vector.shape_cast %217 : vector<16x16x4xf32> to vector<256x4xf32>
      %221 = arith.truncf %220 : vector<256x4xf32> to vector<256x4xbf16>
      %222 = arith.index_cast %213 : i32 to index
      %c0_161 = arith.constant 0 : index
      %c0_162 = arith.constant 0 : index
      %223 = vector.load %arg4[%222, %c0_161, %c0_162] : memref<9x4x2xbf16, #tpu.memory_space<vmem>>, vector<1x4x2xbf16>
      %224 = vector.shape_cast %223 : vector<1x4x2xbf16> to vector<4x2xbf16>
      %cst_163 = arith.constant dense<0.000000e+00> : vector<256x2xf32>
      %225 = tpu.matmul %219, %224, %cst_163 {dimension_numbers = #tpu.dot_dimension_numbers<[1], [0], [0], [1], [0, 0, 1, 1], [], []>} : vector<256x4xbf16>, vector<4x2xbf16>, vector<256x2xf32> -> vector<256x2xf32>
      %226 = arith.addf %211, %225 : vector<256x2xf32>
      %227 = arith.index_cast %213 : i32 to index
      %c0_164 = arith.constant 0 : index
      %c0_165 = arith.constant 0 : index
      %228 = vector.load %arg5[%227, %c0_164, %c0_165] : memref<9x4x2xbf16, #tpu.memory_space<vmem>>, vector<1x4x2xbf16>
      %229 = vector.shape_cast %228 : vector<1x4x2xbf16> to vector<4x2xbf16>
      %cst_166 = arith.constant dense<0.000000e+00> : vector<256x2xf32>
      %230 = tpu.matmul %221, %229, %cst_166 {dimension_numbers = #tpu.dot_dimension_numbers<[1], [0], [0], [1], [0, 0, 1, 1], [], []>} : vector<256x4xbf16>, vector<4x2xbf16>, vector<256x2xf32> -> vector<256x2xf32>
      %231 = arith.addf %226, %230 : vector<256x2xf32>
      %c3_i32_167 = arith.constant 3 : i32
      %232 = arith.muli %c0_i32_154, %c3_i32_167 : i32
      %c1_i32_168 = arith.constant 1 : i32
      %233 = arith.addi %232, %c1_i32_168 : i32
      %234 = arith.index_cast %c0_i32_154 : i32 to index
      %c1_169 = arith.constant 1 : index
      %c0_170 = arith.constant 0 : index
      %235 = vector.load %arg11[%234, %c1_169, %c0_170] : memref<18x18x4xf32, #tpu.memory_space<vmem>>, vector<16x16x4xf32>
      %236 = arith.index_cast %c0_i32_154 : i32 to index
      %c1_171 = arith.constant 1 : index
      %c0_172 = arith.constant 0 : index
      %237 = vector.load %arg12[%236, %c1_171, %c0_172] : memref<18x18x4xf32, #tpu.memory_space<vmem>>, vector<16x16x4xf32>
      %238 = vector.shape_cast %235 : vector<16x16x4xf32> to vector<256x4xf32>
      %239 = arith.truncf %238 : vector<256x4xf32> to vector<256x4xbf16>
      %240 = vector.shape_cast %237 : vector<16x16x4xf32> to vector<256x4xf32>
      %241 = arith.truncf %240 : vector<256x4xf32> to vector<256x4xbf16>
      %242 = arith.index_cast %233 : i32 to index
      %c0_173 = arith.constant 0 : index
      %c0_174 = arith.constant 0 : index
      %243 = vector.load %arg4[%242, %c0_173, %c0_174] : memref<9x4x2xbf16, #tpu.memory_space<vmem>>, vector<1x4x2xbf16>
      %244 = vector.shape_cast %243 : vector<1x4x2xbf16> to vector<4x2xbf16>
      %cst_175 = arith.constant dense<0.000000e+00> : vector<256x2xf32>
      %245 = tpu.matmul %239, %244, %cst_175 {dimension_numbers = #tpu.dot_dimension_numbers<[1], [0], [0], [1], [0, 0, 1, 1], [], []>} : vector<256x4xbf16>, vector<4x2xbf16>, vector<256x2xf32> -> vector<256x2xf32>
      %246 = arith.addf %231, %245 : vector<256x2xf32>
      %247 = arith.index_cast %233 : i32 to index
      %c0_176 = arith.constant 0 : index
      %c0_177 = arith.constant 0 : index
      %248 = vector.load %arg5[%247, %c0_176, %c0_177] : memref<9x4x2xbf16, #tpu.memory_space<vmem>>, vector<1x4x2xbf16>
      %249 = vector.shape_cast %248 : vector<1x4x2xbf16> to vector<4x2xbf16>
      %cst_178 = arith.constant dense<0.000000e+00> : vector<256x2xf32>
      %250 = tpu.matmul %241, %249, %cst_178 {dimension_numbers = #tpu.dot_dimension_numbers<[1], [0], [0], [1], [0, 0, 1, 1], [], []>} : vector<256x4xbf16>, vector<4x2xbf16>, vector<256x2xf32> -> vector<256x2xf32>
      %251 = arith.addf %246, %250 : vector<256x2xf32>
      %c3_i32_179 = arith.constant 3 : i32
      %252 = arith.muli %c0_i32_154, %c3_i32_179 : i32
      %c2_i32_180 = arith.constant 2 : i32
      %253 = arith.addi %252, %c2_i32_180 : i32
      %254 = arith.index_cast %c0_i32_154 : i32 to index
      %c2_181 = arith.constant 2 : index
      %c0_182 = arith.constant 0 : index
      %255 = vector.load %arg11[%254, %c2_181, %c0_182] : memref<18x18x4xf32, #tpu.memory_space<vmem>>, vector<16x16x4xf32>
      %256 = arith.index_cast %c0_i32_154 : i32 to index
      %c2_183 = arith.constant 2 : index
      %c0_184 = arith.constant 0 : index
      %257 = vector.load %arg12[%256, %c2_183, %c0_184] : memref<18x18x4xf32, #tpu.memory_space<vmem>>, vector<16x16x4xf32>
      %258 = vector.shape_cast %255 : vector<16x16x4xf32> to vector<256x4xf32>
      %259 = arith.truncf %258 : vector<256x4xf32> to vector<256x4xbf16>
      %260 = vector.shape_cast %257 : vector<16x16x4xf32> to vector<256x4xf32>
      %261 = arith.truncf %260 : vector<256x4xf32> to vector<256x4xbf16>
      %262 = arith.index_cast %253 : i32 to index
      %c0_185 = arith.constant 0 : index
      %c0_186 = arith.constant 0 : index
      %263 = vector.load %arg4[%262, %c0_185, %c0_186] : memref<9x4x2xbf16, #tpu.memory_space<vmem>>, vector<1x4x2xbf16>
      %264 = vector.shape_cast %263 : vector<1x4x2xbf16> to vector<4x2xbf16>
      %cst_187 = arith.constant dense<0.000000e+00> : vector<256x2xf32>
      %265 = tpu.matmul %259, %264, %cst_187 {dimension_numbers = #tpu.dot_dimension_numbers<[1], [0], [0], [1], [0, 0, 1, 1], [], []>} : vector<256x4xbf16>, vector<4x2xbf16>, vector<256x2xf32> -> vector<256x2xf32>
      %266 = arith.addf %251, %265 : vector<256x2xf32>
      %267 = arith.index_cast %253 : i32 to index
      %c0_188 = arith.constant 0 : index
      %c0_189 = arith.constant 0 : index
      %268 = vector.load %arg5[%267, %c0_188, %c0_189] : memref<9x4x2xbf16, #tpu.memory_space<vmem>>, vector<1x4x2xbf16>
      %269 = vector.shape_cast %268 : vector<1x4x2xbf16> to vector<4x2xbf16>
      %cst_190 = arith.constant dense<0.000000e+00> : vector<256x2xf32>
      %270 = tpu.matmul %261, %269, %cst_190 {dimension_numbers = #tpu.dot_dimension_numbers<[1], [0], [0], [1], [0, 0, 1, 1], [], []>} : vector<256x4xbf16>, vector<4x2xbf16>, vector<256x2xf32> -> vector<256x2xf32>
      %271 = arith.addf %266, %270 : vector<256x2xf32>
      %c1_i32_191 = arith.constant 1 : i32
      %c3_i32_192 = arith.constant 3 : i32
      %272 = arith.muli %c1_i32_191, %c3_i32_192 : i32
      %c0_i32_193 = arith.constant 0 : i32
      %273 = arith.addi %272, %c0_i32_193 : i32
      %274 = arith.index_cast %c1_i32_191 : i32 to index
      %c0_194 = arith.constant 0 : index
      %c0_195 = arith.constant 0 : index
      %275 = vector.load %arg11[%274, %c0_194, %c0_195] : memref<18x18x4xf32, #tpu.memory_space<vmem>>, vector<16x16x4xf32>
      %276 = arith.index_cast %c1_i32_191 : i32 to index
      %c0_196 = arith.constant 0 : index
      %c0_197 = arith.constant 0 : index
      %277 = vector.load %arg12[%276, %c0_196, %c0_197] : memref<18x18x4xf32, #tpu.memory_space<vmem>>, vector<16x16x4xf32>
      %278 = vector.shape_cast %275 : vector<16x16x4xf32> to vector<256x4xf32>
      %279 = arith.truncf %278 : vector<256x4xf32> to vector<256x4xbf16>
      %280 = vector.shape_cast %277 : vector<16x16x4xf32> to vector<256x4xf32>
      %281 = arith.truncf %280 : vector<256x4xf32> to vector<256x4xbf16>
      %282 = arith.index_cast %273 : i32 to index
      %c0_198 = arith.constant 0 : index
      %c0_199 = arith.constant 0 : index
      %283 = vector.load %arg4[%282, %c0_198, %c0_199] : memref<9x4x2xbf16, #tpu.memory_space<vmem>>, vector<1x4x2xbf16>
      %284 = vector.shape_cast %283 : vector<1x4x2xbf16> to vector<4x2xbf16>
      %cst_200 = arith.constant dense<0.000000e+00> : vector<256x2xf32>
      %285 = tpu.matmul %279, %284, %cst_200 {dimension_numbers = #tpu.dot_dimension_numbers<[1], [0], [0], [1], [0, 0, 1, 1], [], []>} : vector<256x4xbf16>, vector<4x2xbf16>, vector<256x2xf32> -> vector<256x2xf32>
      %286 = arith.addf %271, %285 : vector<256x2xf32>
      %287 = arith.index_cast %273 : i32 to index
      %c0_201 = arith.constant 0 : index
      %c0_202 = arith.constant 0 : index
      %288 = vector.load %arg5[%287, %c0_201, %c0_202] : memref<9x4x2xbf16, #tpu.memory_space<vmem>>, vector<1x4x2xbf16>
      %289 = vector.shape_cast %288 : vector<1x4x2xbf16> to vector<4x2xbf16>
      %cst_203 = arith.constant dense<0.000000e+00> : vector<256x2xf32>
      %290 = tpu.matmul %281, %289, %cst_203 {dimension_numbers = #tpu.dot_dimension_numbers<[1], [0], [0], [1], [0, 0, 1, 1], [], []>} : vector<256x4xbf16>, vector<4x2xbf16>, vector<256x2xf32> -> vector<256x2xf32>
      %291 = arith.addf %286, %290 : vector<256x2xf32>
      %c3_i32_204 = arith.constant 3 : i32
      %292 = arith.muli %c1_i32_191, %c3_i32_204 : i32
      %c1_i32_205 = arith.constant 1 : i32
      %293 = arith.addi %292, %c1_i32_205 : i32
      %294 = arith.index_cast %c1_i32_191 : i32 to index
      %c1_206 = arith.constant 1 : index
      %c0_207 = arith.constant 0 : index
      %295 = vector.load %arg11[%294, %c1_206, %c0_207] : memref<18x18x4xf32, #tpu.memory_space<vmem>>, vector<16x16x4xf32>
      %296 = arith.index_cast %c1_i32_191 : i32 to index
      %c1_208 = arith.constant 1 : index
      %c0_209 = arith.constant 0 : index
      %297 = vector.load %arg12[%296, %c1_208, %c0_209] : memref<18x18x4xf32, #tpu.memory_space<vmem>>, vector<16x16x4xf32>
      %298 = vector.shape_cast %295 : vector<16x16x4xf32> to vector<256x4xf32>
      %299 = arith.truncf %298 : vector<256x4xf32> to vector<256x4xbf16>
      %300 = vector.shape_cast %297 : vector<16x16x4xf32> to vector<256x4xf32>
      %301 = arith.truncf %300 : vector<256x4xf32> to vector<256x4xbf16>
      %302 = arith.index_cast %293 : i32 to index
      %c0_210 = arith.constant 0 : index
      %c0_211 = arith.constant 0 : index
      %303 = vector.load %arg4[%302, %c0_210, %c0_211] : memref<9x4x2xbf16, #tpu.memory_space<vmem>>, vector<1x4x2xbf16>
      %304 = vector.shape_cast %303 : vector<1x4x2xbf16> to vector<4x2xbf16>
      %cst_212 = arith.constant dense<0.000000e+00> : vector<256x2xf32>
      %305 = tpu.matmul %299, %304, %cst_212 {dimension_numbers = #tpu.dot_dimension_numbers<[1], [0], [0], [1], [0, 0, 1, 1], [], []>} : vector<256x4xbf16>, vector<4x2xbf16>, vector<256x2xf32> -> vector<256x2xf32>
      %306 = arith.addf %291, %305 : vector<256x2xf32>
      %307 = arith.index_cast %293 : i32 to index
      %c0_213 = arith.constant 0 : index
      %c0_214 = arith.constant 0 : index
      %308 = vector.load %arg5[%307, %c0_213, %c0_214] : memref<9x4x2xbf16, #tpu.memory_space<vmem>>, vector<1x4x2xbf16>
      %309 = vector.shape_cast %308 : vector<1x4x2xbf16> to vector<4x2xbf16>
      %cst_215 = arith.constant dense<0.000000e+00> : vector<256x2xf32>
      %310 = tpu.matmul %301, %309, %cst_215 {dimension_numbers = #tpu.dot_dimension_numbers<[1], [0], [0], [1], [0, 0, 1, 1], [], []>} : vector<256x4xbf16>, vector<4x2xbf16>, vector<256x2xf32> -> vector<256x2xf32>
      %311 = arith.addf %306, %310 : vector<256x2xf32>
      %c3_i32_216 = arith.constant 3 : i32
      %312 = arith.muli %c1_i32_191, %c3_i32_216 : i32
      %c2_i32_217 = arith.constant 2 : i32
      %313 = arith.addi %312, %c2_i32_217 : i32
      %314 = arith.index_cast %c1_i32_191 : i32 to index
      %c2_218 = arith.constant 2 : index
      %c0_219 = arith.constant 0 : index
      %315 = vector.load %arg11[%314, %c2_218, %c0_219] : memref<18x18x4xf32, #tpu.memory_space<vmem>>, vector<16x16x4xf32>
      %316 = arith.index_cast %c1_i32_191 : i32 to index
      %c2_220 = arith.constant 2 : index
      %c0_221 = arith.constant 0 : index
      %317 = vector.load %arg12[%316, %c2_220, %c0_221] : memref<18x18x4xf32, #tpu.memory_space<vmem>>, vector<16x16x4xf32>
      %318 = vector.shape_cast %315 : vector<16x16x4xf32> to vector<256x4xf32>
      %319 = arith.truncf %318 : vector<256x4xf32> to vector<256x4xbf16>
      %320 = vector.shape_cast %317 : vector<16x16x4xf32> to vector<256x4xf32>
      %321 = arith.truncf %320 : vector<256x4xf32> to vector<256x4xbf16>
      %322 = arith.index_cast %313 : i32 to index
      %c0_222 = arith.constant 0 : index
      %c0_223 = arith.constant 0 : index
      %323 = vector.load %arg4[%322, %c0_222, %c0_223] : memref<9x4x2xbf16, #tpu.memory_space<vmem>>, vector<1x4x2xbf16>
      %324 = vector.shape_cast %323 : vector<1x4x2xbf16> to vector<4x2xbf16>
      %cst_224 = arith.constant dense<0.000000e+00> : vector<256x2xf32>
      %325 = tpu.matmul %319, %324, %cst_224 {dimension_numbers = #tpu.dot_dimension_numbers<[1], [0], [0], [1], [0, 0, 1, 1], [], []>} : vector<256x4xbf16>, vector<4x2xbf16>, vector<256x2xf32> -> vector<256x2xf32>
      %326 = arith.addf %311, %325 : vector<256x2xf32>
      %327 = arith.index_cast %313 : i32 to index
      %c0_225 = arith.constant 0 : index
      %c0_226 = arith.constant 0 : index
      %328 = vector.load %arg5[%327, %c0_225, %c0_226] : memref<9x4x2xbf16, #tpu.memory_space<vmem>>, vector<1x4x2xbf16>
      %329 = vector.shape_cast %328 : vector<1x4x2xbf16> to vector<4x2xbf16>
      %cst_227 = arith.constant dense<0.000000e+00> : vector<256x2xf32>
      %330 = tpu.matmul %321, %329, %cst_227 {dimension_numbers = #tpu.dot_dimension_numbers<[1], [0], [0], [1], [0, 0, 1, 1], [], []>} : vector<256x4xbf16>, vector<4x2xbf16>, vector<256x2xf32> -> vector<256x2xf32>
      %331 = arith.addf %326, %330 : vector<256x2xf32>
      %c2_i32_228 = arith.constant 2 : i32
      %c3_i32_229 = arith.constant 3 : i32
      %332 = arith.muli %c2_i32_228, %c3_i32_229 : i32
      %c0_i32_230 = arith.constant 0 : i32
      %333 = arith.addi %332, %c0_i32_230 : i32
      %334 = arith.index_cast %c2_i32_228 : i32 to index
      %c0_231 = arith.constant 0 : index
      %c0_232 = arith.constant 0 : index
      %335 = vector.load %arg11[%334, %c0_231, %c0_232] : memref<18x18x4xf32, #tpu.memory_space<vmem>>, vector<16x16x4xf32>
      %336 = arith.index_cast %c2_i32_228 : i32 to index
      %c0_233 = arith.constant 0 : index
      %c0_234 = arith.constant 0 : index
      %337 = vector.load %arg12[%336, %c0_233, %c0_234] : memref<18x18x4xf32, #tpu.memory_space<vmem>>, vector<16x16x4xf32>
      %338 = vector.shape_cast %335 : vector<16x16x4xf32> to vector<256x4xf32>
      %339 = arith.truncf %338 : vector<256x4xf32> to vector<256x4xbf16>
      %340 = vector.shape_cast %337 : vector<16x16x4xf32> to vector<256x4xf32>
      %341 = arith.truncf %340 : vector<256x4xf32> to vector<256x4xbf16>
      %342 = arith.index_cast %333 : i32 to index
      %c0_235 = arith.constant 0 : index
      %c0_236 = arith.constant 0 : index
      %343 = vector.load %arg4[%342, %c0_235, %c0_236] : memref<9x4x2xbf16, #tpu.memory_space<vmem>>, vector<1x4x2xbf16>
      %344 = vector.shape_cast %343 : vector<1x4x2xbf16> to vector<4x2xbf16>
      %cst_237 = arith.constant dense<0.000000e+00> : vector<256x2xf32>
      %345 = tpu.matmul %339, %344, %cst_237 {dimension_numbers = #tpu.dot_dimension_numbers<[1], [0], [0], [1], [0, 0, 1, 1], [], []>} : vector<256x4xbf16>, vector<4x2xbf16>, vector<256x2xf32> -> vector<256x2xf32>
      %346 = arith.addf %331, %345 : vector<256x2xf32>
      %347 = arith.index_cast %333 : i32 to index
      %c0_238 = arith.constant 0 : index
      %c0_239 = arith.constant 0 : index
      %348 = vector.load %arg5[%347, %c0_238, %c0_239] : memref<9x4x2xbf16, #tpu.memory_space<vmem>>, vector<1x4x2xbf16>
      %349 = vector.shape_cast %348 : vector<1x4x2xbf16> to vector<4x2xbf16>
      %cst_240 = arith.constant dense<0.000000e+00> : vector<256x2xf32>
      %350 = tpu.matmul %341, %349, %cst_240 {dimension_numbers = #tpu.dot_dimension_numbers<[1], [0], [0], [1], [0, 0, 1, 1], [], []>} : vector<256x4xbf16>, vector<4x2xbf16>, vector<256x2xf32> -> vector<256x2xf32>
      %351 = arith.addf %346, %350 : vector<256x2xf32>
      %c3_i32_241 = arith.constant 3 : i32
      %352 = arith.muli %c2_i32_228, %c3_i32_241 : i32
      %c1_i32_242 = arith.constant 1 : i32
      %353 = arith.addi %352, %c1_i32_242 : i32
      %354 = arith.index_cast %c2_i32_228 : i32 to index
      %c1_243 = arith.constant 1 : index
      %c0_244 = arith.constant 0 : index
      %355 = vector.load %arg11[%354, %c1_243, %c0_244] : memref<18x18x4xf32, #tpu.memory_space<vmem>>, vector<16x16x4xf32>
      %356 = arith.index_cast %c2_i32_228 : i32 to index
      %c1_245 = arith.constant 1 : index
      %c0_246 = arith.constant 0 : index
      %357 = vector.load %arg12[%356, %c1_245, %c0_246] : memref<18x18x4xf32, #tpu.memory_space<vmem>>, vector<16x16x4xf32>
      %358 = vector.shape_cast %355 : vector<16x16x4xf32> to vector<256x4xf32>
      %359 = arith.truncf %358 : vector<256x4xf32> to vector<256x4xbf16>
      %360 = vector.shape_cast %357 : vector<16x16x4xf32> to vector<256x4xf32>
      %361 = arith.truncf %360 : vector<256x4xf32> to vector<256x4xbf16>
      %362 = arith.index_cast %353 : i32 to index
      %c0_247 = arith.constant 0 : index
      %c0_248 = arith.constant 0 : index
      %363 = vector.load %arg4[%362, %c0_247, %c0_248] : memref<9x4x2xbf16, #tpu.memory_space<vmem>>, vector<1x4x2xbf16>
      %364 = vector.shape_cast %363 : vector<1x4x2xbf16> to vector<4x2xbf16>
      %cst_249 = arith.constant dense<0.000000e+00> : vector<256x2xf32>
      %365 = tpu.matmul %359, %364, %cst_249 {dimension_numbers = #tpu.dot_dimension_numbers<[1], [0], [0], [1], [0, 0, 1, 1], [], []>} : vector<256x4xbf16>, vector<4x2xbf16>, vector<256x2xf32> -> vector<256x2xf32>
      %366 = arith.addf %351, %365 : vector<256x2xf32>
      %367 = arith.index_cast %353 : i32 to index
      %c0_250 = arith.constant 0 : index
      %c0_251 = arith.constant 0 : index
      %368 = vector.load %arg5[%367, %c0_250, %c0_251] : memref<9x4x2xbf16, #tpu.memory_space<vmem>>, vector<1x4x2xbf16>
      %369 = vector.shape_cast %368 : vector<1x4x2xbf16> to vector<4x2xbf16>
      %cst_252 = arith.constant dense<0.000000e+00> : vector<256x2xf32>
      %370 = tpu.matmul %361, %369, %cst_252 {dimension_numbers = #tpu.dot_dimension_numbers<[1], [0], [0], [1], [0, 0, 1, 1], [], []>} : vector<256x4xbf16>, vector<4x2xbf16>, vector<256x2xf32> -> vector<256x2xf32>
      %371 = arith.addf %366, %370 : vector<256x2xf32>
      %c3_i32_253 = arith.constant 3 : i32
      %372 = arith.muli %c2_i32_228, %c3_i32_253 : i32
      %c2_i32_254 = arith.constant 2 : i32
      %373 = arith.addi %372, %c2_i32_254 : i32
      %374 = arith.index_cast %c2_i32_228 : i32 to index
      %c2_255 = arith.constant 2 : index
      %c0_256 = arith.constant 0 : index
      %375 = vector.load %arg11[%374, %c2_255, %c0_256] : memref<18x18x4xf32, #tpu.memory_space<vmem>>, vector<16x16x4xf32>
      %376 = arith.index_cast %c2_i32_228 : i32 to index
      %c2_257 = arith.constant 2 : index
      %c0_258 = arith.constant 0 : index
      %377 = vector.load %arg12[%376, %c2_257, %c0_258] : memref<18x18x4xf32, #tpu.memory_space<vmem>>, vector<16x16x4xf32>
      %378 = vector.shape_cast %375 : vector<16x16x4xf32> to vector<256x4xf32>
      %379 = arith.truncf %378 : vector<256x4xf32> to vector<256x4xbf16>
      %380 = vector.shape_cast %377 : vector<16x16x4xf32> to vector<256x4xf32>
      %381 = arith.truncf %380 : vector<256x4xf32> to vector<256x4xbf16>
      %382 = arith.index_cast %373 : i32 to index
      %c0_259 = arith.constant 0 : index
      %c0_260 = arith.constant 0 : index
      %383 = vector.load %arg4[%382, %c0_259, %c0_260] : memref<9x4x2xbf16, #tpu.memory_space<vmem>>, vector<1x4x2xbf16>
      %384 = vector.shape_cast %383 : vector<1x4x2xbf16> to vector<4x2xbf16>
      %cst_261 = arith.constant dense<0.000000e+00> : vector<256x2xf32>
      %385 = tpu.matmul %379, %384, %cst_261 {dimension_numbers = #tpu.dot_dimension_numbers<[1], [0], [0], [1], [0, 0, 1, 1], [], []>} : vector<256x4xbf16>, vector<4x2xbf16>, vector<256x2xf32> -> vector<256x2xf32>
      %386 = arith.addf %371, %385 : vector<256x2xf32>
      %387 = arith.index_cast %373 : i32 to index
      %c0_262 = arith.constant 0 : index
      %c0_263 = arith.constant 0 : index
      %388 = vector.load %arg5[%387, %c0_262, %c0_263] : memref<9x4x2xbf16, #tpu.memory_space<vmem>>, vector<1x4x2xbf16>
      %389 = vector.shape_cast %388 : vector<1x4x2xbf16> to vector<4x2xbf16>
      %cst_264 = arith.constant dense<0.000000e+00> : vector<256x2xf32>
      %390 = tpu.matmul %381, %389, %cst_264 {dimension_numbers = #tpu.dot_dimension_numbers<[1], [0], [0], [1], [0, 0, 1, 1], [], []>} : vector<256x4xbf16>, vector<4x2xbf16>, vector<256x2xf32> -> vector<256x2xf32>
      %391 = arith.addf %386, %390 : vector<256x2xf32>
      %c3_i32_265 = arith.constant 3 : i32
      %c0_266 = arith.constant 0 : index
      %c0_267 = arith.constant 0 : index
      %392 = vector.load %arg6[%c0_266, %c0_267] : memref<1x2xf32, #tpu.memory_space<vmem>>, vector<1x2xf32>
      %393 = vector.broadcast %392 : vector<1x2xf32> to vector<256x2xf32>
      %394 = arith.addf %391, %393 : vector<256x2xf32>
      %395 = arith.negf %394 : vector<256x2xf32>
      %396 = math.exp %395 : vector<256x2xf32>
      %cst_268 = arith.constant 1.000000e+00 : f32
      %397 = vector.broadcast %cst_268 : f32 to vector<256x2xf32>
      %398 = arith.addf %397, %396 : vector<256x2xf32>
      %399 = arith.divf %397, %398 : vector<256x2xf32>
      %400 = vector.shape_cast %205 : vector<16x16x4xf32> to vector<256x4xf32>
      %401 = vector.extract_strided_slice %399 {offsets = [0, 0], sizes = [256, 1], strides = [1, 1]} : vector<256x2xf32> to vector<256x1xf32>
      %402 = vector.broadcast %401 : vector<256x1xf32> to vector<256x4xf32>
      %403 = arith.mulf %400, %402 : vector<256x4xf32>
      %404 = vector.shape_cast %208 : vector<16x16x4xf32> to vector<256x4xf32>
      %405 = vector.extract_strided_slice %399 {offsets = [0, 1], sizes = [256, 1], strides = [1, 1]} : vector<256x2xf32> to vector<256x1xf32>
      %406 = vector.broadcast %405 : vector<256x1xf32> to vector<256x4xf32>
      %407 = arith.mulf %404, %406 : vector<256x4xf32>
      %408 = vector.shape_cast %403 : vector<256x4xf32> to vector<16x16x4xf32>
      %c1_269 = arith.constant 1 : index
      %c1_270 = arith.constant 1 : index
      %c0_271 = arith.constant 0 : index
      %409 = vector.load %arg11[%c1_269, %c1_270, %c0_271] : memref<18x18x4xf32, #tpu.memory_space<vmem>>, vector<16x16x4xf32>
      tpu.vector_store %arg11[%c1_269, %c1_270, %c0_271], %408 {strides = array<i32>} : memref<18x18x4xf32, #tpu.memory_space<vmem>>, vector<16x16x4xf32>,
      %410 = vector.shape_cast %407 : vector<256x4xf32> to vector<16x16x4xf32>
      %c1_272 = arith.constant 1 : index
      %c1_273 = arith.constant 1 : index
      %c0_274 = arith.constant 0 : index
      %411 = vector.load %arg12[%c1_272, %c1_273, %c0_274] : memref<18x18x4xf32, #tpu.memory_space<vmem>>, vector<16x16x4xf32>
      tpu.vector_store %arg12[%c1_272, %c1_273, %c0_274], %410 {strides = array<i32>} : memref<18x18x4xf32, #tpu.memory_space<vmem>>, vector<16x16x4xf32>,
    } else {
    }
    %cst = arith.constant 0.000000e+00 : f32
    %3 = vector.broadcast %cst : f32 to vector<256x4xf32>
    %c0_i32_1 = arith.constant 0 : i32
    %c3_i32 = arith.constant 3 : i32
    %4 = arith.muli %c0_i32_1, %c3_i32 : i32
    %c0_i32_2 = arith.constant 0 : i32
    %5 = arith.addi %4, %c0_i32_2 : i32
    %6 = arith.index_cast %c0_i32_1 : i32 to index
    %c0 = arith.constant 0 : index
    %c0_3 = arith.constant 0 : index
    %7 = vector.load %arg11[%6, %c0, %c0_3] : memref<18x18x4xf32, #tpu.memory_space<vmem>>, vector<16x16x4xf32>
    %8 = arith.index_cast %c0_i32_1 : i32 to index
    %c0_4 = arith.constant 0 : index
    %c0_5 = arith.constant 0 : index
    %9 = vector.load %arg12[%8, %c0_4, %c0_5] : memref<18x18x4xf32, #tpu.memory_space<vmem>>, vector<16x16x4xf32>
    %10 = vector.shape_cast %7 : vector<16x16x4xf32> to vector<256x4xf32>
    %11 = arith.truncf %10 : vector<256x4xf32> to vector<256x4xbf16>
    %12 = vector.shape_cast %9 : vector<16x16x4xf32> to vector<256x4xf32>
    %13 = arith.truncf %12 : vector<256x4xf32> to vector<256x4xbf16>
    %14 = arith.index_cast %5 : i32 to index
    %c0_6 = arith.constant 0 : index
    %c0_7 = arith.constant 0 : index
    %15 = vector.load %arg7[%14, %c0_6, %c0_7] : memref<9x4x4xbf16, #tpu.memory_space<vmem>>, vector<1x4x4xbf16>
    %16 = vector.shape_cast %15 : vector<1x4x4xbf16> to vector<4x4xbf16>
    %cst_8 = arith.constant dense<0.000000e+00> : vector<256x4xf32>
    %17 = tpu.matmul %11, %16, %cst_8 {dimension_numbers = #tpu.dot_dimension_numbers<[1], [0], [0], [1], [0, 0, 1, 1], [], []>} : vector<256x4xbf16>, vector<4x4xbf16>, vector<256x4xf32> -> vector<256x4xf32>
    %18 = arith.addf %3, %17 : vector<256x4xf32>
    %19 = arith.index_cast %5 : i32 to index
    %c0_9 = arith.constant 0 : index
    %c0_10 = arith.constant 0 : index
    %20 = vector.load %arg8[%19, %c0_9, %c0_10] : memref<9x4x4xbf16, #tpu.memory_space<vmem>>, vector<1x4x4xbf16>
    %21 = vector.shape_cast %20 : vector<1x4x4xbf16> to vector<4x4xbf16>
    %cst_11 = arith.constant dense<0.000000e+00> : vector<256x4xf32>
    %22 = tpu.matmul %13, %21, %cst_11 {dimension_numbers = #tpu.dot_dimension_numbers<[1], [0], [0], [1], [0, 0, 1, 1], [], []>} : vector<256x4xbf16>, vector<4x4xbf16>, vector<256x4xf32> -> vector<256x4xf32>
    %23 = arith.addf %18, %22 : vector<256x4xf32>
    %c3_i32_12 = arith.constant 3 : i32
    %24 = arith.muli %c0_i32_1, %c3_i32_12 : i32
    %c1_i32 = arith.constant 1 : i32
    %25 = arith.addi %24, %c1_i32 : i32
    %26 = arith.index_cast %c0_i32_1 : i32 to index
    %c1 = arith.constant 1 : index
    %c0_13 = arith.constant 0 : index
    %27 = vector.load %arg11[%26, %c1, %c0_13] : memref<18x18x4xf32, #tpu.memory_space<vmem>>, vector<16x16x4xf32>
    %28 = arith.index_cast %c0_i32_1 : i32 to index
    %c1_14 = arith.constant 1 : index
    %c0_15 = arith.constant 0 : index
    %29 = vector.load %arg12[%28, %c1_14, %c0_15] : memref<18x18x4xf32, #tpu.memory_space<vmem>>, vector<16x16x4xf32>
    %30 = vector.shape_cast %27 : vector<16x16x4xf32> to vector<256x4xf32>
    %31 = arith.truncf %30 : vector<256x4xf32> to vector<256x4xbf16>
    %32 = vector.shape_cast %29 : vector<16x16x4xf32> to vector<256x4xf32>
    %33 = arith.truncf %32 : vector<256x4xf32> to vector<256x4xbf16>
    %34 = arith.index_cast %25 : i32 to index
    %c0_16 = arith.constant 0 : index
    %c0_17 = arith.constant 0 : index
    %35 = vector.load %arg7[%34, %c0_16, %c0_17] : memref<9x4x4xbf16, #tpu.memory_space<vmem>>, vector<1x4x4xbf16>
    %36 = vector.shape_cast %35 : vector<1x4x4xbf16> to vector<4x4xbf16>
    %cst_18 = arith.constant dense<0.000000e+00> : vector<256x4xf32>
    %37 = tpu.matmul %31, %36, %cst_18 {dimension_numbers = #tpu.dot_dimension_numbers<[1], [0], [0], [1], [0, 0, 1, 1], [], []>} : vector<256x4xbf16>, vector<4x4xbf16>, vector<256x4xf32> -> vector<256x4xf32>
    %38 = arith.addf %23, %37 : vector<256x4xf32>
    %39 = arith.index_cast %25 : i32 to index
    %c0_19 = arith.constant 0 : index
    %c0_20 = arith.constant 0 : index
    %40 = vector.load %arg8[%39, %c0_19, %c0_20] : memref<9x4x4xbf16, #tpu.memory_space<vmem>>, vector<1x4x4xbf16>
    %41 = vector.shape_cast %40 : vector<1x4x4xbf16> to vector<4x4xbf16>
    %cst_21 = arith.constant dense<0.000000e+00> : vector<256x4xf32>
    %42 = tpu.matmul %33, %41, %cst_21 {dimension_numbers = #tpu.dot_dimension_numbers<[1], [0], [0], [1], [0, 0, 1, 1], [], []>} : vector<256x4xbf16>, vector<4x4xbf16>, vector<256x4xf32> -> vector<256x4xf32>
    %43 = arith.addf %38, %42 : vector<256x4xf32>
    %c3_i32_22 = arith.constant 3 : i32
    %44 = arith.muli %c0_i32_1, %c3_i32_22 : i32
    %c2_i32 = arith.constant 2 : i32
    %45 = arith.addi %44, %c2_i32 : i32
    %46 = arith.index_cast %c0_i32_1 : i32 to index
    %c2 = arith.constant 2 : index
    %c0_23 = arith.constant 0 : index
    %47 = vector.load %arg11[%46, %c2, %c0_23] : memref<18x18x4xf32, #tpu.memory_space<vmem>>, vector<16x16x4xf32>
    %48 = arith.index_cast %c0_i32_1 : i32 to index
    %c2_24 = arith.constant 2 : index
    %c0_25 = arith.constant 0 : index
    %49 = vector.load %arg12[%48, %c2_24, %c0_25] : memref<18x18x4xf32, #tpu.memory_space<vmem>>, vector<16x16x4xf32>
    %50 = vector.shape_cast %47 : vector<16x16x4xf32> to vector<256x4xf32>
    %51 = arith.truncf %50 : vector<256x4xf32> to vector<256x4xbf16>
    %52 = vector.shape_cast %49 : vector<16x16x4xf32> to vector<256x4xf32>
    %53 = arith.truncf %52 : vector<256x4xf32> to vector<256x4xbf16>
    %54 = arith.index_cast %45 : i32 to index
    %c0_26 = arith.constant 0 : index
    %c0_27 = arith.constant 0 : index
    %55 = vector.load %arg7[%54, %c0_26, %c0_27] : memref<9x4x4xbf16, #tpu.memory_space<vmem>>, vector<1x4x4xbf16>
    %56 = vector.shape_cast %55 : vector<1x4x4xbf16> to vector<4x4xbf16>
    %cst_28 = arith.constant dense<0.000000e+00> : vector<256x4xf32>
    %57 = tpu.matmul %51, %56, %cst_28 {dimension_numbers = #tpu.dot_dimension_numbers<[1], [0], [0], [1], [0, 0, 1, 1], [], []>} : vector<256x4xbf16>, vector<4x4xbf16>, vector<256x4xf32> -> vector<256x4xf32>
    %58 = arith.addf %43, %57 : vector<256x4xf32>
    %59 = arith.index_cast %45 : i32 to index
    %c0_29 = arith.constant 0 : index
    %c0_30 = arith.constant 0 : index
    %60 = vector.load %arg8[%59, %c0_29, %c0_30] : memref<9x4x4xbf16, #tpu.memory_space<vmem>>, vector<1x4x4xbf16>
    %61 = vector.shape_cast %60 : vector<1x4x4xbf16> to vector<4x4xbf16>
    %cst_31 = arith.constant dense<0.000000e+00> : vector<256x4xf32>
    %62 = tpu.matmul %53, %61, %cst_31 {dimension_numbers = #tpu.dot_dimension_numbers<[1], [0], [0], [1], [0, 0, 1, 1], [], []>} : vector<256x4xbf16>, vector<4x4xbf16>, vector<256x4xf32> -> vector<256x4xf32>
    %63 = arith.addf %58, %62 : vector<256x4xf32>
    %c1_i32_32 = arith.constant 1 : i32
    %c3_i32_33 = arith.constant 3 : i32
    %64 = arith.muli %c1_i32_32, %c3_i32_33 : i32
    %c0_i32_34 = arith.constant 0 : i32
    %65 = arith.addi %64, %c0_i32_34 : i32
    %66 = arith.index_cast %c1_i32_32 : i32 to index
    %c0_35 = arith.constant 0 : index
    %c0_36 = arith.constant 0 : index
    %67 = vector.load %arg11[%66, %c0_35, %c0_36] : memref<18x18x4xf32, #tpu.memory_space<vmem>>, vector<16x16x4xf32>
    %68 = arith.index_cast %c1_i32_32 : i32 to index
    %c0_37 = arith.constant 0 : index
    %c0_38 = arith.constant 0 : index
    %69 = vector.load %arg12[%68, %c0_37, %c0_38] : memref<18x18x4xf32, #tpu.memory_space<vmem>>, vector<16x16x4xf32>
    %70 = vector.shape_cast %67 : vector<16x16x4xf32> to vector<256x4xf32>
    %71 = arith.truncf %70 : vector<256x4xf32> to vector<256x4xbf16>
    %72 = vector.shape_cast %69 : vector<16x16x4xf32> to vector<256x4xf32>
    %73 = arith.truncf %72 : vector<256x4xf32> to vector<256x4xbf16>
    %74 = arith.index_cast %65 : i32 to index
    %c0_39 = arith.constant 0 : index
    %c0_40 = arith.constant 0 : index
    %75 = vector.load %arg7[%74, %c0_39, %c0_40] : memref<9x4x4xbf16, #tpu.memory_space<vmem>>, vector<1x4x4xbf16>
    %76 = vector.shape_cast %75 : vector<1x4x4xbf16> to vector<4x4xbf16>
    %cst_41 = arith.constant dense<0.000000e+00> : vector<256x4xf32>
    %77 = tpu.matmul %71, %76, %cst_41 {dimension_numbers = #tpu.dot_dimension_numbers<[1], [0], [0], [1], [0, 0, 1, 1], [], []>} : vector<256x4xbf16>, vector<4x4xbf16>, vector<256x4xf32> -> vector<256x4xf32>
    %78 = arith.addf %63, %77 : vector<256x4xf32>
    %79 = arith.index_cast %65 : i32 to index
    %c0_42 = arith.constant 0 : index
    %c0_43 = arith.constant 0 : index
    %80 = vector.load %arg8[%79, %c0_42, %c0_43] : memref<9x4x4xbf16, #tpu.memory_space<vmem>>, vector<1x4x4xbf16>
    %81 = vector.shape_cast %80 : vector<1x4x4xbf16> to vector<4x4xbf16>
    %cst_44 = arith.constant dense<0.000000e+00> : vector<256x4xf32>
    %82 = tpu.matmul %73, %81, %cst_44 {dimension_numbers = #tpu.dot_dimension_numbers<[1], [0], [0], [1], [0, 0, 1, 1], [], []>} : vector<256x4xbf16>, vector<4x4xbf16>, vector<256x4xf32> -> vector<256x4xf32>
    %83 = arith.addf %78, %82 : vector<256x4xf32>
    %c3_i32_45 = arith.constant 3 : i32
    %84 = arith.muli %c1_i32_32, %c3_i32_45 : i32
    %c1_i32_46 = arith.constant 1 : i32
    %85 = arith.addi %84, %c1_i32_46 : i32
    %86 = arith.index_cast %c1_i32_32 : i32 to index
    %c1_47 = arith.constant 1 : index
    %c0_48 = arith.constant 0 : index
    %87 = vector.load %arg11[%86, %c1_47, %c0_48] : memref<18x18x4xf32, #tpu.memory_space<vmem>>, vector<16x16x4xf32>
    %88 = arith.index_cast %c1_i32_32 : i32 to index
    %c1_49 = arith.constant 1 : index
    %c0_50 = arith.constant 0 : index
    %89 = vector.load %arg12[%88, %c1_49, %c0_50] : memref<18x18x4xf32, #tpu.memory_space<vmem>>, vector<16x16x4xf32>
    %90 = vector.shape_cast %87 : vector<16x16x4xf32> to vector<256x4xf32>
    %91 = arith.truncf %90 : vector<256x4xf32> to vector<256x4xbf16>
    %92 = vector.shape_cast %89 : vector<16x16x4xf32> to vector<256x4xf32>
    %93 = arith.truncf %92 : vector<256x4xf32> to vector<256x4xbf16>
    %94 = arith.index_cast %85 : i32 to index
    %c0_51 = arith.constant 0 : index
    %c0_52 = arith.constant 0 : index
    %95 = vector.load %arg7[%94, %c0_51, %c0_52] : memref<9x4x4xbf16, #tpu.memory_space<vmem>>, vector<1x4x4xbf16>
    %96 = vector.shape_cast %95 : vector<1x4x4xbf16> to vector<4x4xbf16>
    %cst_53 = arith.constant dense<0.000000e+00> : vector<256x4xf32>
    %97 = tpu.matmul %91, %96, %cst_53 {dimension_numbers = #tpu.dot_dimension_numbers<[1], [0], [0], [1], [0, 0, 1, 1], [], []>} : vector<256x4xbf16>, vector<4x4xbf16>, vector<256x4xf32> -> vector<256x4xf32>
    %98 = arith.addf %83, %97 : vector<256x4xf32>
    %99 = arith.index_cast %85 : i32 to index
    %c0_54 = arith.constant 0 : index
    %c0_55 = arith.constant 0 : index
    %100 = vector.load %arg8[%99, %c0_54, %c0_55] : memref<9x4x4xbf16, #tpu.memory_space<vmem>>, vector<1x4x4xbf16>
    %101 = vector.shape_cast %100 : vector<1x4x4xbf16> to vector<4x4xbf16>
    %cst_56 = arith.constant dense<0.000000e+00> : vector<256x4xf32>
    %102 = tpu.matmul %93, %101, %cst_56 {dimension_numbers = #tpu.dot_dimension_numbers<[1], [0], [0], [1], [0, 0, 1, 1], [], []>} : vector<256x4xbf16>, vector<4x4xbf16>, vector<256x4xf32> -> vector<256x4xf32>
    %103 = arith.addf %98, %102 : vector<256x4xf32>
    %c3_i32_57 = arith.constant 3 : i32
    %104 = arith.muli %c1_i32_32, %c3_i32_57 : i32
    %c2_i32_58 = arith.constant 2 : i32
    %105 = arith.addi %104, %c2_i32_58 : i32
    %106 = arith.index_cast %c1_i32_32 : i32 to index
    %c2_59 = arith.constant 2 : index
    %c0_60 = arith.constant 0 : index
    %107 = vector.load %arg11[%106, %c2_59, %c0_60] : memref<18x18x4xf32, #tpu.memory_space<vmem>>, vector<16x16x4xf32>
    %108 = arith.index_cast %c1_i32_32 : i32 to index
    %c2_61 = arith.constant 2 : index
    %c0_62 = arith.constant 0 : index
    %109 = vector.load %arg12[%108, %c2_61, %c0_62] : memref<18x18x4xf32, #tpu.memory_space<vmem>>, vector<16x16x4xf32>
    %110 = vector.shape_cast %107 : vector<16x16x4xf32> to vector<256x4xf32>
    %111 = arith.truncf %110 : vector<256x4xf32> to vector<256x4xbf16>
    %112 = vector.shape_cast %109 : vector<16x16x4xf32> to vector<256x4xf32>
    %113 = arith.truncf %112 : vector<256x4xf32> to vector<256x4xbf16>
    %114 = arith.index_cast %105 : i32 to index
    %c0_63 = arith.constant 0 : index
    %c0_64 = arith.constant 0 : index
    %115 = vector.load %arg7[%114, %c0_63, %c0_64] : memref<9x4x4xbf16, #tpu.memory_space<vmem>>, vector<1x4x4xbf16>
    %116 = vector.shape_cast %115 : vector<1x4x4xbf16> to vector<4x4xbf16>
    %cst_65 = arith.constant dense<0.000000e+00> : vector<256x4xf32>
    %117 = tpu.matmul %111, %116, %cst_65 {dimension_numbers = #tpu.dot_dimension_numbers<[1], [0], [0], [1], [0, 0, 1, 1], [], []>} : vector<256x4xbf16>, vector<4x4xbf16>, vector<256x4xf32> -> vector<256x4xf32>
    %118 = arith.addf %103, %117 : vector<256x4xf32>
    %119 = arith.index_cast %105 : i32 to index
    %c0_66 = arith.constant 0 : index
    %c0_67 = arith.constant 0 : index
    %120 = vector.load %arg8[%119, %c0_66, %c0_67] : memref<9x4x4xbf16, #tpu.memory_space<vmem>>, vector<1x4x4xbf16>
    %121 = vector.shape_cast %120 : vector<1x4x4xbf16> to vector<4x4xbf16>
    %cst_68 = arith.constant dense<0.000000e+00> : vector<256x4xf32>
    %122 = tpu.matmul %113, %121, %cst_68 {dimension_numbers = #tpu.dot_dimension_numbers<[1], [0], [0], [1], [0, 0, 1, 1], [], []>} : vector<256x4xbf16>, vector<4x4xbf16>, vector<256x4xf32> -> vector<256x4xf32>
    %123 = arith.addf %118, %122 : vector<256x4xf32>
    %c2_i32_69 = arith.constant 2 : i32
    %c3_i32_70 = arith.constant 3 : i32
    %124 = arith.muli %c2_i32_69, %c3_i32_70 : i32
    %c0_i32_71 = arith.constant 0 : i32
    %125 = arith.addi %124, %c0_i32_71 : i32
    %126 = arith.index_cast %c2_i32_69 : i32 to index
    %c0_72 = arith.constant 0 : index
    %c0_73 = arith.constant 0 : index
    %127 = vector.load %arg11[%126, %c0_72, %c0_73] : memref<18x18x4xf32, #tpu.memory_space<vmem>>, vector<16x16x4xf32>
    %128 = arith.index_cast %c2_i32_69 : i32 to index
    %c0_74 = arith.constant 0 : index
    %c0_75 = arith.constant 0 : index
    %129 = vector.load %arg12[%128, %c0_74, %c0_75] : memref<18x18x4xf32, #tpu.memory_space<vmem>>, vector<16x16x4xf32>
    %130 = vector.shape_cast %127 : vector<16x16x4xf32> to vector<256x4xf32>
    %131 = arith.truncf %130 : vector<256x4xf32> to vector<256x4xbf16>
    %132 = vector.shape_cast %129 : vector<16x16x4xf32> to vector<256x4xf32>
    %133 = arith.truncf %132 : vector<256x4xf32> to vector<256x4xbf16>
    %134 = arith.index_cast %125 : i32 to index
    %c0_76 = arith.constant 0 : index
    %c0_77 = arith.constant 0 : index
    %135 = vector.load %arg7[%134, %c0_76, %c0_77] : memref<9x4x4xbf16, #tpu.memory_space<vmem>>, vector<1x4x4xbf16>
    %136 = vector.shape_cast %135 : vector<1x4x4xbf16> to vector<4x4xbf16>
    %cst_78 = arith.constant dense<0.000000e+00> : vector<256x4xf32>
    %137 = tpu.matmul %131, %136, %cst_78 {dimension_numbers = #tpu.dot_dimension_numbers<[1], [0], [0], [1], [0, 0, 1, 1], [], []>} : vector<256x4xbf16>, vector<4x4xbf16>, vector<256x4xf32> -> vector<256x4xf32>
    %138 = arith.addf %123, %137 : vector<256x4xf32>
    %139 = arith.index_cast %125 : i32 to index
    %c0_79 = arith.constant 0 : index
    %c0_80 = arith.constant 0 : index
    %140 = vector.load %arg8[%139, %c0_79, %c0_80] : memref<9x4x4xbf16, #tpu.memory_space<vmem>>, vector<1x4x4xbf16>
    %141 = vector.shape_cast %140 : vector<1x4x4xbf16> to vector<4x4xbf16>
    %cst_81 = arith.constant dense<0.000000e+00> : vector<256x4xf32>
    %142 = tpu.matmul %133, %141, %cst_81 {dimension_numbers = #tpu.dot_dimension_numbers<[1], [0], [0], [1], [0, 0, 1, 1], [], []>} : vector<256x4xbf16>, vector<4x4xbf16>, vector<256x4xf32> -> vector<256x4xf32>
    %143 = arith.addf %138, %142 : vector<256x4xf32>
    %c3_i32_82 = arith.constant 3 : i32
    %144 = arith.muli %c2_i32_69, %c3_i32_82 : i32
    %c1_i32_83 = arith.constant 1 : i32
    %145 = arith.addi %144, %c1_i32_83 : i32
    %146 = arith.index_cast %c2_i32_69 : i32 to index
    %c1_84 = arith.constant 1 : index
    %c0_85 = arith.constant 0 : index
    %147 = vector.load %arg11[%146, %c1_84, %c0_85] : memref<18x18x4xf32, #tpu.memory_space<vmem>>, vector<16x16x4xf32>
    %148 = arith.index_cast %c2_i32_69 : i32 to index
    %c1_86 = arith.constant 1 : index
    %c0_87 = arith.constant 0 : index
    %149 = vector.load %arg12[%148, %c1_86, %c0_87] : memref<18x18x4xf32, #tpu.memory_space<vmem>>, vector<16x16x4xf32>
    %150 = vector.shape_cast %147 : vector<16x16x4xf32> to vector<256x4xf32>
    %151 = arith.truncf %150 : vector<256x4xf32> to vector<256x4xbf16>
    %152 = vector.shape_cast %149 : vector<16x16x4xf32> to vector<256x4xf32>
    %153 = arith.truncf %152 : vector<256x4xf32> to vector<256x4xbf16>
    %154 = arith.index_cast %145 : i32 to index
    %c0_88 = arith.constant 0 : index
    %c0_89 = arith.constant 0 : index
    %155 = vector.load %arg7[%154, %c0_88, %c0_89] : memref<9x4x4xbf16, #tpu.memory_space<vmem>>, vector<1x4x4xbf16>
    %156 = vector.shape_cast %155 : vector<1x4x4xbf16> to vector<4x4xbf16>
    %cst_90 = arith.constant dense<0.000000e+00> : vector<256x4xf32>
    %157 = tpu.matmul %151, %156, %cst_90 {dimension_numbers = #tpu.dot_dimension_numbers<[1], [0], [0], [1], [0, 0, 1, 1], [], []>} : vector<256x4xbf16>, vector<4x4xbf16>, vector<256x4xf32> -> vector<256x4xf32>
    %158 = arith.addf %143, %157 : vector<256x4xf32>
    %159 = arith.index_cast %145 : i32 to index
    %c0_91 = arith.constant 0 : index
    %c0_92 = arith.constant 0 : index
    %160 = vector.load %arg8[%159, %c0_91, %c0_92] : memref<9x4x4xbf16, #tpu.memory_space<vmem>>, vector<1x4x4xbf16>
    %161 = vector.shape_cast %160 : vector<1x4x4xbf16> to vector<4x4xbf16>
    %cst_93 = arith.constant dense<0.000000e+00> : vector<256x4xf32>
    %162 = tpu.matmul %153, %161, %cst_93 {dimension_numbers = #tpu.dot_dimension_numbers<[1], [0], [0], [1], [0, 0, 1, 1], [], []>} : vector<256x4xbf16>, vector<4x4xbf16>, vector<256x4xf32> -> vector<256x4xf32>
    %163 = arith.addf %158, %162 : vector<256x4xf32>
    %c3_i32_94 = arith.constant 3 : i32
    %164 = arith.muli %c2_i32_69, %c3_i32_94 : i32
    %c2_i32_95 = arith.constant 2 : i32
    %165 = arith.addi %164, %c2_i32_95 : i32
    %166 = arith.index_cast %c2_i32_69 : i32 to index
    %c2_96 = arith.constant 2 : index
    %c0_97 = arith.constant 0 : index
    %167 = vector.load %arg11[%166, %c2_96, %c0_97] : memref<18x18x4xf32, #tpu.memory_space<vmem>>, vector<16x16x4xf32>
    %168 = arith.index_cast %c2_i32_69 : i32 to index
    %c2_98 = arith.constant 2 : index
    %c0_99 = arith.constant 0 : index
    %169 = vector.load %arg12[%168, %c2_98, %c0_99] : memref<18x18x4xf32, #tpu.memory_space<vmem>>, vector<16x16x4xf32>
    %170 = vector.shape_cast %167 : vector<16x16x4xf32> to vector<256x4xf32>
    %171 = arith.truncf %170 : vector<256x4xf32> to vector<256x4xbf16>
    %172 = vector.shape_cast %169 : vector<16x16x4xf32> to vector<256x4xf32>
    %173 = arith.truncf %172 : vector<256x4xf32> to vector<256x4xbf16>
    %174 = arith.index_cast %165 : i32 to index
    %c0_100 = arith.constant 0 : index
    %c0_101 = arith.constant 0 : index
    %175 = vector.load %arg7[%174, %c0_100, %c0_101] : memref<9x4x4xbf16, #tpu.memory_space<vmem>>, vector<1x4x4xbf16>
    %176 = vector.shape_cast %175 : vector<1x4x4xbf16> to vector<4x4xbf16>
    %cst_102 = arith.constant dense<0.000000e+00> : vector<256x4xf32>
    %177 = tpu.matmul %171, %176, %cst_102 {dimension_numbers = #tpu.dot_dimension_numbers<[1], [0], [0], [1], [0, 0, 1, 1], [], []>} : vector<256x4xbf16>, vector<4x4xbf16>, vector<256x4xf32> -> vector<256x4xf32>
    %178 = arith.addf %163, %177 : vector<256x4xf32>
    %179 = arith.index_cast %165 : i32 to index
    %c0_103 = arith.constant 0 : index
    %c0_104 = arith.constant 0 : index
    %180 = vector.load %arg8[%179, %c0_103, %c0_104] : memref<9x4x4xbf16, #tpu.memory_space<vmem>>, vector<1x4x4xbf16>
    %181 = vector.shape_cast %180 : vector<1x4x4xbf16> to vector<4x4xbf16>
    %cst_105 = arith.constant dense<0.000000e+00> : vector<256x4xf32>
    %182 = tpu.matmul %173, %181, %cst_105 {dimension_numbers = #tpu.dot_dimension_numbers<[1], [0], [0], [1], [0, 0, 1, 1], [], []>} : vector<256x4xbf16>, vector<4x4xbf16>, vector<256x4xf32> -> vector<256x4xf32>
    %183 = arith.addf %178, %182 : vector<256x4xf32>
    %c3_i32_106 = arith.constant 3 : i32
    %c0_107 = arith.constant 0 : index
    %c0_108 = arith.constant 0 : index
    %184 = vector.load %arg9[%c0_107, %c0_108] : memref<1x4xf32, #tpu.memory_space<vmem>>, vector<1x4xf32>
    %185 = vector.broadcast %184 : vector<1x4xf32> to vector<256x4xf32>
    %186 = arith.addf %183, %185 : vector<256x4xf32>
    %cst_109 = arith.constant 0.000000e+00 : f32
    %187 = vector.broadcast %cst_109 : f32 to vector<256x4xf32>
    %188 = arith.maximumf %186, %187 : vector<256x4xf32>
    %189 = vector.shape_cast %188 : vector<256x4xf32> to vector<16x16x4xf32>
    %c0_110 = arith.constant 0 : index
    %c0_111 = arith.constant 0 : index
    %c0_112 = arith.constant 0 : index
    %c0_113 = arith.constant 0 : index
    %190 = vector.load %arg10[%c0_110, %c0_111, %c0_112, %c0_113] : memref<1x16x16x4xf32, #tpu.memory_space<vmem>>, vector<1x16x16x4xf32>
    %191 = vector.shape_cast %190 : vector<1x16x16x4xf32> to vector<16x16x4xf32>
    %192 = vector.shape_cast %189 : vector<16x16x4xf32> to vector<1x16x16x4xf32>
    tpu.vector_store %arg10[%c0_110, %c0_111, %c0_112, %c0_113], %192 {strides = array<i32>} : memref<1x16x16x4xf32, #tpu.memory_space<vmem>>, vector<1x16x16x4xf32>,
    return
  }
  func.func @transform_0(%arg0: i32, %arg1: i32) -> (i32, i32, i32, i32) {
    %c0_i32 = arith.constant 0 : i32
    %c0_i32_0 = arith.constant 0 : i32
    %c0_i32_1 = arith.constant 0 : i32
    %c0_i32_2 = arith.constant 0 : i32
    return %arg0, %c0_i32, %c0_i32_0, %c0_i32_1 : i32, i32, i32, i32
  }
  func.func @transform_1(%arg0: i32, %arg1: i32) -> (i32, i32, i32, i32) {
    %c0_i32 = arith.constant 0 : i32
    %c0_i32_0 = arith.constant 0 : i32
    %c0_i32_1 = arith.constant 0 : i32
    %c0_i32_2 = arith.constant 0 : i32
    return %arg0, %c0_i32, %c0_i32_0, %c0_i32_1 : i32, i32, i32, i32
  }
  func.func @transform_2(%arg0: i32, %arg1: i32) -> (i32, i32, i32) {
    %c0_i32 = arith.constant 0 : i32
    %c0_i32_0 = arith.constant 0 : i32
    %c0_i32_1 = arith.constant 0 : i32
    %c0_i32_2 = arith.constant 0 : i32
    return %c0_i32, %c0_i32_0, %c0_i32_1 : i32, i32, i32
  }
  func.func @transform_3(%arg0: i32, %arg1: i32) -> (i32, i32, i32) {
    %c0_i32 = arith.constant 0 : i32
    %c0_i32_0 = arith.constant 0 : i32
    %c0_i32_1 = arith.constant 0 : i32
    %c0_i32_2 = arith.constant 0 : i32
    return %c0_i32, %c0_i32_0, %c0_i32_1 : i32, i32, i32
  }
  func.func @transform_4(%arg0: i32, %arg1: i32) -> (i32, i32) {
    %c0_i32 = arith.constant 0 : i32
    %c0_i32_0 = arith.constant 0 : i32
    %c0_i32_1 = arith.constant 0 : i32
    return %c0_i32, %c0_i32_0 : i32, i32
  }
  func.func @transform_5(%arg0: i32, %arg1: i32) -> (i32, i32, i32) {
    %c0_i32 = arith.constant 0 : i32
    %c0_i32_0 = arith.constant 0 : i32
    %c0_i32_1 = arith.constant 0 : i32
    return %c0_i32, %c0_i32_0, %arg1 : i32, i32, i32
  }
  func.func @transform_6(%arg0: i32, %arg1: i32) -> (i32, i32, i32) {
    %c0_i32 = arith.constant 0 : i32
    %c0_i32_0 = arith.constant 0 : i32
    %c0_i32_1 = arith.constant 0 : i32
    return %c0_i32, %c0_i32_0, %arg1 : i32, i32, i32
  }
  func.func @transform_7(%arg0: i32, %arg1: i32) -> (i32, i32) {
    %c0_i32 = arith.constant 0 : i32
    %c0_i32_0 = arith.constant 0 : i32
    return %c0_i32, %arg1 : i32, i32
  }
  func.func @transform_8(%arg0: i32, %arg1: i32) -> (i32, i32, i32, i32) {
    %c0_i32 = arith.constant 0 : i32
    %c0_i32_0 = arith.constant 0 : i32
    %c0_i32_1 = arith.constant 0 : i32
    return %arg0, %c0_i32, %c0_i32_0, %arg1 : i32, i32, i32, i32
  }
}

</mosaic_0001>

<bundles_post_ra>
// kernel: tpu_custom_call.1
= control target key start
LH: loop header
LB: loop body
LE: loop exit
PB: predicated region body
PF: predicated region fallthrough
CT: control target
= control target key end

     0   :  { %s19380_s0 = inlined_call_operand.hbm [shape: bf16[2,16,16,4], index: 0, kind: input, shape index: {}]   ;;  %s19381_s1 = inlined_call_operand.hbm [shape: bf16[2,16,16,4], index: 1, kind: input, shape index: {}]   ;;  %s19382_s2 = inlined_call_operand.hbm [shape: bf16[9,4,2], index: 2, kind: input, shape index: {}]   ;;  %s19383_s3 = inlined_call_operand.hbm [shape: bf16[9,4,2], index: 3, kind: input, shape index: {}]   ;;  %s19384_s4 = inlined_call_operand.hbm [shape: f32[1,2], index: 4, kind: input, shape index: {}]   ;;  %s19385_s5 = inlined_call_operand.hbm [shape: bf16[9,4,4], index: 5, kind: input, shape index: {}]   ;;  %s19386_s6 = inlined_call_operand.hbm [shape: bf16[9,4,4], index: 6, kind: input, shape index: {}]   ;;  %s19387_s7 = inlined_call_operand.hbm [shape: f32[1,4], index: 7, kind: input, shape index: {}]   ;;  %s19388_s8 = inlined_call_operand.hbm [shape: f32[2,16,16,4], index: 8, kind: output, shape index: {}]  }
   0x1   :  { %19562 = sst [smem:[#allocation79_spill]] %s19380_s0 }
   0x2   :  { %19563 = sst [smem:[#allocation80_spill]] %s19382_s2 }
   0x3   :  { %19564 = sst [smem:[#allocation81_spill]] %s19383_s3 }
   0x4   :  { %19565 = sst [smem:[#allocation82_spill]] %s19384_s4 }
   0x5   :  { %19566 = sst [smem:[#allocation83_spill]] %s19385_s5 }
   0x6   :  { %19567 = sst [smem:[#allocation84_spill]] %s19388_s8 }
   0x7   :  { %13 = vsyncpa [#allocation5], 0 }
   0x8   :  { %15 = vsyncpa [#allocation5 + $0x1], 0 }
   0x9   :  { %16 = vsyncpa [#allocation8], 0 }
   0xa   :  { %18 = vsyncpa [#allocation8 + $0x1], 0 }
   0xb   :  { %19 = vsyncpa [#allocation11], 0 }
   0xc   :  { %20 = vsyncpa [#allocation14], 0 }
   0xd   :  { %21 = vsyncpa [#allocation17], 0 }
   0xe   :  { %22 = vsyncpa [#allocation6], 0 }
   0xf   :  { %24 = vsyncpa [#allocation6 + $0x1], 0  ;;  %s16585_s27 = smov 0   ;;  %s16587_s28 = smov 0  }
  0x10   :  { %s16589_s29 = smov 0   ;;  %s16591_s30 = smov 0  }
  0x11   :  { %s16593_s9 = smov 0   ;;  %s16595_s10 = smov 0  }
  0x12 LB: > { %19568 = sst [smem:[#allocation26_spill]] %s16512_s30  ;;  %s16616_s11 = sadd.s32 4294967295, %s16520_s10   ;;  %s16520_s10 = sphi %s16595_s10, %s30_s10   ;;  %s16516_s9 = sphi %s16593_s9, %s19810_s9   ;;  %s16512_s30 = sphi %s16591_s30, %s19809_s30   ;;  %s16508_s29 = sphi %s16589_s29, %s19808_s29   ;;  %s16504_s28 = sphi %s16587_s28, %s19807_s28   ;;  %s16500_s27 = sphi %s16585_s27, %s19806_s27  }
  0x13   : > { %p12159_p0 = scmp.ge.s32.totalorder %s16520_s10, 1  ;;  %p19390_p1 = scmp.eq.s32.totalorder %s16616_s11, 0 }
  0x14   : > { %p268_p2 = scmp.lt.s32.totalorder %s16520_s10, 3  ;;  %s16522_s13 = smov [#allocation9]  }
  0x15   : > { %s280_s14 = sshll.u32 %s16522_s13, 4  ;;  %s16523_s16 = smov [#allocation10]   ;;  %s16625_s14 = int_to_ptr.vmem [resolvable:$true] %s280_s14 }
  0x16   : > { %p16621_p3 = pnand %p12159_p0, %p268_p2  ;;  %s293_s17 = sshll.u32 %s16523_s16, 4  ;;  %s16636_s17 = int_to_ptr.vmem [resolvable:$true] %s293_s17 }
  0x17   : > { %s16524_s18 = smov [#allocation13]   ;;  %s19571_s2 = sld [smem:[#allocation80_spill]] }
  0x18   : > { %s19569_s12 = scalar_select %p16621_p3, 1, 0 }
  0x19   : > { %p15949_p4 = pneg %p16621_p3  ;;  %s16638_s19 = sshll.u32 %s16524_s18, 4  ;;  %s320_s19 = int_to_ptr.vmem [resolvable:$true] %s16638_s19 }
  0x1b   : > { %p16632_p6 = pnand %p15949_p4, %p19390_p1 }
  0x1d   : > { %s16190_s22 = scalar_lea.hbm %s19571_s2, 288  ;;  %p16648_p8 = pneg %p16632_p6 }
  0x1e   : > { %p16191_p7 = scmp.ne.s32.totalorder %s19571_s2, %s16190_s22  ;;  %p16197_p11 = scmp.lt.u32.totalorder %s16190_s22, %s19571_s2 }
  0x20   : > { %p16193_p9 = pnand %p16648_p8, %p16191_p7 }
  0x22   : > { %p16194_p10 = pneg %p16193_p9 }
  0x24   : > { %p16199_p12 = pnand %p16197_p11, %p16194_p10 }
  0x26   : > { %16202 = shalt.err (!%p16199_p12)
}
  0x27   : > { %s16203_s16 = scalar_lea.vmem %s16625_s14, 288  ;;  %p16211_p4 = scmp.lt.s32.totalorder %s16625_s14, %s16625_s14 }
  0x28   : > { %p16204_p13 = scmp.ne.s32.totalorder %s16625_s14, %s16203_s16  ;;  %p16212_p5 = scmp.lt.s32.totalorder %s16203_s16, %s16203_s16 }
  0x2a   : > { %p16206_p0 = pnand %p16204_p13, %p16648_p8  ;;  %p16213_p7 = por %p16212_p5, %p16211_p4 }
  0x2c   : > { %p16207_p2 = pneg %p16206_p0 }
  0x2e   : > { %p16214_p9 = pnand %p16213_p7, %p16207_p2 }
  0x30   : > { %16217 = shalt.err (!%p16214_p9)
}
  0x31   : > { %s16525_s18 = smov 32   ;;  %s16526_s20 = smov 2  }
  0x32   : > { %15952 = dma.hbm_to_vmem [thread:$0]  (!%p16632_p6), %s19571_s2, 288, %s16625_s14, [#allocation8], %s16525_s18, %s16525_s18, %s16526_s20  }
  0x33   : > { %s19573_s3 = sld [smem:[#allocation81_spill]] }
  0x39   : > { %s16218_s26 = scalar_lea.hbm %s19573_s3, 288 }
  0x3a   : > { %p16219_p5 = scmp.ne.s32.totalorder %s19573_s3, %s16218_s26  ;;  %p16225_p12 = scmp.lt.u32.totalorder %s16218_s26, %s19573_s3 }
  0x3c   : > { %p16221_p10 = pnand %p16219_p5, %p16648_p8 }
  0x3e   : > { %p16222_p11 = pneg %p16221_p10 }
  0x40   : > { %p16227_p13 = pnand %p16225_p12, %p16222_p11 }
  0x42   : > { %16230 = shalt.err (!%p16227_p13)
}
  0x43   : > { %s16231_s14 = scalar_lea.vmem %s16636_s17, 288  ;;  %p16239_p7 = scmp.lt.s32.totalorder %s16636_s17, %s16636_s17 }
  0x44   : > { %p16232_p0 = scmp.ne.s32.totalorder %s16636_s17, %s16231_s14  ;;  %p16240_p9 = scmp.lt.s32.totalorder %s16231_s14, %s16231_s14 }
  0x46   : > { %p16234_p2 = pnand %p16232_p0, %p16648_p8  ;;  %p16241_p5 = por %p16240_p9, %p16239_p7 }
  0x48   : > { %p16235_p4 = pneg %p16234_p2 }
  0x4a   : > { %p16242_p10 = pnand %p16241_p5, %p16235_p4 }
  0x4c   : > { %16245 = shalt.err (!%p16242_p10)
}
  0x4d   : > { %15955 = dma.hbm_to_vmem [thread:$0]  (!%p16632_p6), %s19573_s3, 288, %s16636_s17, [#allocation11], %s16525_s18, %s16525_s18, %s16526_s20  }
  0x4e   : > { %s19574_s5 = sld [smem:[#allocation83_spill]] }
  0x54   : > { %s16246_s23 = scalar_lea.hbm %s19574_s5, 288 }
  0x55   : > { %p16247_p11 = scmp.ne.s32.totalorder %s19574_s5, %s16246_s23  ;;  %p16253_p0 = scmp.lt.u32.totalorder %s16246_s23, %s19574_s5 }
  0x57   : > { %p16249_p12 = pnand %p16247_p11, %p16648_p8 }
  0x59   : > { %p16250_p13 = pneg %p16249_p12 }
  0x5b   : > { %p16255_p2 = pnand %p16253_p0, %p16250_p13 }
  0x5d   : > { %16258 = shalt.err (!%p16255_p2)
}
  0x5e   : > { %s16259_s14 = scalar_lea.vmem %s320_s19, 288  ;;  %p16267_p5 = scmp.lt.s32.totalorder %s320_s19, %s320_s19 }
  0x5f   : > { %p16260_p4 = scmp.ne.s32.totalorder %s320_s19, %s16259_s14  ;;  %p16268_p10 = scmp.lt.s32.totalorder %s16259_s14, %s16259_s14 }
  0x61   : > { %p16262_p7 = pnand %p16260_p4, %p16648_p8  ;;  %p16269_p1 = por %p16268_p10, %p16267_p5 }
  0x63   : > { %p16263_p9 = pneg %p16262_p7 }
  0x65   : > { %p16270_p3 = pnand %p16269_p1, %p16263_p9 }
  0x67   : > { %16273 = shalt.err (!%p16270_p3)
}
  0x68   : > { %15961 = dma.hbm_to_vmem [thread:$0]  (!%p16632_p6), %s19574_s5, 288, %s320_s19, [#allocation14], %s16525_s18, %s16525_s18, %s16526_s20  }
  0x69   : > { %s16527_s30 = smov [#allocation12]   ;;  %s16528_s22 = smov [#allocation15]  }
  0x6a   : > { %s307_s21 = sshll.u32 %s16527_s30, 4  ;;  %s334_s23 = sshll.u32 %s16528_s22, 4  ;;  %s308_s21 = int_to_ptr.vmem [resolvable:$true] %s307_s21  ;;  %s335_s23 = int_to_ptr.vmem [resolvable:$true] %s334_s23 }
  0x6b   : > { %s19575_s4 = sld [smem:[#allocation82_spill]] }
  0x71   : > { %s16274_s13 = scalar_lea.hbm %s19575_s4, 16 }
  0x72   : > { %p16275_p1 = scmp.ne.s32.totalorder %s19575_s4, %s16274_s13  ;;  %p16281_p12 = scmp.lt.u32.totalorder %s16274_s13, %s19575_s4 }
  0x74   : > { %p16277_p3 = pnand %p16275_p1, %p16648_p8 }
  0x76   : > { %p16278_p11 = pneg %p16277_p3 }
  0x78   : > { %p16283_p13 = pnand %p16281_p12, %p16278_p11 }
  0x7a   : > { %16286 = shalt.err (!%p16283_p13)
}
  0x7b   : > { %s16287_s19 = scalar_lea.vmem %s308_s21, 16  ;;  %s16294_s8 = scalar_lea.vmem %s308_s21, 32 }
  0x7c   : > { %p16288_p0 = scmp.ne.s32.totalorder %s308_s21, %s16287_s19  ;;  %p16295_p7 = scmp.lt.s32.totalorder %s308_s21, %s308_s21 }
  0x7d   : > { %p16296_p9 = scmp.lt.s32.totalorder %s16294_s8, %s16287_s19 }
  0x7e   : > { %p16290_p2 = pnand %p16288_p0, %p16648_p8 }
  0x7f   : > { %p16297_p5 = por %p16296_p9, %p16295_p7 }
  0x80   : > { %p16291_p4 = pneg %p16290_p2 }
  0x82   : > { %p16298_p10 = pnand %p16297_p5, %p16291_p4 }
  0x84   : > { %16301 = shalt.err (!%p16298_p10)
}
  0x85   : > { %15958 = dma.hbm_to_vmem [thread:$0]  (!%p16632_p6), %s19575_s4, 16, %s308_s21, [#allocation11]  }
  0x86   : > { %s16302_s26 = scalar_lea.hbm %s19386_s6, 288 }
  0x87   : > { %p16303_p1 = scmp.ne.s32.totalorder %s19386_s6, %s16302_s26  ;;  %p16309_p12 = scmp.lt.u32.totalorder %s16302_s26, %s19386_s6 }
  0x89   : > { %p16305_p3 = pnand %p16303_p1, %p16648_p8 }
  0x8b   : > { %p16306_p11 = pneg %p16305_p3 }
  0x8d   : > { %p16311_p13 = pnand %p16309_p12, %p16306_p11 }
  0x8f   : > { %16314 = shalt.err (!%p16311_p13)
}
  0x90   : > { %s16315_s19 = scalar_lea.vmem %s335_s23, 288  ;;  %p16323_p7 = scmp.lt.s32.totalorder %s335_s23, %s335_s23 }
  0x91   : > { %p16316_p0 = scmp.ne.s32.totalorder %s335_s23, %s16315_s19  ;;  %p16324_p9 = scmp.lt.s32.totalorder %s16315_s19, %s16315_s19 }
  0x93   : > { %p16318_p2 = pnand %p16316_p0, %p16648_p8  ;;  %p16325_p5 = por %p16324_p9, %p16323_p7 }
  0x95   : > { %p16319_p4 = pneg %p16318_p2 }
  0x97   : > { %p16326_p10 = pnand %p16325_p5, %p16319_p4 }
  0x99   : > { %16329 = shalt.err (!%p16326_p10)
}
  0x9a   : > { %15964 = dma.hbm_to_vmem [thread:$0]  (!%p16632_p6), %s19386_s6, 288, %s335_s23, [#allocation14], %s16525_s18, %s16525_s18, %s16526_s20  }
  0x9b   : > { %s16529_s30 = smov [#allocation16]   ;;  %s16330_s26 = scalar_lea.hbm %s19387_s7, 16 }
  0x9c   : > { %s350_s22 = sshll.u32 %s16529_s30, 4  ;;  %p16331_p1 = scmp.ne.s32.totalorder %s19387_s7, %s16330_s26  ;;  %s351_s22 = int_to_ptr.vmem [resolvable:$true] %s350_s22 }
  0x9d   : > { %p16337_p12 = scmp.lt.u32.totalorder %s16330_s26, %s19387_s7 }
  0x9e   : > { %p16333_p3 = pnand %p16331_p1, %p16648_p8 }
  0xa0   : > { %p16334_p11 = pneg %p16333_p3 }
  0xa2   : > { %p16339_p13 = pnand %p16337_p12, %p16334_p11 }
  0xa4   : > { %16342 = shalt.err (!%p16339_p13)
}
  0xa5   : > { %s16343_s18 = scalar_lea.vmem %s351_s22, 16  ;;  %s16350_s20 = scalar_lea.vmem %s351_s22, 32 }
  0xa6   : > { %p16344_p0 = scmp.ne.s32.totalorder %s351_s22, %s16343_s18  ;;  %p16351_p7 = scmp.lt.s32.totalorder %s351_s22, %s351_s22 }
  0xa7   : > { %p16352_p9 = scmp.lt.s32.totalorder %s16350_s20, %s16343_s18 }
  0xa8   : > { %p16346_p2 = pnand %p16344_p0, %p16648_p8 }
  0xa9   : > { %p16353_p5 = por %p16352_p9, %p16351_p7 }
  0xaa   : > { %p16347_p4 = pneg %p16346_p2 }
  0xac   : > { %p16354_p10 = pnand %p16353_p5, %p16347_p4 }
  0xae   : > { %16357 = shalt.err (!%p16354_p10)
}
  0xaf   : > { %15967 = dma.hbm_to_vmem [thread:$0]  (!%p16632_p6), %s19387_s7, 16, %s351_s22, [#allocation17]  }
  0xb0   : > { %s12158_s25 = sadd.s32 4294967294, %s16520_s10   ;;  %s42_s21 = sadd.s32 1, %s16516_s9 }
  0xb1   : > { %p44_p8 = scmp.ge.s32.totalorder %s42_s21, 2  ;;  %s49_s15 = sadd.s32 1, %s16508_s29 }
  0xb2   : > { %p56_p1 = scmp.ne.s32.totalorder %s16508_s29, %s16504_s28  ;;  %p57_p3 = scmp.eq.s32.totalorder %s16520_s10, 0 }
  0xb3   : > { %s19812_s21 = smov (%p44_p8, %s42_s21), 0  ;;  %p62_p12 = scmp.ne.s32.totalorder %s16504_s28, %s16500_s27 }
  0xb4   : > { %p16785_p11 = por %p57_p3, %p56_p1  ;;  %s46_s30 = ssub.s32 %s16516_s9, %s19812_s21 }
  0xb5   : > { %p255_p6 = scmp.eq.s32.totalorder %s16616_s11, 1  ;;  %p47_p13 = scmp.eq.s32.totalorder %s46_s30, 0 }
  0xb6   : > { %p19577_p0 = scmp.eq.s32.totalorder %s16616_s11, 0  ;;  %p261_p7 = scmp.eq.s32.totalorder %s12158_s25, 1 }
  0xb7   : > { %p16800_p4 = por %p255_p6, %p56_p1  ;;  %p15985_p5 = scmp.lt.s32.totalorder %s16520_s10, 2 }
  0xb8   : > { %p16796_p2 = por %p19577_p0, %p62_p12  ;;  %p16807_p9 = por %p261_p7, %p62_p12 }
  0xb9   : > { %s19579_s2 = scalar_select %p16800_p4, 1, 0 }
  0xba   : > { %s16805_s24 = scalar_select %p47_p13, %s16508_s29, %s49_s15  }
  0xbb   : > { %s19580_s26 = scalar_select %p16807_p9, 1, 0 }
  0xbc   : > { %s361_s13 = sand.u32 1, %s16508_s29   ;;  %s19392_s16 = sshll.u32 %s16516_s9, 11 }
  0xbd   : > { %s16814_s14 = sshll.u32 %s361_s13, 7  ;;  %s19581_s0 = sld [smem:[#allocation79_spill]] }
  0xbe   : > { %s365_s23 = scalar_lea.vmem [#allocation4], %s16814_s14  ;;  %p16826_p10 = pnand %p15985_p5, %p16785_p11 }
  0xbf   : > { %s372_s19 = sshll.u32 %s365_s23, 4  ;;  %s16832_s15 = scalar_lea.sflag [#allocation5], %s361_s13  ;;  %s16830_s19 = int_to_ptr.vmem [resolvable:$true] %s372_s19 }
  0xc0   : > { %p16360_p1 = pneg %p16826_p10 }
  0xc3   : > { %s16821_s20 = scalar_lea.hbm %s19581_s0, %s19392_s16  ;;  %s16363_s18 = scalar_lea.hbm %s19581_s0, 4096 }
  0xc4   : > { %s16358_s30 = scalar_lea.hbm %s16821_s20, 2048  ;;  %p16364_p11 = scmp.lt.u32.totalorder %s16821_s20, %s19581_s0 }
  0xc5   : > { %p16359_p8 = scmp.ne.s32.totalorder %s16821_s20, %s16358_s30  ;;  %p16365_p6 = scmp.lt.u32.totalorder %s16363_s18, %s16358_s30 }
  0xc6   : > { %p16367_p0 = scmp.lt.u32.totalorder %s16358_s30, %s16821_s20 }
  0xc7   : > { %p16361_p3 = pnand %p16360_p1, %p16359_p8  ;;  %p16366_p13 = por %p16365_p6, %p16364_p11 }
  0xc9   : > { %p16362_p12 = pneg %p16361_p3  ;;  %p16368_p7 = por %p16367_p0, %p16366_p13 }
  0xcb   : > { %p16369_p5 = pnand %p16368_p7, %p16362_p12 }
  0xcd   : > { %16372 = shalt.err (!%p16369_p5)
}
  0xce   : > { %s16373_s13 = scalar_lea.vmem %s16830_s19, 2048  ;;  %s16530_s17 = smov [#allocation4]  }
  0xcf   : > { %p16374_p8 = scmp.ne.s32.totalorder %s16830_s19, %s16373_s13  ;;  %s16378_s8 = sshll.u32 %s16530_s17, 4  ;;  %s16379_s8 = int_to_ptr.vmem [resolvable:$false] %s16378_s8 }
  0xd0   : > { %s16380_s16 = scalar_lea.vmem %s16379_s8, 4096  ;;  %p16381_p4 = scmp.lt.s32.totalorder %s16830_s19, %s16379_s8 }
  0xd1   : > { %p16376_p3 = pnand %p16374_p8, %p16360_p1  ;;  %p16382_p11 = scmp.lt.s32.totalorder %s16380_s16, %s16373_s13 }
  0xd3   : > { %p16377_p9 = pneg %p16376_p3  ;;  %p16383_p6 = por %p16382_p11, %p16381_p4 }
  0xd5   : > { %p16384_p13 = pnand %p16383_p6, %p16377_p9 }
  0xd7   : > { %16387 = shalt.err (!%p16384_p13)
}
  0xd8   : > { %s16531_s30 = smov 64   ;;  %s16532_s18 = smov 4  }
  0xd9   : > { %15971 = dma.hbm_to_vmem [thread:$0]  (!%p16826_p10), %s16821_s20, 2048, %s16830_s19, %s16832_s15, %s16531_s30, %s16531_s30, %s16532_s18  }
  0xda   : > { %s19583_s23 = sshll.u32 %s16516_s9, 11  ;;  %s386_s16 = scalar_lea.vmem [#allocation7], %s16814_s14 }
  0xdb   : > { %s16868_s8 = scalar_lea.hbm %s19381_s1, %s19583_s23  ;;  %s393_s0 = sshll.u32 %s386_s16, 4  ;;  %s16872_s0 = int_to_ptr.vmem [resolvable:$true] %s393_s0 }
  0xdc   : > { %s382_s3 = sand.u32 1, %s16520_s10   ;;  %s16388_s5 = scalar_lea.hbm %s16868_s8, 2048 }
  0xdd   : > { %s16874_s4 = scalar_lea.sflag [#allocation8], %s382_s3  ;;  %p16389_p4 = scmp.ne.s32.totalorder %s16868_s8, %s16388_s5 }
  0xde   : > { %s16393_s15 = scalar_lea.hbm %s19381_s1, 4096  ;;  %p16394_p0 = scmp.lt.u32.totalorder %s16868_s8, %s19381_s1 }
  0xdf   : > { %p16391_p9 = pnand %p16389_p4, %p16360_p1  ;;  %p16395_p7 = scmp.lt.u32.totalorder %s16393_s15, %s16388_s5 }
  0xe0   : > { %p16397_p8 = scmp.lt.u32.totalorder %s16388_s5, %s16868_s8 }
  0xe1   : > { %p16392_p12 = pneg %p16391_p9  ;;  %p16396_p5 = por %p16395_p7, %p16394_p0 }
  0xe3   : > { %p16398_p3 = por %p16397_p8, %p16396_p5 }
  0xe5   : > { %p16399_p11 = pnand %p16398_p3, %p16392_p12 }
  0xe7   : > { %16402 = shalt.err (!%p16399_p11)
}
  0xe8   : > { %s16403_s3 = scalar_lea.vmem %s16872_s0, 2048  ;;  %s16533_s14 = smov [#allocation7]  }
  0xe9   : > { %p16404_p6 = scmp.ne.s32.totalorder %s16872_s0, %s16403_s3  ;;  %s16408_s17 = sshll.u32 %s16533_s14, 4  ;;  %s16409_s17 = int_to_ptr.vmem [resolvable:$false] %s16408_s17 }
  0xea   : > { %s16410_s16 = scalar_lea.vmem %s16409_s17, 4096  ;;  %p16411_p9 = scmp.lt.s32.totalorder %s16872_s0, %s16409_s17 }
  0xeb   : > { %p16406_p13 = pnand %p16404_p6, %p16360_p1  ;;  %p16412_p0 = scmp.lt.s32.totalorder %s16410_s16, %s16403_s3 }
  0xed   : > { %p16407_p4 = pneg %p16406_p13  ;;  %p16413_p7 = por %p16412_p0, %p16411_p9 }
  0xef   : > { %p16414_p5 = pnand %p16413_p7, %p16407_p4 }
  0xf1   : > { %16417 = shalt.err (!%p16414_p5)
}
  0xf2   : > { %15974 = dma.hbm_to_vmem [thread:$0]  (!%p16826_p10), %s16868_s8, 2048, %s16872_s0, %s16874_s4, %s16531_s30, %s16531_s30, %s16532_s18  }
  0xf3   : > { %p19584_p1 = scmp.ne.s32.totalorder %s19569_s12, 0 }
  0xf5   : > { %405 = sbr.rel (%p19584_p1) target bundleno = 3191 (0xc77), region = 52 }
  0xfc   : > { %s16906_s5 = sand.u32 1, %s16504_s28  }
  0xfd   : > { %s12174_s20 = sshll.u32 %s16906_s5, 7  ;;  %s408_s19 = scalar_lea.sflag [#allocation5], %s16906_s5 }
  0xfe   : > { %s16910_s15 = scalar_lea.vmem [#allocation4], %s12174_s20 }
  0xff   : > { %16471 = dma.done.wait (%p16796_p2), %s408_s19, 2048  }
 0x100   : > { %16473 = vsyncadd (%p16796_p2), %s408_s19, 4294965248  ;;  %s416_s0 = sand.u32 1, %s16616_s11   ;;  %s16917_s12 = scalar_lea.vmem [#allocation7], %s12174_s20 }
 0x101   : > { %s417_s4 = scalar_lea.sflag [#allocation8], %s416_s0 }
 0x102   : > { %16475 = dma.done.wait (%p16796_p2), %s417_s4, 2048  }
 0x103   : > { %16477 = vsyncadd (%p16796_p2), %s417_s4, 4294965248  ;;  %p19585_p10 = scmp.eq.s32.totalorder %s16616_s11, 0 }
 0x105   : > { %16479 = dma.done.wait (%p19585_p10), [#allocation8], 288   ;;  %p19586_p12 = pmov %p19585_p10 }
 0x106   : > { %p19587_p8 = pmov %p19585_p10 }
 0x107   : > { %16481 = vsyncadd (%p19586_p12), [#allocation8], 4294967008 }
 0x108   : > { %16483 = dma.done.wait (%p19587_p8), [#allocation11], 304   ;;  %p19588_p3 = pmov %p19587_p8 }
 0x10a   : > { %16485 = vsyncadd (%p19588_p3), [#allocation11], 4294966992  ;;  %p19589_p11 = pmov %p19588_p3 }
 0x10b   : > { %p19590_p6 = pmov %p19588_p3 }
 0x10c   : > { %16487 = dma.done.wait (%p19589_p11), [#allocation14], 576  }
 0x10d   : > { %16489 = vsyncadd (%p19590_p6), [#allocation14], 4294966720  ;;  %p19591_p2 = pmov %p19588_p3 }
 0x10f   : > { %16491 = dma.done.wait (%p19591_p2), [#allocation17], 16   ;;  %p19592_p13 = pmov %p19591_p2 }
 0x110   : > { %vm487_vm0 = vcmask 31744   ;;  %vm497_vm1 = vcmask 24576   ;;  %v16534_v0 = vmov 0.0   ;;  %vm908_vm2 = vcmask 1041408   ;;  %v859_v1 = vld [vmem:[#allocation10] sm:$0x3] }
 0x111   : > { %16493 = vsyncadd (%p19592_p13), [#allocation17], 4294967280  ;;  %530 = vst.msk [vmem:[#allocation3] sm:$0xff] %vm487_vm0, %v16534_v0  ;;  %v17083_v2 = vld [vmem:[#allocation9] sm:$0x3]  ;;  %15883 = vmatprep.subr.msk.bf16.mxu0 %vm908_vm2, %v859_v1  ;;  %v910_v4 = vsel %vm908_vm2, %v859_v1, 0 }
 0x112   : > { %531 = vst.msk [vmem:[#allocation3 + $0x8] sm:$0xff] %vm487_vm0, %v16534_v0  ;;  %488 = vst.msk [vmem:[#allocation2] sm:$0xff] %vm487_vm0, %v16534_v0  ;;  %v17086_v3 = vld [vmem:[%s16917_s12] sm:$0xff]   ;;  %v17093_v9 = vld [vmem:[%s16917_s12 + $0x8] sm:$0xff]   ;;  %13572 = vmatpush3.bf16.msra.mxu0 %v910_v4  ;;  %vm490_vm3 = vcmask 25600   ;;  %v1122_v61 = vsel %vm908_vm2, %v17083_v2, 0 }
 0x113   : > { %489 = vst.msk [vmem:[#allocation2 + $0x8] sm:$0xff] %vm487_vm0, %v16534_v0  ;;  %493 = vst.msk [vmem:[#allocation2 + $0x198] sm:$0xff] %vm487_vm0, %v16534_v0  ;;  %v19452_v7 = vunpack.c.l.bf16 %v17086_v3  ;;  %v19450_v8 = vunpack.c.h.bf16 %v17086_v3  ;;  %v19453_v11 = vunpack.c.l.bf16 %v17093_v9  ;;  %v19451_v12 = vunpack.c.h.bf16 %v17093_v9  ;;  %v17098_v13 = vld [vmem:[%s16917_s12 + $0x10] sm:$0xff]   ;;  %v17101_v14 = vld [vmem:[%s16917_s12 + $0x18] sm:$0xff]   ;;  %15884 = vmatprep.subr.msk.bf16.mxu0 %vm908_vm2, %v17083_v2  ;;  %s12182_s11 = sshll.u32 %s16906_s5, 8  ;;  %s19801_s25 = sld [smem:[#allocation26_spill]] }
 0x114   : > { %494 = vst.msk [vmem:[#allocation2 + $0x1a0] sm:$0xff] %vm487_vm0, %v16534_v0  ;;  %534 = vst.msk [vmem:[#allocation3 + $0x198] sm:$0xff] %vm487_vm0, %v16534_v0  ;;  %v17104_v15 = vld [vmem:[%s16917_s12 + $0x20] sm:$0xff]   ;;  %v19449_v16 = vunpack.c.l.bf16 %v17098_v13  ;;  %v19448_v17 = vunpack.c.h.bf16 %v17098_v13  ;;  %v19447_v18 = vunpack.c.l.bf16 %v17101_v14  ;;  %v19446_v19 = vunpack.c.h.bf16 %v17101_v14  ;;  %v17119_v20 = vld [vmem:[%s16917_s12 + $0x28] sm:$0xff]   ;;  %s19230_s22 = scalar_lea.vmem [#allocation18], %s12182_s11  ;;  %s19802_s13 = sld [smem:[#allocation84_spill]] }
 0x115   : > { %535 = vst.msk [vmem:[#allocation3 + $0x1a0] sm:$0xff] %vm487_vm0, %v16534_v0  ;;  %19593 = vst [vmem:[#allocation27_spill] sm:$0xff] %v17086_v3  ;;  %v17122_v21 = vld [vmem:[%s16917_s12 + $0x30] sm:$0xff]   ;;  %v17125_v22 = vld [vmem:[%s16917_s12 + $0x38] sm:$0xff]   ;;  %v19445_v23 = vunpack.c.l.bf16 %v17104_v15  ;;  %v19444_v24 = vunpack.c.h.bf16 %v17104_v15  ;;  %v19443_v25 = vunpack.c.l.bf16 %v17119_v20  ;;  %v19442_v26 = vunpack.c.h.bf16 %v17119_v20  ;;  %s11988_s18 = sshll.u32 %s19230_s22, 4  ;;  %s11974_s14 = scalar_lea.sflag [#allocation6], %s16906_s5  ;;  %s19325_s18 = int_to_ptr.vmem [resolvable:$true] %s11988_s18 }
 0x116   : > { %538 = vst.msk [vmem:[#allocation3 + $0x18] sm:$0x1] %vm497_vm1, %v16534_v0  ;;  %498 = vst.msk [vmem:[#allocation2 + $0x18] sm:$0x1] %vm497_vm1, %v16534_v0  ;;  %v17143_v27 = vld [vmem:[%s16917_s12 + $0x40] sm:$0xff]   ;;  %v17146_v28 = vld [vmem:[%s16917_s12 + $0x48] sm:$0xff]   ;;  %v19441_v30 = vunpack.c.l.bf16 %v17122_v21  ;;  %v19440_v31 = vunpack.c.h.bf16 %v17122_v21  ;;  %v19439_v32 = vunpack.c.l.bf16 %v17125_v22  ;;  %v19438_v33 = vunpack.c.h.bf16 %v17125_v22 }
 0x117   : > { %499 = vst.msk [vmem:[#allocation2 + $0x30] sm:$0x1] %vm497_vm1, %v16534_v0  ;;  %500 = vst.msk [vmem:[#allocation2 + $0x48] sm:$0x1] %vm497_vm1, %v16534_v0  ;;  %v17149_v29 = vld [vmem:[%s16917_s12 + $0x50] sm:$0xff]   ;;  %v17168_v34 = vld [vmem:[%s16917_s12 + $0x58] sm:$0xff]   ;;  %v19437_v37 = vunpack.c.l.bf16 %v17143_v27  ;;  %v19435_v38 = vunpack.c.h.bf16 %v17143_v27  ;;  %v19434_v39 = vunpack.c.l.bf16 %v17146_v28  ;;  %v19424_v40 = vunpack.c.h.bf16 %v17146_v28 }
 0x118   : > { %501 = vst.msk [vmem:[#allocation2 + $0x60] sm:$0x1] %vm497_vm1, %v16534_v0  ;;  %502 = vst.msk [vmem:[#allocation2 + $0x78] sm:$0x1] %vm497_vm1, %v16534_v0  ;;  %v794_v5 = vld [vmem:[#allocation3] sm:$0xff]  ;;  %v17171_v35 = vld [vmem:[%s16917_s12 + $0x60] sm:$0xff]   ;;  %v19423_v42 = vunpack.c.l.bf16 %v17149_v29  ;;  %v19422_v43 = vunpack.c.h.bf16 %v17149_v29  ;;  %v19421_v44 = vunpack.c.l.bf16 %v17168_v34  ;;  %v19420_v45 = vunpack.c.h.bf16 %v17168_v34 }
 0x119   : > { %503 = vst.msk [vmem:[#allocation2 + $0x90] sm:$0x1] %vm497_vm1, %v16534_v0  ;;  %504 = vst.msk [vmem:[#allocation2 + $0xa8] sm:$0x1] %vm497_vm1, %v16534_v0  ;;  %v795_v6 = vld [vmem:[#allocation3 + $0x8] sm:$0xff]  ;;  %v17174_v36 = vld [vmem:[%s16917_s12 + $0x68] sm:$0xff]   ;;  %v19419_v48 = vunpack.c.l.bf16 %v17171_v35  ;;  %v19417_v49 = vunpack.c.h.bf16 %v17171_v35 }
 0x11a   : > { %505 = vst.msk [vmem:[#allocation2 + $0xc0] sm:$0x1] %vm497_vm1, %v16534_v0  ;;  %506 = vst.msk [vmem:[#allocation2 + $0xd8] sm:$0x1] %vm497_vm1, %v16534_v0  ;;  %v842_v10 = vpack.c.bf16 %v795_v6, %v794_v5  ;;  %v17193_v41 = vld [vmem:[%s16917_s12 + $0x70] sm:$0xff]   ;;  %v17212_v46 = vld [vmem:[%s16910_s15] sm:$0xff]   ;;  %v19395_v50 = vunpack.c.l.bf16 %v17174_v36  ;;  %v19394_v51 = vunpack.c.h.bf16 %v17174_v36 }
 0x11b   : > { %507 = vst.msk [vmem:[#allocation2 + $0xf0] sm:$0x1] %vm497_vm1, %v16534_v0  ;;  %508 = vst.msk [vmem:[#allocation2 + $0x108] sm:$0x1] %vm497_vm1, %v16534_v0  ;;  %v17215_v47 = vld [vmem:[%s16910_s15 + $0x8] sm:$0xff]   ;;  %v17234_v52 = vld [vmem:[%s16910_s15 + $0x10] sm:$0xff]   ;;  %v19401_v54 = vunpack.c.l.bf16 %v17193_v41  ;;  %v19397_v55 = vunpack.c.h.bf16 %v17193_v41  ;;  %v19396_v56 = vunpack.c.l.bf16 %v17212_v46  ;;  %v19400_v62 = vunpack.c.h.bf16 %v17212_v46 }
 0x11c   : > { %509 = vst.msk [vmem:[#allocation2 + $0x120] sm:$0x1] %vm497_vm1, %v16534_v0  ;;  %510 = vst.msk [vmem:[#allocation2 + $0x138] sm:$0x1] %vm497_vm1, %v16534_v0  ;;  %13573 = vmatprep.mubr.msk.bf16.mxu0 %vm487_vm0, %v842_v10  ;;  %v17237_v53 = vld [vmem:[%s16910_s15 + $0x18] sm:$0xff]   ;;  %v17255_v57 = vld [vmem:[%s16910_s15 + $0x20] sm:$0xff]   ;;  %v19398_v63 = vunpack.c.l.bf16 %v17215_v47  ;;  %v19402_v6 = vunpack.c.l.bf16 %v17234_v52  ;;  %v19404_v10 = vunpack.c.h.bf16 %v17234_v52 }
 0x11d   : > { %511 = vst.msk [vmem:[#allocation2 + $0x150] sm:$0x1] %vm497_vm1, %v16534_v0  ;;  %512 = vst.msk [vmem:[#allocation2 + $0x168] sm:$0x1] %vm497_vm1, %v16534_v0  ;;  %v17258_v58 = vld [vmem:[%s16910_s15 + $0x28] sm:$0xff]   ;;  %v17278_v1 = vld [vmem:[%s16910_s15 + $0x30] sm:$0xff]  }
 0x11e   : > { %513 = vst.msk [vmem:[#allocation2 + $0x180] sm:$0x1] %vm497_vm1, %v16534_v0  ;;  %514 = vst.msk [vmem:[#allocation2 + $0x29] sm:$0x1] %vm497_vm1, %v16534_v0  ;;  %s12800_s30 = sshll.u32 %s19801_s25, 12  ;;  %s16418_s17 = scalar_lea.vmem %s19325_s18, 4096 }
 0x11f   : > { %515 = vst.msk [vmem:[#allocation2 + $0x41] sm:$0x1] %vm497_vm1, %v16534_v0  ;;  %516 = vst.msk [vmem:[#allocation2 + $0x59] sm:$0x1] %vm497_vm1, %v16534_v0  ;;  %s19323_s3 = scalar_lea.hbm %s19802_s13, %s12800_s30  ;;  %p16419_p4 = scmp.ne.s32.totalorder %s19325_s18, %s16418_s17 }
 0x120   : > { %517 = vst.msk [vmem:[#allocation2 + $0x71] sm:$0x1] %vm497_vm1, %v16534_v0  ;;  %518 = vst.msk [vmem:[#allocation2 + $0x89] sm:$0x1] %vm497_vm1, %v16534_v0  ;;  %p19803_p9 = scmp.ne.s32.totalorder %s19579_s2, 0  ;;  %s16537_s16 = smov [#allocation18]  }
 0x121   : > { %519 = vst.msk [vmem:[#allocation2 + $0xa1] sm:$0x1] %vm497_vm1, %v16534_v0  ;;  %520 = vst.msk [vmem:[#allocation2 + $0xb9] sm:$0x1] %vm497_vm1, %v16534_v0  ;;  %s16422_s20 = sshll.u32 %s16537_s16, 4  ;;  %s16423_s20 = int_to_ptr.vmem [resolvable:$false] %s16422_s20 }
 0x122   : > { %521 = vst.msk [vmem:[#allocation2 + $0xd1] sm:$0x1] %vm497_vm1, %v16534_v0  ;;  %522 = vst.msk [vmem:[#allocation2 + $0xe9] sm:$0x1] %vm497_vm1, %v16534_v0  ;;  %p16420_p0 = pnand %p16419_p4, %p19803_p9  ;;  %s16424_s19 = scalar_lea.vmem %s16423_s20, 8192 }
 0x123   : > { %523 = vst.msk [vmem:[#allocation2 + $0x101] sm:$0x1] %vm497_vm1, %v16534_v0  ;;  %524 = vst.msk [vmem:[#allocation2 + $0x119] sm:$0x1] %vm497_vm1, %v16534_v0  ;;  %p16425_p5 = scmp.lt.s32.totalorder %s19325_s18, %s16423_s20  ;;  %p16426_p1 = scmp.lt.s32.totalorder %s16424_s19, %s16418_s17 }
 0x124   : > { %525 = vst.msk [vmem:[#allocation2 + $0x131] sm:$0x1] %vm497_vm1, %v16534_v0  ;;  %526 = vst.msk [vmem:[#allocation2 + $0x149] sm:$0x1] %vm497_vm1, %v16534_v0  ;;  %p16421_p7 = pneg %p16420_p0 }
 0x125   : > { %527 = vst.msk [vmem:[#allocation2 + $0x161] sm:$0x1] %vm497_vm1, %v16534_v0  ;;  %528 = vst.msk [vmem:[#allocation2 + $0x179] sm:$0x1] %vm497_vm1, %v16534_v0  ;;  %p16427_p10 = por %p16426_p1, %p16425_p5 }
 0x126   : > { %529 = vst.msk [vmem:[#allocation2 + $0x191] sm:$0x1] %vm497_vm1, %v16534_v0  ;;  %539 = vst.msk [vmem:[#allocation3 + $0x30] sm:$0x1] %vm497_vm1, %v16534_v0 }
 0x127   : > { %540 = vst.msk [vmem:[#allocation3 + $0x48] sm:$0x1] %vm497_vm1, %v16534_v0  ;;  %541 = vst.msk [vmem:[#allocation3 + $0x60] sm:$0x1] %vm497_vm1, %v16534_v0  ;;  %p16428_p12 = pnand %p16427_p10, %p16421_p7 }
 0x128   : > { %542 = vst.msk [vmem:[#allocation3 + $0x78] sm:$0x1] %vm497_vm1, %v16534_v0  ;;  %543 = vst.msk [vmem:[#allocation3 + $0x90] sm:$0x1] %vm497_vm1, %v16534_v0 }
 0x129   : > { %544 = vst.msk [vmem:[#allocation3 + $0xa8] sm:$0x1] %vm497_vm1, %v16534_v0  ;;  %545 = vst.msk [vmem:[#allocation3 + $0xc0] sm:$0x1] %vm497_vm1, %v16534_v0 }
 0x12a   : > { %546 = vst.msk [vmem:[#allocation3 + $0xd8] sm:$0x1] %vm497_vm1, %v16534_v0  ;;  %547 = vst.msk [vmem:[#allocation3 + $0xf0] sm:$0x1] %vm497_vm1, %v16534_v0 }
 0x12b   : > { %548 = vst.msk [vmem:[#allocation3 + $0x108] sm:$0x1] %vm497_vm1, %v16534_v0  ;;  %549 = vst.msk [vmem:[#allocation3 + $0x120] sm:$0x1] %vm497_vm1, %v16534_v0 }
 0x12c   : > { %550 = vst.msk [vmem:[#allocation3 + $0x138] sm:$0x1] %vm497_vm1, %v16534_v0  ;;  %551 = vst.msk [vmem:[#allocation3 + $0x150] sm:$0x1] %vm497_vm1, %v16534_v0 }
 0x12d   : > { %552 = vst.msk [vmem:[#allocation3 + $0x168] sm:$0x1] %vm497_vm1, %v16534_v0  ;;  %553 = vst.msk [vmem:[#allocation3 + $0x180] sm:$0x1] %vm497_vm1, %v16534_v0 }
 0x12e   : > { %554 = vst.msk [vmem:[#allocation3 + $0x29] sm:$0x1] %vm497_vm1, %v16534_v0  ;;  %555 = vst.msk [vmem:[#allocation3 + $0x41] sm:$0x1] %vm497_vm1, %v16534_v0 }
 0x12f   : > { %556 = vst.msk [vmem:[#allocation3 + $0x59] sm:$0x1] %vm497_vm1, %v16534_v0  ;;  %557 = vst.msk [vmem:[#allocation3 + $0x71] sm:$0x1] %vm497_vm1, %v16534_v0 }
 0x130   : > { %558 = vst.msk [vmem:[#allocation3 + $0x89] sm:$0x1] %vm497_vm1, %v16534_v0  ;;  %559 = vst.msk [vmem:[#allocation3 + $0xa1] sm:$0x1] %vm497_vm1, %v16534_v0 }
 0x131   : > { %560 = vst.msk [vmem:[#allocation3 + $0xb9] sm:$0x1] %vm497_vm1, %v16534_v0  ;;  %561 = vst.msk [vmem:[#allocation3 + $0xd1] sm:$0x1] %vm497_vm1, %v16534_v0 }
 0x132   : > { %562 = vst.msk [vmem:[#allocation3 + $0xe9] sm:$0x1] %vm497_vm1, %v16534_v0  ;;  %563 = vst.msk [vmem:[#allocation3 + $0x101] sm:$0x1] %vm497_vm1, %v16534_v0 }
 0x133   : > { %564 = vst.msk [vmem:[#allocation3 + $0x119] sm:$0x1] %vm497_vm1, %v16534_v0  ;;  %565 = vst.msk [vmem:[#allocation3 + $0x131] sm:$0x1] %vm497_vm1, %v16534_v0 }
 0x134   : > { %566 = vst.msk [vmem:[#allocation3 + $0x149] sm:$0x1] %vm497_vm1, %v16534_v0  ;;  %567 = vst.msk [vmem:[#allocation3 + $0x161] sm:$0x1] %vm497_vm1, %v16534_v0 }
 0x135   : > { %568 = vst.msk [vmem:[#allocation3 + $0x179] sm:$0x1] %vm497_vm1, %v16534_v0  ;;  %569 = vst.msk [vmem:[#allocation3 + $0x191] sm:$0x1] %vm497_vm1, %v16534_v0 }
 0x136   : > { %19594 = vst [vmem:[#allocation28_spill] sm:$0xff] %v17093_v9  ;;  %19595 = vst [vmem:[#allocation29_spill] sm:$0xff] %v17098_v13 }
 0x137   : > { %19596 = vst [vmem:[#allocation30_spill] sm:$0xff] %v17101_v14  ;;  %19597 = vst [vmem:[#allocation31_spill] sm:$0xff] %v17104_v15 }
 0x138   : > { %730 = vst.msk [vmem:[#allocation3 + $0x19] sm:$0xff] %vm487_vm0, %v19452_v7  ;;  %731 = vst.msk [vmem:[#allocation3 + $0x21] sm:$0xff] %vm487_vm0, %v19450_v8 }
 0x139   : > { %19598 = vst [vmem:[#allocation32_spill] sm:$0xff] %v17119_v20  ;;  %19599 = vst [vmem:[#allocation33_spill] sm:$0xff] %v17122_v21  ;;  %v17653_v20 = vld [vmem:[#allocation9 + $0x6] sm:$0x3] }
 0x13a   : > { %19600 = vst [vmem:[#allocation34_spill] sm:$0xff] %v17125_v22  ;;  %491 = vst.msk [vmem:[#allocation2 + $0x10] sm:$0x3] %vm490_vm3, %v16534_v0 }
 0x13b   : > { %495 = vst.msk [vmem:[#allocation2 + $0x1a8] sm:$0x3] %vm490_vm3, %v16534_v0  ;;  %532 = vst.msk [vmem:[#allocation3 + $0x10] sm:$0x3] %vm490_vm3, %v16534_v0 }
 0x13c   : > { %536 = vst.msk [vmem:[#allocation3 + $0x1a8] sm:$0x3] %vm490_vm3, %v16534_v0  ;;  %19601 = vst [vmem:[#allocation35_spill] sm:$0xff] %v17143_v27  ;;  %v19399_v0 = vunpack.c.h.bf16 %v17215_v47 }
 0x13d   : > { %732 = vst.msk [vmem:[#allocation3 + $0x31] sm:$0xff] %vm487_vm0, %v19453_v11  ;;  %733 = vst.msk [vmem:[#allocation3 + $0x39] sm:$0xff] %vm487_vm0, %v19451_v12 }
 0x13e   : > { %19602 = vst [vmem:[#allocation36_spill] sm:$0xff] %v17146_v28  ;;  %19603 = vst [vmem:[#allocation37_spill] sm:$0xff] %v17149_v29 }
 0x13f   : > { %734 = vst.msk [vmem:[#allocation3 + $0x49] sm:$0xff] %vm487_vm0, %v19449_v16  ;;  %735 = vst.msk [vmem:[#allocation3 + $0x51] sm:$0xff] %vm487_vm0, %v19448_v17  ;;  %v796_v59 = vld [vmem:[#allocation3 + $0x18] sm:$0xff]  ;;  %v797_v60 = vld [vmem:[#allocation3 + $0x20] sm:$0xff] }
 0x140   : > { %736 = vst.msk [vmem:[#allocation3 + $0x61] sm:$0xff] %vm487_vm0, %v19447_v18  ;;  %737 = vst.msk [vmem:[#allocation3 + $0x69] sm:$0xff] %vm487_vm0, %v19446_v19  ;;  %v843_v2 = vpack.c.bf16 %v797_v60, %v796_v59  ;;  %v19403_v59 = vunpack.c.l.bf16 %v17237_v53  ;;  %v17293_v60 = vld [vmem:[%s16910_s15 + $0x38] sm:$0xff]   ;;  %v17519_v17 = vld [vmem:[#allocation9 + $0x4] sm:$0x3] }
 0x141   : > { %19604 = vst [vmem:[#allocation38_spill] sm:$0xff] %v17168_v34  ;;  %19605 = vst [vmem:[#allocation39_spill] sm:$0xff] %v17171_v35 }
 0x142   : > { %19606 = vst [vmem:[#allocation40_spill] sm:$0xff] %v17174_v36  ;;  %738 = vst.msk [vmem:[#allocation3 + $0x79] sm:$0xff] %vm487_vm0, %v19445_v23  ;;  %13574 = vmatmul.mubr.msk.bf16.vlgmr.msra.gmra.mrb[0].mxu0 %vm487_vm0, %v843_v2 }
 0x143   : > { %739 = vst.msk [vmem:[#allocation3 + $0x81] sm:$0xff] %vm487_vm0, %v19444_v24  ;;  %740 = vst.msk [vmem:[#allocation3 + $0x91] sm:$0xff] %vm487_vm0, %v19443_v25  ;;  %13606 = vmatpush3.bf16.msra.mxu0 %v1122_v61  ;;  %v19411_v61 = vunpack.c.l.bf16 %v17293_v60 }
 0x144   : > { %741 = vst.msk [vmem:[#allocation3 + $0x99] sm:$0xff] %vm487_vm0, %v19442_v26  ;;  %19607 = vst [vmem:[#allocation41_spill] sm:$0xff] %v17193_v41  ;;  %v798_v4 = vld [vmem:[#allocation3 + $0x30] sm:$0xff]  ;;  %v799_v5 = vld [vmem:[#allocation3 + $0x38] sm:$0xff] }
 0x145   : > { %742 = vst.msk [vmem:[#allocation3 + $0xa9] sm:$0xff] %vm487_vm0, %v19441_v30  ;;  %743 = vst.msk [vmem:[#allocation3 + $0xb1] sm:$0xff] %vm487_vm0, %v19440_v31 }
 0x146   : > { %744 = vst.msk [vmem:[#allocation3 + $0xc1] sm:$0xff] %vm487_vm0, %v19439_v32  ;;  %745 = vst.msk [vmem:[#allocation3 + $0xc9] sm:$0xff] %vm487_vm0, %v19438_v33  ;;  %v800_v2 = vld [vmem:[#allocation3 + $0x48] sm:$0xff] }
 0x147   : > { %19608 = vst [vmem:[#allocation42_spill] sm:$0xff] %v17212_v46  ;;  %19609 = vst [vmem:[#allocation43_spill] sm:$0xff] %v17215_v47 }
 0x148   : > { %746 = vst.msk [vmem:[#allocation3 + $0xd9] sm:$0xff] %vm487_vm0, %v19437_v37  ;;  %747 = vst.msk [vmem:[#allocation3 + $0xe1] sm:$0xff] %vm487_vm0, %v19435_v38 }
 0x149   : > { %748 = vst.msk [vmem:[#allocation3 + $0xf1] sm:$0xff] %vm487_vm0, %v19434_v39  ;;  %749 = vst.msk [vmem:[#allocation3 + $0xf9] sm:$0xff] %vm487_vm0, %v19424_v40 }
 0x14a   : > { %19610 = vst [vmem:[#allocation44_spill] sm:$0xff] %v17234_v52  ;;  %19611 = vst [vmem:[#allocation45_spill] sm:$0xff] %v17237_v53 }
 0x14b   : > { %750 = vst.msk [vmem:[#allocation3 + $0x109] sm:$0xff] %vm487_vm0, %v19423_v42  ;;  %751 = vst.msk [vmem:[#allocation3 + $0x111] sm:$0xff] %vm487_vm0, %v19422_v43 }
 0x14c   : > { %752 = vst.msk [vmem:[#allocation3 + $0x121] sm:$0xff] %vm487_vm0, %v19421_v44  ;;  %753 = vst.msk [vmem:[#allocation3 + $0x129] sm:$0xff] %vm487_vm0, %v19420_v45  ;;  %v808_v45 = vld [vmem:[#allocation3 + $0xa8] sm:$0xff]  ;;  %v809_v44 = vld [vmem:[#allocation3 + $0xb0] sm:$0xff] }
 0x14d   : > { %19612 = vst [vmem:[#allocation46_spill] sm:$0xff] %v17255_v57  ;;  %19613 = vst [vmem:[#allocation47_spill] sm:$0xff] %v17258_v58  ;;  %v810_v42 = vld [vmem:[#allocation3 + $0xc0] sm:$0xff]  ;;  %v811_v40 = vld [vmem:[#allocation3 + $0xc8] sm:$0xff] }
 0x14e   : > { %754 = vst.msk [vmem:[#allocation3 + $0x139] sm:$0xff] %vm487_vm0, %v19419_v48  ;;  %755 = vst.msk [vmem:[#allocation3 + $0x141] sm:$0xff] %vm487_vm0, %v19417_v49  ;;  %v17389_v48 = vld [vmem:[%s16910_s15 + $0x60] sm:$0xff]  }
 0x14f   : > { %756 = vst.msk [vmem:[#allocation3 + $0x151] sm:$0xff] %vm487_vm0, %v19395_v50  ;;  %757 = vst.msk [vmem:[#allocation3 + $0x159] sm:$0xff] %vm487_vm0, %v19394_v51  ;;  %v844_v51 = vpack.c.bf16 %v799_v5, %v798_v4  ;;  %v17295_v50 = vld [vmem:[#allocation9 + $0x2] sm:$0x3]  ;;  %v19406_v4 = vunpack.c.h.bf16 %v17255_v57 }
 0x150   : > { %19614 = vst [vmem:[#allocation48_spill] sm:$0xff] %v17278_v1  ;;  %758 = vst.msk [vmem:[#allocation3 + $0x169] sm:$0xff] %vm487_vm0, %v19401_v54  ;;  %v17310_v5 = vld [vmem:[%s16910_s15 + $0x40] sm:$0xff]   ;;  %v17326_v54 = vld [vmem:[%s16910_s15 + $0x48] sm:$0xff]   ;;  %15885 = vmatprep.subr.msk.bf16.mxu0 %vm908_vm2, %v17295_v50 }
 0x151   : > { %759 = vst.msk [vmem:[#allocation3 + $0x171] sm:$0xff] %vm487_vm0, %v19397_v55  ;;  %698 = vst.msk [vmem:[#allocation2 + $0x19] sm:$0xff] %vm487_vm0, %v19396_v56  ;;  %v19407_v56 = vunpack.c.h.bf16 %v17237_v53  ;;  %v19405_v55 = vunpack.c.l.bf16 %v17255_v57  ;;  %13577 = vmatprep.mubr.msk.bf16.mxu0 %vm487_vm0, %v844_v51  ;;  %v803_v51 = vld [vmem:[#allocation3 + $0x68] sm:$0xff] }
 0x152   : > { %19615 = vst [vmem:[#allocation49_spill] sm:$0xff] %v17293_v60  ;;  %699 = vst.msk [vmem:[#allocation2 + $0x21] sm:$0xff] %vm487_vm0, %v19400_v62  ;;  %v19410_v62 = vunpack.c.l.bf16 %v17278_v1  ;;  %v817_v39 = vld [vmem:[#allocation3 + $0x110] sm:$0xff] }
 0x153   : > { %700 = vst.msk [vmem:[#allocation2 + $0x31] sm:$0xff] %vm487_vm0, %v19398_v63  ;;  %701 = vst.msk [vmem:[#allocation2 + $0x39] sm:$0xff] %vm487_vm0, %v19399_v0  ;;  %v19408_v63 = vunpack.c.l.bf16 %v17258_v58  ;;  %v19409_v0 = vunpack.c.h.bf16 %v17258_v58  ;;  %v818_v38 = vld [vmem:[#allocation3 + $0x120] sm:$0xff] }
 0x154   : > { %19616 = vst [vmem:[#allocation50_spill] sm:$0xff] %v17310_v5  ;;  %702 = vst.msk [vmem:[#allocation2 + $0x49] sm:$0xff] %vm487_vm0, %v19402_v6  ;;  %v801_v6 = vld [vmem:[#allocation3 + $0x50] sm:$0xff]  ;;  %v17586_v58 = vld [vmem:[#allocation10 + $0x4] sm:$0x3] }
 0x155   : > { %703 = vst.msk [vmem:[#allocation2 + $0x51] sm:$0xff] %vm487_vm0, %v19404_v10  ;;  %704 = vst.msk [vmem:[#allocation2 + $0x61] sm:$0xff] %vm487_vm0, %v19403_v59  ;;  %v19415_v59 = vunpack.c.h.bf16 %v17278_v1  ;;  %v802_v10 = vld [vmem:[#allocation3 + $0x60] sm:$0xff]  ;;  %v2020_v1 = vsel %vm908_vm2, %v17519_v17, 0  ;;  %v2266_v21 = vsel %vm908_vm2, %v17586_v58, 0 }
 0x156   : > { %19617 = vst [vmem:[#allocation51_spill] sm:$0xff] %v17326_v54  ;;  %705 = vst.msk [vmem:[#allocation2 + $0x69] sm:$0xff] %vm487_vm0, %v19407_v56  ;;  %v19413_v56 = vunpack.c.h.bf16 %v17310_v5 }
 0x157   : > { %706 = vst.msk [vmem:[#allocation2 + $0x79] sm:$0xff] %vm487_vm0, %v19405_v55  ;;  %707 = vst.msk [vmem:[#allocation2 + $0x81] sm:$0xff] %vm487_vm0, %v19406_v4  ;;  %v19414_v55 = vunpack.c.h.bf16 %v17293_v60  ;;  %v19412_v4 = vunpack.c.l.bf16 %v17310_v5 }
 0x158   : > { %708 = vst.msk [vmem:[#allocation2 + $0x91] sm:$0xff] %vm487_vm0, %v19408_v63  ;;  %709 = vst.msk [vmem:[#allocation2 + $0x99] sm:$0xff] %vm487_vm0, %v19409_v0  ;;  %v19416_v63 = vunpack.c.l.bf16 %v17326_v54  ;;  %v19418_v0 = vunpack.c.h.bf16 %v17326_v54 }
 0x159   : > { %710 = vst.msk [vmem:[#allocation2 + $0xa9] sm:$0xff] %vm487_vm0, %v19410_v62  ;;  %711 = vst.msk [vmem:[#allocation2 + $0xb1] sm:$0xff] %vm487_vm0, %v19415_v59  ;;  %v845_v62 = vpack.c.bf16 %v801_v6, %v800_v2  ;;  %v804_v6 = vld [vmem:[#allocation3 + $0x78] sm:$0xff]  ;;  %v805_v2 = vld [vmem:[#allocation3 + $0x80] sm:$0xff] }
 0x15a   : > { %712 = vst.msk [vmem:[#allocation2 + $0xc1] sm:$0xff] %vm487_vm0, %v19411_v61  ;;  %713 = vst.msk [vmem:[#allocation2 + $0xc9] sm:$0xff] %vm487_vm0, %v19414_v55  ;;  %v846_v61 = vpack.c.bf16 %v803_v51, %v802_v10  ;;  %v847_v10 = vpack.c.bf16 %v805_v2, %v804_v6  ;;  %v17380_v55 = vld [vmem:[%s16910_s15 + $0x50] sm:$0xff]   ;;  %v17383_v59 = vld [vmem:[%s16910_s15 + $0x58] sm:$0xff]   ;;  %v19427_v6 = vunpack.c.h.bf16 %v17389_v48 }
 0x15b   : > { %714 = vst.msk [vmem:[#allocation2 + $0xd9] sm:$0xff] %vm487_vm0, %v19412_v4  ;;  %715 = vst.msk [vmem:[#allocation2 + $0xe1] sm:$0xff] %vm487_vm0, %v19413_v56  ;;  %13578 = vmatmul.mubr.msk.bf16.gmra.mrb[4].mxu0 %vm487_vm0, %v845_v62  ;;  %v806_v4 = vld [vmem:[#allocation3 + $0x90] sm:$0xff]  ;;  %v807_v56 = vld [vmem:[#allocation3 + $0x98] sm:$0xff]  ;;  %v19431_v49 = vunpack.c.h.bf16 %v17380_v55 }
 0x15c   : > { %716 = vst.msk [vmem:[#allocation2 + $0xf1] sm:$0xff] %vm487_vm0, %v19416_v63  ;;  %717 = vst.msk [vmem:[#allocation2 + $0xf9] sm:$0xff] %vm487_vm0, %v19418_v0  ;;  %13581 = vmatprep.mubr.msk.bf16.mxu0 %vm487_vm0, %v846_v61  ;;  %v848_v51 = vpack.c.bf16 %v807_v56, %v806_v4  ;;  %v19430_v63 = vunpack.c.l.bf16 %v17380_v55  ;;  %v19426_v0 = vunpack.c.l.bf16 %v17383_v59  ;;  %v17392_v62 = vld [vmem:[%s16910_s15 + $0x68] sm:$0xff]   ;;  %v17395_v61 = vld [vmem:[%s16910_s15 + $0x70] sm:$0xff]   ;;  %v19429_v56 = vunpack.c.h.bf16 %v17383_v59 }
 0x15d   : > { %19618 = vst [vmem:[#allocation52_spill] sm:$0xff] %v17380_v55  ;;  %19619 = vst [vmem:[#allocation53_spill] sm:$0xff] %v17383_v59  ;;  %v19425_v4 = vunpack.c.l.bf16 %v17389_v48  ;;  %v19428_v2 = vunpack.c.l.bf16 %v17392_v62  ;;  %v19433_v43 = vunpack.c.l.bf16 %v17395_v61 }
 0x15e   : > { %19620 = vst [vmem:[#allocation54_spill] sm:$0xff] %v17389_v48  ;;  %19621 = vst [vmem:[#allocation55_spill] sm:$0xff] %v17392_v62 }
 0x15f   : > { %19622 = vst [vmem:[#allocation56_spill] sm:$0xff] %v17395_v61  ;;  %718 = vst.msk [vmem:[#allocation2 + $0x109] sm:$0xff] %vm487_vm0, %v19430_v63  ;;  %v815_v63 = vld [vmem:[#allocation3 + $0xf8] sm:$0xff] }
 0x160   : > { %719 = vst.msk [vmem:[#allocation2 + $0x111] sm:$0xff] %vm487_vm0, %v19431_v49  ;;  %720 = vst.msk [vmem:[#allocation2 + $0x121] sm:$0xff] %vm487_vm0, %v19426_v0  ;;  %v850_v0 = vpack.c.bf16 %v811_v40, %v810_v42  ;;  %v820_v42 = vld [vmem:[#allocation3 + $0x138] sm:$0xff] }
 0x161   : > { %721 = vst.msk [vmem:[#allocation2 + $0x129] sm:$0xff] %vm487_vm0, %v19429_v56  ;;  %722 = vst.msk [vmem:[#allocation2 + $0x139] sm:$0xff] %vm487_vm0, %v19425_v4  ;;  %v849_v4 = vpack.c.bf16 %v809_v44, %v808_v45  ;;  %v814_v56 = vld [vmem:[#allocation3 + $0xf0] sm:$0xff]  ;;  %v821_v45 = vld [vmem:[#allocation3 + $0x140] sm:$0xff] }
 0x162   : > { %723 = vst.msk [vmem:[#allocation2 + $0x141] sm:$0xff] %vm487_vm0, %v19427_v6  ;;  %724 = vst.msk [vmem:[#allocation2 + $0x151] sm:$0xff] %vm487_vm0, %v19428_v2  ;;  %v812_v6 = vld [vmem:[#allocation3 + $0xd8] sm:$0xff]  ;;  %v813_v2 = vld [vmem:[#allocation3 + $0xe0] sm:$0xff] }
 0x163   : > { %13582 = vmatmul.mubr.msk.bf16.gmra.mrb[8].mxu0 %vm487_vm0, %v847_v10  ;;  %v19432_v10 = vunpack.c.h.bf16 %v17392_v62  ;;  %726 = vst.msk [vmem:[#allocation2 + $0x169] sm:$0xff] %vm487_vm0, %v19433_v43  ;;  %v851_v49 = vpack.c.bf16 %v813_v2, %v812_v6  ;;  %v816_v43 = vld [vmem:[#allocation3 + $0x108] sm:$0xff]  ;;  %v855_v6 = vpack.c.bf16 %v821_v45, %v820_v42  ;;  %v762_v2 = vld [vmem:[#allocation2] sm:$0xff] }
 0x164   : > { %13585 = vmatprep.mubr.msk.bf16.mxu0 %vm487_vm0, %v848_v51  ;;  %v19436_v51 = vunpack.c.h.bf16 %v17395_v61  ;;  %v853_v44 = vpack.c.bf16 %v817_v39, %v816_v43  ;;  %v764_v43 = vld [vmem:[#allocation2 + $0x18] sm:$0xff] }
 0x165   : > { %725 = vst.msk [vmem:[#allocation2 + $0x159] sm:$0xff] %vm487_vm0, %v19432_v10  ;;  %v852_v10 = vpack.c.bf16 %v815_v63, %v814_v56  ;;  %v825_v56 = vld [vmem:[#allocation3 + $0x170] sm:$0xff] }
 0x166   : > { %727 = vst.msk [vmem:[#allocation2 + $0x171] sm:$0xff] %vm487_vm0, %v19436_v51  ;;  %v819_v51 = vld [vmem:[#allocation3 + $0x128] sm:$0xff] }
 0x167   : > { %v854_v40 = vpack.c.bf16 %v819_v51, %v818_v38  ;;  %v765_v51 = vld [vmem:[#allocation2 + $0x20] sm:$0xff] }
 0x168   : > { %v17446_v42 = vpack.c.bf16 %v765_v51, %v764_v43  ;;  %v775_v43 = vld [vmem:[#allocation2 + $0x98] sm:$0xff] }
 0x16b   : > { %13586 = vmatmul.mubr.msk.bf16.gmra.mrb[12].mxu0 %vm487_vm0, %v849_v4  ;;  %v823_v4 = vld [vmem:[#allocation3 + $0x158] sm:$0xff] }
 0x16c   : > { %13589 = vmatprep.mubr.msk.bf16.mxu0 %vm487_vm0, %v850_v0  ;;  %v822_v0 = vld [vmem:[#allocation3 + $0x150] sm:$0xff] }
 0x16d   : > { %v856_v63 = vpack.c.bf16 %v823_v4, %v822_v0  ;;  %v1432_v0 = vsel %vm908_vm2, %v17295_v50, 0  ;;  %v17452_v4 = vld [vmem:[#allocation10 + $0x2] sm:$0x3]  ;;  %v772_v50 = vld [vmem:[#allocation2 + $0x78] sm:$0xff] }
 0x16e   : > { %v1678_v18 = vsel %vm908_vm2, %v17452_v4, 0 }
 0x173   : > { %13590 = vmatmul.mubr.msk.bf16.gmra.mrb[16].mxu0 %vm487_vm0, %v851_v49  ;;  %v824_v49 = vld [vmem:[#allocation3 + $0x168] sm:$0xff] }
 0x174   : > { %13593 = vmatprep.mubr.msk.bf16.mxu0 %vm487_vm0, %v852_v10  ;;  %v763_v10 = vld [vmem:[#allocation2 + $0x8] sm:$0xff]  ;;  %v857_v39 = vpack.c.bf16 %v825_v56, %v824_v49  ;;  %v770_v49 = vld [vmem:[#allocation2 + $0x60] sm:$0xff] }
 0x175   : > { %v826_v38 = vpack.c.bf16 %v763_v10, %v762_v2  ;;  %v771_v56 = vld [vmem:[#allocation2 + $0x68] sm:$0xff] }
 0x176   : > { %v17462_v10 = vpack.c.bf16 %v771_v56, %v770_v49 }
 0x17b   : > { %13594 = vmatmul.mubr.msk.bf16.gmra.mrb[20].mxu0 %vm487_vm0, %v853_v44  ;;  %v766_v44 = vld [vmem:[#allocation2 + $0x30] sm:$0xff] }
 0x17c   : > { %13597 = vmatprep.mubr.msk.bf16.mxu0 %vm487_vm0, %v854_v40  ;;  %v767_v40 = vld [vmem:[#allocation2 + $0x38] sm:$0xff] }
 0x17d   : > { %v17448_v45 = vpack.c.bf16 %v767_v40, %v766_v44  ;;  %v776_v40 = vld [vmem:[#allocation2 + $0xa8] sm:$0xff] }
 0x183   : > { %13598 = vmatmul.mubr.msk.bf16.gmra.mrb[24].mxu0 %vm487_vm0, %v855_v6  ;;  %v768_v6 = vld [vmem:[#allocation2 + $0x48] sm:$0xff] }
 0x184   : > { %13601 = vmatprep.mubr.msk.bf16.mxu0 %vm487_vm0, %v856_v63  ;;  %v769_v63 = vld [vmem:[#allocation2 + $0x50] sm:$0xff] }
 0x185   : > { %v17460_v2 = vpack.c.bf16 %v769_v63, %v768_v6  ;;  %v778_v6 = vld [vmem:[#allocation2 + $0xc0] sm:$0xff]  ;;  %v779_v63 = vld [vmem:[#allocation2 + $0xc8] sm:$0xff] }
 0x186   : > { %v17478_v56 = vpack.c.bf16 %v779_v63, %v778_v6  ;;  %v786_v6 = vld [vmem:[#allocation2 + $0x120] sm:$0xff]  ;;  %v787_v63 = vld [vmem:[#allocation2 + $0x128] sm:$0xff] }
 0x187   : > { %v17494_v31 = vpack.c.bf16 %v787_v63, %v786_v6  ;;  %v1285_v6 = vld [vmem:[#allocation2 + $0x1] sm:$0xff]  ;;  %v1286_v63 = vld [vmem:[#allocation2 + $0x9] sm:$0xff] }
 0x188   : > { %v1349_v24 = vpack.c.bf16 %v1286_v63, %v1285_v6  ;;  %v1294_v6 = vld [vmem:[#allocation2 + $0x69] sm:$0xff] }
 0x18b   : > { %13602 = vmatmul.mubr.msk.bf16.gmra.mrb[28].mxu0 %vm487_vm0, %v857_v39  ;;  %v773_v39 = vld [vmem:[#allocation2 + $0x80] sm:$0xff] }
 0x18c   : > { %13607 = vmatprep.mubr.msk.bf16.mxu0 %vm487_vm0, %v826_v38  ;;  %v774_v38 = vld [vmem:[#allocation2 + $0x90] sm:$0xff]  ;;  %v17468_v51 = vpack.c.bf16 %v773_v39, %v772_v50  ;;  %v780_v50 = vld [vmem:[#allocation2 + $0xd8] sm:$0xff]  ;;  %v781_v39 = vld [vmem:[#allocation2 + $0xe0] sm:$0xff] }
 0x18d   : > { %v17470_v44 = vpack.c.bf16 %v775_v43, %v774_v38  ;;  %v782_v38 = vld [vmem:[#allocation2 + $0xf0] sm:$0xff]  ;;  %v783_v43 = vld [vmem:[#allocation2 + $0xf8] sm:$0xff]  ;;  %v17484_v37 = vpack.c.bf16 %v781_v39, %v780_v50  ;;  %v789_v39 = vld [vmem:[#allocation2 + $0x140] sm:$0xff] }
 0x18e   : > { %v17486_v33 = vpack.c.bf16 %v783_v43, %v782_v38  ;;  %v788_v50 = vld [vmem:[#allocation2 + $0x138] sm:$0xff]  ;;  %v790_v38 = vld [vmem:[#allocation2 + $0x150] sm:$0xff] }
 0x18f   : > { %v791_v43 = vld [vmem:[#allocation2 + $0x158] sm:$0xff]  ;;  %v17500_v30 = vpack.c.bf16 %v789_v39, %v788_v50  ;;  %v1288_v39 = vld [vmem:[#allocation2 + $0x21] sm:$0xff] }
 0x190   : > { %v17502_v26 = vpack.c.bf16 %v791_v43, %v790_v38  ;;  %v1287_v50 = vld [vmem:[#allocation2 + $0x19] sm:$0xff]  ;;  %v1289_v38 = vld [vmem:[#allocation2 + $0x31] sm:$0xff] }
 0x191   : > { %v1290_v43 = vld [vmem:[#allocation2 + $0x39] sm:$0xff]  ;;  %v17513_v23 = vpack.c.bf16 %v1288_v39, %v1287_v50  ;;  %v1297_v39 = vld [vmem:[#allocation2 + $0x91] sm:$0xff] }
 0x192   : > { %v17515_v19 = vpack.c.bf16 %v1290_v43, %v1289_v38  ;;  %v1298_v38 = vld [vmem:[#allocation2 + $0x99] sm:$0xff] }
 0x193   : > { %13608 = vmatmul.mubr.msk.bf16.vlgmr.msra.gmra.mrb[0].mxu0 %vm487_vm0, %v17446_v42  ;;  %v17537_v16 = vpack.c.bf16 %v1298_v38, %v1297_v39  ;;  %v1305_v39 = vld [vmem:[#allocation2 + $0xf1] sm:$0xff]  ;;  %v1306_v38 = vld [vmem:[#allocation2 + $0xf9] sm:$0xff] }
 0x194   : > { %13640 = vmatpush3.bf16.msra.mxu0 %v1432_v0  ;;  %13611 = vmatprep.mubr.msk.bf16.mxu0 %vm487_vm0, %v17448_v45  ;;  %v777_v0 = vld [vmem:[#allocation2 + $0xb0] sm:$0xff]  ;;  %v17553_v11 = vpack.c.bf16 %v1306_v38, %v1305_v39  ;;  %v1314_v38 = vld [vmem:[#allocation2 + $0x159] sm:$0xff] }
 0x195   : > { %15886 = vmatprep.subr.msk.bf16.mxu0 %vm908_vm2, %v17452_v4  ;;  %v17476_v49 = vpack.c.bf16 %v777_v0, %v776_v40  ;;  %v784_v40 = vld [vmem:[#allocation2 + $0x108] sm:$0xff]  ;;  %v785_v0 = vld [vmem:[#allocation2 + $0x110] sm:$0xff] }
 0x196   : > { %v17492_v32 = vpack.c.bf16 %v785_v0, %v784_v40  ;;  %v792_v40 = vld [vmem:[#allocation2 + $0x168] sm:$0xff]  ;;  %v793_v0 = vld [vmem:[#allocation2 + $0x170] sm:$0xff] }
 0x197   : > { %v17508_v25 = vpack.c.bf16 %v793_v0, %v792_v40  ;;  %v1292_v40 = vld [vmem:[#allocation2 + $0x51] sm:$0xff]  ;;  %v1293_v0 = vld [vmem:[#allocation2 + $0x61] sm:$0xff] }
 0x198   : > { %v17529_v50 = vpack.c.bf16 %v1294_v6, %v1293_v0  ;;  %v1296_v4 = vld [vmem:[#allocation2 + $0x81] sm:$0xff]  ;;  %v1302_v6 = vld [vmem:[#allocation2 + $0xc9] sm:$0xff]  ;;  %v1313_v39 = vld [vmem:[#allocation2 + $0x151] sm:$0xff] }
 0x199   : > { %v1301_v0 = vld [vmem:[#allocation2 + $0xc1] sm:$0xff]  ;;  %v17569_v59 = vpack.c.bf16 %v1314_v38, %v1313_v39  ;;  %v1322_v38 = vld [vmem:[#allocation3 + $0x39] sm:$0xff] }
 0x19a   : > { %v17545_v12 = vpack.c.bf16 %v1302_v6, %v1301_v0  ;;  %v1309_v0 = vld [vmem:[#allocation2 + $0x121] sm:$0xff]  ;;  %v1310_v6 = vld [vmem:[#allocation2 + $0x129] sm:$0xff] }
 0x19b   : > { %13612 = vmatmul.mubr.msk.bf16.gmra.mrb[4].mxu0 %vm487_vm0, %v17460_v2  ;;  %v17561_v62 = vpack.c.bf16 %v1310_v6, %v1309_v0  ;;  %v1317_v0 = vld [vmem:[#allocation3 + $0x1] sm:$0xff]  ;;  %v1318_v6 = vld [vmem:[#allocation3 + $0x9] sm:$0xff]  ;;  %v1321_v39 = vld [vmem:[#allocation3 + $0x31] sm:$0xff] }
 0x19c   : > { %13615 = vmatprep.mubr.msk.bf16.mxu0 %vm487_vm0, %v17462_v10  ;;  %v1365_v54 = vpack.c.bf16 %v1318_v6, %v1317_v0  ;;  %v17582_v60 = vpack.c.bf16 %v1322_v38, %v1321_v39  ;;  %v1326_v0 = vld [vmem:[#allocation3 + $0x69] sm:$0xff]  ;;  %v1330_v39 = vld [vmem:[#allocation3 + $0x99] sm:$0xff] }
 0x1a3   : > { %13616 = vmatmul.mubr.msk.bf16.gmra.mrb[8].mxu0 %vm487_vm0, %v17468_v51 }
 0x1a4   : > { %13619 = vmatprep.mubr.msk.bf16.mxu0 %vm487_vm0, %v17470_v44 }
 0x1ab   : > { %13620 = vmatmul.mubr.msk.bf16.gmra.mrb[12].mxu0 %vm487_vm0, %v17476_v49 }
 0x1ac   : > { %13623 = vmatprep.mubr.msk.bf16.mxu0 %vm487_vm0, %v17478_v56 }
 0x1b3   : > { %13624 = vmatmul.mubr.msk.bf16.gmra.mrb[16].mxu0 %vm487_vm0, %v17484_v37 }
 0x1b4   : > { %13627 = vmatprep.mubr.msk.bf16.mxu0 %vm487_vm0, %v17486_v33 }
 0x1bb   : > { %13628 = vmatmul.mubr.msk.bf16.gmra.mrb[20].mxu0 %vm487_vm0, %v17492_v32 }
 0x1bc   : > { %13631 = vmatprep.mubr.msk.bf16.mxu0 %vm487_vm0, %v17494_v31 }
 0x1c3   : > { %13632 = vmatmul.mubr.msk.bf16.gmra.mrb[24].mxu0 %vm487_vm0, %v17500_v30 }
 0x1c4   : > { %13635 = vmatprep.mubr.msk.bf16.mxu0 %vm487_vm0, %v17502_v26 }
 0x1cb   : > { %13636 = vmatmul.mubr.msk.bf16.gmra.mrb[28].mxu0 %vm487_vm0, %v17508_v25 }
 0x1cc   : > { %13641 = vmatprep.mubr.msk.bf16.mxu0 %vm487_vm0, %v1349_v24  ;;  %v1291_v24 = vld [vmem:[#allocation2 + $0x49] sm:$0xff] }
 0x1cd   : > { %v17527_v63 = vpack.c.bf16 %v1292_v40, %v1291_v24  ;;  %v1299_v24 = vld [vmem:[#allocation2 + $0xa9] sm:$0xff]  ;;  %v1300_v40 = vld [vmem:[#allocation2 + $0xb1] sm:$0xff] }
 0x1ce   : > { %v17543_v8 = vpack.c.bf16 %v1300_v40, %v1299_v24  ;;  %v1307_v24 = vld [vmem:[#allocation2 + $0x109] sm:$0xff]  ;;  %v1308_v40 = vld [vmem:[#allocation2 + $0x111] sm:$0xff] }
 0x1cf   : > { %v17559_v61 = vpack.c.bf16 %v1308_v40, %v1307_v24  ;;  %v1315_v24 = vld [vmem:[#allocation2 + $0x169] sm:$0xff]  ;;  %v1316_v40 = vld [vmem:[#allocation2 + $0x171] sm:$0xff] }
 0x1d0   : > { %v17575_v55 = vpack.c.bf16 %v1316_v40, %v1315_v24  ;;  %v1324_v24 = vld [vmem:[#allocation3 + $0x51] sm:$0xff]  ;;  %v1325_v40 = vld [vmem:[#allocation3 + $0x61] sm:$0xff] }
 0x1d3   : > { %13642 = vmatmul.mubr.msk.bf16.vlgmr.msra.gmra.mrb[0].mxu0 %vm487_vm0, %v17513_v23 }
 0x1d4   : > { %13674 = vmatpush3.bf16.msra.mxu0 %v1678_v18  ;;  %13645 = vmatprep.mubr.msk.bf16.mxu0 %vm487_vm0, %v17515_v19  ;;  %v1295_v18 = vld [vmem:[#allocation2 + $0x79] sm:$0xff] }
 0x1d5   : > { %15887 = vmatprep.subr.msk.bf16.mxu0 %vm908_vm2, %v17519_v17  ;;  %v17535_v43 = vpack.c.bf16 %v1296_v4, %v1295_v18  ;;  %v1303_v18 = vld [vmem:[#allocation2 + $0xd9] sm:$0xff]  ;;  %v1304_v4 = vld [vmem:[#allocation2 + $0xe1] sm:$0xff]  ;;  %v1327_v17 = vld [vmem:[#allocation3 + $0x79] sm:$0xff] }
 0x1d6   : > { %v17551_v7 = vpack.c.bf16 %v1304_v4, %v1303_v18  ;;  %v1311_v18 = vld [vmem:[#allocation2 + $0x139] sm:$0xff]  ;;  %v1312_v4 = vld [vmem:[#allocation2 + $0x141] sm:$0xff] }
 0x1d7   : > { %v17567_v48 = vpack.c.bf16 %v1312_v4, %v1311_v18  ;;  %v1319_v18 = vld [vmem:[#allocation3 + $0x19] sm:$0xff]  ;;  %v1320_v4 = vld [vmem:[#allocation3 + $0x21] sm:$0xff] }
 0x1d8   : > { %v17580_v5 = vpack.c.bf16 %v1320_v4, %v1319_v18  ;;  %v17596_v18 = vpack.c.bf16 %v1326_v0, %v1325_v40  ;;  %v1329_v4 = vld [vmem:[#allocation3 + $0x91] sm:$0xff]  ;;  %v1333_v40 = vld [vmem:[#allocation3 + $0xc1] sm:$0xff]  ;;  %v1334_v0 = vld [vmem:[#allocation3 + $0xc9] sm:$0xff] }
 0x1d9   : > { %v17604_v57 = vpack.c.bf16 %v1330_v39, %v1329_v4  ;;  %v17612_v52 = vpack.c.bf16 %v1334_v0, %v1333_v40  ;;  %v1337_v4 = vld [vmem:[#allocation3 + $0xf1] sm:$0xff]  ;;  %v1338_v39 = vld [vmem:[#allocation3 + $0xf9] sm:$0xff]  ;;  %v1341_v40 = vld [vmem:[#allocation3 + $0x121] sm:$0xff] }
 0x1da   : > { %v17620_v46 = vpack.c.bf16 %v1338_v39, %v1337_v4  ;;  %v1342_v0 = vld [vmem:[#allocation3 + $0x129] sm:$0xff]  ;;  %v1345_v4 = vld [vmem:[#allocation3 + $0x151] sm:$0xff]  ;;  %v1346_v39 = vld [vmem:[#allocation3 + $0x159] sm:$0xff] }
 0x1db   : > { %13646 = vmatmul.mubr.msk.bf16.gmra.mrb[4].mxu0 %vm487_vm0, %v17527_v63  ;;  %v17628_v36 = vpack.c.bf16 %v1342_v0, %v1341_v40  ;;  %v17636_v34 = vpack.c.bf16 %v1346_v39, %v1345_v4  ;;  %v1873_v40 = vld [vmem:[#allocation2 + $0x2] sm:$0xff]  ;;  %v1874_v0 = vld [vmem:[#allocation2 + $0xa] sm:$0xff]  ;;  %v1877_v4 = vld [vmem:[#allocation2 + $0x32] sm:$0xff] }
 0x1dc   : > { %13649 = vmatprep.mubr.msk.bf16.mxu0 %vm487_vm0, %v17529_v50  ;;  %v1937_v28 = vpack.c.bf16 %v1874_v0, %v1873_v40  ;;  %v1878_v39 = vld [vmem:[#allocation2 + $0x3a] sm:$0xff]  ;;  %v1882_v40 = vld [vmem:[#allocation2 + $0x6a] sm:$0xff] }
 0x1dd   : > { %v17649_v22 = vpack.c.bf16 %v1878_v39, %v1877_v4  ;;  %v1886_v4 = vld [vmem:[#allocation2 + $0x9a] sm:$0xff] }
 0x1e3   : > { %13650 = vmatmul.mubr.msk.bf16.gmra.mrb[8].mxu0 %vm487_vm0, %v17535_v43 }
 0x1e4   : > { %13653 = vmatprep.mubr.msk.bf16.mxu0 %vm487_vm0, %v17537_v16 }
 0x1eb   : > { %13654 = vmatmul.mubr.msk.bf16.gmra.mrb[12].mxu0 %vm487_vm0, %v17543_v8 }
 0x1ec   : > { %13657 = vmatprep.mubr.msk.bf16.mxu0 %vm487_vm0, %v17545_v12 }
 0x1f3   : > { %13658 = vmatmul.mubr.msk.bf16.gmra.mrb[16].mxu0 %vm487_vm0, %v17551_v7 }
 0x1f4   : > { %13661 = vmatprep.mubr.msk.bf16.mxu0 %vm487_vm0, %v17553_v11 }
 0x1fb   : > { %13662 = vmatmul.mubr.msk.bf16.gmra.mrb[20].mxu0 %vm487_vm0, %v17559_v61 }
 0x1fc   : > { %13665 = vmatprep.mubr.msk.bf16.mxu0 %vm487_vm0, %v17561_v62 }
 0x203   : > { %13666 = vmatmul.mubr.msk.bf16.gmra.mrb[24].mxu0 %vm487_vm0, %v17567_v48 }
 0x204   : > { %13669 = vmatprep.mubr.msk.bf16.mxu0 %vm487_vm0, %v17569_v59 }
 0x20b   : > { %13670 = vmatmul.mubr.msk.bf16.gmra.mrb[28].mxu0 %vm487_vm0, %v17575_v55 }
 0x20c   : > { %13675 = vmatprep.mubr.msk.bf16.mxu0 %vm487_vm0, %v1365_v54  ;;  %v1323_v54 = vld [vmem:[#allocation3 + $0x49] sm:$0xff] }
 0x20d   : > { %v17594_v6 = vpack.c.bf16 %v1324_v24, %v1323_v54  ;;  %v1331_v54 = vld [vmem:[#allocation3 + $0xa9] sm:$0xff]  ;;  %v1332_v24 = vld [vmem:[#allocation3 + $0xb1] sm:$0xff] }
 0x20e   : > { %v17610_v53 = vpack.c.bf16 %v1332_v24, %v1331_v54  ;;  %v1339_v54 = vld [vmem:[#allocation3 + $0x109] sm:$0xff]  ;;  %v1340_v24 = vld [vmem:[#allocation3 + $0x111] sm:$0xff] }
 0x20f   : > { %v17626_v41 = vpack.c.bf16 %v1340_v24, %v1339_v54  ;;  %v1347_v54 = vld [vmem:[#allocation3 + $0x169] sm:$0xff]  ;;  %v1348_v24 = vld [vmem:[#allocation3 + $0x171] sm:$0xff] }
 0x210   : > { %v17642_v29 = vpack.c.bf16 %v1348_v24, %v1347_v54  ;;  %v1880_v54 = vld [vmem:[#allocation2 + $0x52] sm:$0xff]  ;;  %v1881_v24 = vld [vmem:[#allocation2 + $0x62] sm:$0xff] }
 0x213   : > { %13676 = vmatmul.mubr.msk.bf16.vlgmr.msra.gmra.mrb[0].mxu0 %vm487_vm0, %v17580_v5 }
 0x214   : > { %13708 = vmatpush3.bf16.msra.mxu0 %v2020_v1  ;;  %13679 = vmatprep.mubr.msk.bf16.mxu0 %vm487_vm0, %v17582_v60  ;;  %v1328_v1 = vld [vmem:[#allocation3 + $0x81] sm:$0xff] }
 0x215   : > { %15888 = vmatprep.subr.msk.bf16.mxu0 %vm908_vm2, %v17586_v58  ;;  %v17602_v38 = vpack.c.bf16 %v1328_v1, %v1327_v17  ;;  %v1335_v17 = vld [vmem:[#allocation3 + $0xd9] sm:$0xff]  ;;  %v1336_v1 = vld [vmem:[#allocation3 + $0xe1] sm:$0xff] }
 0x216   : > { %v17618_v47 = vpack.c.bf16 %v1336_v1, %v1335_v17  ;;  %v1343_v17 = vld [vmem:[#allocation3 + $0x139] sm:$0xff]  ;;  %v1344_v1 = vld [vmem:[#allocation3 + $0x141] sm:$0xff] }
 0x217   : > { %v17634_v35 = vpack.c.bf16 %v1344_v1, %v1343_v17  ;;  %v1875_v17 = vld [vmem:[#allocation2 + $0x1a] sm:$0xff]  ;;  %v1876_v1 = vld [vmem:[#allocation2 + $0x22] sm:$0xff] }
 0x218   : > { %v17647_v27 = vpack.c.bf16 %v1876_v1, %v1875_v17  ;;  %v17663_v17 = vpack.c.bf16 %v1882_v40, %v1881_v24  ;;  %v1884_v58 = vld [vmem:[#allocation2 + $0x82] sm:$0xff]  ;;  %v1885_v1 = vld [vmem:[#allocation2 + $0x92] sm:$0xff]  ;;  %v1890_v40 = vld [vmem:[#allocation2 + $0xca] sm:$0xff] }
 0x219   : > { %v17671_v15 = vpack.c.bf16 %v1886_v4, %v1885_v1  ;;  %v1889_v24 = vld [vmem:[#allocation2 + $0xc2] sm:$0xff]  ;;  %v1893_v1 = vld [vmem:[#allocation2 + $0xf2] sm:$0xff]  ;;  %v1894_v4 = vld [vmem:[#allocation2 + $0xfa] sm:$0xff] }
 0x21a   : > { %v17679_v13 = vpack.c.bf16 %v1890_v40, %v1889_v24  ;;  %v17687_v9 = vpack.c.bf16 %v1894_v4, %v1893_v1  ;;  %v1897_v24 = vld [vmem:[#allocation2 + $0x122] sm:$0xff]  ;;  %v1898_v40 = vld [vmem:[#allocation2 + $0x12a] sm:$0xff]  ;;  %v1901_v1 = vld [vmem:[#allocation2 + $0x152] sm:$0xff] }
 0x21b   : > { %13680 = vmatmul.mubr.msk.bf16.gmra.mrb[4].mxu0 %vm487_vm0, %v17594_v6  ;;  %19624 = vst [vmem:[#allocation58_spill] sm:$0xff] %v17671_v15  ;;  %v1902_v4 = vld [vmem:[#allocation2 + $0x15a] sm:$0xff] }
 0x21c   : > { %13683 = vmatprep.mubr.msk.bf16.mxu0 %vm487_vm0, %v17596_v18  ;;  %19626 = vst [vmem:[#allocation60_spill] sm:$0xff] %v17679_v13  ;;  %19628 = vst [vmem:[#allocation62_spill] sm:$0xff] %v17687_v9 }
 0x223   : > { %13684 = vmatmul.mubr.msk.bf16.gmra.mrb[8].mxu0 %vm487_vm0, %v17602_v38 }
 0x224   : > { %13687 = vmatprep.mubr.msk.bf16.mxu0 %vm487_vm0, %v17604_v57 }
 0x22b   : > { %13688 = vmatmul.mubr.msk.bf16.gmra.mrb[12].mxu0 %vm487_vm0, %v17610_v53 }
 0x22c   : > { %13691 = vmatprep.mubr.msk.bf16.mxu0 %vm487_vm0, %v17612_v52 }
 0x233   : > { %13692 = vmatmul.mubr.msk.bf16.gmra.mrb[16].mxu0 %vm487_vm0, %v17618_v47 }
 0x234   : > { %13695 = vmatprep.mubr.msk.bf16.mxu0 %vm487_vm0, %v17620_v46 }
 0x23b   : > { %13696 = vmatmul.mubr.msk.bf16.gmra.mrb[20].mxu0 %vm487_vm0, %v17626_v41 }
 0x23c   : > { %13699 = vmatprep.mubr.msk.bf16.mxu0 %vm487_vm0, %v17628_v36 }
 0x243   : > { %13700 = vmatmul.mubr.msk.bf16.gmra.mrb[24].mxu0 %vm487_vm0, %v17634_v35 }
 0x244   : > { %13703 = vmatprep.mubr.msk.bf16.mxu0 %vm487_vm0, %v17636_v34 }
 0x24b   : > { %13704 = vmatmul.mubr.msk.bf16.gmra.mrb[28].mxu0 %vm487_vm0, %v17642_v29 }
 0x24c   : > { %13709 = vmatprep.mubr.msk.bf16.mxu0 %vm487_vm0, %v1937_v28  ;;  %v1879_v28 = vld [vmem:[#allocation2 + $0x4a] sm:$0xff] }
 0x24d   : > { %v17661_v0 = vpack.c.bf16 %v1880_v54, %v1879_v28  ;;  %v1887_v28 = vld [vmem:[#allocation2 + $0xaa] sm:$0xff]  ;;  %v1888_v54 = vld [vmem:[#allocation2 + $0xb2] sm:$0xff] }
 0x24e   : > { %v17677_v14 = vpack.c.bf16 %v1888_v54, %v1887_v28  ;;  %v1895_v28 = vld [vmem:[#allocation2 + $0x10a] sm:$0xff]  ;;  %v1896_v54 = vld [vmem:[#allocation2 + $0x112] sm:$0xff] }
 0x250   : > { %19625 = vst [vmem:[#allocation59_spill] sm:$0xff] %v17677_v14 }
 0x253   : > { %13710 = vmatmul.mubr.msk.bf16.vlgmr.msra.gmra.mrb[0].mxu0 %vm487_vm0, %v17647_v27 }
 0x254   : > { %13742 = vmatpush3.bf16.msra.mxu0 %v2266_v21  ;;  %13713 = vmatprep.mubr.msk.bf16.mxu0 %vm487_vm0, %v17649_v22  ;;  %v1883_v21 = vld [vmem:[#allocation2 + $0x7a] sm:$0xff] }
 0x255   : > { %15889 = vmatprep.subr.msk.bf16.mxu0 %vm908_vm2, %v17653_v20  ;;  %v17669_v39 = vpack.c.bf16 %v1884_v58, %v1883_v21  ;;  %v1891_v21 = vld [vmem:[#allocation2 + $0xda] sm:$0xff]  ;;  %v1892_v58 = vld [vmem:[#allocation2 + $0xe2] sm:$0xff] }
 0x256   : > { %v17685_v3 = vpack.c.bf16 %v1892_v58, %v1891_v21  ;;  %v1899_v21 = vld [vmem:[#allocation2 + $0x13a] sm:$0xff]  ;;  %v1900_v58 = vld [vmem:[#allocation2 + $0x142] sm:$0xff] }
 0x257   : > { %19623 = vst [vmem:[#allocation57_spill] sm:$0xff] %v17669_v39 }
 0x258   : > { %19627 = vst [vmem:[#allocation61_spill] sm:$0xff] %v17685_v3 }
 0x25b   : > { %13714 = vmatmul.mubr.msk.bf16.gmra.mrb[4].mxu0 %vm487_vm0, %v17661_v0 }
 0x25c   : > { %13717 = vmatprep.mubr.msk.bf16.mxu0 %vm487_vm0, %v17663_v17 }
 0x263   : > { %13718 = vmatmul.mubr.msk.bf16.gmra.mrb[8].mxu0 %vm487_vm0, %v17669_v39  ;;  %v17731_v39 = vld [vmem:[#allocation10 + $0x6] sm:$0x3] }
 0x264   : > { %13721 = vmatprep.mubr.msk.bf16.mxu0 %vm487_vm0, %v17671_v15 }
 0x26b   : > { %13722 = vmatmul.mubr.msk.bf16.gmra.mrb[12].mxu0 %vm487_vm0, %v17677_v14  ;;  %v17695_v14 = vpack.c.bf16 %v1898_v40, %v1897_v24  ;;  %v1903_v24 = vld [vmem:[#allocation2 + $0x16a] sm:$0xff]  ;;  %v1904_v40 = vld [vmem:[#allocation2 + $0x172] sm:$0xff] }
 0x26c   : > { %13725 = vmatprep.mubr.msk.bf16.mxu0 %vm487_vm0, %v17679_v13  ;;  %v17693_v13 = vpack.c.bf16 %v1896_v54, %v1895_v28  ;;  %v17708_v54 = vpack.c.bf16 %v1902_v4, %v1901_v1  ;;  %v17720_v1 = vpack.c.bf16 %v1904_v40, %v1903_v24  ;;  %v1911_v24 = vld [vmem:[#allocation3 + $0x4a] sm:$0xff]  ;;  %v1912_v40 = vld [vmem:[#allocation3 + $0x52] sm:$0xff] }
 0x26d   : > { %19630 = vst [vmem:[#allocation64_spill] sm:$0xff] %v17695_v14 }
 0x26e   : > { %19629 = vst [vmem:[#allocation63_spill] sm:$0xff] %v17693_v13  ;;  %19633 = vst [vmem:[#allocation67_spill] sm:$0xff] %v17708_v54 }
 0x273   : > { %13726 = vmatmul.mubr.msk.bf16.gmra.mrb[16].mxu0 %vm487_vm0, %v17685_v3  ;;  %v17702_v3 = vld [vmem:[%s16910_s15 + $0x78] sm:$0xff]  }
 0x274   : > { %13729 = vmatprep.mubr.msk.bf16.mxu0 %vm487_vm0, %v17687_v9  ;;  %19631 = vst [vmem:[#allocation65_spill] sm:$0xff] %v17702_v3  ;;  %v17704_v9 = vpack.c.bf16 %v1900_v58, %v1899_v21  ;;  %v19519_v15 = vunpack.c.l.bf16 %v17702_v3  ;;  %v19520_v28 = vunpack.c.h.bf16 %v17702_v3  ;;  %v1905_v21 = vld [vmem:[#allocation3 + $0x2] sm:$0xff]  ;;  %v1906_v58 = vld [vmem:[#allocation3 + $0xa] sm:$0xff]  ;;  %v1909_v3 = vld [vmem:[#allocation3 + $0x32] sm:$0xff] }
 0x275   : > { %v1953_v4 = vpack.c.bf16 %v1906_v58, %v1905_v21  ;;  %v1913_v21 = vld [vmem:[#allocation3 + $0x62] sm:$0xff]  ;;  %v1914_v58 = vld [vmem:[#allocation3 + $0x6a] sm:$0xff] }
 0x276   : > { %19632 = vst [vmem:[#allocation66_spill] sm:$0xff] %v17704_v9  ;;  %728 = vst.msk [vmem:[#allocation2 + $0x181] sm:$0xff] %vm487_vm0, %v19519_v15  ;;  %v1907_v15 = vld [vmem:[#allocation3 + $0x1a] sm:$0xff] }
 0x277   : > { %729 = vst.msk [vmem:[#allocation2 + $0x189] sm:$0xff] %vm487_vm0, %v19520_v28  ;;  %v1908_v28 = vld [vmem:[#allocation3 + $0x22] sm:$0xff] }
 0x27b   : > { %13730 = vmatmul.mubr.msk.bf16.gmra.mrb[20].mxu0 %vm487_vm0, %v17693_v13 }
 0x27c   : > { %13733 = vmatprep.mubr.msk.bf16.mxu0 %vm487_vm0, %v17695_v14  ;;  %v1910_v14 = vld [vmem:[#allocation3 + $0x3a] sm:$0xff] }
 0x27d   : > { %v17727_v13 = vpack.c.bf16 %v1910_v14, %v1909_v3  ;;  %v17739_v3 = vpack.c.bf16 %v1912_v40, %v1911_v24  ;;  %v17741_v14 = vpack.c.bf16 %v1914_v58, %v1913_v21  ;;  %v1919_v24 = vld [vmem:[#allocation3 + $0xaa] sm:$0xff]  ;;  %v1920_v40 = vld [vmem:[#allocation3 + $0xb2] sm:$0xff]  ;;  %v1921_v21 = vld [vmem:[#allocation3 + $0xc2] sm:$0xff] }
 0x27e   : > { %v1922_v58 = vld [vmem:[#allocation3 + $0xca] sm:$0xff] }
 0x27f   : > { %19635 = vst [vmem:[#allocation69_spill] sm:$0xff] %v17727_v13  ;;  %19636 = vst [vmem:[#allocation70_spill] sm:$0xff] %v17739_v3 }
 0x280   : > { %19637 = vst [vmem:[#allocation71_spill] sm:$0xff] %v17741_v14 }
 0x283   : > { %13734 = vmatmul.mubr.msk.bf16.gmra.mrb[24].mxu0 %vm487_vm0, %v17704_v9  ;;  %v17725_v9 = vpack.c.bf16 %v1908_v28, %v1907_v15  ;;  %v1915_v15 = vld [vmem:[#allocation3 + $0x7a] sm:$0xff]  ;;  %v1917_v28 = vld [vmem:[#allocation3 + $0x92] sm:$0xff] }
 0x284   : > { %13737 = vmatprep.mubr.msk.bf16.mxu0 %vm487_vm0, %v17708_v54  ;;  %v2608_v54 = vsel %vm908_vm2, %v17653_v20, 0  ;;  %v1916_v20 = vld [vmem:[#allocation3 + $0x82] sm:$0xff] }
 0x285   : > { %19634 = vst [vmem:[#allocation68_spill] sm:$0xff] %v17725_v9 }
 0x28b   : > { %13738 = vmatmul.mubr.msk.bf16.gmra.mrb[28].mxu0 %vm487_vm0, %v17720_v1 }
 0x28c   : > { %13743 = vmatprep.mubr.msk.bf16.mxu0 %vm487_vm0, %v1953_v4  ;;  %v17747_v4 = vpack.c.bf16 %v1916_v20, %v1915_v15  ;;  %v1923_v15 = vld [vmem:[#allocation3 + $0xda] sm:$0xff]  ;;  %v1924_v20 = vld [vmem:[#allocation3 + $0xe2] sm:$0xff] }
 0x28e   : > { %19638 = vst [vmem:[#allocation72_spill] sm:$0xff] %v17747_v4 }
 0x293   : > { %13744 = vmatmul.mubr.msk.bf16.vlgmr.msra.gmra.mrb[0].mxu0 %vm487_vm0, %v17725_v9 }
 0x294   : > { %13776 = vmatpush3.bf16.msra.mxu0 %v2608_v54  ;;  %13747 = vmatprep.mubr.msk.bf16.mxu0 %vm487_vm0, %v17727_v13  ;;  %v1918_v54 = vld [vmem:[#allocation3 + $0x9a] sm:$0xff] }
 0x295   : > { %15890 = vmatprep.subr.msk.bf16.mxu0 %vm908_vm2, %v17731_v39  ;;  %v17749_v13 = vpack.c.bf16 %v1918_v54, %v1917_v28  ;;  %v1925_v28 = vld [vmem:[#allocation3 + $0xf2] sm:$0xff]  ;;  %v1926_v54 = vld [vmem:[#allocation3 + $0xfa] sm:$0xff] }
 0x297   : > { %19639 = vst [vmem:[#allocation73_spill] sm:$0xff] %v17749_v13 }
 0x29b   : > { %13748 = vmatmul.mubr.msk.bf16.gmra.mrb[4].mxu0 %vm487_vm0, %v17739_v3  ;;  %v17755_v3 = vpack.c.bf16 %v1920_v40, %v1919_v24  ;;  %v1927_v24 = vld [vmem:[#allocation3 + $0x10a] sm:$0xff]  ;;  %v1928_v40 = vld [vmem:[#allocation3 + $0x112] sm:$0xff] }
 0x29c   : > { %13751 = vmatprep.mubr.msk.bf16.mxu0 %vm487_vm0, %v17741_v14  ;;  %v17757_v14 = vpack.c.bf16 %v1922_v58, %v1921_v21  ;;  %v1929_v21 = vld [vmem:[#allocation3 + $0x122] sm:$0xff]  ;;  %v1930_v58 = vld [vmem:[#allocation3 + $0x12a] sm:$0xff] }
 0x29d   : > { %19640 = vst [vmem:[#allocation74_spill] sm:$0xff] %v17755_v3 }
 0x29e   : > { %19641 = vst [vmem:[#allocation75_spill] sm:$0xff] %v17757_v14 }
 0x2a3   : > { %13752 = vmatmul.mubr.msk.bf16.gmra.mrb[8].mxu0 %vm487_vm0, %v17747_v4  ;;  %v17763_v4 = vpack.c.bf16 %v1924_v20, %v1923_v15  ;;  %v1931_v15 = vld [vmem:[#allocation3 + $0x13a] sm:$0xff]  ;;  %v1932_v20 = vld [vmem:[#allocation3 + $0x142] sm:$0xff] }
 0x2a4   : > { %13755 = vmatprep.mubr.msk.bf16.mxu0 %vm487_vm0, %v17749_v13  ;;  %v17765_v13 = vpack.c.bf16 %v1926_v54, %v1925_v28  ;;  %v1933_v28 = vld [vmem:[#allocation3 + $0x152] sm:$0xff]  ;;  %v1934_v54 = vld [vmem:[#allocation3 + $0x15a] sm:$0xff] }
 0x2a5   : > { %19642 = vst [vmem:[#allocation76_spill] sm:$0xff] %v17763_v4 }
 0x2a6   : > { %19643 = vst [vmem:[#allocation77_spill] sm:$0xff] %v17765_v13 }
 0x2ab   : > { %13756 = vmatmul.mubr.msk.bf16.gmra.mrb[12].mxu0 %vm487_vm0, %v17755_v3  ;;  %v17773_v3 = vpack.c.bf16 %v1930_v58, %v1929_v21  ;;  %v1935_v21 = vld [vmem:[#allocation3 + $0x16a] sm:$0xff]  ;;  %v1936_v58 = vld [vmem:[#allocation3 + $0x172] sm:$0xff] }
 0x2ac   : > { %13759 = vmatprep.mubr.msk.bf16.mxu0 %vm487_vm0, %v17757_v14  ;;  %v17771_v14 = vpack.c.bf16 %v1928_v40, %v1927_v24  ;;  %v17786_v40 = vpack.c.bf16 %v1934_v54, %v1933_v28  ;;  %v3146_v28 = vld [vmem:[#allocation9 + $0x8] sm:$0x3] }
 0x2ad   : > { %v2501_v54 = vld [vmem:[#allocation3 + $0x78] sm:$0xff] }
 0x2b3   : > { %13760 = vmatmul.mubr.msk.bf16.gmra.mrb[16].mxu0 %vm487_vm0, %v17763_v4  ;;  %v17780_v4 = vld [vmem:[%s16917_s12 + $0x78] sm:$0xff]  }
 0x2b4   : > { %13763 = vmatprep.mubr.msk.bf16.mxu0 %vm487_vm0, %v17765_v13  ;;  %19644 = vst [vmem:[#allocation78_spill] sm:$0xff] %v17780_v4  ;;  %v17782_v13 = vpack.c.bf16 %v1932_v20, %v1931_v15  ;;  %v19538_v9 = vunpack.c.l.bf16 %v17780_v4  ;;  %v19539_v24 = vunpack.c.h.bf16 %v17780_v4  ;;  %v17798_v15 = vpack.c.bf16 %v1936_v58, %v1935_v21  ;;  %v2502_v21 = vld [vmem:[#allocation3 + $0x80] sm:$0xff] }
 0x2b5   : > { %v2854_v20 = vsel %vm908_vm2, %v17731_v39, 0  ;;  %v2500_v39 = vld [vmem:[#allocation3 + $0x68] sm:$0xff] }
 0x2b6   : > { %760 = vst.msk [vmem:[#allocation3 + $0x181] sm:$0xff] %vm487_vm0, %v19538_v9  ;;  %761 = vst.msk [vmem:[#allocation3 + $0x189] sm:$0xff] %vm487_vm0, %v19539_v24 }
 0x2bb   : > { %13764 = vmatmul.mubr.msk.bf16.gmra.mrb[20].mxu0 %vm487_vm0, %v17771_v14 }
 0x2bc   : > { %13767 = vmatprep.mubr.msk.bf16.mxu0 %vm487_vm0, %v17773_v3 }
 0x2c3   : > { %13768 = vmatmul.mubr.msk.bf16.gmra.mrb[24].mxu0 %vm487_vm0, %v17782_v13 }
 0x2c4   : > { %13771 = vmatprep.mubr.msk.bf16.mxu0 %vm487_vm0, %v17786_v40 }
 0x2cb   : > { %13772 = vmatmul.mubr.msk.bf16.gmra.mrb[28].mxu0 %vm487_vm0, %v17798_v15 }
 0x2cc   : > { %13777 = vmatprep.mubr.msk.bf16.mxu0 %vm487_vm0, %v17446_v42  ;;  %v2491_v42 = vld [vmem:[#allocation2 + $0x180] sm:$0xff] }
 0x2d3   : > { %13778 = vmatmul.mubr.msk.bf16.vlgmr.msra.gmra.mrb[0].mxu0 %vm487_vm0, %v17448_v45  ;;  %v2493_v45 = vld [vmem:[#allocation3 + $0x18] sm:$0xff] }
 0x2d4   : > { %13810 = vmatpush3.bf16.msra.mxu0 %v2854_v20  ;;  %13781 = vmatprep.mubr.msk.bf16.mxu0 %vm487_vm0, %v17460_v2  ;;  %v2494_v2 = vld [vmem:[#allocation3 + $0x20] sm:$0xff]  ;;  %v17852_v20 = vpack.c.bf16 %v2502_v21, %v2501_v54  ;;  %v2512_v54 = vld [vmem:[#allocation3 + $0xf8] sm:$0xff]  ;;  %v2513_v21 = vld [vmem:[#allocation3 + $0x108] sm:$0xff] }
 0x2d5   : > { %15891 = vmatprep.subr.msk.bf16.mxu0 %vm908_vm2, %v3146_v28 }
 0x2db   : > { %13782 = vmatmul.mubr.msk.bf16.gmra.mrb[4].mxu0 %vm487_vm0, %v17462_v10  ;;  %v2541_v10 = vpack.c.bf16 %v2494_v2, %v2493_v45  ;;  %v2506_v45 = vld [vmem:[#allocation3 + $0xb0] sm:$0xff] }
 0x2dc   : > { %13785 = vmatprep.mubr.msk.bf16.mxu0 %vm487_vm0, %v17468_v51  ;;  %v2498_v51 = vld [vmem:[#allocation3 + $0x50] sm:$0xff] }
 0x2e3   : > { %13786 = vmatmul.mubr.msk.bf16.gmra.mrb[8].mxu0 %vm487_vm0, %v17470_v44 }
 0x2e4   : > { %13789 = vmatprep.mubr.msk.bf16.mxu0 %vm487_vm0, %v17476_v49  ;;  %v3392_v49 = vld [vmem:[#allocation10 + $0x8] sm:$0x3] }
 0x2eb   : > { %13790 = vmatmul.mubr.msk.bf16.gmra.mrb[12].mxu0 %vm487_vm0, %v17478_v56  ;;  %v2499_v56 = vld [vmem:[#allocation3 + $0x60] sm:$0xff] }
 0x2ec   : > { %13793 = vmatprep.mubr.msk.bf16.mxu0 %vm487_vm0, %v17484_v37  ;;  %v2492_v37 = vld [vmem:[#allocation2 + $0x188] sm:$0xff]  ;;  %v17850_v58 = vpack.c.bf16 %v2500_v39, %v2499_v56  ;;  %v2511_v39 = vld [vmem:[#allocation3 + $0xf0] sm:$0xff] }
 0x2f3   : > { %13794 = vmatmul.mubr.msk.bf16.gmra.mrb[16].mxu0 %vm487_vm0, %v17486_v33  ;;  %v17835_v33 = vpack.c.bf16 %v2492_v37, %v2491_v42  ;;  %v2504_v42 = vld [vmem:[#allocation3 + $0x98] sm:$0xff]  ;;  %v2505_v37 = vld [vmem:[#allocation3 + $0xa8] sm:$0xff] }
 0x2f4   : > { %13797 = vmatprep.mubr.msk.bf16.mxu0 %vm487_vm0, %v17492_v32  ;;  %v2497_v32 = vld [vmem:[#allocation3 + $0x48] sm:$0xff] }
 0x2f5   : > { %v17842_v44 = vpack.c.bf16 %v2498_v51, %v2497_v32  ;;  %v2509_v32 = vld [vmem:[#allocation3 + $0xd8] sm:$0xff]  ;;  %v2510_v51 = vld [vmem:[#allocation3 + $0xe0] sm:$0xff] }
 0x2f6   : > { %v17868_v56 = vpack.c.bf16 %v2510_v51, %v2509_v32  ;;  %v2518_v32 = vld [vmem:[#allocation3 + $0x140] sm:$0xff] }
 0x2fb   : > { %13798 = vmatmul.mubr.msk.bf16.gmra.mrb[20].mxu0 %vm487_vm0, %v17494_v31  ;;  %v2495_v31 = vld [vmem:[#allocation3 + $0x30] sm:$0xff] }
 0x2fc   : > { %13801 = vmatprep.mubr.msk.bf16.mxu0 %vm487_vm0, %v17500_v30  ;;  %v2496_v30 = vld [vmem:[#allocation3 + $0x38] sm:$0xff] }
 0x303   : > { %13802 = vmatmul.mubr.msk.bf16.gmra.mrb[24].mxu0 %vm487_vm0, %v17502_v26  ;;  %v17840_v26 = vpack.c.bf16 %v2496_v30, %v2495_v31  ;;  %v2507_v31 = vld [vmem:[#allocation3 + $0xc0] sm:$0xff]  ;;  %v2508_v30 = vld [vmem:[#allocation3 + $0xc8] sm:$0xff] }
 0x304   : > { %13805 = vmatprep.mubr.msk.bf16.mxu0 %vm487_vm0, %v17508_v25  ;;  %v3196_v25 = vsel %vm908_vm2, %v3146_v28, 0  ;;  %v2503_v28 = vld [vmem:[#allocation3 + $0x90] sm:$0xff] }
 0x305   : > { %v17858_v2 = vpack.c.bf16 %v2504_v42, %v2503_v28  ;;  %v2514_v28 = vld [vmem:[#allocation3 + $0x110] sm:$0xff]  ;;  %v17874_v42 = vpack.c.bf16 %v2512_v54, %v2511_v39  ;;  %v2520_v54 = vld [vmem:[#allocation3 + $0x158] sm:$0xff] }
 0x306   : > { %v2519_v39 = vld [vmem:[#allocation3 + $0x150] sm:$0xff] }
 0x307   : > { %v17890_v24 = vpack.c.bf16 %v2520_v54, %v2519_v39  ;;  %v3734_v39 = vld [vmem:[#allocation9 + $0xa] sm:$0x3]  ;;  %v3700_v54 = vld [vmem:[#allocation3 + $0x18a] sm:$0xff] }
 0x30b   : > { %13806 = vmatmul.mubr.msk.bf16.gmra.mrb[28].mxu0 %vm487_vm0, %v17835_v33 }
 0x30c   : > { %13811 = vmatprep.mubr.msk.bf16.mxu0 %vm487_vm0, %v2541_v10  ;;  %v17860_v10 = vpack.c.bf16 %v2506_v45, %v2505_v37  ;;  %v17876_v37 = vpack.c.bf16 %v2514_v28, %v2513_v21  ;;  %v2515_v45 = vld [vmem:[#allocation3 + $0x120] sm:$0xff]  ;;  %v2521_v21 = vld [vmem:[#allocation3 + $0x168] sm:$0xff]  ;;  %v2522_v28 = vld [vmem:[#allocation3 + $0x170] sm:$0xff] }
 0x30d   : > { %v17892_v4 = vpack.c.bf16 %v2522_v28, %v2521_v21  ;;  %v4226_v21 = vld [vmem:[#allocation2 + $0x30] sm:$0xff]  ;;  %v4227_v28 = vld [vmem:[#allocation2 + $0x38] sm:$0xff] }
 0x313   : > { %13812 = vmatmul.mubr.msk.bf16.vlgmr.msra.gmra.mrb[0].mxu0 %vm487_vm0, %v17840_v26 }
 0x314   : > { %13844 = vmatpush3.bf16.msra.mxu0 %v3196_v25  ;;  %13815 = vmatprep.mubr.msk.bf16.mxu0 %vm487_vm0, %v17842_v44  ;;  %v17866_v25 = vpack.c.bf16 %v2508_v30, %v2507_v31  ;;  %v2516_v31 = vld [vmem:[#allocation3 + $0x128] sm:$0xff]  ;;  %v2517_v30 = vld [vmem:[#allocation3 + $0x138] sm:$0xff] }
 0x315   : > { %15892 = vmatprep.subr.msk.bf16.mxu0 %vm908_vm2, %v3392_v49  ;;  %v17882_v51 = vpack.c.bf16 %v2516_v31, %v2515_v45  ;;  %v17884_v9 = vpack.c.bf16 %v2518_v32, %v2517_v30  ;;  %v2523_v45 = vld [vmem:[#allocation3 + $0x180] sm:$0xff]  ;;  %v2524_v31 = vld [vmem:[#allocation3 + $0x188] sm:$0xff]  ;;  %v3442_v32 = vsel %vm908_vm2, %v3392_v49, 0 }
 0x316   : > { %v17898_v30 = vpack.c.bf16 %v2524_v31, %v2523_v45  ;;  %v3699_v49 = vld [vmem:[#allocation3 + $0x182] sm:$0xff]  ;;  %v4291_v31 = vpack.c.bf16 %v4227_v28, %v4226_v21  ;;  %v4257_v28 = vld [vmem:[#allocation2 + $0x1a0] sm:$0xff] }
 0x317   : > { %v18042_v45 = vpack.c.bf16 %v3700_v54, %v3699_v49  ;;  %v4253_v49 = vld [vmem:[#allocation2 + $0x170] sm:$0xff]  ;;  %v4256_v21 = vld [vmem:[#allocation2 + $0x198] sm:$0xff] }
 0x31b   : > { %13816 = vmatmul.mubr.msk.bf16.gmra.mrb[4].mxu0 %vm487_vm0, %v17850_v58 }
 0x31c   : > { %13819 = vmatprep.mubr.msk.bf16.mxu0 %vm487_vm0, %v17852_v20 }
 0x323   : > { %13820 = vmatmul.mubr.msk.bf16.gmra.mrb[8].mxu0 %vm487_vm0, %v17858_v2 }
 0x324   : > { %13823 = vmatprep.mubr.msk.bf16.mxu0 %vm487_vm0, %v17860_v10 }
 0x32b   : > { %13824 = vmatmul.mubr.msk.bf16.gmra.mrb[12].mxu0 %vm487_vm0, %v17866_v25 }
 0x32c   : > { %13827 = vmatprep.mubr.msk.bf16.mxu0 %vm487_vm0, %v17868_v56 }
 0x333   : > { %13828 = vmatmul.mubr.msk.bf16.gmra.mrb[16].mxu0 %vm487_vm0, %v17874_v42 }
 0x334   : > { %13831 = vmatprep.mubr.msk.bf16.mxu0 %vm487_vm0, %v17876_v37 }
 0x33b   : > { %13832 = vmatmul.mubr.msk.bf16.gmra.mrb[20].mxu0 %vm487_vm0, %v17882_v51 }
 0x33c   : > { %13835 = vmatprep.mubr.msk.bf16.mxu0 %vm487_vm0, %v17884_v9 }
 0x343   : > { %13836 = vmatmul.mubr.msk.bf16.gmra.mrb[24].mxu0 %vm487_vm0, %v17890_v24 }
 0x344   : > { %13839 = vmatprep.mubr.msk.bf16.mxu0 %vm487_vm0, %v17892_v4 }
 0x34b   : > { %13840 = vmatmul.mubr.msk.bf16.gmra.mrb[28].mxu0 %vm487_vm0, %v17898_v30 }
 0x34c   : > { %13845 = vmatprep.mubr.msk.bf16.mxu0 %vm487_vm0, %v17513_v23  ;;  %v3112_v23 = vld [vmem:[#allocation3 + $0x189] sm:$0xff] }
 0x353   : > { %13846 = vmatmul.mubr.msk.bf16.vlgmr.msra.gmra.mrb[0].mxu0 %vm487_vm0, %v17515_v19  ;;  %v3111_v19 = vld [vmem:[#allocation3 + $0x181] sm:$0xff] }
 0x354   : > { %13878 = vmatpush3.bf16.msra.mxu0 %v3442_v32  ;;  %13849 = vmatprep.mubr.msk.bf16.mxu0 %vm487_vm0, %v17527_v63  ;;  %v19656_v63 = vld [vmem:[#allocation69_spill] sm:$0xff]  ;;  %v4231_v32 = vld [vmem:[#allocation2 + $0x68] sm:$0xff] }
 0x355   : > { %15893 = vmatprep.subr.msk.bf16.mxu0 %vm908_vm2, %v3734_v39 }
 0x35b   : > { %13850 = vmatmul.mubr.msk.bf16.gmra.mrb[4].mxu0 %vm487_vm0, %v17529_v50  ;;  %v19657_v50 = vld [vmem:[#allocation70_spill] sm:$0xff] }
 0x35c   : > { %13853 = vmatprep.mubr.msk.bf16.mxu0 %vm487_vm0, %v17535_v43  ;;  %v19658_v43 = vld [vmem:[#allocation71_spill] sm:$0xff] }
 0x363   : > { %13854 = vmatmul.mubr.msk.bf16.gmra.mrb[8].mxu0 %vm487_vm0, %v17537_v16  ;;  %v3980_v16 = vld [vmem:[#allocation10 + $0xa] sm:$0x3] }
 0x364   : > { %13857 = vmatprep.mubr.msk.bf16.mxu0 %vm487_vm0, %v17543_v8  ;;  %v3079_v8 = vld [vmem:[#allocation2 + $0x181] sm:$0xff] }
 0x36b   : > { %13858 = vmatmul.mubr.msk.bf16.gmra.mrb[12].mxu0 %vm487_vm0, %v17545_v12 }
 0x36c   : > { %13861 = vmatprep.mubr.msk.bf16.mxu0 %vm487_vm0, %v17551_v7  ;;  %v3080_v7 = vld [vmem:[#allocation2 + $0x189] sm:$0xff] }
 0x36d   : > { %v17934_v12 = vpack.c.bf16 %v3080_v7, %v3079_v8  ;;  %v4912_v8 = vld [vmem:[#allocation9 + $0xe] sm:$0x3]  ;;  %v4232_v7 = vld [vmem:[#allocation2 + $0x78] sm:$0xff] }
 0x373   : > { %13862 = vmatmul.mubr.msk.bf16.gmra.mrb[16].mxu0 %vm487_vm0, %v17553_v11  ;;  %v3784_v11 = vsel %vm908_vm2, %v3734_v39, 0 }
 0x374   : > { %13865 = vmatprep.mubr.msk.bf16.mxu0 %vm487_vm0, %v17559_v61  ;;  %v4570_v61 = vld [vmem:[#allocation10 + $0xc] sm:$0x3] }
 0x37b   : > { %13866 = vmatmul.mubr.msk.bf16.gmra.mrb[20].mxu0 %vm487_vm0, %v17561_v62 }
 0x37c   : > { %13869 = vmatprep.mubr.msk.bf16.mxu0 %vm487_vm0, %v17567_v48  ;;  %v19651_v48 = vld [vmem:[#allocation63_spill] sm:$0xff] }
 0x383   : > { %13870 = vmatmul.mubr.msk.bf16.gmra.mrb[24].mxu0 %vm487_vm0, %v17569_v59  ;;  %v3668_v59 = vld [vmem:[#allocation2 + $0x18a] sm:$0xff] }
 0x384   : > { %13873 = vmatprep.mubr.msk.bf16.mxu0 %vm487_vm0, %v17575_v55  ;;  %v19654_v55 = vld [vmem:[#allocation67_spill] sm:$0xff] }
 0x38b   : > { %13874 = vmatmul.mubr.msk.bf16.gmra.mrb[28].mxu0 %vm487_vm0, %v17934_v12 }
 0x38c   : > { %13879 = vmatprep.mubr.msk.bf16.mxu0 %vm487_vm0, %v17580_v5  ;;  %v19655_v5 = vld [vmem:[#allocation68_spill] sm:$0xff] }
 0x393   : > { %13880 = vmatmul.mubr.msk.bf16.vlgmr.msra.gmra.mrb[0].mxu0 %vm487_vm0, %v17582_v60 }
 0x394   : > { %13912 = vmatpush3.bf16.msra.mxu0 %v3784_v11  ;;  %13883 = vmatprep.mubr.msk.bf16.mxu0 %vm487_vm0, %v17594_v6  ;;  %v19659_v6 = vld [vmem:[#allocation72_spill] sm:$0xff]  ;;  %v4233_v11 = vld [vmem:[#allocation2 + $0x80] sm:$0xff] }
 0x395   : > { %15894 = vmatprep.subr.msk.bf16.mxu0 %vm908_vm2, %v3980_v16 }
 0x39b   : > { %13884 = vmatmul.mubr.msk.bf16.gmra.mrb[4].mxu0 %vm487_vm0, %v17596_v18  ;;  %v19660_v18 = vld [vmem:[#allocation73_spill] sm:$0xff] }
 0x39c   : > { %13887 = vmatprep.mubr.msk.bf16.mxu0 %vm487_vm0, %v17602_v38  ;;  %v19661_v38 = vld [vmem:[#allocation74_spill] sm:$0xff] }
 0x3a3   : > { %13888 = vmatmul.mubr.msk.bf16.gmra.mrb[8].mxu0 %vm487_vm0, %v17604_v57  ;;  %v3667_v57 = vld [vmem:[#allocation2 + $0x182] sm:$0xff] }
 0x3a4   : > { %13891 = vmatprep.mubr.msk.bf16.mxu0 %vm487_vm0, %v17610_v53  ;;  %v19653_v53 = vld [vmem:[#allocation66_spill] sm:$0xff]  ;;  %v18006_v60 = vpack.c.bf16 %v3668_v59, %v3667_v57 }
 0x3a5   : > { %v4244_v59 = vld [vmem:[#allocation2 + $0x108] sm:$0xff] }
 0x3ab   : > { %13892 = vmatmul.mubr.msk.bf16.gmra.mrb[12].mxu0 %vm487_vm0, %v17612_v52  ;;  %v19652_v52 = vld [vmem:[#allocation64_spill] sm:$0xff] }
 0x3ac   : > { %13895 = vmatprep.mubr.msk.bf16.mxu0 %vm487_vm0, %v17618_v47  ;;  %v17970_v47 = vpack.c.bf16 %v3112_v23, %v3111_v19  ;;  %v4235_v19 = vld [vmem:[#allocation2 + $0x98] sm:$0xff]  ;;  %v4294_v23 = vpack.c.bf16 %v4233_v11, %v4232_v7  ;;  %v4827_v7 = vld [vmem:[#allocation2 + $0xc1] sm:$0xff]  ;;  %v4828_v11 = vld [vmem:[#allocation2 + $0xc9] sm:$0xff] }
 0x3b3   : > { %13896 = vmatmul.mubr.msk.bf16.gmra.mrb[16].mxu0 %vm487_vm0, %v17620_v46  ;;  %v19650_v46 = vld [vmem:[#allocation62_spill] sm:$0xff] }
 0x3b4   : > { %13899 = vmatprep.mubr.msk.bf16.mxu0 %vm487_vm0, %v17626_v41  ;;  %v4324_v41 = vld [vmem:[#allocation9 + $0xc] sm:$0x3] }
 0x3b5   : > { %v4374_v62 = vsel %vm908_vm2, %v4324_v41, 0 }
 0x3bb   : > { %13900 = vmatmul.mubr.msk.bf16.gmra.mrb[20].mxu0 %vm487_vm0, %v17628_v36  ;;  %v4030_v36 = vsel %vm908_vm2, %v3980_v16, 0  ;;  %v4234_v16 = vld [vmem:[#allocation2 + $0x90] sm:$0xff] }
 0x3bc   : > { %13903 = vmatprep.mubr.msk.bf16.mxu0 %vm487_vm0, %v17634_v35  ;;  %v19648_v35 = vld [vmem:[#allocation60_spill] sm:$0xff] }
 0x3c3   : > { %13904 = vmatmul.mubr.msk.bf16.gmra.mrb[24].mxu0 %vm487_vm0, %v17636_v34  ;;  %v19646_v34 = vld [vmem:[#allocation58_spill] sm:$0xff] }
 0x3c4   : > { %13907 = vmatprep.mubr.msk.bf16.mxu0 %vm487_vm0, %v17642_v29  ;;  %v19645_v29 = vld [vmem:[#allocation57_spill] sm:$0xff] }
 0x3cb   : > { %13908 = vmatmul.mubr.msk.bf16.gmra.mrb[28].mxu0 %vm487_vm0, %v17970_v47 }
 0x3cc   : > { %13913 = vmatprep.mubr.msk.bf16.mxu0 %vm487_vm0, %v17647_v27  ;;  %v19647_v27 = vld [vmem:[#allocation59_spill] sm:$0xff] }
 0x3d3   : > { %13914 = vmatmul.mubr.msk.bf16.vlgmr.msra.gmra.mrb[0].mxu0 %vm487_vm0, %v17649_v22  ;;  %v19649_v22 = vld [vmem:[#allocation61_spill] sm:$0xff] }
 0x3d4   : > { %13946 = vmatpush3.bf16.msra.mxu0 %v4030_v36  ;;  %13917 = vmatprep.mubr.msk.bf16.mxu0 %vm487_vm0, %v17661_v0  ;;  %v19662_v0 = vld [vmem:[#allocation75_spill] sm:$0xff]  ;;  %v4295_v36 = vpack.c.bf16 %v4235_v19, %v4234_v16  ;;  %v4885_v19 = vpack.c.bf16 %v4828_v11, %v4827_v7 }
 0x3d5   : > { %15895 = vmatprep.subr.msk.bf16.mxu0 %vm908_vm2, %v4324_v41  ;;  %v4236_v41 = vld [vmem:[#allocation2 + $0xa8] sm:$0xff] }
 0x3db   : > { %13918 = vmatmul.mubr.msk.bf16.gmra.mrb[4].mxu0 %vm487_vm0, %v17663_v17  ;;  %v19663_v17 = vld [vmem:[#allocation76_spill] sm:$0xff] }
 0x3dc   : > { %13921 = vmatprep.mubr.msk.bf16.mxu0 %vm487_vm0, %v19645_v29  ;;  %v4237_v29 = vld [vmem:[#allocation2 + $0xb0] sm:$0xff] }
 0x3e3   : > { %13922 = vmatmul.mubr.msk.bf16.gmra.mrb[8].mxu0 %vm487_vm0, %v19646_v34  ;;  %v4238_v34 = vld [vmem:[#allocation2 + $0xc0] sm:$0xff] }
 0x3e4   : > { %13925 = vmatprep.mubr.msk.bf16.mxu0 %vm487_vm0, %v19647_v27  ;;  %v4239_v27 = vld [vmem:[#allocation2 + $0xc8] sm:$0xff] }
 0x3eb   : > { %13926 = vmatmul.mubr.msk.bf16.gmra.mrb[12].mxu0 %vm487_vm0, %v19648_v35  ;;  %v4296_v35 = vpack.c.bf16 %v4237_v29, %v4236_v41  ;;  %v4831_v41 = vld [vmem:[#allocation2 + $0xf1] sm:$0xff]  ;;  %v4832_v29 = vld [vmem:[#allocation2 + $0xf9] sm:$0xff] }
 0x3ec   : > { %13929 = vmatprep.mubr.msk.bf16.mxu0 %vm487_vm0, %v19649_v22  ;;  %v4297_v22 = vpack.c.bf16 %v4239_v27, %v4238_v34  ;;  %v4887_v27 = vpack.c.bf16 %v4832_v29, %v4831_v41 }
 0x3f3   : > { %13930 = vmatmul.mubr.msk.bf16.gmra.mrb[16].mxu0 %vm487_vm0, %v19650_v46  ;;  %v4240_v46 = vld [vmem:[#allocation2 + $0xd8] sm:$0xff] }
 0x3f4   : > { %13933 = vmatprep.mubr.msk.bf16.mxu0 %vm487_vm0, %v19651_v48  ;;  %v4241_v48 = vld [vmem:[#allocation2 + $0xe0] sm:$0xff] }
 0x3fb   : > { %13934 = vmatmul.mubr.msk.bf16.gmra.mrb[20].mxu0 %vm487_vm0, %v19652_v52  ;;  %v4242_v52 = vld [vmem:[#allocation2 + $0xf0] sm:$0xff] }
 0x3fc   : > { %13937 = vmatprep.mubr.msk.bf16.mxu0 %vm487_vm0, %v19653_v53  ;;  %v4243_v53 = vld [vmem:[#allocation2 + $0xf8] sm:$0xff] }
 0x3fd   : > { %v4299_v57 = vpack.c.bf16 %v4243_v53, %v4242_v52 }
 0x403   : > { %13938 = vmatmul.mubr.msk.bf16.gmra.mrb[24].mxu0 %vm487_vm0, %v19654_v55  ;;  %v4298_v55 = vpack.c.bf16 %v4241_v48, %v4240_v46  ;;  %v4835_v46 = vld [vmem:[#allocation2 + $0x121] sm:$0xff]  ;;  %v4836_v48 = vld [vmem:[#allocation2 + $0x129] sm:$0xff] }
 0x404   : > { %13941 = vmatprep.mubr.msk.bf16.mxu0 %vm487_vm0, %v17720_v1  ;;  %v19664_v1 = vld [vmem:[#allocation77_spill] sm:$0xff]  ;;  %v4889_v53 = vpack.c.bf16 %v4836_v48, %v4835_v46  ;;  %v4878_v46 = vld [vmem:[#allocation3 + $0x1a1] sm:$0xff] }
 0x405   : > { %v5403_v48 = vld [vmem:[#allocation2 + $0x32] sm:$0xff] }
 0x40b   : > { %13942 = vmatmul.mubr.msk.bf16.gmra.mrb[28].mxu0 %vm487_vm0, %v18006_v60 }
 0x40c   : > { %13947 = vmatprep.mubr.msk.bf16.mxu0 %vm487_vm0, %v19655_v5  ;;  %v4245_v5 = vld [vmem:[#allocation2 + $0x110] sm:$0xff] }
 0x413   : > { %13948 = vmatmul.mubr.msk.bf16.vlgmr.msra.gmra.mrb[0].mxu0 %vm487_vm0, %v19656_v63  ;;  %v4300_v63 = vpack.c.bf16 %v4245_v5, %v4244_v59  ;;  %v4839_v59 = vld [vmem:[#allocation2 + $0x151] sm:$0xff]  ;;  %v4840_v5 = vld [vmem:[#allocation2 + $0x159] sm:$0xff] }
 0x414   : > { %13980 = vmatpush3.bf16.msra.mxu0 %v4374_v62  ;;  %13951 = vmatprep.mubr.msk.bf16.mxu0 %vm487_vm0, %v19657_v50  ;;  %v4246_v62 = vld [vmem:[#allocation2 + $0x120] sm:$0xff] }
 0x415   : > { %15896 = vmatprep.subr.msk.bf16.mxu0 %vm908_vm2, %v4570_v61 }
 0x41b   : > { %13952 = vmatmul.mubr.msk.bf16.gmra.mrb[4].mxu0 %vm487_vm0, %v19658_v43  ;;  %v4248_v43 = vld [vmem:[#allocation2 + $0x138] sm:$0xff] }
 0x41c   : > { %13955 = vmatprep.mubr.msk.bf16.mxu0 %vm487_vm0, %v19659_v6  ;;  %v4249_v6 = vld [vmem:[#allocation2 + $0x140] sm:$0xff] }
 0x423   : > { %13956 = vmatmul.mubr.msk.bf16.gmra.mrb[8].mxu0 %vm487_vm0, %v19660_v18  ;;  %v4250_v18 = vld [vmem:[#allocation2 + $0x150] sm:$0xff] }
 0x424   : > { %13959 = vmatprep.mubr.msk.bf16.mxu0 %vm487_vm0, %v19661_v38  ;;  %v4251_v38 = vld [vmem:[#allocation2 + $0x158] sm:$0xff] }
 0x42b   : > { %13960 = vmatmul.mubr.msk.bf16.gmra.mrb[12].mxu0 %vm487_vm0, %v19662_v0  ;;  %v4302_v0 = vpack.c.bf16 %v4249_v6, %v4248_v43  ;;  %v4845_v6 = vld [vmem:[#allocation2 + $0x199] sm:$0xff] }
 0x42c   : > { %13963 = vmatprep.mubr.msk.bf16.mxu0 %vm487_vm0, %v19663_v17  ;;  %v4303_v17 = vpack.c.bf16 %v4251_v38, %v4250_v18  ;;  %v4846_v18 = vld [vmem:[#allocation2 + $0x1a1] sm:$0xff] }
 0x42d   : > { %v4847_v38 = vld [vmem:[#allocation3 + $0x31] sm:$0xff] }
 0x433   : > { %13964 = vmatmul.mubr.msk.bf16.gmra.mrb[16].mxu0 %vm487_vm0, %v19664_v1  ;;  %v4252_v1 = vld [vmem:[#allocation2 + $0x168] sm:$0xff] }
 0x434   : > { %13967 = vmatprep.mubr.msk.bf16.mxu0 %vm487_vm0, %v17771_v14  ;;  %v4230_v14 = vld [vmem:[#allocation2 + $0x60] sm:$0xff]  ;;  %v4304_v54 = vpack.c.bf16 %v4253_v49, %v4252_v1 }
 0x435   : > { %v4293_v39 = vpack.c.bf16 %v4231_v32, %v4230_v14  ;;  %v4823_v14 = vld [vmem:[#allocation2 + $0x91] sm:$0xff]  ;;  %v4824_v32 = vld [vmem:[#allocation2 + $0x99] sm:$0xff] }
 0x436   : > { %v4849_v49 = vld [vmem:[#allocation3 + $0x49] sm:$0xff] }
 0x43b   : > { %13968 = vmatmul.mubr.msk.bf16.gmra.mrb[20].mxu0 %vm487_vm0, %v17773_v3  ;;  %v4228_v3 = vld [vmem:[#allocation2 + $0x48] sm:$0xff] }
 0x43c   : > { %13971 = vmatprep.mubr.msk.bf16.mxu0 %vm487_vm0, %v17782_v13  ;;  %v4229_v13 = vld [vmem:[#allocation2 + $0x50] sm:$0xff] }
 0x443   : > { %13972 = vmatmul.mubr.msk.bf16.gmra.mrb[24].mxu0 %vm487_vm0, %v17786_v40  ;;  %v4292_v40 = vpack.c.bf16 %v4229_v13, %v4228_v3  ;;  %v4962_v3 = vsel %vm908_vm2, %v4912_v8, 0  ;;  %v5158_v13 = vld [vmem:[#allocation10 + $0xe] sm:$0x3] }
 0x444   : > { %13975 = vmatprep.mubr.msk.bf16.mxu0 %vm487_vm0, %v17798_v15  ;;  %v4620_v15 = vsel %vm908_vm2, %v4570_v61, 0  ;;  %v4247_v61 = vld [vmem:[#allocation2 + $0x128] sm:$0xff] }
 0x445   : > { %v4301_v50 = vpack.c.bf16 %v4247_v61, %v4246_v62  ;;  %v4891_v61 = vpack.c.bf16 %v4840_v5, %v4839_v59  ;;  %v5406_v59 = vld [vmem:[#allocation2 + $0x52] sm:$0xff]  ;;  %v5407_v5 = vld [vmem:[#allocation2 + $0x62] sm:$0xff] }
 0x44b   : > { %13976 = vmatmul.mubr.msk.bf16.gmra.mrb[28].mxu0 %vm487_vm0, %v18042_v45 }
 0x44c   : > { %13981 = vmatprep.mubr.msk.bf16.mxu0 %vm487_vm0, %v4291_v31  ;;  %v4306_v31 = vpack.c.bf16 %v4257_v28, %v4256_v21  ;;  %v4851_v21 = vld [vmem:[#allocation3 + $0x61] sm:$0xff]  ;;  %v4852_v28 = vld [vmem:[#allocation3 + $0x69] sm:$0xff] }
 0x453   : > { %13982 = vmatmul.mubr.msk.bf16.vlgmr.msra.gmra.mrb[0].mxu0 %vm487_vm0, %v4292_v40 }
 0x454   : > { %14014 = vmatpush3.bf16.msra.mxu0 %v4620_v15  ;;  %13985 = vmatprep.mubr.msk.bf16.mxu0 %vm487_vm0, %v4293_v39  ;;  %v4883_v39 = vpack.c.bf16 %v4824_v32, %v4823_v14  ;;  %v4825_v15 = vld [vmem:[#allocation2 + $0xa9] sm:$0xff] }
 0x455   : > { %15897 = vmatprep.subr.msk.bf16.mxu0 %vm908_vm2, %v4912_v8  ;;  %v4826_v8 = vld [vmem:[#allocation2 + $0xb1] sm:$0xff] }
 0x456   : > { %v4884_v16 = vpack.c.bf16 %v4826_v8, %v4825_v15  ;;  %v4867_v15 = vld [vmem:[#allocation3 + $0x121] sm:$0xff]  ;;  %v4868_v8 = vld [vmem:[#allocation3 + $0x129] sm:$0xff] }
 0x457   : > { %v4905_v11 = vpack.c.bf16 %v4868_v8, %v4867_v15  ;;  %v5436_v15 = vld [vmem:[#allocation3 + $0x3a] sm:$0xff] }
 0x45b   : > { %13986 = vmatmul.mubr.msk.bf16.gmra.mrb[4].mxu0 %vm487_vm0, %v4294_v23  ;;  %v4829_v23 = vld [vmem:[#allocation2 + $0xd9] sm:$0xff] }
 0x45c   : > { %13989 = vmatprep.mubr.msk.bf16.mxu0 %vm487_vm0, %v4295_v36  ;;  %v4830_v36 = vld [vmem:[#allocation2 + $0xe1] sm:$0xff] }
 0x45d   : > { %v4886_v34 = vpack.c.bf16 %v4830_v36, %v4829_v23  ;;  %v4871_v23 = vld [vmem:[#allocation3 + $0x151] sm:$0xff]  ;;  %v4872_v36 = vld [vmem:[#allocation3 + $0x159] sm:$0xff] }
 0x45e   : > { %v4907_v29 = vpack.c.bf16 %v4872_v36, %v4871_v23  ;;  %v5440_v23 = vld [vmem:[#allocation3 + $0x6a] sm:$0xff] }
 0x463   : > { %13990 = vmatmul.mubr.msk.bf16.gmra.mrb[8].mxu0 %vm487_vm0, %v4296_v35  ;;  %v4833_v35 = vld [vmem:[#allocation2 + $0x109] sm:$0xff] }
 0x464   : > { %13993 = vmatprep.mubr.msk.bf16.mxu0 %vm487_vm0, %v4297_v22  ;;  %v4834_v22 = vld [vmem:[#allocation2 + $0x111] sm:$0xff] }
 0x465   : > { %v4888_v52 = vpack.c.bf16 %v4834_v22, %v4833_v35  ;;  %v4877_v22 = vld [vmem:[#allocation3 + $0x199] sm:$0xff] }
 0x46b   : > { %13994 = vmatmul.mubr.msk.bf16.gmra.mrb[12].mxu0 %vm487_vm0, %v4298_v55  ;;  %v4837_v55 = vld [vmem:[#allocation2 + $0x139] sm:$0xff] }
 0x46c   : > { %13997 = vmatprep.mubr.msk.bf16.mxu0 %vm487_vm0, %v4299_v57  ;;  %v4838_v57 = vld [vmem:[#allocation2 + $0x141] sm:$0xff] }
 0x46d   : > { %v4890_v62 = vpack.c.bf16 %v4838_v57, %v4837_v55  ;;  %v5405_v57 = vld [vmem:[#allocation2 + $0x4a] sm:$0xff] }
 0x473   : > { %13998 = vmatmul.mubr.msk.bf16.gmra.mrb[16].mxu0 %vm487_vm0, %v4300_v63  ;;  %v4841_v63 = vld [vmem:[#allocation2 + $0x169] sm:$0xff] }
 0x474   : > { %14001 = vmatprep.mubr.msk.bf16.mxu0 %vm487_vm0, %v4301_v50  ;;  %v4842_v50 = vld [vmem:[#allocation2 + $0x171] sm:$0xff] }
 0x475   : > { %v4892_v43 = vpack.c.bf16 %v4842_v50, %v4841_v63 }
 0x47b   : > { %14002 = vmatmul.mubr.msk.bf16.gmra.mrb[20].mxu0 %vm487_vm0, %v4302_v0  ;;  %v4848_v0 = vld [vmem:[#allocation3 + $0x39] sm:$0xff] }
 0x47c   : > { %14005 = vmatprep.mubr.msk.bf16.mxu0 %vm487_vm0, %v4303_v17  ;;  %v4894_v17 = vpack.c.bf16 %v4846_v18, %v4845_v6  ;;  %v4895_v1 = vpack.c.bf16 %v4848_v0, %v4847_v38  ;;  %v5411_v6 = vld [vmem:[#allocation2 + $0x92] sm:$0xff]  ;;  %v5412_v18 = vld [vmem:[#allocation2 + $0x9a] sm:$0xff] }
 0x47d   : > { %v5471_v0 = vpack.c.bf16 %v5412_v18, %v5411_v6  ;;  %v5455_v6 = vld [vmem:[#allocation3 + $0x122] sm:$0xff]  ;;  %v5456_v18 = vld [vmem:[#allocation3 + $0x12a] sm:$0xff] }
 0x483   : > { %14006 = vmatmul.mubr.msk.bf16.gmra.mrb[24].mxu0 %vm487_vm0, %v4304_v54  ;;  %v4850_v54 = vld [vmem:[#allocation3 + $0x51] sm:$0xff] }
 0x484   : > { %14009 = vmatprep.mubr.msk.bf16.mxu0 %vm487_vm0, %v17835_v33  ;;  %v4289_v33 = vld [vmem:[#allocation3 + $0x198] sm:$0xff] }
 0x48b   : > { %14010 = vmatmul.mubr.msk.bf16.gmra.mrb[28].mxu0 %vm487_vm0, %v4306_v31  ;;  %v4896_v31 = vpack.c.bf16 %v4850_v54, %v4849_v49  ;;  %v5415_v49 = vld [vmem:[#allocation2 + $0xc2] sm:$0xff]  ;;  %v5416_v54 = vld [vmem:[#allocation2 + $0xca] sm:$0xff] }
 0x48c   : > { %14015 = vmatprep.mubr.msk.bf16.mxu0 %vm487_vm0, %v17840_v26  ;;  %v4290_v26 = vld [vmem:[#allocation3 + $0x1a0] sm:$0xff] }
 0x493   : > { %14016 = vmatmul.mubr.msk.bf16.vlgmr.msra.gmra.mrb[0].mxu0 %vm487_vm0, %v17842_v44  ;;  %v4815_v44 = vld [vmem:[#allocation2 + $0x31] sm:$0xff] }
 0x494   : > { %14048 = vmatpush3.bf16.msra.mxu0 %v4962_v3  ;;  %14019 = vmatprep.mubr.msk.bf16.mxu0 %vm487_vm0, %v17850_v58  ;;  %v4816_v58 = vld [vmem:[#allocation2 + $0x39] sm:$0xff]  ;;  %v4897_v3 = vpack.c.bf16 %v4852_v28, %v4851_v21  ;;  %v5473_v28 = vpack.c.bf16 %v5416_v54, %v5415_v49  ;;  %v5459_v49 = vld [vmem:[#allocation3 + $0x152] sm:$0xff]  ;;  %v5460_v54 = vld [vmem:[#allocation3 + $0x15a] sm:$0xff] }
 0x495   : > { %15898 = vmatprep.subr.msk.bf16.mxu0 %vm908_vm2, %v5158_v13 }
 0x49b   : > { %14020 = vmatmul.mubr.msk.bf16.gmra.mrb[4].mxu0 %vm487_vm0, %v17852_v20  ;;  %v4322_v20 = vpack.c.bf16 %v4290_v26, %v4289_v33  ;;  %v4853_v33 = vld [vmem:[#allocation3 + $0x79] sm:$0xff]  ;;  %v4854_v26 = vld [vmem:[#allocation3 + $0x81] sm:$0xff] }
 0x49c   : > { %14023 = vmatprep.mubr.msk.bf16.mxu0 %vm487_vm0, %v17858_v2  ;;  %v4879_v2 = vpack.c.bf16 %v4816_v58, %v4815_v44  ;;  %v4855_v44 = vld [vmem:[#allocation3 + $0x91] sm:$0xff]  ;;  %v4856_v58 = vld [vmem:[#allocation3 + $0x99] sm:$0xff] }
 0x4a3   : > { %14024 = vmatmul.mubr.msk.bf16.gmra.mrb[8].mxu0 %vm487_vm0, %v17860_v10  ;;  %v4818_v10 = vld [vmem:[#allocation2 + $0x51] sm:$0xff] }
 0x4a4   : > { %14027 = vmatprep.mubr.msk.bf16.mxu0 %vm487_vm0, %v17866_v25  ;;  %v4819_v25 = vld [vmem:[#allocation2 + $0x61] sm:$0xff] }
 0x4ab   : > { %14028 = vmatmul.mubr.msk.bf16.gmra.mrb[12].mxu0 %vm487_vm0, %v17868_v56 }
 0x4ac   : > { %14031 = vmatprep.mubr.msk.bf16.mxu0 %vm487_vm0, %v17874_v42 }
 0x4b3   : > { %14032 = vmatmul.mubr.msk.bf16.gmra.mrb[16].mxu0 %vm487_vm0, %v17876_v37  ;;  %v18100_v37 = vld [vmem:[#allocation9 + $0x10] sm:$0x3] }
 0x4b4   : > { %14035 = vmatprep.mubr.msk.bf16.mxu0 %vm487_vm0, %v17882_v51  ;;  %v4821_v51 = vld [vmem:[#allocation2 + $0x79] sm:$0xff] }
 0x4bb   : > { %14036 = vmatmul.mubr.msk.bf16.gmra.mrb[20].mxu0 %vm487_vm0, %v17884_v9  ;;  %v4817_v9 = vld [vmem:[#allocation2 + $0x49] sm:$0xff] }
 0x4bc   : > { %14039 = vmatprep.mubr.msk.bf16.mxu0 %vm487_vm0, %v17890_v24  ;;  %v4820_v24 = vld [vmem:[#allocation2 + $0x69] sm:$0xff]  ;;  %v4880_v56 = vpack.c.bf16 %v4818_v10, %v4817_v9  ;;  %v4857_v9 = vld [vmem:[#allocation3 + $0xa9] sm:$0xff]  ;;  %v4858_v10 = vld [vmem:[#allocation3 + $0xb1] sm:$0xff] }
 0x4bd   : > { %v4881_v42 = vpack.c.bf16 %v4820_v24, %v4819_v25  ;;  %v4859_v25 = vld [vmem:[#allocation3 + $0xc1] sm:$0xff]  ;;  %v4860_v24 = vld [vmem:[#allocation3 + $0xc9] sm:$0xff] }
 0x4c3   : > { %14040 = vmatmul.mubr.msk.bf16.gmra.mrb[24].mxu0 %vm487_vm0, %v17892_v4  ;;  %v5208_v4 = vsel %vm908_vm2, %v5158_v13, 0  ;;  %v5550_v13 = vsel %vm908_vm2, %v18100_v37, 0 }
 0x4c4   : > { %14043 = vmatprep.mubr.msk.bf16.mxu0 %vm487_vm0, %v17898_v30  ;;  %v4822_v30 = vld [vmem:[#allocation2 + $0x81] sm:$0xff] }
 0x4c5   : > { %v4882_v40 = vpack.c.bf16 %v4822_v30, %v4821_v51  ;;  %v4863_v51 = vld [vmem:[#allocation3 + $0xf1] sm:$0xff]  ;;  %v4864_v30 = vld [vmem:[#allocation3 + $0xf9] sm:$0xff] }
 0x4c6   : > { %v4903_v32 = vpack.c.bf16 %v4864_v30, %v4863_v51  ;;  %v5429_v51 = vld [vmem:[#allocation2 + $0x16a] sm:$0xff]  ;;  %v5430_v30 = vld [vmem:[#allocation2 + $0x172] sm:$0xff] }
 0x4cb   : > { %14044 = vmatmul.mubr.msk.bf16.gmra.mrb[28].mxu0 %vm487_vm0, %v4322_v20  ;;  %v4898_v20 = vpack.c.bf16 %v4854_v26, %v4853_v33 }
 0x4cc   : > { %14049 = vmatprep.mubr.msk.bf16.mxu0 %vm487_vm0, %v4879_v2  ;;  %v4899_v2 = vpack.c.bf16 %v4856_v58, %v4855_v44  ;;  %v5421_v44 = vld [vmem:[#allocation2 + $0x10a] sm:$0xff]  ;;  %v5422_v58 = vld [vmem:[#allocation2 + $0x112] sm:$0xff] }
 0x4d3   : > { %14050 = vmatmul.mubr.msk.bf16.vlgmr.msra.gmra.mrb[0].mxu0 %vm487_vm0, %v4880_v56  ;;  %v4900_v56 = vpack.c.bf16 %v4858_v10, %v4857_v9  ;;  %v5476_v9 = vpack.c.bf16 %v5422_v58, %v5421_v44  ;;  %v16535_v44 = vmov 1   ;;  %v18181_v58 = vld [vmem:[#allocation12] ss:$0 sm:$0xff] }
 0x4d4   : > { %14082 = vmatpush3.bf16.msra.mxu0 %v5208_v4  ;;  %14053 = vmatprep.mubr.msk.bf16.mxu0 %vm487_vm0, %v4881_v42  ;;  %v4901_v42 = vpack.c.bf16 %v4860_v24, %v4859_v25  ;;  %v4861_v4 = vld [vmem:[#allocation3 + $0xd9] sm:$0xff]  ;;  %v5425_v25 = vld [vmem:[#allocation2 + $0x13a] sm:$0xff] }
 0x4d5   : > { %15899 = vmatprep.subr.msk.bf16.mxu0 %vm908_vm2, %v18100_v37  ;;  %v4862_v37 = vld [vmem:[#allocation3 + $0xe1] sm:$0xff]  ;;  %v5426_v24 = vld [vmem:[#allocation2 + $0x142] sm:$0xff]  ;;  %16057 = vset.pattern.permute.xlu1 %v16535_v44 }
 0x4d6   : > { %v4902_v14 = vpack.c.bf16 %v4862_v37, %v4861_v4  ;;  %v5478_v4 = vpack.c.bf16 %v5426_v24, %v5425_v25  ;;  %16056 = vset.pattern.permute.xlu0 %v16535_v44 }
 0x4db   : > { %14054 = vmatmul.mubr.msk.bf16.gmra.mrb[4].mxu0 %vm487_vm0, %v4882_v40  ;;  %v4865_v40 = vld [vmem:[#allocation3 + $0x109] sm:$0xff] }
 0x4dc   : > { %14057 = vmatprep.mubr.msk.bf16.mxu0 %vm487_vm0, %v4883_v39  ;;  %v4866_v39 = vld [vmem:[#allocation3 + $0x111] sm:$0xff] }
 0x4dd   : > { %v4904_v7 = vpack.c.bf16 %v4866_v39, %v4865_v40  ;;  %v5434_v40 = vld [vmem:[#allocation2 + $0x1a2] sm:$0xff] }
 0x4de   : > { %v5435_v39 = vld [vmem:[#allocation3 + $0x32] sm:$0xff] }
 0x4e3   : > { %14058 = vmatmul.mubr.msk.bf16.gmra.mrb[8].mxu0 %vm487_vm0, %v4884_v16  ;;  %v4869_v16 = vld [vmem:[#allocation3 + $0x139] sm:$0xff] }
 0x4e4   : > { %14061 = vmatprep.mubr.msk.bf16.mxu0 %vm487_vm0, %v4885_v19  ;;  %v4870_v19 = vld [vmem:[#allocation3 + $0x141] sm:$0xff] }
 0x4e5   : > { %v4906_v41 = vpack.c.bf16 %v4870_v19, %v4869_v16  ;;  %v5438_v16 = vld [vmem:[#allocation3 + $0x52] sm:$0xff]  ;;  %v5439_v19 = vld [vmem:[#allocation3 + $0x62] sm:$0xff] }
 0x4eb   : > { %14062 = vmatmul.mubr.msk.bf16.gmra.mrb[12].mxu0 %vm487_vm0, %v4886_v34  ;;  %v4873_v34 = vld [vmem:[#allocation3 + $0x169] sm:$0xff] }
 0x4ec   : > { %14065 = vmatprep.mubr.msk.bf16.mxu0 %vm487_vm0, %v4887_v27  ;;  %v4874_v27 = vld [vmem:[#allocation3 + $0x171] sm:$0xff] }
 0x4ed   : > { %v4908_v35 = vpack.c.bf16 %v4874_v27, %v4873_v34  ;;  %v5443_v34 = vld [vmem:[#allocation3 + $0x92] sm:$0xff]  ;;  %v5444_v27 = vld [vmem:[#allocation3 + $0x9a] sm:$0xff] }
 0x4f3   : > { %14066 = vmatmul.mubr.msk.bf16.gmra.mrb[16].mxu0 %vm487_vm0, %v4888_v52  ;;  %v5404_v52 = vld [vmem:[#allocation2 + $0x3a] sm:$0xff] }
 0x4f4   : > { %14069 = vmatprep.mubr.msk.bf16.mxu0 %vm487_vm0, %v4889_v53  ;;  %v4910_v53 = vpack.c.bf16 %v4878_v46, %v4877_v22  ;;  %v5467_v55 = vpack.c.bf16 %v5404_v52, %v5403_v48  ;;  %v5487_v22 = vpack.c.bf16 %v5444_v27, %v5443_v34  ;;  %v5445_v46 = vld [vmem:[#allocation3 + $0xaa] sm:$0xff]  ;;  %v5446_v48 = vld [vmem:[#allocation3 + $0xb2] sm:$0xff]  ;;  %v5447_v52 = vld [vmem:[#allocation3 + $0xc2] sm:$0xff] }
 0x4fb   : > { %14070 = vmatmul.mubr.msk.bf16.gmra.mrb[20].mxu0 %vm487_vm0, %v4890_v62  ;;  %v5408_v62 = vld [vmem:[#allocation2 + $0x6a] sm:$0xff] }
 0x4fc   : > { %14073 = vmatprep.mubr.msk.bf16.mxu0 %vm487_vm0, %v4891_v61  ;;  %v5468_v61 = vpack.c.bf16 %v5406_v59, %v5405_v57  ;;  %v5469_v63 = vpack.c.bf16 %v5408_v62, %v5407_v5  ;;  %v5449_v59 = vld [vmem:[#allocation3 + $0xda] sm:$0xff]  ;;  %v5450_v5 = vld [vmem:[#allocation3 + $0xe2] sm:$0xff]  ;;  %v5451_v62 = vld [vmem:[#allocation3 + $0xf2] sm:$0xff] }
 0x503   : > { %14074 = vmatmul.mubr.msk.bf16.gmra.mrb[24].mxu0 %vm487_vm0, %v4892_v43  ;;  %v5410_v43 = vld [vmem:[#allocation2 + $0x82] sm:$0xff] }
 0x504   : > { %14077 = vmatprep.mubr.msk.bf16.mxu0 %vm487_vm0, %v17934_v12  ;;  %v18123_v12 = vld [vmem:[#allocation10 + $0x10] sm:$0x3] }
 0x505   : > { %v5796_v50 = vsel %vm908_vm2, %v18123_v12, 0 }
 0x50b   : > { %14078 = vmatmul.mubr.msk.bf16.gmra.mrb[28].mxu0 %vm487_vm0, %v4894_v17  ;;  %v5413_v17 = vld [vmem:[#allocation2 + $0xaa] sm:$0xff] }
 0x50c   : > { %14083 = vmatprep.mubr.msk.bf16.mxu0 %vm487_vm0, %v4895_v1  ;;  %v5414_v1 = vld [vmem:[#allocation2 + $0xb2] sm:$0xff] }
 0x50d   : > { %v5472_v21 = vpack.c.bf16 %v5414_v1, %v5413_v17  ;;  %v5457_v17 = vld [vmem:[#allocation3 + $0x13a] sm:$0xff]  ;;  %v5458_v1 = vld [vmem:[#allocation3 + $0x142] sm:$0xff] }
 0x513   : > { %14084 = vmatmul.mubr.msk.bf16.vlgmr.msra.gmra.mrb[0].mxu0 %vm487_vm0, %v4896_v31  ;;  %v5417_v31 = vld [vmem:[#allocation2 + $0xda] sm:$0xff] }
 0x514   : > { %14116 = vmatpush3.bf16.msra.mxu0 %v5550_v13  ;;  %14087 = vmatprep.mubr.msk.bf16.mxu0 %vm487_vm0, %v4897_v3  ;;  %v5418_v3 = vld [vmem:[#allocation2 + $0xe2] sm:$0xff]  ;;  %v5419_v13 = vld [vmem:[#allocation2 + $0xf2] sm:$0xff] }
 0x515   : > { %15900 = vmatprep.subr.msk.bf16.mxu0 %vm908_vm2, %v18123_v12  ;;  %v5420_v12 = vld [vmem:[#allocation2 + $0xfa] sm:$0xff]  ;;  %v5474_v33 = vpack.c.bf16 %v5418_v3, %v5417_v31  ;;  %v5462_v3 = vld [vmem:[#allocation3 + $0x172] sm:$0xff] }
 0x516   : > { %v5475_v26 = vpack.c.bf16 %v5420_v12, %v5419_v13  ;;  %v5461_v31 = vld [vmem:[#allocation3 + $0x16a] sm:$0xff]  ;;  %v5465_v12 = vld [vmem:[#allocation3 + $0x19a] sm:$0xff] }
 0x517   : > { %v5496_v13 = vpack.c.bf16 %v5462_v3, %v5461_v31 }
 0x51b   : > { %14088 = vmatmul.mubr.msk.bf16.gmra.mrb[4].mxu0 %vm487_vm0, %v4898_v20  ;;  %v5423_v20 = vld [vmem:[#allocation2 + $0x122] sm:$0xff] }
 0x51c   : > { %14091 = vmatprep.mubr.msk.bf16.mxu0 %vm487_vm0, %v4899_v2  ;;  %v5424_v2 = vld [vmem:[#allocation2 + $0x12a] sm:$0xff] }
 0x51d   : > { %v5477_v10 = vpack.c.bf16 %v5424_v2, %v5423_v20 }
 0x523   : > { %14092 = vmatmul.mubr.msk.bf16.gmra.mrb[8].mxu0 %vm487_vm0, %v4900_v56  ;;  %v5427_v56 = vld [vmem:[#allocation2 + $0x152] sm:$0xff] }
 0x524   : > { %14095 = vmatprep.mubr.msk.bf16.mxu0 %vm487_vm0, %v4901_v42  ;;  %v5428_v42 = vld [vmem:[#allocation2 + $0x15a] sm:$0xff] }
 0x525   : > { %v5479_v37 = vpack.c.bf16 %v5428_v42, %v5427_v56 }
 0x52b   : > { %14096 = vmatmul.mubr.msk.bf16.gmra.mrb[12].mxu0 %vm487_vm0, %v4902_v14  ;;  %v5480_v14 = vpack.c.bf16 %v5430_v30, %v5429_v51 }
 0x52c   : > { %14099 = vmatprep.mubr.msk.bf16.mxu0 %vm487_vm0, %v4903_v32  ;;  %v5433_v32 = vld [vmem:[#allocation2 + $0x19a] sm:$0xff] }
 0x52d   : > { %v5482_v8 = vpack.c.bf16 %v5434_v40, %v5433_v32 }
 0x533   : > { %14100 = vmatmul.mubr.msk.bf16.gmra.mrb[16].mxu0 %vm487_vm0, %v4904_v7  ;;  %v5483_v7 = vpack.c.bf16 %v5436_v15, %v5435_v39 }
 0x534   : > { %14103 = vmatprep.mubr.msk.bf16.mxu0 %vm487_vm0, %v4905_v11  ;;  %v5437_v11 = vld [vmem:[#allocation3 + $0x4a] sm:$0xff] }
 0x535   : > { %v5484_v36 = vpack.c.bf16 %v5438_v16, %v5437_v11 }
 0x53b   : > { %14104 = vmatmul.mubr.msk.bf16.gmra.mrb[20].mxu0 %vm487_vm0, %v4906_v41  ;;  %v5485_v41 = vpack.c.bf16 %v5440_v23, %v5439_v19 }
 0x53c   : > { %14107 = vmatprep.mubr.msk.bf16.mxu0 %vm487_vm0, %v4907_v29  ;;  %v5442_v29 = vld [vmem:[#allocation3 + $0x82] sm:$0xff] }
 0x543   : > { %14108 = vmatmul.mubr.msk.bf16.gmra.mrb[24].mxu0 %vm487_vm0, %v4908_v35 }
 0x544   : > { %14111 = vmatprep.mubr.msk.bf16.mxu0 %vm487_vm0, %v17970_v47  ;;  %v5409_v47 = vld [vmem:[#allocation2 + $0x7a] sm:$0xff] }
 0x545   : > { %v5470_v38 = vpack.c.bf16 %v5410_v43, %v5409_v47  ;;  %v5453_v47 = vld [vmem:[#allocation3 + $0x10a] sm:$0xff]  ;;  %v5454_v43 = vld [vmem:[#allocation3 + $0x112] sm:$0xff] }
 0x54b   : > { %14112 = vmatmul.mubr.msk.bf16.gmra.mrb[28].mxu0 %vm487_vm0, %v4910_v53  ;;  %v5448_v53 = vld [vmem:[#allocation3 + $0xca] sm:$0xff] }
 0x54c   : > { %14117 = vmatprep.mubr.msk.bf16.mxu0 %vm487_vm0, %v5467_v55  ;;  %v5488_v55 = vpack.c.bf16 %v5446_v48, %v5445_v46  ;;  %v5489_v57 = vpack.c.bf16 %v5448_v53, %v5447_v52 }
 0x553   : > { %14118 = vmatmul.mubr.msk.bf16.vlgmr.msra.gmra.mrb[0].mxu0 %vm487_vm0, %v5468_v61  ;;  %v5452_v61 = vld [vmem:[#allocation3 + $0xfa] sm:$0xff] }
 0x554   : > { %14150 = vmatpush3.bf16.msra.mxu0 %v5796_v50  ;;  %14121 = vmatprep.mubr.msk.bf16.mxu0 %vm487_vm0, %v5469_v63  ;;  %v5490_v63 = vpack.c.bf16 %v5450_v5, %v5449_v59  ;;  %v5491_v50 = vpack.c.bf16 %v5452_v61, %v5451_v62 }
 0x55b   : > { %14122 = vmatmul.mubr.msk.bf16.gmra.mrb[4].mxu0 %vm487_vm0, %v5470_v38  ;;  %v5492_v38 = vpack.c.bf16 %v5454_v43, %v5453_v47 }
 0x55c   : > { %14125 = vmatprep.mubr.msk.bf16.mxu0 %vm487_vm0, %v5471_v0  ;;  %v5493_v0 = vpack.c.bf16 %v5456_v18, %v5455_v6 }
 0x563   : > { %14126 = vmatmul.mubr.msk.bf16.gmra.mrb[8].mxu0 %vm487_vm0, %v5472_v21  ;;  %v5494_v21 = vpack.c.bf16 %v5458_v1, %v5457_v17 }
 0x564   : > { %14129 = vmatprep.mubr.msk.bf16.mxu0 %vm487_vm0, %v5473_v28  ;;  %v5495_v28 = vpack.c.bf16 %v5460_v54, %v5459_v49 }
 0x56b   : > { %14130 = vmatmul.mubr.msk.bf16.gmra.mrb[12].mxu0 %vm487_vm0, %v5474_v33  ;;  %v5466_v33 = vld [vmem:[#allocation3 + $0x1a2] sm:$0xff] }
 0x56c   : > { %14133 = vmatprep.mubr.msk.bf16.mxu0 %vm487_vm0, %v5475_v26  ;;  %v5498_v26 = vpack.c.bf16 %v5466_v33, %v5465_v12 }
 0x573   : > { %14134 = vmatmul.mubr.msk.bf16.gmra.mrb[16].mxu0 %vm487_vm0, %v5476_v9 }
 0x574   : > { %14137 = vmatprep.mubr.msk.bf16.mxu0 %vm487_vm0, %v5477_v10 }
 0x57b   : > { %14138 = vmatmul.mubr.msk.bf16.gmra.mrb[20].mxu0 %vm487_vm0, %v5478_v4 }
 0x57c   : > { %14141 = vmatprep.mubr.msk.bf16.mxu0 %vm487_vm0, %v5479_v37 }
 0x583   : > { %14142 = vmatmul.mubr.msk.bf16.gmra.mrb[24].mxu0 %vm487_vm0, %v5480_v14 }
 0x584   : > { %14145 = vmatprep.mubr.msk.bf16.mxu0 %vm487_vm0, %v18006_v60  ;;  %v5441_v60 = vld [vmem:[#allocation3 + $0x7a] sm:$0xff] }
 0x585   : > { %v5486_v35 = vpack.c.bf16 %v5442_v29, %v5441_v60 }
 0x58b   : > { %14146 = vmatmul.mubr.msk.bf16.gmra.mrb[28].mxu0 %vm487_vm0, %v5482_v8 }
 0x58c   : > { %14151 = vmatprep.mubr.msk.bf16.mxu0 %vm487_vm0, %v5483_v7 }
 0x593   : > { %14152 = vmatmul.mubr.msk.bf16.vlgmr.msra.gmra.mrb[0].mxu0 %vm487_vm0, %v5484_v36 }
 0x594   : > { %14155 = vmatprep.mubr.msk.bf16.mxu0 %vm487_vm0, %v5485_v41 }
 0x59b   : > { %14156 = vmatmul.mubr.msk.bf16.gmra.mrb[4].mxu0 %vm487_vm0, %v5486_v35 }
 0x59c   : > { %14159 = vmatprep.mubr.msk.bf16.mxu0 %vm487_vm0, %v5487_v22 }
 0x5a3   : > { %14160 = vmatmul.mubr.msk.bf16.gmra.mrb[8].mxu0 %vm487_vm0, %v5488_v55 }
 0x5a4   : > { %14163 = vmatprep.mubr.msk.bf16.mxu0 %vm487_vm0, %v5489_v57 }
 0x5ab   : > { %14164 = vmatmul.mubr.msk.bf16.gmra.mrb[12].mxu0 %vm487_vm0, %v5490_v63 }
 0x5ac   : > { %14167 = vmatprep.mubr.msk.bf16.mxu0 %vm487_vm0, %v5491_v50 }
 0x5b3   : > { %14168 = vmatmul.mubr.msk.bf16.gmra.mrb[16].mxu0 %vm487_vm0, %v5492_v38 }
 0x5b4   : > { %14171 = vmatprep.mubr.msk.bf16.mxu0 %vm487_vm0, %v5493_v0 }
 0x5bb   : > { %14172 = vmatmul.mubr.msk.bf16.gmra.mrb[20].mxu0 %vm487_vm0, %v5494_v21 }
 0x5bc   : > { %14175 = vmatprep.mubr.msk.bf16.mxu0 %vm487_vm0, %v5495_v28 }
 0x5c3   : > { %14176 = vmatmul.mubr.msk.bf16.gmra.mrb[24].mxu0 %vm487_vm0, %v5496_v13 }
 0x5c4   : > { %14179 = vmatprep.mubr.msk.bf16.mxu0 %vm487_vm0, %v18042_v45 }
 0x5cb   : > { %14180 = vmatmul.mubr.msk.bf16.gmra.mrb[28].mxu0 %vm487_vm0, %v5498_v26 }
 0x666   : > { %v14153_v20 = vpop.f32.mrb[0].mxu0 }
 0x667   : > { %v6000_v2 = vadd.f32 %v14153_v20, %v18181_v58  ;;  %v5832_v9 = vpop.f32.mrb[1].mxu0 }
 0x668   : > { %v5998_v10 = vadd.f32 %v18181_v58, %v5832_v9  ;;  %v14154_v25 = vpop.f32.mrb[2].mxu0 }
 0x669   : > { %v12474_v45 = vmul.f32 -1.442695, %v6000_v2  ;;  %v6001_v24 = vadd.f32 %v14154_v25, %v18181_v58  ;;  %v5835_v56 = vpop.f32.mrb[3].mxu0 }
 0x66a   : > { %v12472_v42 = vmul.f32 -1.442695, %v5998_v10  ;;  %v5999_v4 = vadd.f32 %v18181_v58, %v5835_v56 }
 0x66b   : > { %16062 = vpow2.f32 %v12474_v45  ;;  %v12475_v37 = vmul.f32 -1.442695, %v6001_v24 }
 0x66c   : > { %16064 = vpow2.f32 %v12472_v42  ;;  %v12473_v51 = vmul.f32 -1.442695, %v5999_v4 }
 0x66d   : > { %16066 = vpow2.f32 %v12475_v37 }
 0x66e   : > { %16068 = vpow2.f32 %v12473_v51  ;;  %v14157_v30 = vpop.f32.mrb[4].mxu0 }
 0x66f   : > { %v6004_v14 = vadd.f32 %v14157_v30, %v18181_v58  ;;  %v5848_v32 = vpop.f32.mrb[5].mxu0 }
 0x670   : > { %v6002_v40 = vadd.f32 %v18181_v58, %v5848_v32  ;;  %v14158_v39 = vpop.f32.mrb[6].mxu0 }
 0x671   : > { %v12478_v15 = vmul.f32 -1.442695, %v6004_v14  ;;  %v6005_v8 = vadd.f32 %v14158_v39, %v18181_v58  ;;  %v5851_v7 = vpop.f32.mrb[7].mxu0 }
 0x672   : > { %v12476_v11 = vmul.f32 -1.442695, %v6002_v40  ;;  %v6003_v16 = vadd.f32 %v18181_v58, %v5851_v7 }
 0x673   : > { %16070 = vpow2.f32 %v12478_v15  ;;  %v12479_v19 = vmul.f32 -1.442695, %v6005_v8 }
 0x674   : > { %16072 = vpow2.f32 %v12476_v11  ;;  %v12477_v23 = vmul.f32 -1.442695, %v6003_v16 }
 0x675   : > { %v16063_v36 = vpop.eup %16062  ;;  %16074 = vpow2.f32 %v12479_v19 }
 0x676   : > { %v16065_v41 = vpop.eup %16064  ;;  %v6128_v60 = vadd.f32 1.0, %v16063_v36  ;;  %16076 = vpow2.f32 %v12477_v23  ;;  %v14161_v29 = vpop.f32.mrb[8].mxu0 }
 0x677   : > { %v16067_v34 = vpop.eup %16066  ;;  %v6126_v27 = vadd.f32 1.0, %v16065_v41  ;;  %v6008_v35 = vadd.f32 %v14161_v29, %v18181_v58  ;;  %v5864_v22 = vpop.f32.mrb[9].mxu0 }
 0x678   : > { %v16069_v46 = vpop.eup %16068  ;;  %16078 = vrcp.f32 %v6128_v60  ;;  %v6129_v48 = vadd.f32 1.0, %v16067_v34  ;;  %v6006_v52 = vadd.f32 %v18181_v58, %v5864_v22  ;;  %v14162_v53 = vpop.f32.mrb[10].mxu0 }
 0x679   : > { %16080 = vrcp.f32 %v6126_v27  ;;  %v6127_v55 = vadd.f32 1.0, %v16069_v46  ;;  %v12482_v57 = vmul.f32 -1.442695, %v6008_v35  ;;  %v6009_v59 = vadd.f32 %v14162_v53, %v18181_v58  ;;  %v5867_v5 = vpop.f32.mrb[11].mxu0 }
 0x67a   : > { %16082 = vrcp.f32 %v6129_v48  ;;  %v12480_v62 = vmul.f32 -1.442695, %v6006_v52  ;;  %v6007_v61 = vadd.f32 %v18181_v58, %v5867_v5 }
 0x67b   : > { %16084 = vrcp.f32 %v6127_v55  ;;  %v12483_v63 = vmul.f32 -1.442695, %v6009_v59 }
 0x67c   : > { %16086 = vpow2.f32 %v12482_v57  ;;  %v12481_v50 = vmul.f32 -1.442695, %v6007_v61 }
 0x67d   : > { %v16071_v47 = vpop.eup %16070  ;;  %16088 = vpow2.f32 %v12480_v62  ;;  %v6735_v62 = vld [vmem:[#allocation15] sm:$0x3] }
 0x67e   : > { %v16073_v43 = vpop.eup %16072  ;;  %v6132_v6 = vadd.f32 1.0, %v16071_v47  ;;  %16090 = vpow2.f32 %v12483_v63  ;;  %v14165_v18 = vpop.f32.mrb[12].mxu0  ;;  %15901 = vmatprep.subr.msk.bf16.mxu1 %vm908_vm2, %v6735_v62 }
 0x67f   : > { %v16075_v38 = vpop.eup %16074  ;;  %v6130_v0 = vadd.f32 1.0, %v16073_v43  ;;  %16092 = vpow2.f32 %v12481_v50  ;;  %v6012_v17 = vadd.f32 %v14165_v18, %v18181_v58  ;;  %v5880_v1 = vpop.f32.mrb[13].mxu0 }
 0x680   : > { %v16077_v49 = vpop.eup %16076  ;;  %16094 = vrcp.f32 %v6132_v6  ;;  %v6133_v54 = vadd.f32 1.0, %v16075_v38  ;;  %v6010_v21 = vadd.f32 %v18181_v58, %v5880_v1  ;;  %v14166_v28 = vpop.f32.mrb[14].mxu0  ;;  %v6787_v1 = vsel %vm908_vm2, %v6735_v62, 0 }
 0x681   : > { %16096 = vrcp.f32 %v6130_v0  ;;  %v6131_v31 = vadd.f32 1.0, %v16077_v49  ;;  %v12486_v3 = vmul.f32 -1.442695, %v6012_v17  ;;  %v6013_v13 = vadd.f32 %v14166_v28, %v18181_v58  ;;  %v5883_v12 = vpop.f32.mrb[15].mxu0  ;;  %v6670_v49 = vld [vmem:[#allocation3] sm:$0xff]  ;;  %14184 = vmatpush3.bf16.msra.mxu1 %v6787_v1 }
 0x682   : > { %v18198_v33 = vpop.eup %16078  ;;  %16098 = vrcp.f32 %v6133_v54  ;;  %v12484_v26 = vmul.f32 -1.442695, %v6010_v21  ;;  %v6011_v20 = vadd.f32 %v18181_v58, %v5883_v12  ;;  %v6671_v54 = vld [vmem:[#allocation3 + $0x8] sm:$0xff] }
 0x683   : > { %v18201_v2 = vpop.eup %16080  ;;  %16100 = vrcp.f32 %v6131_v31  ;;  %v12487_v9 = vmul.f32 -1.442695, %v6013_v13  ;;  %6423 = vperm.xlu1 %16057, %v18198_v33   ;;  %v6718_v31 = vpack.c.bf16 %v6671_v54, %v6670_v49 }
 0x684   : > { %v18204_v10 = vpop.eup %16082  ;;  %16102 = vpow2.f32 %v12486_v3  ;;  %v12485_v25 = vmul.f32 -1.442695, %v6011_v20  ;;  %6415 = vperm.xlu0 %16056, %v18201_v2   ;;  %v18237_v3 = vld [vmem:[#allocation13] sm:$0x3] }
 0x685   : > { %v18207_v45 = vpop.eup %16084  ;;  %16104 = vpow2.f32 %v12484_v26  ;;  %15902 = vmatprep.subr.msk.bf16.mxu1 %vm908_vm2, %v18237_v3  ;;  %14185 = vmatprep.mubr.msk.bf16.mxu1 %vm487_vm0, %v6718_v31 }
 0x686   : > { %v16087_v24 = vpop.eup %16086  ;;  %16106 = vpow2.f32 %v12487_v9  ;;  %v14169_v56 = vpop.f32.mrb[16].mxu0 }
 0x687   : > { %v16089_v42 = vpop.eup %16088  ;;  %v6136_v4 = vadd.f32 1.0, %v16087_v24  ;;  %16108 = vpow2.f32 %v12485_v25  ;;  %v6016_v37 = vadd.f32 %v14169_v56, %v18181_v58  ;;  %6427 = vperm.xlu1 %16057, %v18204_v10   ;;  %v5896_v51 = vpop.f32.mrb[17].mxu0 }
 0x688   : > { %v16091_v30 = vpop.eup %16090  ;;  %v6134_v14 = vadd.f32 1.0, %v16089_v42  ;;  %v6014_v32 = vadd.f32 %v18181_v58, %v5896_v51  ;;  %6419 = vperm.xlu0 %16056, %v18207_v45   ;;  %v14170_v40 = vpop.f32.mrb[18].mxu0 }
 0x689   : > { %v16093_v39 = vpop.eup %16092  ;;  %16110 = vrcp.f32 %v6136_v4  ;;  %v6137_v15 = vadd.f32 1.0, %v16091_v30  ;;  %v12490_v8 = vmul.f32 -1.442695, %v6016_v37  ;;  %v6017_v7 = vadd.f32 %v14170_v40, %v18181_v58  ;;  %v5899_v11 = vpop.f32.mrb[19].mxu0 }
 0x68a   : > { %v18214_v16 = vpop.eup %16094  ;;  %16112 = vrcp.f32 %v6134_v14  ;;  %v6135_v19 = vadd.f32 1.0, %v16093_v39  ;;  %v12488_v23 = vmul.f32 -1.442695, %v6014_v32  ;;  %v6015_v36 = vadd.f32 %v18181_v58, %v5899_v11 }
 0x68b   : > { %v18217_v41 = vpop.eup %16096  ;;  %16114 = vrcp.f32 %v6137_v15  ;;  %v12491_v60 = vmul.f32 -1.442695, %v6017_v7 }
 0x68c   : > { %v18219_v29 = vpop.eup %16098  ;;  %16116 = vrcp.f32 %v6135_v19  ;;  %v12489_v34 = vmul.f32 -1.442695, %v6015_v36  ;;  %6431 = vperm.xlu0 %16056, %v18217_v41  }
 0x68d   : > { %v18222_v27 = vpop.eup %16100  ;;  %16118 = vpow2.f32 %v12490_v8 }
 0x68e   : > { %v16103_v35 = vpop.eup %16102  ;;  %16120 = vpow2.f32 %v12488_v23  ;;  %6435 = vperm.xlu1 %16057, %v18222_v27   ;;  %v14173_v22 = vpop.f32.mrb[20].mxu0 }
 0x68f   : > { %v16105_v46 = vpop.eup %16104  ;;  %v6140_v48 = vadd.f32 1.0, %v16103_v35  ;;  %16122 = vpow2.f32 %v12491_v60  ;;  %v6020_v52 = vadd.f32 %v14173_v22, %v18181_v58  ;;  %v5912_v53 = vpop.f32.mrb[21].mxu0 }
 0x690   : > { %v16107_v55 = vpop.eup %16106  ;;  %v6138_v57 = vadd.f32 1.0, %v16105_v46  ;;  %16124 = vpow2.f32 %v12489_v34  ;;  %v6018_v59 = vadd.f32 %v18181_v58, %v5912_v53  ;;  %6439 = vperm.xlu0 %16056, %v18214_v16   ;;  %v14174_v5 = vpop.f32.mrb[22].mxu0 }
 0x691   : > { %v16109_v61 = vpop.eup %16108  ;;  %16126 = vrcp.f32 %v6140_v48  ;;  %v6141_v63 = vadd.f32 1.0, %v16107_v55  ;;  %v12494_v50 = vmul.f32 -1.442695, %v6020_v52  ;;  %v6021_v47 = vadd.f32 %v14174_v5, %v18181_v58  ;;  %v5915_v43 = vpop.f32.mrb[23].mxu0 }
 0x692   : > { %16128 = vrcp.f32 %v6138_v57  ;;  %v6139_v6 = vadd.f32 1.0, %v16109_v61  ;;  %v12492_v18 = vmul.f32 -1.442695, %v6018_v59  ;;  %v6019_v38 = vadd.f32 %v18181_v58, %v5915_v43  ;;  %6443 = vperm.xlu1 %16057, %v18219_v29  }
 0x693   : > { %v18232_v0 = vpop.eup %16110  ;;  %16130 = vrcp.f32 %v6141_v63  ;;  %v12495_v17 = vmul.f32 -1.442695, %v6021_v47 }
 0x694   : > { %v18235_v21 = vpop.eup %16112  ;;  %16132 = vrcp.f32 %v6139_v6  ;;  %v12493_v28 = vmul.f32 -1.442695, %v6019_v38 }
 0x695   : > { %v18239_v13 = vpop.eup %16114  ;;  %16134 = vpow2.f32 %v12494_v50  ;;  %6447 = vperm.xlu0 %16056, %v18235_v21  }
 0x696   : > { %v18244_v12 = vpop.eup %16116  ;;  %16136 = vpow2.f32 %v12492_v18  ;;  %v14177_v26 = vpop.f32.mrb[24].mxu0 }
 0x697   : > { %v16119_v20 = vpop.eup %16118  ;;  %16138 = vpow2.f32 %v12495_v17  ;;  %6451 = vperm.xlu1 %16057, %v18244_v12   ;;  %v6024_v9 = vadd.f32 %v14177_v26, %v18181_v58  ;;  %v5928_v25 = vpop.f32.mrb[25].mxu0 }
 0x698   : > { %v16121_v24 = vpop.eup %16120  ;;  %v6144_v56 = vadd.f32 1.0, %v16119_v20  ;;  %16140 = vpow2.f32 %v12493_v28  ;;  %v6022_v42 = vadd.f32 %v18181_v58, %v5928_v25  ;;  %v14178_v4 = vpop.f32.mrb[26].mxu0 }
 0x699   : > { %v16123_v37 = vpop.eup %16122  ;;  %v6142_v51 = vadd.f32 1.0, %v16121_v24  ;;  %6455 = vperm.xlu0 %16056, %v18232_v0   ;;  %v6025_v30 = vadd.f32 %v14178_v4, %v18181_v58  ;;  %v5931_v14 = vpop.f32.mrb[27].mxu0  ;;  %v12498_v39 = vmul.f32 -1.442695, %v6024_v9 }
 0x69a   : > { %v16125_v32 = vpop.eup %16124  ;;  %16142 = vrcp.f32 %v6144_v56  ;;  %v6145_v40 = vadd.f32 1.0, %v16123_v37  ;;  %v6023_v15 = vadd.f32 %v18181_v58, %v5931_v14  ;;  %v12496_v11 = vmul.f32 -1.442695, %v6022_v42 }
 0x69b   : > { %v18253_v8 = vpop.eup %16126  ;;  %16144 = vrcp.f32 %v6142_v51  ;;  %v6143_v7 = vadd.f32 1.0, %v16125_v32  ;;  %6459 = vperm.xlu1 %16057, %v18239_v13   ;;  %v12499_v23 = vmul.f32 -1.442695, %v6025_v30 }
 0x69c   : > { %v18256_v19 = vpop.eup %16128  ;;  %16146 = vrcp.f32 %v6145_v40  ;;  %v12497_v60 = vmul.f32 -1.442695, %v6023_v15 }
 0x69d   : > { %v18258_v36 = vpop.eup %16130  ;;  %16148 = vrcp.f32 %v6143_v7  ;;  %6463 = vperm.xlu0 %16056, %v18256_v19  }
 0x69e   : > { %v18261_v34 = vpop.eup %16132  ;;  %16150 = vpow2.f32 %v12498_v39  ;;  %v14181_v35 = vpop.f32.mrb[28].mxu0 }
 0x69f   : > { %v16135_v22 = vpop.eup %16134  ;;  %16152 = vpow2.f32 %v12496_v11  ;;  %6467 = vperm.xlu1 %16057, %v18261_v34   ;;  %v18265_v46 = vadd.f32 %v14181_v35, %v18181_v58  ;;  %v5944_v48 = vpop.f32.mrb[29].mxu0 }
 0x6a0   : > { %v16137_v52 = vpop.eup %16136  ;;  %16154 = vpow2.f32 %v12499_v23  ;;  %v6026_v53 = vadd.f32 %v18181_v58, %v5944_v48  ;;  %v14182_v55 = vpop.f32.mrb[30].mxu0  ;;  %v6148_v63 = vadd.f32 1.0, %v16135_v22  ;;  %v16536_v23 = vmov 0  }
 0x6a1   : > { %v16139_v57 = vpop.eup %16138  ;;  %v6146_v59 = vadd.f32 1.0, %v16137_v52  ;;  %16156 = vpow2.f32 %v12497_v60  ;;  %6471 = vperm.xlu0 %16056, %v18253_v8   ;;  %v18270_v5 = vadd.f32 %v14182_v55, %v18181_v58  ;;  %v5947_v62 = vpop.f32.mrb[31].mxu0  ;;  %v19671_v55 = vld [vmem:[#allocation29_spill] sm:$0xff] }
 0x6a2   : > { %v16141_v61 = vpop.eup %16140  ;;  %v6027_v50 = vadd.f32 %v18181_v58, %v5947_v62  ;;  %v12500_v43 = vmul.f32 -1.442695, %v6026_v53  ;;  %v6149_v18 = vadd.f32 1.0, %v16139_v57  ;;  %v19672_v57 = vunpack.c.l.bf16 %v19671_v55 }
 0x6a3   : > { %16158 = vrcp.f32 %v6146_v59  ;;  %v6147_v47 = vadd.f32 1.0, %v16141_v61  ;;  %6475 = vperm.xlu1 %16057, %v18258_v36  }
 0x6a4   : > { %v18274_v6 = vpop.eup %16142  ;;  %v12501_v17 = vmul.f32 -1.442695, %v6027_v50 }
 0x6a5   : > { %v18276_v38 = vpop.eup %16144  ;;  %16160 = vrcp.f32 %v6147_v47 }
 0x6a6   : > { %v18278_v1 = vpop.eup %16146  ;;  %16162 = vrcp.f32 %v6148_v63  ;;  %6479 = vperm.xlu0 %16056, %v18276_v38   ;;  %v19674_v63 = vld [vmem:[#allocation30_spill] sm:$0xff] }
 0x6a7   : > { %v18281_v49 = vpop.eup %16148  ;;  %16164 = vpow2.f32 %v12500_v43  ;;  %v19675_v50 = vunpack.c.l.bf16 %v19674_v63 }
 0x6a8   : > { %v16151_v58 = vpop.eup %16150  ;;  %16166 = vrcp.f32 %v6149_v18  ;;  %6483 = vperm.xlu1 %16057, %v18281_v49  }
 0x6a9   : > { %v16153_v54 = vpop.eup %16152  ;;  %16168 = vpow2.f32 %v12501_v17  ;;  %v6152_v20 = vadd.f32 1.0, %v16151_v58  ;;  %v19676_v17 = vunpack.c.h.bf16 %v19674_v63  ;;  %v6999_v58 = vsel %vm908_vm2, %v18237_v3, 0  ;;  %v19692_v63 = vld [vmem:[#allocation36_spill] sm:$0xff] }
 0x6aa   : > { %v16155_v28 = vpop.eup %16154  ;;  %v6150_v31 = vadd.f32 1.0, %v16153_v54  ;;  %6487 = vperm.xlu0 %16056, %v18274_v6  }
 0x6ab   : > { %v16157_v26 = vpop.eup %16156  ;;  %v6153_v24 = vadd.f32 1.0, %v16155_v28 }
 0x6ac   : > { %16170 = vrcp.f32 %v6150_v31  ;;  %v6151_v9 = vadd.f32 1.0, %v16157_v26  ;;  %6491 = vperm.xlu1 %16057, %v18278_v1   ;;  %v18335_v31 = vld [vmem:[#allocation13 + $0x2] sm:$0x3] }
 0x6ad   : > { %v16159_v25 = vpop.eup %16158 }
 0x6ae   : > { %16172 = vrcp.f32 %v6151_v9  ;;  %6495 = vperm.xlu0 %16056, %v16159_v25  }
 0x6af   : > { %v16161_v56 = vpop.eup %16160  ;;  %16174 = vrcp.f32 %v6152_v20  ;;  %v19677_v20 = vld [vmem:[#allocation31_spill] sm:$0xff] }
 0x6b0   : > { %v16163_v42 = vpop.eup %16162  ;;  %6499 = vperm.xlu1 %16057, %v16161_v56   ;;  %16176 = vrcp.f32 %v6153_v24  ;;  %v19678_v9 = vunpack.c.l.bf16 %v19677_v20  ;;  %v19679_v3 = vunpack.c.h.bf16 %v19677_v20 }
 0x6b1   : > { %v16165_v4 = vpop.eup %16164 }
 0x6b2   : > { %v16167_v37 = vpop.eup %16166  ;;  %v6154_v51 = vadd.f32 1.0, %v16165_v4  ;;  %6503 = vperm.xlu0 %16056, %v16163_v42  }
 0x6b3   : > { %v16169_v30 = vpop.eup %16168 }
 0x6b4   : > { %16178 = vrcp.f32 %v6154_v51  ;;  %v6155_v14 = vadd.f32 1.0, %v16169_v30  ;;  %6507 = vperm.xlu1 %16057, %v16167_v37  }
 0x6b6   : > { %v16171_v32 = vpop.eup %16170  ;;  %16180 = vrcp.f32 %v6155_v14 }
 0x6b7   : > { %6511 = vperm.xlu0 %16056, %v16171_v32  }
 0x6b8   : > { %v16173_v40 = vpop.eup %16172 }
 0x6b9   : > { %6515 = vperm.xlu1 %16057, %v16173_v40   ;;  %v16175_v39 = vpop.eup %16174 }
 0x6ba   : > { %v16177_v15 = vpop.eup %16176 }
 0x6bb   : > { %6519 = vperm.xlu0 %16056, %v16175_v39  }
 0x6bd   : > { %6523 = vperm.xlu1 %16057, %v16177_v15  }
 0x6be   : > { %v16179_v7 = vpop.eup %16178 }
 0x6bf   : > { %6527 = vperm.xlu0 %16056, %v16179_v7  }
 0x6c0   : > { %v16181_v11 = vpop.eup %16180 }
 0x6c1   : > { %6531 = vperm.xlu1 %16057, %v16181_v11  }
 0x6c3   : > { %16058 = vset.pattern.permute.xlu0 %v16536_v23 }
 0x6c4   : > { %6224 = vperm.xlu0 %16058, %v18201_v2   ;;  %v12502_v2 = vmul.f32 -1.442695, %v18265_v46 }
 0x6c5   : > { %16059 = vset.pattern.permute.xlu1 %v16536_v23 }
 0x6c6   : > { %6229 = vperm.xlu1 %16059, %v18207_v45  }
 0x6c8   : > { %6239 = vperm.xlu0 %16058, %v18204_v10  }
 0x6ca   : > { %6234 = vperm.xlu1 %16059, %v18198_v33   ;;  %v12503_v33 = vmul.f32 -1.442695, %v18270_v5 }
 0x6cc   : > { %6249 = vperm.xlu0 %16058, %v18222_v27   ;;  %16182 = vpow2.f32 %v12503_v33 }
 0x6cd   : > { %16184 = vpow2.f32 %v12502_v2  ;;  %v19683_v2 = vld [vmem:[#allocation33_spill] sm:$0xff] }
 0x6ce   : > { %6244 = vperm.xlu1 %16059, %v18217_v41  }
 0x6d0   : > { %6259 = vperm.xlu0 %16058, %v18219_v29  }
 0x6d2   : > { %6254 = vperm.xlu1 %16059, %v18214_v16  }
 0x6d4   : > { %6269 = vperm.xlu0 %16058, %v18244_v12  }
 0x6d6   : > { %6264 = vperm.xlu1 %16059, %v18235_v21   ;;  %v16183_v10 = vpop.eup %16182  ;;  %v19665_v21 = vld [vmem:[#allocation28_spill] sm:$0xff] }
 0x6d7   : > { %v16185_v45 = vpop.eup %16184  ;;  %v6157_v16 = vadd.f32 1.0, %v16183_v10  ;;  %v19669_v35 = vunpack.c.h.bf16 %v19665_v21  ;;  %v19684_v10 = vunpack.c.l.bf16 %v19683_v2 }
 0x6d8   : > { %6279 = vperm.xlu0 %16058, %v18239_v13   ;;  %v6156_v41 = vadd.f32 1.0, %v16185_v45  ;;  %v19666_v13 = vunpack.c.l.bf16 %v19665_v21  ;;  %v19686_v21 = vld [vmem:[#allocation34_spill] sm:$0xff] }
 0x6d9   : > { %16186 = vrcp.f32 %v6157_v16 }
 0x6da   : > { %6274 = vperm.xlu1 %16059, %v18232_v0   ;;  %16188 = vrcp.f32 %v6156_v41  ;;  %v19685_v41 = vunpack.c.h.bf16 %v19683_v2 }
 0x6dc   : > { %6289 = vperm.xlu0 %16058, %v18261_v34  }
 0x6de   : > { %6284 = vperm.xlu1 %16059, %v18256_v19   ;;  %v19667_v19 = vld [vmem:[#allocation27_spill] sm:$0xff] }
 0x6df   : > { %v19670_v48 = vunpack.c.h.bf16 %v19667_v19 }
 0x6e0   : > { %6299 = vperm.xlu0 %16058, %v18258_v36   ;;  %v19668_v36 = vunpack.c.l.bf16 %v19667_v19 }
 0x6e2   : > { %6294 = vperm.xlu1 %16059, %v18253_v8  }
 0x6e3   : > { %v16187_v29 = vpop.eup %16186 }
 0x6e4   : > { %6309 = vperm.xlu0 %16058, %v18281_v49   ;;  %v16189_v27 = vpop.eup %16188 }
 0x6e6   : > { %6304 = vperm.xlu1 %16059, %v18276_v38  }
 0x6e8   : > { %6319 = vperm.xlu0 %16058, %v18278_v1  }
 0x6ea   : > { %6314 = vperm.xlu1 %16059, %v18274_v6  }
 0x6ec   : > { %6329 = vperm.xlu0 %16058, %v16161_v56  }
 0x6ee   : > { %6324 = vperm.xlu1 %16059, %v16159_v25  }
 0x6f0   : > { %6339 = vperm.xlu0 %16058, %v16167_v37   ;;  %v19680_v37 = vld [vmem:[#allocation32_spill] sm:$0xff] }
 0x6f1   : > { %v19681_v51 = vunpack.c.l.bf16 %v19680_v37 }
 0x6f2   : > { %6334 = vperm.xlu1 %16059, %v16163_v42  }
 0x6f4   : > { %6349 = vperm.xlu0 %16058, %v16173_v40  }
 0x6f6   : > { %6344 = vperm.xlu1 %16059, %v16171_v32  }
 0x6f8   : > { %6359 = vperm.xlu0 %16058, %v16177_v15  }
 0x6fa   : > { %6354 = vperm.xlu1 %16059, %v16175_v39   ;;  %v19682_v39 = vunpack.c.h.bf16 %v19680_v37 }
 0x6fc   : > { %6369 = vperm.xlu0 %16058, %v16181_v11  }
 0x6fe   : > { %6364 = vperm.xlu1 %16059, %v16179_v7  }
 0x700   : > { %6379 = vperm.xlu0 %16058, %v16187_v29  }
 0x702   : > { %6374 = vperm.xlu1 %16059, %v16189_v27   ;;  %v6424_v0 = vpop.permute.xlu1 %6423 }
 0x703   : > { %v6544_v12 = vmul.f32 %v19666_v13, %v6424_v0  ;;  %v6416_v8 = vpop.permute.xlu0 %6415  ;;  %v19687_v13 = vunpack.c.l.bf16 %v19686_v21 }
 0x704   : > { %16061 = vset.pattern.permute.xlu0 %v16535_v44  ;;  %v6542_v60 = vmul.f32 %v19668_v36, %v6416_v8 }
 0x705   : > { %6608 = vst.msk [vmem:[#allocation3 + $0x31] sm:$0xff] %vm487_vm0, %v6544_v12  ;;  %6539 = vperm.xlu0 %16061, %v16187_v29  }
 0x706   : > { %6606 = vst.msk [vmem:[#allocation3 + $0x19] sm:$0xff] %vm487_vm0, %v6542_v60  ;;  %16060 = vset.pattern.permute.xlu1 %v16535_v44  ;;  %v6428_v34 = vpop.permute.xlu1 %6427  ;;  %v19673_v44 = vunpack.c.h.bf16 %v19671_v55  ;;  %v19688_v60 = vunpack.c.h.bf16 %v19686_v21 }
 0x707   : > { %6535 = vperm.xlu1 %16060, %v16189_v27   ;;  %v6545_v22 = vmul.f32 %v19669_v35, %v6428_v34  ;;  %v6420_v46 = vpop.permute.xlu0 %6419 }
 0x708   : > { %v6543_v52 = vmul.f32 %v19670_v48, %v6420_v46 }
 0x709   : > { %6609 = vst.msk [vmem:[#allocation3 + $0x39] sm:$0xff] %vm487_vm0, %v6545_v22 }
 0x70a   : > { %6607 = vst.msk [vmem:[#allocation3 + $0x21] sm:$0xff] %vm487_vm0, %v6543_v52  ;;  %v19689_v52 = vld [vmem:[#allocation35_spill] sm:$0xff] }
 0x70b   : > { %v6432_v53 = vpop.permute.xlu0 %6431 }
 0x70c   : > { %v6546_v59 = vmul.f32 %v19672_v57, %v6432_v53  ;;  %v6674_v54 = vld [vmem:[#allocation3 + $0x30] sm:$0xff]  ;;  %v19690_v53 = vunpack.c.l.bf16 %v19689_v52 }
 0x70d   : > { %v6436_v5 = vpop.permute.xlu1 %6435  ;;  %v6672_v18 = vld [vmem:[#allocation3 + $0x18] sm:$0xff] }
 0x70e   : > { %6610 = vst.msk [vmem:[#allocation3 + $0x49] sm:$0xff] %vm487_vm0, %v6546_v59  ;;  %v6547_v62 = vmul.f32 %v19673_v44, %v6436_v5  ;;  %v19691_v59 = vunpack.c.h.bf16 %v19689_v52 }
 0x70f   : > { %v6440_v61 = vpop.permute.xlu0 %6439 }
 0x710   : > { %6611 = vst.msk [vmem:[#allocation3 + $0x51] sm:$0xff] %vm487_vm0, %v6547_v62  ;;  %v6548_v47 = vmul.f32 %v19675_v50, %v6440_v61  ;;  %v6675_v43 = vld [vmem:[#allocation3 + $0x38] sm:$0xff]  ;;  %v19693_v50 = vunpack.c.l.bf16 %v19692_v63 }
 0x711   : > { %v6444_v6 = vpop.permute.xlu1 %6443  ;;  %v6673_v38 = vld [vmem:[#allocation3 + $0x20] sm:$0xff]  ;;  %v6720_v28 = vpack.c.bf16 %v6675_v43, %v6674_v54  ;;  %v19695_v54 = vld [vmem:[#allocation37_spill] sm:$0xff] }
 0x712   : > { %6612 = vst.msk [vmem:[#allocation3 + $0x61] sm:$0xff] %vm487_vm0, %v6548_v47  ;;  %v6549_v1 = vmul.f32 %v19676_v17, %v6444_v6  ;;  %v6719_v49 = vpack.c.bf16 %v6673_v38, %v6672_v18  ;;  %v19694_v18 = vunpack.c.h.bf16 %v19692_v63 }
 0x714   : > { %6613 = vst.msk [vmem:[#allocation3 + $0x69] sm:$0xff] %vm487_vm0, %v6549_v1  ;;  %v6448_v26 = vpop.permute.xlu0 %6447  ;;  %14186 = vmatmul.mubr.msk.bf16.vlgmr.msra.gmra.mrb[0].mxu1 %vm487_vm0, %v6719_v49 }
 0x715   : > { %v6550_v25 = vmul.f32 %v19678_v9, %v6448_v26  ;;  %14218 = vmatpush3.bf16.msra.mxu1 %v6999_v58  ;;  %14189 = vmatprep.mubr.msk.bf16.mxu1 %vm487_vm0, %v6720_v28  ;;  %v6676_v14 = vld [vmem:[#allocation3 + $0x48] sm:$0xff]  ;;  %v19696_v28 = vunpack.c.l.bf16 %v19695_v54  ;;  %v19697_v9 = vunpack.c.h.bf16 %v19695_v54 }
 0x716   : > { %v6452_v24 = vpop.permute.xlu1 %6451  ;;  %15903 = vmatprep.subr.msk.bf16.mxu1 %vm908_vm2, %v18335_v31 }
 0x717   : > { %6614 = vst.msk [vmem:[#allocation3 + $0x79] sm:$0xff] %vm487_vm0, %v6550_v25  ;;  %v6551_v56 = vmul.f32 %v19679_v3, %v6452_v24  ;;  %v6677_v42 = vld [vmem:[#allocation3 + $0x50] sm:$0xff] }
 0x718   : > { %v6456_v4 = vpop.permute.xlu0 %6455  ;;  %v6721_v40 = vpack.c.bf16 %v6677_v42, %v6676_v14  ;;  %v19698_v42 = vld [vmem:[#allocation38_spill] sm:$0xff] }
 0x719   : > { %6615 = vst.msk [vmem:[#allocation3 + $0x81] sm:$0xff] %vm487_vm0, %v6551_v56  ;;  %v6552_v30 = vmul.f32 %v19681_v51, %v6456_v4  ;;  %v6678_v7 = vld [vmem:[#allocation3 + $0x60] sm:$0xff]  ;;  %v19699_v4 = vunpack.c.l.bf16 %v19698_v42  ;;  %v19700_v14 = vunpack.c.h.bf16 %v19698_v42 }
 0x71a   : > { %v6460_v32 = vpop.permute.xlu1 %6459 }
 0x71b   : > { %6616 = vst.msk [vmem:[#allocation3 + $0x91] sm:$0xff] %vm487_vm0, %v6552_v30  ;;  %v6553_v15 = vmul.f32 %v19682_v39, %v6460_v32  ;;  %v6679_v11 = vld [vmem:[#allocation3 + $0x68] sm:$0xff] }
 0x71c   : > { %v6464_v23 = vpop.permute.xlu0 %6463  ;;  %14190 = vmatmul.mubr.msk.bf16.gmra.mrb[4].mxu1 %vm487_vm0, %v6721_v40  ;;  %v6722_v33 = vpack.c.bf16 %v6679_v11, %v6678_v7  ;;  %v19701_v11 = vld [vmem:[#allocation39_spill] sm:$0xff] }
 0x71d   : > { %6617 = vst.msk [vmem:[#allocation3 + $0x99] sm:$0xff] %vm487_vm0, %v6553_v15  ;;  %v6554_v45 = vmul.f32 %v19684_v10, %v6464_v23  ;;  %v19702_v23 = vunpack.c.l.bf16 %v19701_v11  ;;  %v19703_v10 = vunpack.c.h.bf16 %v19701_v11 }
 0x71e   : > { %v6468_v16 = vpop.permute.xlu1 %6467  ;;  %14193 = vmatprep.mubr.msk.bf16.mxu1 %vm487_vm0, %v6722_v33  ;;  %v6680_v8 = vld [vmem:[#allocation3 + $0x78] sm:$0xff] }
 0x71f   : > { %6618 = vst.msk [vmem:[#allocation3 + $0xa9] sm:$0xff] %vm487_vm0, %v6554_v45  ;;  %v6555_v29 = vmul.f32 %v19685_v41, %v6468_v16 }
 0x720   : > { %v6472_v27 = vpop.permute.xlu0 %6471  ;;  %v6681_v0 = vld [vmem:[#allocation3 + $0x80] sm:$0xff] }
 0x721   : > { %6619 = vst.msk [vmem:[#allocation3 + $0xb1] sm:$0xff] %vm487_vm0, %v6555_v29  ;;  %v6556_v12 = vmul.f32 %v19687_v13, %v6472_v27  ;;  %v6723_v36 = vpack.c.bf16 %v6681_v0, %v6680_v8  ;;  %v19704_v0 = vld [vmem:[#allocation40_spill] sm:$0xff] }
 0x722   : > { %v6476_v19 = vpop.permute.xlu1 %6475  ;;  %v6682_v35 = vld [vmem:[#allocation3 + $0x90] sm:$0xff]  ;;  %v19705_v21 = vunpack.c.l.bf16 %v19704_v0  ;;  %v19706_v8 = vunpack.c.h.bf16 %v19704_v0 }
 0x723   : > { %6620 = vst.msk [vmem:[#allocation3 + $0xc1] sm:$0xff] %vm487_vm0, %v6556_v12  ;;  %v6557_v34 = vmul.f32 %v19688_v60, %v6476_v19  ;;  %v19722_v0 = vld [vmem:[#allocation46_spill] sm:$0xff] }
 0x724   : > { %14194 = vmatmul.mubr.msk.bf16.gmra.mrb[8].mxu1 %vm487_vm0, %v6723_v36  ;;  %v6683_v22 = vld [vmem:[#allocation3 + $0x98] sm:$0xff] }
 0x725   : > { %6621 = vst.msk [vmem:[#allocation3 + $0xc9] sm:$0xff] %vm487_vm0, %v6557_v34  ;;  %v6480_v46 = vpop.permute.xlu0 %6479  ;;  %v6724_v48 = vpack.c.bf16 %v6683_v22, %v6682_v35  ;;  %v19707_v22 = vld [vmem:[#allocation41_spill] sm:$0xff] }
 0x726   : > { %v6558_v55 = vmul.f32 %v19690_v53, %v6480_v46  ;;  %v6684_v61 = vld [vmem:[#allocation3 + $0xa8] sm:$0xff]  ;;  %v19708_v46 = vunpack.c.l.bf16 %v19707_v22  ;;  %v19709_v53 = vunpack.c.h.bf16 %v19707_v22 }
 0x727   : > { %v6484_v57 = vpop.permute.xlu1 %6483  ;;  %14197 = vmatprep.mubr.msk.bf16.mxu1 %vm487_vm0, %v6724_v48 }
 0x728   : > { %6622 = vst.msk [vmem:[#allocation3 + $0xd9] sm:$0xff] %vm487_vm0, %v6558_v55  ;;  %v6559_v5 = vmul.f32 %v19691_v59, %v6484_v57  ;;  %v6685_v44 = vld [vmem:[#allocation3 + $0xb0] sm:$0xff] }
 0x729   : > { %v6488_v62 = vpop.permute.xlu0 %6487  ;;  %v6725_v43 = vpack.c.bf16 %v6685_v44, %v6684_v61 }
 0x72a   : > { %6623 = vst.msk [vmem:[#allocation3 + $0xe1] sm:$0xff] %vm487_vm0, %v6559_v5  ;;  %v6560_v47 = vmul.f32 %v19693_v50, %v6488_v62  ;;  %v6686_v17 = vld [vmem:[#allocation3 + $0xc0] sm:$0xff]  ;;  %v19710_v62 = vld [vmem:[#allocation42_spill] sm:$0xff] }
 0x72b   : > { %v6492_v6 = vpop.permute.xlu1 %6491  ;;  %v19711_v61 = vunpack.c.l.bf16 %v19710_v62 }
 0x72c   : > { %6624 = vst.msk [vmem:[#allocation3 + $0xf1] sm:$0xff] %vm487_vm0, %v6560_v47  ;;  %v6561_v38 = vmul.f32 %v19694_v18, %v6492_v6  ;;  %14198 = vmatmul.mubr.msk.bf16.gmra.mrb[12].mxu1 %vm487_vm0, %v6725_v43  ;;  %v6687_v1 = vld [vmem:[#allocation3 + $0xc8] sm:$0xff]  ;;  %v19712_v47 = vunpack.c.h.bf16 %v19710_v62 }
 0x72d   : > { %v6496_v49 = vpop.permute.xlu0 %6495  ;;  %v6726_v58 = vpack.c.bf16 %v6687_v1, %v6686_v17  ;;  %v6638_v1 = vld [vmem:[#allocation2] sm:$0xff]  ;;  %v19728_v62 = vld [vmem:[#allocation48_spill] sm:$0xff] }
 0x72e   : > { %6625 = vst.msk [vmem:[#allocation3 + $0xf9] sm:$0xff] %vm487_vm0, %v6561_v38  ;;  %v6562_v26 = vmul.f32 %v19696_v28, %v6496_v49  ;;  %v6639_v49 = vld [vmem:[#allocation2 + $0x8] sm:$0xff] }
 0x72f   : > { %v6500_v20 = vpop.permute.xlu1 %6499  ;;  %14201 = vmatprep.mubr.msk.bf16.mxu1 %vm487_vm0, %v6726_v58  ;;  %v6688_v3 = vld [vmem:[#allocation3 + $0xd8] sm:$0xff] }
 0x730   : > { %6626 = vst.msk [vmem:[#allocation3 + $0x109] sm:$0xff] %vm487_vm0, %v6562_v26  ;;  %v6563_v25 = vmul.f32 %v19697_v9, %v6500_v20  ;;  %v19713_v58 = vld [vmem:[#allocation43_spill] sm:$0xff] }
 0x731   : > { %v6504_v24 = vpop.permute.xlu0 %6503  ;;  %v6689_v56 = vld [vmem:[#allocation3 + $0xe0] sm:$0xff]  ;;  %v19714_v54 = vunpack.c.h.bf16 %v19713_v58  ;;  %v19715_v20 = vunpack.c.l.bf16 %v19713_v58 }
 0x732   : > { %6627 = vst.msk [vmem:[#allocation3 + $0x111] sm:$0xff] %vm487_vm0, %v6563_v25  ;;  %v6564_v37 = vmul.f32 %v19699_v4, %v6504_v24  ;;  %v6727_v51 = vpack.c.bf16 %v6689_v56, %v6688_v3  ;;  %v6702_v3 = vpack.c.bf16 %v6639_v49, %v6638_v1  ;;  %v19716_v4 = vld [vmem:[#allocation44_spill] sm:$0xff] }
 0x733   : > { %v6508_v30 = vpop.permute.xlu1 %6507  ;;  %v6690_v40 = vld [vmem:[#allocation3 + $0xf0] sm:$0xff] }
 0x734   : > { %6628 = vst.msk [vmem:[#allocation3 + $0x121] sm:$0xff] %vm487_vm0, %v6564_v37  ;;  %v6565_v32 = vmul.f32 %v19700_v14, %v6508_v30  ;;  %14202 = vmatmul.mubr.msk.bf16.gmra.mrb[16].mxu1 %vm487_vm0, %v6727_v51  ;;  %v19717_v37 = vunpack.c.h.bf16 %v19716_v4  ;;  %v19718_v14 = vunpack.c.l.bf16 %v19716_v4 }
 0x735   : > { %v6691_v39 = vld [vmem:[#allocation3 + $0xf8] sm:$0xff] }
 0x736   : > { %6629 = vst.msk [vmem:[#allocation3 + $0x129] sm:$0xff] %vm487_vm0, %v6565_v32  ;;  %v6512_v15 = vpop.permute.xlu0 %6511  ;;  %v6728_v7 = vpack.c.bf16 %v6691_v39, %v6690_v40  ;;  %v19719_v39 = vld [vmem:[#allocation45_spill] sm:$0xff] }
 0x737   : > { %v6566_v33 = vmul.f32 %v19702_v23, %v6512_v15  ;;  %v6692_v16 = vld [vmem:[#allocation3 + $0x108] sm:$0xff]  ;;  %v19720_v15 = vunpack.c.h.bf16 %v19719_v39 }
 0x738   : > { %v6516_v2 = vpop.permute.xlu1 %6515  ;;  %14205 = vmatprep.mubr.msk.bf16.mxu1 %vm487_vm0, %v6728_v7 }
 0x739   : > { %6630 = vst.msk [vmem:[#allocation3 + $0x139] sm:$0xff] %vm487_vm0, %v6566_v33  ;;  %v6567_v45 = vmul.f32 %v19703_v10, %v6516_v2  ;;  %v6693_v41 = vld [vmem:[#allocation3 + $0x110] sm:$0xff]  ;;  %v19721_v33 = vunpack.c.l.bf16 %v19719_v39 }
 0x73a   : > { %v6520_v29 = vpop.permute.xlu0 %6519  ;;  %v6729_v27 = vpack.c.bf16 %v6693_v41, %v6692_v16  ;;  %v7309_v41 = vsel %vm908_vm2, %v18335_v31, 0 }
 0x73b   : > { %6631 = vst.msk [vmem:[#allocation3 + $0x141] sm:$0xff] %vm487_vm0, %v6567_v45  ;;  %v6568_v13 = vmul.f32 %v19705_v21, %v6520_v29  ;;  %v6694_v36 = vld [vmem:[#allocation3 + $0x120] sm:$0xff]  ;;  %v19723_v21 = vunpack.c.h.bf16 %v19722_v0 }
 0x73c   : > { %v6524_v12 = vpop.permute.xlu1 %6523  ;;  %14206 = vmatmul.mubr.msk.bf16.gmra.mrb[20].mxu1 %vm487_vm0, %v6729_v27 }
 0x73d   : > { %6632 = vst.msk [vmem:[#allocation3 + $0x151] sm:$0xff] %vm487_vm0, %v6568_v13  ;;  %v6569_v19 = vmul.f32 %v19706_v8, %v6524_v12  ;;  %v6695_v60 = vld [vmem:[#allocation3 + $0x128] sm:$0xff] }
 0x73e   : > { %v6528_v34 = vpop.permute.xlu0 %6527  ;;  %v6730_v35 = vpack.c.bf16 %v6695_v60, %v6694_v36  ;;  %v18454_v8 = vld [vmem:[#allocation15 + $0x2] sm:$0x3]  ;;  %v19724_v36 = vunpack.c.l.bf16 %v19722_v0 }
 0x73f   : > { %6633 = vst.msk [vmem:[#allocation3 + $0x159] sm:$0xff] %vm487_vm0, %v6569_v19  ;;  %v6570_v48 = vmul.f32 %v19708_v46, %v6528_v34  ;;  %v19725_v34 = vld [vmem:[#allocation47_spill] sm:$0xff] }
 0x740   : > { %v6532_v52 = vpop.permute.xlu1 %6531  ;;  %14209 = vmatprep.mubr.msk.bf16.mxu1 %vm487_vm0, %v6730_v35  ;;  %v6696_v57 = vld [vmem:[#allocation3 + $0x138] sm:$0xff]  ;;  %v19726_v35 = vunpack.c.h.bf16 %v19725_v34 }
 0x741   : > { %6634 = vst.msk [vmem:[#allocation3 + $0x169] sm:$0xff] %vm487_vm0, %v6570_v48  ;;  %v6571_v55 = vmul.f32 %v19709_v53, %v6532_v52  ;;  %v19727_v53 = vunpack.c.l.bf16 %v19725_v34 }
 0x742   : > { %v6697_v59 = vld [vmem:[#allocation3 + $0x140] sm:$0xff] }
 0x743   : > { %6635 = vst.msk [vmem:[#allocation3 + $0x171] sm:$0xff] %vm487_vm0, %v6571_v55  ;;  %v6225_v5 = vpop.permute.xlu0 %6224  ;;  %v6731_v44 = vpack.c.bf16 %v6697_v59, %v6696_v57 }
 0x744   : > { %v6382_v63 = vmul.f32 %v19711_v61, %v6225_v5  ;;  %v6698_v6 = vld [vmem:[#allocation3 + $0x150] sm:$0xff]  ;;  %v19729_v61 = vunpack.c.h.bf16 %v19728_v62 }
 0x745   : > { %v6230_v50 = vpop.permute.xlu1 %6229  ;;  %14210 = vmatmul.mubr.msk.bf16.gmra.mrb[24].mxu1 %vm487_vm0, %v6731_v44 }
 0x746   : > { %6574 = vst.msk [vmem:[#allocation2 + $0x19] sm:$0xff] %vm487_vm0, %v6382_v63  ;;  %v6383_v43 = vmul.f32 %v19712_v47, %v6230_v50  ;;  %v6699_v18 = vld [vmem:[#allocation3 + $0x158] sm:$0xff] }
 0x747   : > { %v6240_v38 = vpop.permute.xlu0 %6239  ;;  %v6732_v17 = vpack.c.bf16 %v6699_v18, %v6698_v6 }
 0x748   : > { %6575 = vst.msk [vmem:[#allocation2 + $0x21] sm:$0xff] %vm487_vm0, %v6383_v43  ;;  %v6385_v28 = vmul.f32 %v19714_v54, %v6240_v38  ;;  %v6700_v25 = vld [vmem:[#allocation3 + $0x168] sm:$0xff]  ;;  %v19730_v43 = vunpack.c.l.bf16 %v19728_v62  ;;  %v19746_v62 = vld [vmem:[#allocation54_spill] sm:$0xff] }
 0x749   : > { %14213 = vmatprep.mubr.msk.bf16.mxu1 %vm487_vm0, %v6732_v17  ;;  %v6235_v26 = vpop.permute.xlu1 %6234  ;;  %v19731_v38 = vld [vmem:[#allocation49_spill] sm:$0xff] }
 0x74a   : > { %6577 = vst.msk [vmem:[#allocation2 + $0x39] sm:$0xff] %vm487_vm0, %v6385_v28  ;;  %v6384_v9 = vmul.f32 %v19715_v20, %v6235_v26  ;;  %v6701_v24 = vld [vmem:[#allocation3 + $0x170] sm:$0xff]  ;;  %v19732_v17 = vunpack.c.h.bf16 %v19731_v38  ;;  %v19733_v28 = vunpack.c.l.bf16 %v19731_v38 }
 0x74b   : > { %v6250_v56 = vpop.permute.xlu0 %6249  ;;  %v6733_v42 = vpack.c.bf16 %v6701_v24, %v6700_v25 }
 0x74c   : > { %6576 = vst.msk [vmem:[#allocation2 + $0x31] sm:$0xff] %vm487_vm0, %v6384_v9  ;;  %v6387_v51 = vmul.f32 %v19717_v37, %v6250_v56 }
 0x74d   : > { %v6245_v30 = vpop.permute.xlu1 %6244  ;;  %14214 = vmatmul.mubr.msk.bf16.gmra.mrb[28].mxu1 %vm487_vm0, %v6733_v42  ;;  %v6640_v10 = vld [vmem:[#allocation2 + $0x18] sm:$0xff] }
 0x74e   : > { %6579 = vst.msk [vmem:[#allocation2 + $0x51] sm:$0xff] %vm487_vm0, %v6387_v51  ;;  %v6386_v32 = vmul.f32 %v19718_v14, %v6245_v30  ;;  %14219 = vmatprep.mubr.msk.bf16.mxu1 %vm487_vm0, %v6702_v3  ;;  %v19734_v3 = vld [vmem:[#allocation50_spill] sm:$0xff] }
 0x74f   : > { %v6260_v40 = vpop.permute.xlu0 %6259  ;;  %v6641_v11 = vld [vmem:[#allocation2 + $0x20] sm:$0xff]  ;;  %v19735_v56 = vunpack.c.h.bf16 %v19734_v3  ;;  %v19736_v51 = vunpack.c.l.bf16 %v19734_v3 }
 0x750   : > { %6578 = vst.msk [vmem:[#allocation2 + $0x49] sm:$0xff] %vm487_vm0, %v6386_v32  ;;  %v6389_v7 = vmul.f32 %v19720_v15, %v6260_v40  ;;  %v18445_v16 = vpack.c.bf16 %v6641_v11, %v6640_v10  ;;  %v19737_v32 = vld [vmem:[#allocation51_spill] sm:$0xff] }
 0x751   : > { %v6255_v23 = vpop.permute.xlu1 %6254  ;;  %v19738_v40 = vunpack.c.h.bf16 %v19737_v32 }
 0x752   : > { %6581 = vst.msk [vmem:[#allocation2 + $0x69] sm:$0xff] %vm487_vm0, %v6389_v7  ;;  %v6388_v2 = vmul.f32 %v19721_v33, %v6255_v23  ;;  %v19739_v23 = vunpack.c.l.bf16 %v19737_v32 }
 0x753   : > { %v6270_v45 = vpop.permute.xlu0 %6269  ;;  %v6642_v29 = vld [vmem:[#allocation2 + $0x30] sm:$0xff]  ;;  %v6643_v27 = vld [vmem:[#allocation2 + $0x38] sm:$0xff] }
 0x754   : > { %6580 = vst.msk [vmem:[#allocation2 + $0x61] sm:$0xff] %vm487_vm0, %v6388_v2  ;;  %v6391_v13 = vmul.f32 %v19723_v21, %v6270_v45  ;;  %v18452_v12 = vpack.c.bf16 %v6643_v27, %v6642_v29  ;;  %v19740_v29 = vld [vmem:[#allocation52_spill] sm:$0xff] }
 0x755   : > { %v6265_v19 = vpop.permute.xlu1 %6264  ;;  %14220 = vmatmul.mubr.msk.bf16.vlgmr.msra.gmra.mrb[0].mxu1 %vm487_vm0, %v18445_v16  ;;  %v19741_v27 = vunpack.c.h.bf16 %v19740_v29 }
 0x756   : > { %6583 = vst.msk [vmem:[#allocation2 + $0x81] sm:$0xff] %vm487_vm0, %v6391_v13  ;;  %v6390_v31 = vmul.f32 %v19724_v36, %v6265_v19  ;;  %14252 = vmatpush3.bf16.msra.mxu1 %v7309_v41  ;;  %14223 = vmatprep.mubr.msk.bf16.mxu1 %vm487_vm0, %v18452_v12  ;;  %v19742_v19 = vunpack.c.l.bf16 %v19740_v29 }
 0x757   : > { %v6280_v60 = vpop.permute.xlu0 %6279  ;;  %15904 = vmatprep.subr.msk.bf16.mxu1 %vm908_vm2, %v18454_v8  ;;  %v6644_v46 = vld [vmem:[#allocation2 + $0x48] sm:$0xff]  ;;  %v6645_v48 = vld [vmem:[#allocation2 + $0x50] sm:$0xff] }
 0x758   : > { %6582 = vst.msk [vmem:[#allocation2 + $0x79] sm:$0xff] %vm487_vm0, %v6390_v31  ;;  %v6393_v22 = vmul.f32 %v19726_v35, %v6280_v60  ;;  %v18471_v59 = vpack.c.bf16 %v6645_v48, %v6644_v46  ;;  %v19743_v60 = vld [vmem:[#allocation53_spill] sm:$0xff] }
 0x759   : > { %v6275_v52 = vpop.permute.xlu1 %6274  ;;  %v19744_v34 = vunpack.c.h.bf16 %v19743_v60 }
 0x75a   : > { %6585 = vst.msk [vmem:[#allocation2 + $0x99] sm:$0xff] %vm487_vm0, %v6393_v22  ;;  %v6392_v55 = vmul.f32 %v19727_v53, %v6275_v52  ;;  %v19745_v52 = vunpack.c.l.bf16 %v19743_v60 }
 0x75b   : > { %v6290_v57 = vpop.permute.xlu0 %6289  ;;  %v6646_v5 = vld [vmem:[#allocation2 + $0x60] sm:$0xff]  ;;  %v6647_v44 = vld [vmem:[#allocation2 + $0x68] sm:$0xff] }
 0x75c   : > { %6584 = vst.msk [vmem:[#allocation2 + $0x91] sm:$0xff] %vm487_vm0, %v6392_v55  ;;  %v6395_v63 = vmul.f32 %v19729_v61, %v6290_v57  ;;  %v18476_v50 = vpack.c.bf16 %v6647_v44, %v6646_v5  ;;  %v19747_v61 = vunpack.c.h.bf16 %v19746_v62 }
 0x75d   : > { %v6285_v47 = vpop.permute.xlu1 %6284  ;;  %14224 = vmatmul.mubr.msk.bf16.gmra.mrb[4].mxu1 %vm487_vm0, %v18471_v59 }
 0x75e   : > { %6587 = vst.msk [vmem:[#allocation2 + $0xb1] sm:$0xff] %vm487_vm0, %v6395_v63  ;;  %v6394_v6 = vmul.f32 %v19730_v43, %v6285_v47  ;;  %14227 = vmatprep.mubr.msk.bf16.mxu1 %vm487_vm0, %v18476_v50 }
 0x75f   : > { %v6300_v18 = vpop.permute.xlu0 %6299  ;;  %v6648_v49 = vld [vmem:[#allocation2 + $0x78] sm:$0xff]  ;;  %v6649_v58 = vld [vmem:[#allocation2 + $0x80] sm:$0xff] }
 0x760   : > { %6586 = vst.msk [vmem:[#allocation2 + $0xa9] sm:$0xff] %vm487_vm0, %v6394_v6  ;;  %v6397_v1 = vmul.f32 %v19732_v17, %v6300_v18  ;;  %v18491_v9 = vpack.c.bf16 %v6649_v58, %v6648_v49  ;;  %v19748_v6 = vunpack.c.l.bf16 %v19746_v62  ;;  %v19749_v17 = vld [vmem:[#allocation55_spill] sm:$0xff] }
 0x761   : > { %v6295_v54 = vpop.permute.xlu1 %6294  ;;  %v7166_v62 = vld [vmem:[#allocation2 + $0x31] sm:$0xff] }
 0x762   : > { %6589 = vst.msk [vmem:[#allocation2 + $0xc9] sm:$0xff] %vm487_vm0, %v6397_v1  ;;  %v6396_v26 = vmul.f32 %v19733_v28, %v6295_v54  ;;  %v19750_v1 = vunpack.c.h.bf16 %v19749_v17 }
 0x763   : > { %v6310_v20 = vpop.permute.xlu0 %6309  ;;  %v6650_v25 = vld [vmem:[#allocation2 + $0x90] sm:$0xff]  ;;  %v6651_v24 = vld [vmem:[#allocation2 + $0x98] sm:$0xff] }
 0x764   : > { %6588 = vst.msk [vmem:[#allocation2 + $0xc1] sm:$0xff] %vm487_vm0, %v6396_v26  ;;  %v6399_v42 = vmul.f32 %v19735_v56, %v6310_v20  ;;  %v18496_v4 = vpack.c.bf16 %v6651_v24, %v6650_v25  ;;  %v19751_v26 = vunpack.c.l.bf16 %v19749_v17  ;;  %v7168_v17 = vld [vmem:[#allocation2 + $0x49] sm:$0xff] }
 0x765   : > { %v6305_v37 = vpop.permute.xlu1 %6304  ;;  %14228 = vmatmul.mubr.msk.bf16.gmra.mrb[8].mxu1 %vm487_vm0, %v18491_v9 }
 0x766   : > { %6591 = vst.msk [vmem:[#allocation2 + $0xe1] sm:$0xff] %vm487_vm0, %v6399_v42  ;;  %v6398_v30 = vmul.f32 %v19736_v51, %v6305_v37  ;;  %14231 = vmatprep.mubr.msk.bf16.mxu1 %vm487_vm0, %v18496_v4  ;;  %v19752_v42 = vld [vmem:[#allocation56_spill] sm:$0xff] }
 0x767   : > { %v6320_v14 = vpop.permute.xlu0 %6319  ;;  %v6652_v15 = vld [vmem:[#allocation2 + $0xa8] sm:$0xff]  ;;  %v6653_v7 = vld [vmem:[#allocation2 + $0xb0] sm:$0xff]  ;;  %v19753_v37 = vunpack.c.h.bf16 %v19752_v42  ;;  %v19754_v32 = vunpack.c.l.bf16 %v19752_v42 }
 0x768   : > { %6590 = vst.msk [vmem:[#allocation2 + $0xd9] sm:$0xff] %vm487_vm0, %v6398_v30  ;;  %v6401_v39 = vmul.f32 %v19738_v40, %v6320_v14  ;;  %v18511_v10 = vpack.c.bf16 %v6653_v7, %v6652_v15  ;;  %v19755_v15 = vld [vmem:[#allocation65_spill] sm:$0xff]  ;;  %v7176_v42 = vld [vmem:[#allocation2 + $0xa9] sm:$0xff] }
 0x769   : > { %v6315_v11 = vpop.permute.xlu1 %6314  ;;  %v19756_v7 = vunpack.c.h.bf16 %v19755_v15 }
 0x76a   : > { %6593 = vst.msk [vmem:[#allocation2 + $0xf9] sm:$0xff] %vm487_vm0, %v6401_v39  ;;  %v6400_v33 = vmul.f32 %v19739_v23, %v6315_v11 }
 0x76b   : > { %v6330_v2 = vpop.permute.xlu0 %6329  ;;  %v6654_v45 = vld [vmem:[#allocation2 + $0xc0] sm:$0xff]  ;;  %v6655_v41 = vld [vmem:[#allocation2 + $0xc8] sm:$0xff] }
 0x76c   : > { %6592 = vst.msk [vmem:[#allocation2 + $0xf1] sm:$0xff] %vm487_vm0, %v6400_v33  ;;  %v6403_v0 = vmul.f32 %v19741_v27, %v6330_v2  ;;  %v18516_v21 = vpack.c.bf16 %v6655_v41, %v6654_v45  ;;  %v19757_v45 = vunpack.c.l.bf16 %v19755_v15 }
 0x76d   : > { %v6325_v13 = vpop.permute.xlu1 %6324  ;;  %14232 = vmatmul.mubr.msk.bf16.gmra.mrb[12].mxu1 %vm487_vm0, %v18511_v10 }
 0x76e   : > { %6595 = vst.msk [vmem:[#allocation2 + $0x111] sm:$0xff] %vm487_vm0, %v6403_v0  ;;  %v6402_v36 = vmul.f32 %v19742_v19, %v6325_v13  ;;  %14235 = vmatprep.mubr.msk.bf16.mxu1 %vm487_vm0, %v18516_v21 }
 0x76f   : > { %v6340_v31 = vpop.permute.xlu0 %6339  ;;  %v6656_v22 = vld [vmem:[#allocation2 + $0xd8] sm:$0xff]  ;;  %v6657_v46 = vld [vmem:[#allocation2 + $0xe0] sm:$0xff] }
 0x770   : > { %6594 = vst.msk [vmem:[#allocation2 + $0x109] sm:$0xff] %vm487_vm0, %v6402_v36  ;;  %v6405_v35 = vmul.f32 %v19744_v34, %v6340_v31  ;;  %v18531_v57 = vpack.c.bf16 %v6657_v46, %v6656_v22  ;;  %v19758_v36 = vld [vmem:[#allocation78_spill] sm:$0xff] }
 0x771   : > { %v6335_v48 = vpop.permute.xlu1 %6334  ;;  %v19759_v31 = vunpack.c.h.bf16 %v19758_v36  ;;  %v7162_v46 = vld [vmem:[#allocation2 + $0x1] sm:$0xff] }
 0x772   : > { %6597 = vst.msk [vmem:[#allocation2 + $0x129] sm:$0xff] %vm487_vm0, %v6405_v35  ;;  %v6404_v53 = vmul.f32 %v19745_v52, %v6335_v48  ;;  %v19760_v35 = vunpack.c.l.bf16 %v19758_v36  ;;  %v7163_v48 = vld [vmem:[#allocation2 + $0x9] sm:$0xff] }
 0x773   : > { %v6350_v55 = vpop.permute.xlu0 %6349  ;;  %v6658_v5 = vld [vmem:[#allocation2 + $0xf0] sm:$0xff]  ;;  %v6659_v44 = vld [vmem:[#allocation2 + $0xf8] sm:$0xff] }
 0x774   : > { %6596 = vst.msk [vmem:[#allocation2 + $0x121] sm:$0xff] %vm487_vm0, %v6404_v53  ;;  %v6407_v63 = vmul.f32 %v19747_v61, %v6350_v55  ;;  %v18536_v47 = vpack.c.bf16 %v6659_v44, %v6658_v5  ;;  %v7226_v55 = vpack.c.bf16 %v7163_v48, %v7162_v46  ;;  %v7165_v44 = vld [vmem:[#allocation2 + $0x21] sm:$0xff]  ;;  %v7164_v61 = vld [vmem:[#allocation2 + $0x19] sm:$0xff]  ;;  %v7182_v15 = vld [vmem:[#allocation2 + $0xf1] sm:$0xff] }
 0x775   : > { %v6345_v43 = vpop.permute.xlu1 %6344  ;;  %14236 = vmatmul.mubr.msk.bf16.gmra.mrb[16].mxu1 %vm487_vm0, %v18531_v57  ;;  %v7194_v46 = vld [vmem:[#allocation3 + $0x1] sm:$0xff]  ;;  %v7195_v48 = vld [vmem:[#allocation3 + $0x9] sm:$0xff] }
 0x776   : > { %6599 = vst.msk [vmem:[#allocation2 + $0x141] sm:$0xff] %vm487_vm0, %v6407_v63  ;;  %v6406_v18 = vmul.f32 %v19748_v6, %v6345_v43  ;;  %14239 = vmatprep.mubr.msk.bf16.mxu1 %vm487_vm0, %v18536_v47  ;;  %v18591_v63 = vpack.c.bf16 %v7165_v44, %v7164_v61  ;;  %v7555_v43 = vsel %vm908_vm2, %v18454_v8, 0  ;;  %v7167_v6 = vld [vmem:[#allocation2 + $0x39] sm:$0xff]  ;;  %v7171_v8 = vld [vmem:[#allocation2 + $0x69] sm:$0xff] }
 0x777   : > { %v6360_v38 = vpop.permute.xlu0 %6359  ;;  %v6660_v58 = vld [vmem:[#allocation2 + $0x108] sm:$0xff]  ;;  %v6661_v54 = vld [vmem:[#allocation2 + $0x110] sm:$0xff] }
 0x778   : > { %6598 = vst.msk [vmem:[#allocation2 + $0x139] sm:$0xff] %vm487_vm0, %v6406_v18  ;;  %v6409_v49 = vmul.f32 %v19750_v1, %v6360_v38  ;;  %v18551_v24 = vpack.c.bf16 %v6661_v54, %v6660_v58  ;;  %v18595_v18 = vpack.c.bf16 %v7167_v6, %v7166_v62  ;;  %v18597_v38 = vld [vmem:[#allocation13 + $0x4] sm:$0x3]  ;;  %v7170_v1 = vld [vmem:[#allocation2 + $0x61] sm:$0xff]  ;;  %v7197_v62 = vld [vmem:[#allocation3 + $0x21] sm:$0xff] }
 0x779   : > { %v6355_v28 = vpop.permute.xlu1 %6354  ;;  %v18607_v54 = vpack.c.bf16 %v7171_v8, %v7170_v1  ;;  %v7199_v61 = vld [vmem:[#allocation3 + $0x39] sm:$0xff]  ;;  %v7198_v1 = vld [vmem:[#allocation3 + $0x31] sm:$0xff]  ;;  %v18664_v8 = vld [vmem:[#allocation15 + $0x4] sm:$0x3] }
 0x77a   : > { %6601 = vst.msk [vmem:[#allocation2 + $0x159] sm:$0xff] %vm487_vm0, %v6409_v49  ;;  %v6408_v20 = vmul.f32 %v19751_v26, %v6355_v28  ;;  %v7169_v49 = vld [vmem:[#allocation2 + $0x51] sm:$0xff]  ;;  %v7172_v28 = vld [vmem:[#allocation2 + $0x79] sm:$0xff] }
 0x77b   : > { %v6370_v25 = vpop.permute.xlu0 %6369  ;;  %v6662_v3 = vld [vmem:[#allocation2 + $0x120] sm:$0xff]  ;;  %v6663_v56 = vld [vmem:[#allocation2 + $0x128] sm:$0xff]  ;;  %v18605_v58 = vpack.c.bf16 %v7169_v49, %v7168_v17  ;;  %v7174_v26 = vld [vmem:[#allocation2 + $0x91] sm:$0xff]  ;;  %v7897_v17 = vsel %vm908_vm2, %v18597_v38, 0  ;;  %v18662_v49 = vpack.c.bf16 %v7199_v61, %v7198_v1 }
 0x77c   : > { %6600 = vst.msk [vmem:[#allocation2 + $0x151] sm:$0xff] %vm487_vm0, %v6408_v20  ;;  %v6411_v51 = vmul.f32 %v19753_v37, %v6370_v25  ;;  %v18556_v30 = vpack.c.bf16 %v6663_v56, %v6662_v3  ;;  %v7173_v20 = vld [vmem:[#allocation2 + $0x81] sm:$0xff]  ;;  %v7175_v3 = vld [vmem:[#allocation2 + $0x99] sm:$0xff]  ;;  %v7221_v1 = vld [vmem:[#allocation3 + $0x141] sm:$0xff] }
 0x77d   : > { %v6365_v14 = vpop.permute.xlu1 %6364  ;;  %14240 = vmatmul.mubr.msk.bf16.gmra.mrb[20].mxu1 %vm487_vm0, %v18551_v24  ;;  %v18613_v25 = vpack.c.bf16 %v7173_v20, %v7172_v28  ;;  %v18615_v56 = vpack.c.bf16 %v7175_v3, %v7174_v26  ;;  %v7178_v37 = vld [vmem:[#allocation2 + $0xc1] sm:$0xff]  ;;  %v7203_v26 = vld [vmem:[#allocation3 + $0x69] sm:$0xff] }
 0x77e   : > { %6603 = vst.msk [vmem:[#allocation2 + $0x171] sm:$0xff] %vm487_vm0, %v6411_v51  ;;  %v6410_v40 = vmul.f32 %v19754_v32, %v6365_v14  ;;  %14243 = vmatprep.mubr.msk.bf16.mxu1 %vm487_vm0, %v18556_v30  ;;  %v7177_v51 = vld [vmem:[#allocation2 + $0xb1] sm:$0xff]  ;;  %v7179_v32 = vld [vmem:[#allocation2 + $0xc9] sm:$0xff]  ;;  %v7201_v28 = vld [vmem:[#allocation3 + $0x51] sm:$0xff] }
 0x77f   : > { %v6380_v39 = vpop.permute.xlu0 %6379  ;;  %v6664_v23 = vld [vmem:[#allocation2 + $0x138] sm:$0xff]  ;;  %v6665_v33 = vld [vmem:[#allocation2 + $0x140] sm:$0xff]  ;;  %v18621_v14 = vpack.c.bf16 %v7177_v51, %v7176_v42  ;;  %v7207_v51 = vld [vmem:[#allocation3 + $0x99] sm:$0xff] }
 0x780   : > { %6602 = vst.msk [vmem:[#allocation2 + $0x169] sm:$0xff] %vm487_vm0, %v6410_v40  ;;  %v6413_v11 = vmul.f32 %v19756_v7, %v6380_v39  ;;  %v18571_v29 = vpack.c.bf16 %v6665_v33, %v6664_v23  ;;  %v18623_v40 = vpack.c.bf16 %v7179_v32, %v7178_v37  ;;  %v7180_v39 = vld [vmem:[#allocation2 + $0xd9] sm:$0xff]  ;;  %v7181_v7 = vld [vmem:[#allocation2 + $0xe1] sm:$0xff]  ;;  %v7205_v37 = vld [vmem:[#allocation3 + $0x81] sm:$0xff] }
 0x781   : > { %v6375_v2 = vpop.permute.xlu1 %6374  ;;  %v7183_v23 = vld [vmem:[#allocation2 + $0xf9] sm:$0xff]  ;;  %v7204_v32 = vld [vmem:[#allocation3 + $0x79] sm:$0xff] }
 0x782   : > { %6605 = vst.msk [vmem:[#allocation2 + $0x189] sm:$0xff] %vm487_vm0, %v6413_v11  ;;  %v6412_v41 = vmul.f32 %v19757_v45, %v6375_v2  ;;  %v18629_v11 = vpack.c.bf16 %v7181_v7, %v7180_v39  ;;  %v18631_v33 = vpack.c.bf16 %v7183_v23, %v7182_v15  ;;  %v7184_v2 = vld [vmem:[#allocation2 + $0x109] sm:$0xff]  ;;  %v7186_v45 = vld [vmem:[#allocation2 + $0x121] sm:$0xff]  ;;  %v7188_v36 = vld [vmem:[#allocation2 + $0x139] sm:$0xff]  ;;  %v18680_v39 = vpack.c.bf16 %v7205_v37, %v7204_v32 }
 0x783   : > { %v6666_v27 = vld [vmem:[#allocation2 + $0x150] sm:$0xff]  ;;  %v6667_v0 = vld [vmem:[#allocation2 + $0x158] sm:$0xff]  ;;  %v7206_v15 = vld [vmem:[#allocation3 + $0x91] sm:$0xff] }
 0x784   : > { %6604 = vst.msk [vmem:[#allocation2 + $0x181] sm:$0xff] %vm487_vm0, %v6412_v41  ;;  %v6540_v13 = vpop.permute.xlu0 %6539  ;;  %v18574_v19 = vpack.c.bf16 %v6667_v0, %v6666_v27  ;;  %v7185_v41 = vld [vmem:[#allocation2 + $0x111] sm:$0xff]  ;;  %v7187_v0 = vld [vmem:[#allocation2 + $0x129] sm:$0xff]  ;;  %v7200_v20 = vld [vmem:[#allocation3 + $0x49] sm:$0xff]  ;;  %v18682_v7 = vpack.c.bf16 %v7207_v51, %v7206_v15 }
 0x785   : > { %v6573_v60 = vmul.f32 %v19759_v31, %v6540_v13  ;;  %14244 = vmatmul.mubr.msk.bf16.gmra.mrb[24].mxu1 %vm487_vm0, %v18571_v29  ;;  %v18637_v27 = vpack.c.bf16 %v7185_v41, %v7184_v2  ;;  %v18639_v13 = vpack.c.bf16 %v7187_v0, %v7186_v45  ;;  %v7190_v31 = vld [vmem:[#allocation2 + $0x151] sm:$0xff]  ;;  %v18672_v3 = vpack.c.bf16 %v7201_v28, %v7200_v20  ;;  %v7209_v23 = vld [vmem:[#allocation3 + $0xb1] sm:$0xff]  ;;  %v7211_v2 = vld [vmem:[#allocation3 + $0xc9] sm:$0xff] }
 0x786   : > { %v6536_v34 = vpop.permute.xlu1 %6535  ;;  %14247 = vmatprep.mubr.msk.bf16.mxu1 %vm487_vm0, %v18574_v19  ;;  %v7208_v45 = vld [vmem:[#allocation3 + $0xa9] sm:$0xff]  ;;  %v7210_v0 = vld [vmem:[#allocation3 + $0xc1] sm:$0xff]  ;;  %v7223_v28 = vld [vmem:[#allocation3 + $0x159] sm:$0xff] }
 0x787   : > { %6637 = vst.msk [vmem:[#allocation3 + $0x189] sm:$0xff] %vm487_vm0, %v6573_v60  ;;  %v6572_v22 = vmul.f32 %v19760_v35, %v6536_v34  ;;  %v6668_v52 = vld [vmem:[#allocation2 + $0x168] sm:$0xff]  ;;  %v6669_v53 = vld [vmem:[#allocation2 + $0x170] sm:$0xff]  ;;  %v7191_v35 = vld [vmem:[#allocation2 + $0x159] sm:$0xff]  ;;  %v18688_v41 = vpack.c.bf16 %v7209_v23, %v7208_v45 }
 0x788   : > { %v18586_v5 = vpack.c.bf16 %v6669_v53, %v6668_v52  ;;  %v7189_v60 = vld [vmem:[#allocation2 + $0x141] sm:$0xff]  ;;  %v7192_v52 = vld [vmem:[#allocation2 + $0x169] sm:$0xff]  ;;  %v7193_v53 = vld [vmem:[#allocation2 + $0x171] sm:$0xff] }
 0x789   : > { %6636 = vst.msk [vmem:[#allocation3 + $0x181] sm:$0xff] %vm487_vm0, %v6572_v22  ;;  %v18645_v34 = vpack.c.bf16 %v7189_v60, %v7188_v36  ;;  %v18647_v22 = vpack.c.bf16 %v7191_v35, %v7190_v31  ;;  %v18653_v44 = vpack.c.bf16 %v7193_v53, %v7192_v52  ;;  %v18690_v36 = vpack.c.bf16 %v7211_v2, %v7210_v0  ;;  %v7213_v31 = vld [vmem:[#allocation3 + $0xe1] sm:$0xff]  ;;  %v7215_v60 = vld [vmem:[#allocation3 + $0xf9] sm:$0xff]  ;;  %v7217_v53 = vld [vmem:[#allocation3 + $0x111] sm:$0xff] }
 0x78a   : > { %v7212_v35 = vld [vmem:[#allocation3 + $0xd9] sm:$0xff]  ;;  %v7225_v15 = vld [vmem:[#allocation3 + $0x171] sm:$0xff]  ;;  %v7224_v23 = vld [vmem:[#allocation3 + $0x169] sm:$0xff] }
 0x78b   : > { %v7750_v51 = vld [vmem:[#allocation2 + $0x2] sm:$0xff]  ;;  %v7751_v32 = vld [vmem:[#allocation2 + $0xa] sm:$0xff]  ;;  %v18720_v45 = vpack.c.bf16 %v7225_v15, %v7224_v23  ;;  %v7752_v0 = vld [vmem:[#allocation2 + $0x1a] sm:$0xff] }
 0x78c   : > { %v7814_v2 = vpack.c.bf16 %v7751_v32, %v7750_v51  ;;  %v7760_v51 = vld [vmem:[#allocation2 + $0x7a] sm:$0xff]  ;;  %v7762_v32 = vld [vmem:[#allocation2 + $0x92] sm:$0xff]  ;;  %v7761_v15 = vld [vmem:[#allocation2 + $0x82] sm:$0xff] }
 0x78d   : > { %14248 = vmatmul.mubr.msk.bf16.gmra.mrb[28].mxu1 %vm487_vm0, %v18586_v5  ;;  %v18747_v23 = vpack.c.bf16 %v7761_v15, %v7760_v51  ;;  %v7769_v51 = vld [vmem:[#allocation2 + $0xe2] sm:$0xff]  ;;  %v7771_v15 = vld [vmem:[#allocation2 + $0xfa] sm:$0xff] }
 0x78e   : > { %14253 = vmatprep.mubr.msk.bf16.mxu1 %vm487_vm0, %v7226_v55  ;;  %v7242_v55 = vpack.c.bf16 %v7195_v48, %v7194_v46  ;;  %v18696_v46 = vpack.c.bf16 %v7213_v31, %v7212_v35  ;;  %v7214_v48 = vld [vmem:[#allocation3 + $0xf1] sm:$0xff] }
 0x78f   : > { %v18698_v52 = vpack.c.bf16 %v7215_v60, %v7214_v48  ;;  %v7753_v31 = vld [vmem:[#allocation2 + $0x22] sm:$0xff]  ;;  %v7754_v60 = vld [vmem:[#allocation2 + $0x32] sm:$0xff]  ;;  %v8143_v48 = vsel %vm908_vm2, %v18664_v8, 0  ;;  %19761 = vst [vmem:[#allocation57_spill] sm:$0xff] %v18747_v23 }
 0x790   : > { %v18725_v35 = vpack.c.bf16 %v7753_v31, %v7752_v0  ;;  %v7764_v31 = vld [vmem:[#allocation2 + $0xaa] sm:$0xff] }
 0x795   : > { %14254 = vmatmul.mubr.msk.bf16.vlgmr.msra.gmra.mrb[0].mxu1 %vm487_vm0, %v18591_v63 }
 0x796   : > { %14286 = vmatpush3.bf16.msra.mxu1 %v7555_v43  ;;  %14257 = vmatprep.mubr.msk.bf16.mxu1 %vm487_vm0, %v18595_v18  ;;  %v7196_v43 = vld [vmem:[#allocation3 + $0x19] sm:$0xff] }
 0x797   : > { %15905 = vmatprep.subr.msk.bf16.mxu1 %vm908_vm2, %v18597_v38  ;;  %v18658_v6 = vpack.c.bf16 %v7197_v62, %v7196_v43  ;;  %v7202_v38 = vld [vmem:[#allocation3 + $0x61] sm:$0xff]  ;;  %v7216_v62 = vld [vmem:[#allocation3 + $0x109] sm:$0xff] }
 0x798   : > { %v18674_v42 = vpack.c.bf16 %v7203_v26, %v7202_v38  ;;  %v18704_v61 = vpack.c.bf16 %v7217_v53, %v7216_v62  ;;  %v7218_v43 = vld [vmem:[#allocation3 + $0x121] sm:$0xff]  ;;  %v7220_v26 = vld [vmem:[#allocation3 + $0x139] sm:$0xff]  ;;  %v7222_v38 = vld [vmem:[#allocation3 + $0x151] sm:$0xff] }
 0x799   : > { %v18712_v20 = vpack.c.bf16 %v7221_v1, %v7220_v26  ;;  %v18714_v37 = vpack.c.bf16 %v7223_v28, %v7222_v38  ;;  %v7755_v53 = vld [vmem:[#allocation2 + $0x3a] sm:$0xff]  ;;  %v18731_v62 = vld [vmem:[#allocation13 + $0x6] sm:$0x3]  ;;  %v7758_v1 = vld [vmem:[#allocation2 + $0x62] sm:$0xff] }
 0x79a   : > { %v7757_v28 = vld [vmem:[#allocation2 + $0x52] sm:$0xff] }
 0x79d   : > { %14258 = vmatmul.mubr.msk.bf16.gmra.mrb[4].mxu1 %vm487_vm0, %v18605_v58 }
 0x79e   : > { %14261 = vmatprep.mubr.msk.bf16.mxu1 %vm487_vm0, %v18607_v54 }
 0x7a5   : > { %14262 = vmatmul.mubr.msk.bf16.gmra.mrb[8].mxu1 %vm487_vm0, %v18613_v25 }
 0x7a6   : > { %14265 = vmatprep.mubr.msk.bf16.mxu1 %vm487_vm0, %v18615_v56 }
 0x7ad   : > { %14266 = vmatmul.mubr.msk.bf16.gmra.mrb[12].mxu1 %vm487_vm0, %v18621_v14 }
 0x7ae   : > { %14269 = vmatprep.mubr.msk.bf16.mxu1 %vm487_vm0, %v18623_v40 }
 0x7b5   : > { %14270 = vmatmul.mubr.msk.bf16.gmra.mrb[16].mxu1 %vm487_vm0, %v18629_v11 }
 0x7b6   : > { %14273 = vmatprep.mubr.msk.bf16.mxu1 %vm487_vm0, %v18631_v33 }
 0x7bd   : > { %14274 = vmatmul.mubr.msk.bf16.gmra.mrb[20].mxu1 %vm487_vm0, %v18637_v27 }
 0x7be   : > { %14277 = vmatprep.mubr.msk.bf16.mxu1 %vm487_vm0, %v18639_v13 }
 0x7c5   : > { %14278 = vmatmul.mubr.msk.bf16.gmra.mrb[24].mxu1 %vm487_vm0, %v18645_v34 }
 0x7c6   : > { %14281 = vmatprep.mubr.msk.bf16.mxu1 %vm487_vm0, %v18647_v22 }
 0x7cd   : > { %14282 = vmatmul.mubr.msk.bf16.gmra.mrb[28].mxu1 %vm487_vm0, %v18653_v44 }
 0x7ce   : > { %14287 = vmatprep.mubr.msk.bf16.mxu1 %vm487_vm0, %v7242_v55  ;;  %v7219_v55 = vld [vmem:[#allocation3 + $0x129] sm:$0xff] }
 0x7d5   : > { %14288 = vmatmul.mubr.msk.bf16.vlgmr.msra.gmra.mrb[0].mxu1 %vm487_vm0, %v18658_v6 }
 0x7d6   : > { %14320 = vmatpush3.bf16.msra.mxu1 %v7897_v17  ;;  %14291 = vmatprep.mubr.msk.bf16.mxu1 %vm487_vm0, %v18662_v49  ;;  %v18706_v17 = vpack.c.bf16 %v7219_v55, %v7218_v43  ;;  %v18729_v55 = vpack.c.bf16 %v7755_v53, %v7754_v60  ;;  %v7756_v43 = vld [vmem:[#allocation2 + $0x4a] sm:$0xff]  ;;  %v7766_v60 = vld [vmem:[#allocation2 + $0xc2] sm:$0xff] }
 0x7d7   : > { %15906 = vmatprep.subr.msk.bf16.mxu1 %vm908_vm2, %v18664_v8  ;;  %v18739_v26 = vpack.c.bf16 %v7757_v28, %v7756_v43  ;;  %v7759_v8 = vld [vmem:[#allocation2 + $0x6a] sm:$0xff]  ;;  %v7768_v28 = vld [vmem:[#allocation2 + $0xda] sm:$0xff] }
 0x7d8   : > { %v18741_v38 = vpack.c.bf16 %v7759_v8, %v7758_v1  ;;  %v7767_v43 = vld [vmem:[#allocation2 + $0xca] sm:$0xff]  ;;  %v7770_v8 = vld [vmem:[#allocation2 + $0xf2] sm:$0xff] }
 0x7d9   : > { %v18757_v1 = vpack.c.bf16 %v7767_v43, %v7766_v60  ;;  %v7774_v60 = vld [vmem:[#allocation2 + $0x122] sm:$0xff] }
 0x7db   : > { %19764 = vst [vmem:[#allocation60_spill] sm:$0xff] %v18757_v1 }
 0x7dd   : > { %14292 = vmatmul.mubr.msk.bf16.gmra.mrb[4].mxu1 %vm487_vm0, %v18672_v3 }
 0x7de   : > { %14295 = vmatprep.mubr.msk.bf16.mxu1 %vm487_vm0, %v18674_v42 }
 0x7e5   : > { %14296 = vmatmul.mubr.msk.bf16.gmra.mrb[8].mxu1 %vm487_vm0, %v18680_v39 }
 0x7e6   : > { %14299 = vmatprep.mubr.msk.bf16.mxu1 %vm487_vm0, %v18682_v7 }
 0x7ed   : > { %14300 = vmatmul.mubr.msk.bf16.gmra.mrb[12].mxu1 %vm487_vm0, %v18688_v41 }
 0x7ee   : > { %14303 = vmatprep.mubr.msk.bf16.mxu1 %vm487_vm0, %v18690_v36 }
 0x7f5   : > { %14304 = vmatmul.mubr.msk.bf16.gmra.mrb[16].mxu1 %vm487_vm0, %v18696_v46 }
 0x7f6   : > { %14307 = vmatprep.mubr.msk.bf16.mxu1 %vm487_vm0, %v18698_v52 }
 0x7fd   : > { %14308 = vmatmul.mubr.msk.bf16.gmra.mrb[20].mxu1 %vm487_vm0, %v18704_v61 }
 0x7fe   : > { %14311 = vmatprep.mubr.msk.bf16.mxu1 %vm487_vm0, %v18706_v17 }
 0x805   : > { %14312 = vmatmul.mubr.msk.bf16.gmra.mrb[24].mxu1 %vm487_vm0, %v18712_v20 }
 0x806   : > { %14315 = vmatprep.mubr.msk.bf16.mxu1 %vm487_vm0, %v18714_v37 }
 0x80d   : > { %14316 = vmatmul.mubr.msk.bf16.gmra.mrb[28].mxu1 %vm487_vm0, %v18720_v45 }
 0x80e   : > { %14321 = vmatprep.mubr.msk.bf16.mxu1 %vm487_vm0, %v7814_v2  ;;  %v7763_v2 = vld [vmem:[#allocation2 + $0x9a] sm:$0xff] }
 0x80f   : > { %v18749_v0 = vpack.c.bf16 %v7763_v2, %v7762_v32  ;;  %v18763_v32 = vpack.c.bf16 %v7769_v51, %v7768_v28  ;;  %v18765_v2 = vpack.c.bf16 %v7771_v15, %v7770_v8  ;;  %v7776_v28 = vld [vmem:[#allocation2 + $0x13a] sm:$0xff]  ;;  %v7778_v8 = vld [vmem:[#allocation2 + $0x152] sm:$0xff]  ;;  %v7777_v51 = vld [vmem:[#allocation2 + $0x142] sm:$0xff] }
 0x810   : > { %v18779_v15 = vpack.c.bf16 %v7777_v51, %v7776_v28  ;;  %v7785_v28 = vld [vmem:[#allocation3 + $0x22] sm:$0xff]  ;;  %v7787_v51 = vld [vmem:[#allocation3 + $0x3a] sm:$0xff] }
 0x811   : > { %19762 = vst [vmem:[#allocation58_spill] sm:$0xff] %v18749_v0  ;;  %19765 = vst [vmem:[#allocation61_spill] sm:$0xff] %v18763_v32 }
 0x812   : > { %19766 = vst [vmem:[#allocation62_spill] sm:$0xff] %v18765_v2  ;;  %19769 = vst [vmem:[#allocation66_spill] sm:$0xff] %v18779_v15 }
 0x815   : > { %14322 = vmatmul.mubr.msk.bf16.vlgmr.msra.gmra.mrb[0].mxu1 %vm487_vm0, %v18725_v35 }
 0x816   : > { %14354 = vmatpush3.bf16.msra.mxu1 %v8143_v48  ;;  %14325 = vmatprep.mubr.msk.bf16.mxu1 %vm487_vm0, %v18729_v55  ;;  %v7765_v48 = vld [vmem:[#allocation2 + $0xb2] sm:$0xff] }
 0x817   : > { %15907 = vmatprep.subr.msk.bf16.mxu1 %vm908_vm2, %v18731_v62  ;;  %v18755_v53 = vpack.c.bf16 %v7765_v48, %v7764_v31  ;;  %v7772_v31 = vld [vmem:[#allocation2 + $0x10a] sm:$0xff]  ;;  %v7773_v48 = vld [vmem:[#allocation2 + $0x112] sm:$0xff] }
 0x818   : > { %v18771_v43 = vpack.c.bf16 %v7773_v48, %v7772_v31  ;;  %v7783_v31 = vld [vmem:[#allocation3 + $0xa] sm:$0xff]  ;;  %v7781_v48 = vld [vmem:[#allocation2 + $0x172] sm:$0xff] }
 0x819   : > { %19763 = vst [vmem:[#allocation59_spill] sm:$0xff] %v18755_v53 }
 0x81a   : > { %19767 = vst [vmem:[#allocation63_spill] sm:$0xff] %v18771_v43 }
 0x81d   : > { %14326 = vmatmul.mubr.msk.bf16.gmra.mrb[4].mxu1 %vm487_vm0, %v18739_v26 }
 0x81e   : > { %14329 = vmatprep.mubr.msk.bf16.mxu1 %vm487_vm0, %v18741_v38 }
 0x825   : > { %14330 = vmatmul.mubr.msk.bf16.gmra.mrb[8].mxu1 %vm487_vm0, %v18747_v23  ;;  %v8683_v23 = vld [vmem:[#allocation15 + $0x6] sm:$0x3] }
 0x826   : > { %14333 = vmatprep.mubr.msk.bf16.mxu1 %vm487_vm0, %v18749_v0 }
 0x82d   : > { %14334 = vmatmul.mubr.msk.bf16.gmra.mrb[12].mxu1 %vm487_vm0, %v18755_v53 }
 0x82e   : > { %14337 = vmatprep.mubr.msk.bf16.mxu1 %vm487_vm0, %v18757_v1  ;;  %v7775_v1 = vld [vmem:[#allocation2 + $0x12a] sm:$0xff] }
 0x82f   : > { %v18773_v53 = vpack.c.bf16 %v7775_v1, %v7774_v60  ;;  %v7782_v1 = vld [vmem:[#allocation3 + $0x2] sm:$0xff]  ;;  %v7780_v60 = vld [vmem:[#allocation2 + $0x16a] sm:$0xff] }
 0x831   : > { %19768 = vst [vmem:[#allocation64_spill] sm:$0xff] %v18773_v53 }
 0x835   : > { %14338 = vmatmul.mubr.msk.bf16.gmra.mrb[16].mxu1 %vm487_vm0, %v18763_v32 }
 0x836   : > { %14341 = vmatprep.mubr.msk.bf16.mxu1 %vm487_vm0, %v18765_v2  ;;  %v7779_v2 = vld [vmem:[#allocation2 + $0x15a] sm:$0xff] }
 0x837   : > { %v18781_v32 = vpack.c.bf16 %v7779_v2, %v7778_v8  ;;  %v7784_v2 = vld [vmem:[#allocation3 + $0x1a] sm:$0xff]  ;;  %v7786_v8 = vld [vmem:[#allocation3 + $0x32] sm:$0xff] }
 0x838   : > { %v18796_v0 = vpack.c.bf16 %v7787_v51, %v7786_v8  ;;  %v7795_v8 = vld [vmem:[#allocation3 + $0x9a] sm:$0xff] }
 0x839   : > { %19770 = vst [vmem:[#allocation67_spill] sm:$0xff] %v18781_v32 }
 0x83a   : > { %19771 = vst [vmem:[#allocation68_spill] sm:$0xff] %v18796_v0 }
 0x83d   : > { %14342 = vmatmul.mubr.msk.bf16.gmra.mrb[20].mxu1 %vm487_vm0, %v18771_v43  ;;  %v7830_v43 = vpack.c.bf16 %v7783_v31, %v7782_v1  ;;  %v7789_v1 = vld [vmem:[#allocation3 + $0x52] sm:$0xff]  ;;  %v7790_v31 = vld [vmem:[#allocation3 + $0x62] sm:$0xff] }
 0x83e   : > { %14345 = vmatprep.mubr.msk.bf16.mxu1 %vm487_vm0, %v18773_v53  ;;  %v18787_v53 = vpack.c.bf16 %v7781_v48, %v7780_v60  ;;  %v7791_v60 = vld [vmem:[#allocation3 + $0x6a] sm:$0xff] }
 0x845   : > { %14346 = vmatmul.mubr.msk.bf16.gmra.mrb[24].mxu1 %vm487_vm0, %v18779_v15  ;;  %v18792_v15 = vpack.c.bf16 %v7785_v28, %v7784_v2  ;;  %v18805_v2 = vpack.c.bf16 %v7791_v60, %v7790_v31  ;;  %v7794_v28 = vld [vmem:[#allocation3 + $0x92] sm:$0xff]  ;;  %v7798_v31 = vld [vmem:[#allocation3 + $0xc2] sm:$0xff]  ;;  %v7799_v60 = vld [vmem:[#allocation3 + $0xca] sm:$0xff] }
 0x846   : > { %14349 = vmatprep.mubr.msk.bf16.mxu1 %vm487_vm0, %v18781_v32  ;;  %v8487_v32 = vsel %vm908_vm2, %v18731_v62, 0  ;;  %v7792_v62 = vld [vmem:[#allocation3 + $0x7a] sm:$0xff] }
 0x847   : > { %19773 = vst [vmem:[#allocation70_spill] sm:$0xff] %v18805_v2 }
 0x84d   : > { %14350 = vmatmul.mubr.msk.bf16.gmra.mrb[28].mxu1 %vm487_vm0, %v18787_v53 }
 0x84e   : > { %14355 = vmatprep.mubr.msk.bf16.mxu1 %vm487_vm0, %v7830_v43  ;;  %v7788_v43 = vld [vmem:[#allocation3 + $0x4a] sm:$0xff] }
 0x84f   : > { %v18803_v48 = vpack.c.bf16 %v7789_v1, %v7788_v43  ;;  %v7796_v43 = vld [vmem:[#allocation3 + $0xaa] sm:$0xff]  ;;  %v7797_v1 = vld [vmem:[#allocation3 + $0xb2] sm:$0xff] }
 0x851   : > { %19772 = vst [vmem:[#allocation69_spill] sm:$0xff] %v18803_v48 }
 0x855   : > { %14356 = vmatmul.mubr.msk.bf16.vlgmr.msra.gmra.mrb[0].mxu1 %vm487_vm0, %v18792_v15 }
 0x856   : > { %14388 = vmatpush3.bf16.msra.mxu1 %v8487_v32  ;;  %14359 = vmatprep.mubr.msk.bf16.mxu1 %vm487_vm0, %v18796_v0  ;;  %v7793_v32 = vld [vmem:[#allocation3 + $0x82] sm:$0xff]  ;;  %v18813_v0 = vpack.c.bf16 %v7795_v8, %v7794_v28  ;;  %v7802_v28 = vld [vmem:[#allocation3 + $0xf2] sm:$0xff]  ;;  %v7803_v8 = vld [vmem:[#allocation3 + $0xfa] sm:$0xff] }
 0x857   : > { %15908 = vmatprep.subr.msk.bf16.mxu1 %vm908_vm2, %v8683_v23  ;;  %v18811_v51 = vpack.c.bf16 %v7793_v32, %v7792_v62  ;;  %v7800_v62 = vld [vmem:[#allocation3 + $0xda] sm:$0xff]  ;;  %v7801_v32 = vld [vmem:[#allocation3 + $0xe2] sm:$0xff] }
 0x858   : > { %19775 = vst [vmem:[#allocation72_spill] sm:$0xff] %v18813_v0 }
 0x859   : > { %19774 = vst [vmem:[#allocation71_spill] sm:$0xff] %v18811_v51 }
 0x85d   : > { %14360 = vmatmul.mubr.msk.bf16.gmra.mrb[4].mxu1 %vm487_vm0, %v18803_v48  ;;  %v18819_v48 = vpack.c.bf16 %v7797_v1, %v7796_v43  ;;  %v7804_v43 = vld [vmem:[#allocation3 + $0x10a] sm:$0xff]  ;;  %v7805_v1 = vld [vmem:[#allocation3 + $0x112] sm:$0xff] }
 0x85e   : > { %14363 = vmatprep.mubr.msk.bf16.mxu1 %vm487_vm0, %v18805_v2  ;;  %v18821_v2 = vpack.c.bf16 %v7799_v60, %v7798_v31  ;;  %v7806_v31 = vld [vmem:[#allocation3 + $0x122] sm:$0xff]  ;;  %v7807_v60 = vld [vmem:[#allocation3 + $0x12a] sm:$0xff] }
 0x85f   : > { %19776 = vst [vmem:[#allocation73_spill] sm:$0xff] %v18819_v48 }
 0x860   : > { %19777 = vst [vmem:[#allocation74_spill] sm:$0xff] %v18821_v2 }
 0x865   : > { %14364 = vmatmul.mubr.msk.bf16.gmra.mrb[8].mxu1 %vm487_vm0, %v18811_v51  ;;  %v18827_v51 = vpack.c.bf16 %v7801_v32, %v7800_v62  ;;  %v7808_v62 = vld [vmem:[#allocation3 + $0x13a] sm:$0xff]  ;;  %v7809_v32 = vld [vmem:[#allocation3 + $0x142] sm:$0xff] }
 0x866   : > { %14367 = vmatprep.mubr.msk.bf16.mxu1 %vm487_vm0, %v18813_v0  ;;  %v18829_v0 = vpack.c.bf16 %v7803_v8, %v7802_v28  ;;  %v7810_v28 = vld [vmem:[#allocation3 + $0x152] sm:$0xff]  ;;  %v7811_v8 = vld [vmem:[#allocation3 + $0x15a] sm:$0xff] }
 0x867   : > { %19778 = vst [vmem:[#allocation75_spill] sm:$0xff] %v18827_v51 }
 0x868   : > { %19779 = vst [vmem:[#allocation76_spill] sm:$0xff] %v18829_v0 }
 0x86d   : > { %14368 = vmatmul.mubr.msk.bf16.gmra.mrb[12].mxu1 %vm487_vm0, %v18819_v48  ;;  %v18835_v48 = vpack.c.bf16 %v7805_v1, %v7804_v43  ;;  %v7812_v43 = vld [vmem:[#allocation3 + $0x16a] sm:$0xff]  ;;  %v7813_v1 = vld [vmem:[#allocation3 + $0x172] sm:$0xff] }
 0x86e   : > { %14371 = vmatprep.mubr.msk.bf16.mxu1 %vm487_vm0, %v18821_v2  ;;  %v18837_v2 = vpack.c.bf16 %v7807_v60, %v7806_v31  ;;  %v18851_v31 = vpack.c.bf16 %v7813_v1, %v7812_v43  ;;  %v8733_v60 = vsel %vm908_vm2, %v8683_v23, 0  ;;  %v8381_v23 = vld [vmem:[#allocation3 + $0x80] sm:$0xff]  ;;  %v8383_v1 = vld [vmem:[#allocation3 + $0x98] sm:$0xff] }
 0x875   : > { %14372 = vmatmul.mubr.msk.bf16.gmra.mrb[16].mxu1 %vm487_vm0, %v18827_v51  ;;  %v18843_v51 = vpack.c.bf16 %v7809_v32, %v7808_v62  ;;  %v9025_v62 = vld [vmem:[#allocation13 + $0x8] sm:$0x3]  ;;  %v8378_v32 = vld [vmem:[#allocation3 + $0x60] sm:$0xff] }
 0x876   : > { %14375 = vmatprep.mubr.msk.bf16.mxu1 %vm487_vm0, %v18829_v0  ;;  %v18845_v0 = vpack.c.bf16 %v7811_v8, %v7810_v28  ;;  %v8380_v8 = vld [vmem:[#allocation3 + $0x78] sm:$0xff] }
 0x877   : > { %v18904_v43 = vpack.c.bf16 %v8381_v23, %v8380_v8  ;;  %v8390_v23 = vld [vmem:[#allocation3 + $0xf0] sm:$0xff]  ;;  %v8392_v8 = vld [vmem:[#allocation3 + $0x108] sm:$0xff] }
 0x87d   : > { %14376 = vmatmul.mubr.msk.bf16.gmra.mrb[20].mxu1 %vm487_vm0, %v18835_v48 }
 0x87e   : > { %14379 = vmatprep.mubr.msk.bf16.mxu1 %vm487_vm0, %v18837_v2 }
 0x885   : > { %14380 = vmatmul.mubr.msk.bf16.gmra.mrb[24].mxu1 %vm487_vm0, %v18843_v51 }
 0x886   : > { %14383 = vmatprep.mubr.msk.bf16.mxu1 %vm487_vm0, %v18845_v0 }
 0x88d   : > { %14384 = vmatmul.mubr.msk.bf16.gmra.mrb[28].mxu1 %vm487_vm0, %v18851_v31 }
 0x88e   : > { %14389 = vmatprep.mubr.msk.bf16.mxu1 %vm487_vm0, %v18445_v16  ;;  %v8369_v16 = vld [vmem:[#allocation2 + $0x180] sm:$0xff] }
 0x895   : > { %14390 = vmatmul.mubr.msk.bf16.vlgmr.msra.gmra.mrb[0].mxu1 %vm487_vm0, %v18452_v12  ;;  %v8370_v12 = vld [vmem:[#allocation2 + $0x188] sm:$0xff] }
 0x896   : > { %14422 = vmatpush3.bf16.msra.mxu1 %v8733_v60  ;;  %14393 = vmatprep.mubr.msk.bf16.mxu1 %vm487_vm0, %v18471_v59  ;;  %v8373_v59 = vld [vmem:[#allocation3 + $0x20] sm:$0xff]  ;;  %v8385_v60 = vld [vmem:[#allocation3 + $0xb0] sm:$0xff] }
 0x897   : > { %15909 = vmatprep.subr.msk.bf16.mxu1 %vm908_vm2, %v9025_v62 }
 0x89d   : > { %14394 = vmatmul.mubr.msk.bf16.gmra.mrb[4].mxu1 %vm487_vm0, %v18476_v50  ;;  %v18887_v50 = vpack.c.bf16 %v8370_v12, %v8369_v16  ;;  %v8384_v12 = vld [vmem:[#allocation3 + $0xa8] sm:$0xff] }
 0x89e   : > { %14397 = vmatprep.mubr.msk.bf16.mxu1 %vm487_vm0, %v18491_v9  ;;  %v8372_v9 = vld [vmem:[#allocation3 + $0x18] sm:$0xff] }
 0x8a5   : > { %14398 = vmatmul.mubr.msk.bf16.gmra.mrb[8].mxu1 %vm487_vm0, %v18496_v4  ;;  %v8420_v4 = vpack.c.bf16 %v8373_v59, %v8372_v9  ;;  %v18912_v59 = vpack.c.bf16 %v8385_v60, %v8384_v12  ;;  %v8387_v9 = vld [vmem:[#allocation3 + $0xc8] sm:$0xff]  ;;  %v8394_v12 = vld [vmem:[#allocation3 + $0x120] sm:$0xff] }
 0x8a6   : > { %14401 = vmatprep.mubr.msk.bf16.mxu1 %vm487_vm0, %v18511_v10  ;;  %v8375_v10 = vld [vmem:[#allocation3 + $0x38] sm:$0xff]  ;;  %v8395_v60 = vld [vmem:[#allocation3 + $0x128] sm:$0xff] }
 0x8ad   : > { %14402 = vmatmul.mubr.msk.bf16.gmra.mrb[12].mxu1 %vm487_vm0, %v18516_v21  ;;  %v8377_v21 = vld [vmem:[#allocation3 + $0x50] sm:$0xff] }
 0x8ae   : > { %14405 = vmatprep.mubr.msk.bf16.mxu1 %vm487_vm0, %v18531_v57  ;;  %v8374_v57 = vld [vmem:[#allocation3 + $0x30] sm:$0xff] }
 0x8b5   : > { %14406 = vmatmul.mubr.msk.bf16.gmra.mrb[16].mxu1 %vm487_vm0, %v18536_v47  ;;  %v18892_v47 = vpack.c.bf16 %v8375_v10, %v8374_v57  ;;  %v8386_v10 = vld [vmem:[#allocation3 + $0xc0] sm:$0xff]  ;;  %v8388_v57 = vld [vmem:[#allocation3 + $0xd8] sm:$0xff] }
 0x8b6   : > { %14409 = vmatprep.mubr.msk.bf16.mxu1 %vm487_vm0, %v18551_v24  ;;  %v9075_v24 = vsel %vm908_vm2, %v9025_v62, 0  ;;  %v8382_v62 = vld [vmem:[#allocation3 + $0x90] sm:$0xff] }
 0x8b7   : > { %v18910_v16 = vpack.c.bf16 %v8383_v1, %v8382_v62  ;;  %v8397_v62 = vld [vmem:[#allocation3 + $0x140] sm:$0xff] }
 0x8bd   : > { %14410 = vmatmul.mubr.msk.bf16.gmra.mrb[20].mxu1 %vm487_vm0, %v18556_v30  ;;  %v8376_v30 = vld [vmem:[#allocation3 + $0x48] sm:$0xff] }
 0x8be   : > { %14413 = vmatprep.mubr.msk.bf16.mxu1 %vm487_vm0, %v18571_v29  ;;  %v18895_v29 = vpack.c.bf16 %v8377_v21, %v8376_v30  ;;  %v18918_v21 = vpack.c.bf16 %v8387_v9, %v8386_v10  ;;  %v8391_v30 = vld [vmem:[#allocation3 + $0xf8] sm:$0xff]  ;;  %v18934_v9 = vpack.c.bf16 %v8395_v60, %v8394_v12  ;;  %v8402_v60 = vld [vmem:[#allocation3 + $0x180] sm:$0xff] }
 0x8c5   : > { %14414 = vmatmul.mubr.msk.bf16.gmra.mrb[24].mxu1 %vm487_vm0, %v18574_v19  ;;  %v9271_v19 = vld [vmem:[#allocation15 + $0x8] sm:$0x3] }
 0x8c6   : > { %14417 = vmatprep.mubr.msk.bf16.mxu1 %vm487_vm0, %v18586_v5  ;;  %v8379_v5 = vld [vmem:[#allocation3 + $0x68] sm:$0xff] }
 0x8c7   : > { %v18902_v28 = vpack.c.bf16 %v8379_v5, %v8378_v32  ;;  %v8393_v5 = vld [vmem:[#allocation3 + $0x110] sm:$0xff]  ;;  %v18926_v32 = vpack.c.bf16 %v8391_v30, %v8390_v23 }
 0x8c8   : > { %v18928_v1 = vpack.c.bf16 %v8393_v5, %v8392_v8  ;;  %v8401_v30 = vld [vmem:[#allocation3 + $0x170] sm:$0xff]  ;;  %v8400_v8 = vld [vmem:[#allocation3 + $0x168] sm:$0xff] }
 0x8c9   : > { %v8398_v5 = vld [vmem:[#allocation3 + $0x150] sm:$0xff] }
 0x8ca   : > { %19780 = vst [vmem:[#allocation77_spill] sm:$0xff] %v18928_v1 }
 0x8cd   : > { %14418 = vmatmul.mubr.msk.bf16.gmra.mrb[28].mxu1 %vm487_vm0, %v18887_v50 }
 0x8ce   : > { %14423 = vmatprep.mubr.msk.bf16.mxu1 %vm487_vm0, %v8420_v4  ;;  %v8389_v4 = vld [vmem:[#allocation3 + $0xe0] sm:$0xff] }
 0x8d5   : > { %14424 = vmatmul.mubr.msk.bf16.vlgmr.msra.gmra.mrb[0].mxu1 %vm487_vm0, %v18892_v47 }
 0x8d6   : > { %14456 = vmatpush3.bf16.msra.mxu1 %v9075_v24  ;;  %14427 = vmatprep.mubr.msk.bf16.mxu1 %vm487_vm0, %v18895_v29  ;;  %v18920_v24 = vpack.c.bf16 %v8389_v4, %v8388_v57  ;;  %v8396_v4 = vld [vmem:[#allocation3 + $0x138] sm:$0xff] }
 0x8d7   : > { %15910 = vmatprep.subr.msk.bf16.mxu1 %vm908_vm2, %v9271_v19  ;;  %v18936_v10 = vpack.c.bf16 %v8397_v62, %v8396_v4  ;;  %v8399_v57 = vld [vmem:[#allocation3 + $0x158] sm:$0xff]  ;;  %v8403_v62 = vld [vmem:[#allocation3 + $0x188] sm:$0xff]  ;;  %v9321_v4 = vsel %vm908_vm2, %v9271_v19, 0 }
 0x8d8   : > { %v18942_v23 = vpack.c.bf16 %v8399_v57, %v8398_v5  ;;  %v18950_v12 = vpack.c.bf16 %v8403_v62, %v8402_v60  ;;  %v9613_v57 = vld [vmem:[#allocation13 + $0xa] sm:$0x3]  ;;  %v10106_v19 = vld [vmem:[#allocation2 + $0x38] sm:$0xff]  ;;  %v10110_v60 = vld [vmem:[#allocation2 + $0x68] sm:$0xff] }
 0x8dd   : > { %14428 = vmatmul.mubr.msk.bf16.gmra.mrb[4].mxu1 %vm487_vm0, %v18902_v28 }
 0x8de   : > { %14431 = vmatprep.mubr.msk.bf16.mxu1 %vm487_vm0, %v18904_v43 }
 0x8e5   : > { %14432 = vmatmul.mubr.msk.bf16.gmra.mrb[8].mxu1 %vm487_vm0, %v18910_v16 }
 0x8e6   : > { %14435 = vmatprep.mubr.msk.bf16.mxu1 %vm487_vm0, %v18912_v59 }
 0x8ed   : > { %14436 = vmatmul.mubr.msk.bf16.gmra.mrb[12].mxu1 %vm487_vm0, %v18918_v21 }
 0x8ee   : > { %14439 = vmatprep.mubr.msk.bf16.mxu1 %vm487_vm0, %v18920_v24 }
 0x8f5   : > { %14440 = vmatmul.mubr.msk.bf16.gmra.mrb[16].mxu1 %vm487_vm0, %v18926_v32 }
 0x8f6   : > { %14443 = vmatprep.mubr.msk.bf16.mxu1 %vm487_vm0, %v18928_v1  ;;  %v18944_v1 = vpack.c.bf16 %v8401_v30, %v8400_v8  ;;  %v9579_v30 = vld [vmem:[#allocation3 + $0x18a] sm:$0xff] }
 0x8fd   : > { %14444 = vmatmul.mubr.msk.bf16.gmra.mrb[20].mxu1 %vm487_vm0, %v18934_v9 }
 0x8fe   : > { %14447 = vmatprep.mubr.msk.bf16.mxu1 %vm487_vm0, %v18936_v10 }
 0x905   : > { %14448 = vmatmul.mubr.msk.bf16.gmra.mrb[24].mxu1 %vm487_vm0, %v18942_v23 }
 0x906   : > { %14451 = vmatprep.mubr.msk.bf16.mxu1 %vm487_vm0, %v18944_v1 }
 0x90d   : > { %14452 = vmatmul.mubr.msk.bf16.gmra.mrb[28].mxu1 %vm487_vm0, %v18950_v12 }
 0x90e   : > { %14457 = vmatprep.mubr.msk.bf16.mxu1 %vm487_vm0, %v18591_v63  ;;  %v8958_v63 = vld [vmem:[#allocation2 + $0x181] sm:$0xff] }
 0x915   : > { %14458 = vmatmul.mubr.msk.bf16.vlgmr.msra.gmra.mrb[0].mxu1 %vm487_vm0, %v18595_v18  ;;  %v8959_v18 = vld [vmem:[#allocation2 + $0x189] sm:$0xff] }
 0x916   : > { %14490 = vmatpush3.bf16.msra.mxu1 %v9321_v4  ;;  %14461 = vmatprep.mubr.msk.bf16.mxu1 %vm487_vm0, %v18605_v58  ;;  %v18986_v58 = vpack.c.bf16 %v8959_v18, %v8958_v63  ;;  %v10791_v4 = vld [vmem:[#allocation13 + $0xe] sm:$0x3]  ;;  %v10112_v63 = vld [vmem:[#allocation2 + $0x80] sm:$0xff] }
 0x917   : > { %15911 = vmatprep.subr.msk.bf16.mxu1 %vm908_vm2, %v9613_v57  ;;  %v10113_v18 = vld [vmem:[#allocation2 + $0x90] sm:$0xff] }
 0x91d   : > { %14462 = vmatmul.mubr.msk.bf16.gmra.mrb[4].mxu1 %vm487_vm0, %v18607_v54  ;;  %v9663_v54 = vsel %vm908_vm2, %v9613_v57, 0  ;;  %v10111_v57 = vld [vmem:[#allocation2 + $0x78] sm:$0xff] }
 0x91e   : > { %14465 = vmatprep.mubr.msk.bf16.mxu1 %vm487_vm0, %v18613_v25  ;;  %v9859_v25 = vld [vmem:[#allocation15 + $0xa] sm:$0x3] }
 0x925   : > { %14466 = vmatmul.mubr.msk.bf16.gmra.mrb[8].mxu1 %vm487_vm0, %v18615_v56  ;;  %v8990_v56 = vld [vmem:[#allocation3 + $0x181] sm:$0xff] }
 0x926   : > { %14469 = vmatprep.mubr.msk.bf16.mxu1 %vm487_vm0, %v18621_v14  ;;  %v8991_v14 = vld [vmem:[#allocation3 + $0x189] sm:$0xff] }
 0x92d   : > { %14470 = vmatmul.mubr.msk.bf16.gmra.mrb[12].mxu1 %vm487_vm0, %v18623_v40  ;;  %v19022_v40 = vpack.c.bf16 %v8991_v14, %v8990_v56  ;;  %v10115_v14 = vld [vmem:[#allocation2 + $0xa8] sm:$0xff] }
 0x92e   : > { %14473 = vmatprep.mubr.msk.bf16.mxu1 %vm487_vm0, %v18629_v11  ;;  %v9909_v11 = vsel %vm908_vm2, %v9859_v25, 0 }
 0x935   : > { %14474 = vmatmul.mubr.msk.bf16.gmra.mrb[16].mxu1 %vm487_vm0, %v18631_v33  ;;  %v10203_v33 = vld [vmem:[#allocation13 + $0xc] sm:$0x3] }
 0x936   : > { %14477 = vmatprep.mubr.msk.bf16.mxu1 %vm487_vm0, %v18637_v27  ;;  %v19781_v27 = vld [vmem:[#allocation57_spill] sm:$0xff] }
 0x93d   : > { %14478 = vmatmul.mubr.msk.bf16.gmra.mrb[20].mxu1 %vm487_vm0, %v18639_v13  ;;  %v19782_v13 = vld [vmem:[#allocation58_spill] sm:$0xff] }
 0x93e   : > { %14481 = vmatprep.mubr.msk.bf16.mxu1 %vm487_vm0, %v18645_v34  ;;  %v19783_v34 = vld [vmem:[#allocation59_spill] sm:$0xff] }
 0x945   : > { %14482 = vmatmul.mubr.msk.bf16.gmra.mrb[24].mxu1 %vm487_vm0, %v18647_v22  ;;  %v19784_v22 = vld [vmem:[#allocation60_spill] sm:$0xff] }
 0x946   : > { %14485 = vmatprep.mubr.msk.bf16.mxu1 %vm487_vm0, %v18653_v44  ;;  %v19785_v44 = vld [vmem:[#allocation61_spill] sm:$0xff] }
 0x94d   : > { %14486 = vmatmul.mubr.msk.bf16.gmra.mrb[28].mxu1 %vm487_vm0, %v18986_v58 }
 0x94e   : > { %14491 = vmatprep.mubr.msk.bf16.mxu1 %vm487_vm0, %v18658_v6  ;;  %v19786_v6 = vld [vmem:[#allocation62_spill] sm:$0xff] }
 0x955   : > { %14492 = vmatmul.mubr.msk.bf16.vlgmr.msra.gmra.mrb[0].mxu1 %vm487_vm0, %v18662_v49  ;;  %v19787_v49 = vld [vmem:[#allocation63_spill] sm:$0xff] }
 0x956   : > { %14524 = vmatpush3.bf16.msra.mxu1 %v9663_v54  ;;  %14495 = vmatprep.mubr.msk.bf16.mxu1 %vm487_vm0, %v18672_v3  ;;  %v19788_v3 = vld [vmem:[#allocation64_spill] sm:$0xff] }
 0x957   : > { %15912 = vmatprep.subr.msk.bf16.mxu1 %vm908_vm2, %v9859_v25  ;;  %v10114_v54 = vld [vmem:[#allocation2 + $0x98] sm:$0xff]  ;;  %v10173_v25 = vpack.c.bf16 %v10112_v63, %v10111_v57  ;;  %v10706_v57 = vld [vmem:[#allocation2 + $0xc1] sm:$0xff] }
 0x958   : > { %v10174_v56 = vpack.c.bf16 %v10114_v54, %v10113_v18  ;;  %v10705_v63 = vld [vmem:[#allocation2 + $0xb1] sm:$0xff]  ;;  %v10707_v54 = vld [vmem:[#allocation2 + $0xc9] sm:$0xff] }
 0x95d   : > { %14496 = vmatmul.mubr.msk.bf16.gmra.mrb[4].mxu1 %vm487_vm0, %v18674_v42  ;;  %v19789_v42 = vld [vmem:[#allocation66_spill] sm:$0xff] }
 0x95e   : > { %14499 = vmatprep.mubr.msk.bf16.mxu1 %vm487_vm0, %v18680_v39  ;;  %v19790_v39 = vld [vmem:[#allocation67_spill] sm:$0xff] }
 0x965   : > { %14500 = vmatmul.mubr.msk.bf16.gmra.mrb[8].mxu1 %vm487_vm0, %v18682_v7  ;;  %v9546_v7 = vld [vmem:[#allocation2 + $0x182] sm:$0xff] }
 0x966   : > { %14503 = vmatprep.mubr.msk.bf16.mxu1 %vm487_vm0, %v18688_v41  ;;  %v9547_v41 = vld [vmem:[#allocation2 + $0x18a] sm:$0xff] }
 0x96d   : > { %14504 = vmatmul.mubr.msk.bf16.gmra.mrb[12].mxu1 %vm487_vm0, %v18690_v36  ;;  %v19058_v36 = vpack.c.bf16 %v9547_v41, %v9546_v7  ;;  %v10124_v7 = vld [vmem:[#allocation2 + $0x110] sm:$0xff]  ;;  %v10125_v41 = vld [vmem:[#allocation2 + $0x120] sm:$0xff] }
 0x96e   : > { %14507 = vmatprep.mubr.msk.bf16.mxu1 %vm487_vm0, %v18696_v46  ;;  %v10253_v46 = vsel %vm908_vm2, %v10203_v33, 0 }
 0x975   : > { %14508 = vmatmul.mubr.msk.bf16.gmra.mrb[16].mxu1 %vm487_vm0, %v18698_v52  ;;  %v10449_v52 = vld [vmem:[#allocation15 + $0xc] sm:$0x3] }
 0x976   : > { %14511 = vmatprep.mubr.msk.bf16.mxu1 %vm487_vm0, %v18704_v61  ;;  %v19791_v61 = vld [vmem:[#allocation68_spill] sm:$0xff]  ;;  %v10499_v62 = vsel %vm908_vm2, %v10449_v52, 0 }
 0x97d   : > { %14512 = vmatmul.mubr.msk.bf16.gmra.mrb[20].mxu1 %vm487_vm0, %v18706_v17  ;;  %v19792_v17 = vld [vmem:[#allocation69_spill] sm:$0xff] }
 0x97e   : > { %14515 = vmatprep.mubr.msk.bf16.mxu1 %vm487_vm0, %v18712_v20  ;;  %v19793_v20 = vld [vmem:[#allocation70_spill] sm:$0xff] }
 0x985   : > { %14516 = vmatmul.mubr.msk.bf16.gmra.mrb[24].mxu1 %vm487_vm0, %v18714_v37  ;;  %v19794_v37 = vld [vmem:[#allocation71_spill] sm:$0xff] }
 0x986   : > { %14519 = vmatprep.mubr.msk.bf16.mxu1 %vm487_vm0, %v18720_v45  ;;  %v19795_v45 = vld [vmem:[#allocation72_spill] sm:$0xff] }
 0x98d   : > { %14520 = vmatmul.mubr.msk.bf16.gmra.mrb[28].mxu1 %vm487_vm0, %v19022_v40 }
 0x98e   : > { %14525 = vmatprep.mubr.msk.bf16.mxu1 %vm487_vm0, %v18725_v35  ;;  %v19796_v35 = vld [vmem:[#allocation73_spill] sm:$0xff] }
 0x995   : > { %14526 = vmatmul.mubr.msk.bf16.vlgmr.msra.gmra.mrb[0].mxu1 %vm487_vm0, %v18729_v55  ;;  %v19797_v55 = vld [vmem:[#allocation74_spill] sm:$0xff] }
 0x996   : > { %14558 = vmatpush3.bf16.msra.mxu1 %v9909_v11  ;;  %14529 = vmatprep.mubr.msk.bf16.mxu1 %vm487_vm0, %v18739_v26  ;;  %v19798_v26 = vld [vmem:[#allocation75_spill] sm:$0xff] }
 0x997   : > { %15913 = vmatprep.subr.msk.bf16.mxu1 %vm908_vm2, %v10203_v33  ;;  %v10116_v11 = vld [vmem:[#allocation2 + $0xb0] sm:$0xff]  ;;  %v10117_v33 = vld [vmem:[#allocation2 + $0xc0] sm:$0xff] }
 0x99d   : > { %14530 = vmatmul.mubr.msk.bf16.gmra.mrb[4].mxu1 %vm487_vm0, %v18741_v38  ;;  %v19799_v38 = vld [vmem:[#allocation76_spill] sm:$0xff] }
 0x99e   : > { %14533 = vmatprep.mubr.msk.bf16.mxu1 %vm487_vm0, %v19781_v27  ;;  %v10118_v27 = vld [vmem:[#allocation2 + $0xc8] sm:$0xff] }
 0x9a5   : > { %14534 = vmatmul.mubr.msk.bf16.gmra.mrb[8].mxu1 %vm487_vm0, %v19782_v13  ;;  %v10175_v13 = vpack.c.bf16 %v10116_v11, %v10115_v14  ;;  %v10710_v14 = vld [vmem:[#allocation2 + $0xf1] sm:$0xff]  ;;  %v10709_v11 = vld [vmem:[#allocation2 + $0xe1] sm:$0xff] }
 0x9a6   : > { %14537 = vmatprep.mubr.msk.bf16.mxu1 %vm487_vm0, %v19783_v34  ;;  %v10176_v34 = vpack.c.bf16 %v10118_v27, %v10117_v33  ;;  %v10711_v27 = vld [vmem:[#allocation2 + $0xf9] sm:$0xff] }
 0x9ad   : > { %14538 = vmatmul.mubr.msk.bf16.gmra.mrb[12].mxu1 %vm487_vm0, %v19784_v22  ;;  %v10119_v22 = vld [vmem:[#allocation2 + $0xd8] sm:$0xff] }
 0x9ae   : > { %14541 = vmatprep.mubr.msk.bf16.mxu1 %vm487_vm0, %v19785_v44  ;;  %v10120_v44 = vld [vmem:[#allocation2 + $0xe0] sm:$0xff] }
 0x9b5   : > { %14542 = vmatmul.mubr.msk.bf16.gmra.mrb[16].mxu1 %vm487_vm0, %v19786_v6  ;;  %v10121_v6 = vld [vmem:[#allocation2 + $0xf0] sm:$0xff] }
 0x9b6   : > { %14545 = vmatprep.mubr.msk.bf16.mxu1 %vm487_vm0, %v19787_v49  ;;  %v10122_v49 = vld [vmem:[#allocation2 + $0xf8] sm:$0xff] }
 0x9bd   : > { %14546 = vmatmul.mubr.msk.bf16.gmra.mrb[20].mxu1 %vm487_vm0, %v19788_v3  ;;  %v10177_v3 = vpack.c.bf16 %v10120_v44, %v10119_v22  ;;  %v10714_v22 = vld [vmem:[#allocation2 + $0x121] sm:$0xff]  ;;  %v10713_v44 = vld [vmem:[#allocation2 + $0x111] sm:$0xff] }
 0x9be   : > { %14549 = vmatprep.mubr.msk.bf16.mxu1 %vm487_vm0, %v19789_v42  ;;  %v10178_v42 = vpack.c.bf16 %v10122_v49, %v10121_v6  ;;  %v10715_v49 = vld [vmem:[#allocation2 + $0x129] sm:$0xff] }
 0x9c5   : > { %14550 = vmatmul.mubr.msk.bf16.gmra.mrb[24].mxu1 %vm487_vm0, %v19790_v39  ;;  %v10123_v39 = vld [vmem:[#allocation2 + $0x108] sm:$0xff] }
 0x9c6   : > { %14553 = vmatprep.mubr.msk.bf16.mxu1 %vm487_vm0, %v18787_v53  ;;  %v9578_v53 = vld [vmem:[#allocation3 + $0x182] sm:$0xff] }
 0x9c7   : > { %v19094_v5 = vpack.c.bf16 %v9579_v30, %v9578_v53 }
 0x9cd   : > { %14554 = vmatmul.mubr.msk.bf16.gmra.mrb[28].mxu1 %vm487_vm0, %v19058_v36 }
 0x9ce   : > { %14559 = vmatprep.mubr.msk.bf16.mxu1 %vm487_vm0, %v18792_v15  ;;  %v10105_v15 = vld [vmem:[#allocation2 + $0x30] sm:$0xff] }
 0x9cf   : > { %v10170_v8 = vpack.c.bf16 %v10106_v19, %v10105_v15  ;;  %v10135_v15 = vld [vmem:[#allocation2 + $0x198] sm:$0xff]  ;;  %v10136_v19 = vld [vmem:[#allocation2 + $0x1a0] sm:$0xff] }
 0x9d0   : > { %v10185_v30 = vpack.c.bf16 %v10136_v19, %v10135_v15  ;;  %v10731_v15 = vld [vmem:[#allocation3 + $0x69] sm:$0xff] }
 0x9d1   : > { %v10728_v19 = vld [vmem:[#allocation3 + $0x49] sm:$0xff] }
 0x9d5   : > { %14560 = vmatmul.mubr.msk.bf16.vlgmr.msra.gmra.mrb[0].mxu1 %vm487_vm0, %v19791_v61 }
 0x9d6   : > { %14592 = vmatpush3.bf16.msra.mxu1 %v10253_v46  ;;  %14563 = vmatprep.mubr.msk.bf16.mxu1 %vm487_vm0, %v19792_v17  ;;  %v10126_v46 = vld [vmem:[#allocation2 + $0x128] sm:$0xff]  ;;  %v10127_v17 = vld [vmem:[#allocation2 + $0x138] sm:$0xff] }
 0x9d7   : > { %15914 = vmatprep.subr.msk.bf16.mxu1 %vm908_vm2, %v10449_v52  ;;  %v10179_v52 = vpack.c.bf16 %v10124_v7, %v10123_v39  ;;  %v10180_v61 = vpack.c.bf16 %v10126_v46, %v10125_v41  ;;  %v10718_v39 = vld [vmem:[#allocation2 + $0x151] sm:$0xff]  ;;  %v10717_v7 = vld [vmem:[#allocation2 + $0x141] sm:$0xff]  ;;  %v10719_v46 = vld [vmem:[#allocation2 + $0x159] sm:$0xff] }
 0x9dd   : > { %14564 = vmatmul.mubr.msk.bf16.gmra.mrb[4].mxu1 %vm487_vm0, %v19793_v20  ;;  %v10128_v20 = vld [vmem:[#allocation2 + $0x140] sm:$0xff] }
 0x9de   : > { %14567 = vmatprep.mubr.msk.bf16.mxu1 %vm487_vm0, %v19794_v37  ;;  %v10129_v37 = vld [vmem:[#allocation2 + $0x150] sm:$0xff] }
 0x9e5   : > { %14568 = vmatmul.mubr.msk.bf16.gmra.mrb[8].mxu1 %vm487_vm0, %v19795_v45  ;;  %v10130_v45 = vld [vmem:[#allocation2 + $0x158] sm:$0xff] }
 0x9e6   : > { %14571 = vmatprep.mubr.msk.bf16.mxu1 %vm487_vm0, %v19796_v35  ;;  %v10181_v35 = vpack.c.bf16 %v10128_v20, %v10127_v17  ;;  %v10721_v17 = vld [vmem:[#allocation2 + $0x171] sm:$0xff] }
 0x9ed   : > { %14572 = vmatmul.mubr.msk.bf16.gmra.mrb[12].mxu1 %vm487_vm0, %v19797_v55  ;;  %v10182_v55 = vpack.c.bf16 %v10130_v45, %v10129_v37  ;;  %v10724_v37 = vld [vmem:[#allocation2 + $0x199] sm:$0xff]  ;;  %v10725_v45 = vld [vmem:[#allocation2 + $0x1a1] sm:$0xff] }
 0x9ee   : > { %14575 = vmatprep.mubr.msk.bf16.mxu1 %vm487_vm0, %v19798_v26  ;;  %v10131_v26 = vld [vmem:[#allocation2 + $0x168] sm:$0xff] }
 0x9f5   : > { %14576 = vmatmul.mubr.msk.bf16.gmra.mrb[16].mxu1 %vm487_vm0, %v19799_v38  ;;  %v10132_v38 = vld [vmem:[#allocation2 + $0x170] sm:$0xff] }
 0x9f6   : > { %14579 = vmatprep.mubr.msk.bf16.mxu1 %vm487_vm0, %v18835_v48  ;;  %v10107_v48 = vld [vmem:[#allocation2 + $0x48] sm:$0xff]  ;;  %v10183_v53 = vpack.c.bf16 %v10132_v38, %v10131_v26 }
 0x9f7   : > { %v10726_v26 = vld [vmem:[#allocation3 + $0x31] sm:$0xff] }
 0x9fd   : > { %14580 = vmatmul.mubr.msk.bf16.gmra.mrb[20].mxu1 %vm487_vm0, %v18837_v2  ;;  %v10108_v2 = vld [vmem:[#allocation2 + $0x50] sm:$0xff] }
 0x9fe   : > { %14583 = vmatprep.mubr.msk.bf16.mxu1 %vm487_vm0, %v18843_v51  ;;  %v10109_v51 = vld [vmem:[#allocation2 + $0x60] sm:$0xff] }
 0xa05   : > { %14584 = vmatmul.mubr.msk.bf16.gmra.mrb[24].mxu1 %vm487_vm0, %v18845_v0  ;;  %v10171_v0 = vpack.c.bf16 %v10108_v2, %v10107_v48  ;;  %v11037_v48 = vld [vmem:[#allocation15 + $0xe] sm:$0x3]  ;;  %v11379_v2 = vld [vmem:[#allocation13 + $0x10] sm:$0x3] }
 0xa06   : > { %14587 = vmatprep.mubr.msk.bf16.mxu1 %vm487_vm0, %v18851_v31  ;;  %v10172_v31 = vpack.c.bf16 %v10110_v60, %v10109_v51  ;;  %v10702_v51 = vld [vmem:[#allocation2 + $0x91] sm:$0xff]  ;;  %v10701_v60 = vld [vmem:[#allocation2 + $0x81] sm:$0xff] }
 0xa0d   : > { %14588 = vmatmul.mubr.msk.bf16.gmra.mrb[28].mxu1 %vm487_vm0, %v19094_v5 }
 0xa0e   : > { %14593 = vmatprep.mubr.msk.bf16.mxu1 %vm487_vm0, %v10170_v8  ;;  %v10841_v8 = vsel %vm908_vm2, %v10791_v4, 0 }
 0xa15   : > { %14594 = vmatmul.mubr.msk.bf16.vlgmr.msra.gmra.mrb[0].mxu1 %vm487_vm0, %v10171_v0 }
 0xa16   : > { %14626 = vmatpush3.bf16.msra.mxu1 %v10499_v62  ;;  %14597 = vmatprep.mubr.msk.bf16.mxu1 %vm487_vm0, %v10172_v31  ;;  %v10703_v62 = vld [vmem:[#allocation2 + $0x99] sm:$0xff] }
 0xa17   : > { %15915 = vmatprep.subr.msk.bf16.mxu1 %vm908_vm2, %v10791_v4  ;;  %v10762_v31 = vpack.c.bf16 %v10703_v62, %v10702_v51  ;;  %v10704_v4 = vld [vmem:[#allocation2 + $0xa9] sm:$0xff]  ;;  %v10745_v62 = vld [vmem:[#allocation3 + $0x111] sm:$0xff] }
 0xa18   : > { %v10763_v18 = vpack.c.bf16 %v10705_v63, %v10704_v4  ;;  %v10744_v4 = vld [vmem:[#allocation3 + $0x109] sm:$0xff]  ;;  %v10746_v63 = vld [vmem:[#allocation3 + $0x121] sm:$0xff] }
 0xa1d   : > { %14598 = vmatmul.mubr.msk.bf16.gmra.mrb[4].mxu1 %vm487_vm0, %v10173_v25  ;;  %v10764_v25 = vpack.c.bf16 %v10707_v54, %v10706_v57  ;;  %v10783_v57 = vpack.c.bf16 %v10745_v62, %v10744_v4  ;;  %v10749_v54 = vld [vmem:[#allocation3 + $0x141] sm:$0xff]  ;;  %v11313_v62 = vld [vmem:[#allocation2 + $0x1a2] sm:$0xff] }
 0xa1e   : > { %14601 = vmatprep.mubr.msk.bf16.mxu1 %vm487_vm0, %v10174_v56  ;;  %v10708_v56 = vld [vmem:[#allocation2 + $0xd9] sm:$0xff]  ;;  %v11314_v4 = vld [vmem:[#allocation3 + $0x32] sm:$0xff] }
 0xa1f   : > { %v10765_v33 = vpack.c.bf16 %v10709_v11, %v10708_v56  ;;  %v10748_v56 = vld [vmem:[#allocation3 + $0x139] sm:$0xff]  ;;  %v10750_v11 = vld [vmem:[#allocation3 + $0x151] sm:$0xff] }
 0xa25   : > { %14602 = vmatmul.mubr.msk.bf16.gmra.mrb[8].mxu1 %vm487_vm0, %v10175_v13  ;;  %v10766_v13 = vpack.c.bf16 %v10711_v27, %v10710_v14  ;;  %v10785_v14 = vpack.c.bf16 %v10749_v54, %v10748_v56  ;;  %v10753_v27 = vld [vmem:[#allocation3 + $0x171] sm:$0xff] }
 0xa26   : > { %14605 = vmatprep.mubr.msk.bf16.mxu1 %vm487_vm0, %v10176_v34  ;;  %v10712_v34 = vld [vmem:[#allocation2 + $0x109] sm:$0xff]  ;;  %v11319_v56 = vld [vmem:[#allocation3 + $0x6a] sm:$0xff] }
 0xa27   : > { %v10767_v6 = vpack.c.bf16 %v10713_v44, %v10712_v34  ;;  %v10757_v44 = vld [vmem:[#allocation3 + $0x1a1] sm:$0xff]  ;;  %v11317_v54 = vld [vmem:[#allocation3 + $0x52] sm:$0xff] }
 0xa2d   : > { %14606 = vmatmul.mubr.msk.bf16.gmra.mrb[12].mxu1 %vm487_vm0, %v10177_v3  ;;  %v10768_v3 = vpack.c.bf16 %v10715_v49, %v10714_v22  ;;  %v10756_v22 = vld [vmem:[#allocation3 + $0x199] sm:$0xff]  ;;  %v11282_v49 = vld [vmem:[#allocation2 + $0x32] sm:$0xff] }
 0xa2e   : > { %14609 = vmatprep.mubr.msk.bf16.mxu1 %vm487_vm0, %v10178_v42  ;;  %v10716_v42 = vld [vmem:[#allocation2 + $0x139] sm:$0xff] }
 0xa2f   : > { %v10769_v41 = vpack.c.bf16 %v10717_v7, %v10716_v42  ;;  %v11286_v7 = vld [vmem:[#allocation2 + $0x62] sm:$0xff] }
 0xa35   : > { %14610 = vmatmul.mubr.msk.bf16.gmra.mrb[16].mxu1 %vm487_vm0, %v10179_v52  ;;  %v10770_v52 = vpack.c.bf16 %v10719_v46, %v10718_v39  ;;  %v11284_v39 = vld [vmem:[#allocation2 + $0x4a] sm:$0xff] }
 0xa36   : > { %14613 = vmatprep.mubr.msk.bf16.mxu1 %vm487_vm0, %v10180_v61  ;;  %v10720_v61 = vld [vmem:[#allocation2 + $0x169] sm:$0xff] }
 0xa37   : > { %v10771_v20 = vpack.c.bf16 %v10721_v17, %v10720_v61  ;;  %v11287_v61 = vld [vmem:[#allocation2 + $0x6a] sm:$0xff] }
 0xa38   : > { %v11348_v17 = vpack.c.bf16 %v11287_v61, %v11286_v7  ;;  %v11328_v7 = vld [vmem:[#allocation3 + $0xda] sm:$0xff] }
 0xa3d   : > { %14614 = vmatmul.mubr.msk.bf16.gmra.mrb[20].mxu1 %vm487_vm0, %v10181_v35  ;;  %v10773_v35 = vpack.c.bf16 %v10725_v45, %v10724_v37  ;;  %v11289_v37 = vld [vmem:[#allocation2 + $0x82] sm:$0xff] }
 0xa3e   : > { %14617 = vmatprep.mubr.msk.bf16.mxu1 %vm487_vm0, %v10182_v55  ;;  %v10727_v55 = vld [vmem:[#allocation3 + $0x39] sm:$0xff] }
 0xa3f   : > { %v10774_v38 = vpack.c.bf16 %v10727_v55, %v10726_v26  ;;  %v11292_v26 = vld [vmem:[#allocation2 + $0xaa] sm:$0xff] }
 0xa45   : > { %14618 = vmatmul.mubr.msk.bf16.gmra.mrb[24].mxu1 %vm487_vm0, %v10183_v53  ;;  %v10729_v53 = vld [vmem:[#allocation3 + $0x51] sm:$0xff] }
 0xa46   : > { %14621 = vmatprep.mubr.msk.bf16.mxu1 %vm487_vm0, %v18887_v50  ;;  %v19800_v50 = vld [vmem:[#allocation77_spill] sm:$0xff] }
 0xa4d   : > { %14622 = vmatmul.mubr.msk.bf16.gmra.mrb[28].mxu1 %vm487_vm0, %v10185_v30  ;;  %v10775_v30 = vpack.c.bf16 %v10729_v53, %v10728_v19  ;;  %v11293_v53 = vld [vmem:[#allocation2 + $0xb2] sm:$0xff]  ;;  %v11295_v19 = vld [vmem:[#allocation2 + $0xca] sm:$0xff] }
 0xa4e   : > { %14627 = vmatprep.mubr.msk.bf16.mxu1 %vm487_vm0, %v18892_v47  ;;  %v10168_v47 = vld [vmem:[#allocation3 + $0x198] sm:$0xff] }
 0xa55   : > { %14628 = vmatmul.mubr.msk.bf16.vlgmr.msra.gmra.mrb[0].mxu1 %vm487_vm0, %v18895_v29  ;;  %v10169_v29 = vld [vmem:[#allocation3 + $0x1a0] sm:$0xff] }
 0xa56   : > { %14660 = vmatpush3.bf16.msra.mxu1 %v10841_v8  ;;  %14631 = vmatprep.mubr.msk.bf16.mxu1 %vm487_vm0, %v18902_v28  ;;  %v10201_v28 = vpack.c.bf16 %v10169_v29, %v10168_v47  ;;  %v11429_v8 = vsel %vm908_vm2, %v11379_v2, 0  ;;  %v11625_v47 = vld [vmem:[#allocation15 + $0x10] sm:$0x3] }
 0xa57   : > { %15916 = vmatprep.subr.msk.bf16.mxu1 %vm908_vm2, %v11037_v48  ;;  %v10735_v29 = vld [vmem:[#allocation3 + $0x99] sm:$0xff] }
 0xa5d   : > { %14632 = vmatmul.mubr.msk.bf16.gmra.mrb[4].mxu1 %vm487_vm0, %v18904_v43  ;;  %v10694_v43 = vld [vmem:[#allocation2 + $0x31] sm:$0xff] }
 0xa5e   : > { %14635 = vmatprep.mubr.msk.bf16.mxu1 %vm487_vm0, %v18910_v16  ;;  %v10695_v16 = vld [vmem:[#allocation2 + $0x39] sm:$0xff] }
 0xa65   : > { %14636 = vmatmul.mubr.msk.bf16.gmra.mrb[8].mxu1 %vm487_vm0, %v18912_v59  ;;  %v10758_v59 = vpack.c.bf16 %v10695_v16, %v10694_v43  ;;  %v10734_v16 = vld [vmem:[#allocation3 + $0x91] sm:$0xff] }
 0xa66   : > { %14639 = vmatprep.mubr.msk.bf16.mxu1 %vm487_vm0, %v18918_v21  ;;  %v10696_v21 = vld [vmem:[#allocation2 + $0x49] sm:$0xff] }
 0xa6d   : > { %14640 = vmatmul.mubr.msk.bf16.gmra.mrb[12].mxu1 %vm487_vm0, %v18920_v24  ;;  %v10698_v24 = vld [vmem:[#allocation2 + $0x61] sm:$0xff] }
 0xa6e   : > { %14643 = vmatprep.mubr.msk.bf16.mxu1 %vm487_vm0, %v18926_v32  ;;  %v10697_v32 = vld [vmem:[#allocation2 + $0x51] sm:$0xff] }
 0xa75   : > { %14644 = vmatmul.mubr.msk.bf16.gmra.mrb[16].mxu1 %vm487_vm0, %v19800_v50 }
 0xa76   : > { %14647 = vmatprep.mubr.msk.bf16.mxu1 %vm487_vm0, %v18934_v9  ;;  %v10759_v9 = vpack.c.bf16 %v10697_v32, %v10696_v21  ;;  %v10737_v21 = vld [vmem:[#allocation3 + $0xb1] sm:$0xff]  ;;  %v10736_v32 = vld [vmem:[#allocation3 + $0xa9] sm:$0xff] }
 0xa7d   : > { %14648 = vmatmul.mubr.msk.bf16.gmra.mrb[20].mxu1 %vm487_vm0, %v18936_v10  ;;  %v11087_v10 = vsel %vm908_vm2, %v11037_v48, 0  ;;  %v10730_v48 = vld [vmem:[#allocation3 + $0x61] sm:$0xff] }
 0xa7e   : > { %14651 = vmatprep.mubr.msk.bf16.mxu1 %vm487_vm0, %v18942_v23  ;;  %v10776_v50 = vpack.c.bf16 %v10731_v15, %v10730_v48  ;;  %v11351_v15 = vpack.c.bf16 %v11293_v53, %v11292_v26  ;;  %v11298_v48 = vld [vmem:[#allocation2 + $0xf2] sm:$0xff]  ;;  %v11336_v26 = vld [vmem:[#allocation3 + $0x13a] sm:$0xff]  ;;  %v11338_v53 = vld [vmem:[#allocation3 + $0x152] sm:$0xff] }
 0xa85   : > { %14652 = vmatmul.mubr.msk.bf16.gmra.mrb[24].mxu1 %vm487_vm0, %v18944_v1  ;;  %v10699_v1 = vld [vmem:[#allocation2 + $0x69] sm:$0xff] }
 0xa86   : > { %14655 = vmatprep.mubr.msk.bf16.mxu1 %vm487_vm0, %v18950_v12  ;;  %v10760_v23 = vpack.c.bf16 %v10699_v1, %v10698_v24  ;;  %v10700_v12 = vld [vmem:[#allocation2 + $0x79] sm:$0xff] }
 0xa87   : > { %v10761_v0 = vpack.c.bf16 %v10701_v60, %v10700_v12  ;;  %v10739_v24 = vld [vmem:[#allocation3 + $0xc9] sm:$0xff]  ;;  %v10740_v12 = vld [vmem:[#allocation3 + $0xd9] sm:$0xff]  ;;  %v10742_v60 = vld [vmem:[#allocation3 + $0xf1] sm:$0xff] }
 0xa8d   : > { %14656 = vmatmul.mubr.msk.bf16.gmra.mrb[28].mxu1 %vm487_vm0, %v10201_v28  ;;  %v10732_v28 = vld [vmem:[#allocation3 + $0x79] sm:$0xff] }
 0xa8e   : > { %14661 = vmatprep.mubr.msk.bf16.mxu1 %vm487_vm0, %v10758_v59  ;;  %v10778_v59 = vpack.c.bf16 %v10735_v29, %v10734_v16  ;;  %v11301_v16 = vld [vmem:[#allocation2 + $0x112] sm:$0xff] }
 0xa95   : > { %14662 = vmatmul.mubr.msk.bf16.vlgmr.msra.gmra.mrb[0].mxu1 %vm487_vm0, %v10759_v9  ;;  %v10779_v9 = vpack.c.bf16 %v10737_v21, %v10736_v32  ;;  %v11303_v21 = vld [vmem:[#allocation2 + $0x12a] sm:$0xff]  ;;  %v11304_v32 = vld [vmem:[#allocation2 + $0x13a] sm:$0xff] }
 0xa96   : > { %14694 = vmatpush3.bf16.msra.mxu1 %v11087_v10  ;;  %14665 = vmatprep.mubr.msk.bf16.mxu1 %vm487_vm0, %v10760_v23  ;;  %v10738_v10 = vld [vmem:[#allocation3 + $0xc1] sm:$0xff] }
 0xa97   : > { %15917 = vmatprep.subr.msk.bf16.mxu1 %vm908_vm2, %v11379_v2  ;;  %v10780_v1 = vpack.c.bf16 %v10739_v24, %v10738_v10  ;;  %v10741_v23 = vld [vmem:[#allocation3 + $0xe1] sm:$0xff]  ;;  %v10743_v2 = vld [vmem:[#allocation3 + $0xf9] sm:$0xff] }
 0xa98   : > { %v10781_v51 = vpack.c.bf16 %v10741_v23, %v10740_v12  ;;  %v11305_v10 = vld [vmem:[#allocation2 + $0x142] sm:$0xff]  ;;  %v11307_v23 = vld [vmem:[#allocation2 + $0x15a] sm:$0xff]  ;;  %v11308_v12 = vld [vmem:[#allocation2 + $0x16a] sm:$0xff] }
 0xa9d   : > { %14666 = vmatmul.mubr.msk.bf16.gmra.mrb[4].mxu1 %vm487_vm0, %v10761_v0  ;;  %v10782_v0 = vpack.c.bf16 %v10743_v2, %v10742_v60 }
 0xa9e   : > { %14669 = vmatprep.mubr.msk.bf16.mxu1 %vm487_vm0, %v10762_v31  ;;  %v10747_v31 = vld [vmem:[#allocation3 + $0x129] sm:$0xff] }
 0xaa5   : > { %14670 = vmatmul.mubr.msk.bf16.gmra.mrb[8].mxu1 %vm487_vm0, %v10763_v18  ;;  %v10784_v18 = vpack.c.bf16 %v10747_v31, %v10746_v63 }
 0xaa6   : > { %14673 = vmatprep.mubr.msk.bf16.mxu1 %vm487_vm0, %v10764_v25  ;;  %v10751_v25 = vld [vmem:[#allocation3 + $0x159] sm:$0xff] }
 0xaad   : > { %14674 = vmatmul.mubr.msk.bf16.gmra.mrb[12].mxu1 %vm487_vm0, %v10765_v33  ;;  %v10786_v33 = vpack.c.bf16 %v10751_v25, %v10750_v11  ;;  %v11318_v25 = vld [vmem:[#allocation3 + $0x62] sm:$0xff] }
 0xaae   : > { %14677 = vmatprep.mubr.msk.bf16.mxu1 %vm487_vm0, %v10766_v13  ;;  %v10752_v13 = vld [vmem:[#allocation3 + $0x169] sm:$0xff]  ;;  %v11364_v11 = vpack.c.bf16 %v11319_v56, %v11318_v25 }
 0xaaf   : > { %v10787_v34 = vpack.c.bf16 %v10753_v27, %v10752_v13  ;;  %v11322_v27 = vld [vmem:[#allocation3 + $0x92] sm:$0xff]  ;;  %v11323_v13 = vld [vmem:[#allocation3 + $0x9a] sm:$0xff] }
 0xab5   : > { %14678 = vmatmul.mubr.msk.bf16.gmra.mrb[16].mxu1 %vm487_vm0, %v10767_v6  ;;  %v10789_v6 = vpack.c.bf16 %v10757_v44, %v10756_v22  ;;  %v11366_v22 = vpack.c.bf16 %v11323_v13, %v11322_v27  ;;  %v11324_v44 = vld [vmem:[#allocation3 + $0xaa] sm:$0xff] }
 0xab6   : > { %14681 = vmatprep.mubr.msk.bf16.mxu1 %vm487_vm0, %v10768_v3  ;;  %v11283_v3 = vld [vmem:[#allocation2 + $0x3a] sm:$0xff] }
 0xab7   : > { %v11346_v42 = vpack.c.bf16 %v11283_v3, %v11282_v49  ;;  %v11326_v49 = vld [vmem:[#allocation3 + $0xc2] sm:$0xff]  ;;  %v11327_v3 = vld [vmem:[#allocation3 + $0xca] sm:$0xff] }
 0xabd   : > { %14682 = vmatmul.mubr.msk.bf16.gmra.mrb[20].mxu1 %vm487_vm0, %v10769_v41  ;;  %v11285_v41 = vld [vmem:[#allocation2 + $0x52] sm:$0xff] }
 0xabe   : > { %14685 = vmatprep.mubr.msk.bf16.mxu1 %vm487_vm0, %v10770_v52  ;;  %v11347_v46 = vpack.c.bf16 %v11285_v41, %v11284_v39  ;;  %v11675_v52 = vsel %vm908_vm2, %v11625_v47, 0  ;;  %v11368_v39 = vpack.c.bf16 %v11327_v3, %v11326_v49  ;;  %v11329_v41 = vld [vmem:[#allocation3 + $0xe2] sm:$0xff] }
 0xabf   : > { %v11369_v61 = vpack.c.bf16 %v11329_v41, %v11328_v7 }
 0xac5   : > { %14686 = vmatmul.mubr.msk.bf16.gmra.mrb[24].mxu1 %vm487_vm0, %v10771_v20  ;;  %v11290_v20 = vld [vmem:[#allocation2 + $0x92] sm:$0xff] }
 0xac6   : > { %14689 = vmatprep.mubr.msk.bf16.mxu1 %vm487_vm0, %v18986_v58  ;;  %v10733_v58 = vld [vmem:[#allocation3 + $0x81] sm:$0xff] }
 0xac7   : > { %v10777_v43 = vpack.c.bf16 %v10733_v58, %v10732_v28  ;;  %v11299_v58 = vld [vmem:[#allocation2 + $0xfa] sm:$0xff]  ;;  %v11300_v28 = vld [vmem:[#allocation2 + $0x10a] sm:$0xff] }
 0xac8   : > { %v11354_v29 = vpack.c.bf16 %v11299_v58, %v11298_v48  ;;  %v11341_v48 = vld [vmem:[#allocation3 + $0x172] sm:$0xff]  ;;  %v11345_v58 = vld [vmem:[#allocation3 + $0x1a2] sm:$0xff] }
 0xacd   : > { %14690 = vmatmul.mubr.msk.bf16.gmra.mrb[28].mxu1 %vm487_vm0, %v10773_v35  ;;  %v11291_v35 = vld [vmem:[#allocation2 + $0x9a] sm:$0xff] }
 0xace   : > { %14695 = vmatprep.mubr.msk.bf16.mxu1 %vm487_vm0, %v10774_v38  ;;  %v11350_v55 = vpack.c.bf16 %v11291_v35, %v11290_v20  ;;  %v11294_v38 = vld [vmem:[#allocation2 + $0xc2] sm:$0xff] }
 0xacf   : > { %v11333_v20 = vld [vmem:[#allocation3 + $0x112] sm:$0xff] }
 0xad5   : > { %14696 = vmatmul.mubr.msk.bf16.vlgmr.msra.gmra.mrb[0].mxu1 %vm487_vm0, %v10775_v30  ;;  %v11352_v30 = vpack.c.bf16 %v11295_v19, %v11294_v38  ;;  %v11337_v38 = vld [vmem:[#allocation3 + $0x142] sm:$0xff] }
 0xad6   : > { %14728 = vmatpush3.bf16.msra.mxu1 %v11429_v8  ;;  %14699 = vmatprep.mubr.msk.bf16.mxu1 %vm487_vm0, %v10776_v50  ;;  %v11296_v8 = vld [vmem:[#allocation2 + $0xda] sm:$0xff]  ;;  %v11297_v50 = vld [vmem:[#allocation2 + $0xe2] sm:$0xff]  ;;  %v11373_v19 = vpack.c.bf16 %v11337_v38, %v11336_v26 }
 0xad7   : > { %15918 = vmatprep.subr.msk.bf16.mxu1 %vm908_vm2, %v11625_v47  ;;  %v11353_v47 = vpack.c.bf16 %v11297_v50, %v11296_v8  ;;  %v11340_v8 = vld [vmem:[#allocation3 + $0x16a] sm:$0xff] }
 0xad8   : > { %v11375_v50 = vpack.c.bf16 %v11341_v48, %v11340_v8 }
 0xadd   : > { %14700 = vmatmul.mubr.msk.bf16.gmra.mrb[4].mxu1 %vm487_vm0, %v10777_v43  ;;  %v11302_v43 = vld [vmem:[#allocation2 + $0x122] sm:$0xff] }
 0xade   : > { %14703 = vmatprep.mubr.msk.bf16.mxu1 %vm487_vm0, %v10778_v59  ;;  %v11355_v59 = vpack.c.bf16 %v11301_v16, %v11300_v28  ;;  %v11356_v24 = vpack.c.bf16 %v11303_v21, %v11302_v43  ;;  %v19223_v28 = vld [vmem:[#allocation16] ss:$0 sm:$0xff] }
 0xae5   : > { %14704 = vmatmul.mubr.msk.bf16.gmra.mrb[8].mxu1 %vm487_vm0, %v10779_v9  ;;  %v11306_v9 = vld [vmem:[#allocation2 + $0x152] sm:$0xff] }
 0xae6   : > { %14707 = vmatprep.mubr.msk.bf16.mxu1 %vm487_vm0, %v10780_v1  ;;  %v11357_v1 = vpack.c.bf16 %v11305_v10, %v11304_v32  ;;  %v11358_v2 = vpack.c.bf16 %v11307_v23, %v11306_v9 }
 0xaed   : > { %14708 = vmatmul.mubr.msk.bf16.gmra.mrb[12].mxu1 %vm487_vm0, %v10781_v51  ;;  %v11309_v51 = vld [vmem:[#allocation2 + $0x172] sm:$0xff] }
 0xaee   : > { %14711 = vmatprep.mubr.msk.bf16.mxu1 %vm487_vm0, %v10782_v0  ;;  %v11359_v60 = vpack.c.bf16 %v11309_v51, %v11308_v12  ;;  %v11312_v0 = vld [vmem:[#allocation2 + $0x19a] sm:$0xff] }
 0xaef   : > { %v11361_v31 = vpack.c.bf16 %v11313_v62, %v11312_v0 }
 0xaf5   : > { %14712 = vmatmul.mubr.msk.bf16.gmra.mrb[16].mxu1 %vm487_vm0, %v10783_v57  ;;  %v11315_v57 = vld [vmem:[#allocation3 + $0x3a] sm:$0xff] }
 0xaf6   : > { %14715 = vmatprep.mubr.msk.bf16.mxu1 %vm487_vm0, %v10784_v18  ;;  %v11362_v63 = vpack.c.bf16 %v11315_v57, %v11314_v4  ;;  %v11316_v18 = vld [vmem:[#allocation3 + $0x4a] sm:$0xff] }
 0xafd   : > { %14716 = vmatmul.mubr.msk.bf16.gmra.mrb[20].mxu1 %vm487_vm0, %v10785_v14  ;;  %v11363_v14 = vpack.c.bf16 %v11317_v54, %v11316_v18 }
 0xafe   : > { %14719 = vmatprep.mubr.msk.bf16.mxu1 %vm487_vm0, %v10786_v33  ;;  %v11321_v33 = vld [vmem:[#allocation3 + $0x82] sm:$0xff] }
 0xb05   : > { %14720 = vmatmul.mubr.msk.bf16.gmra.mrb[24].mxu1 %vm487_vm0, %v10787_v34 }
 0xb06   : > { %14723 = vmatprep.mubr.msk.bf16.mxu1 %vm487_vm0, %v19022_v40  ;;  %v11288_v40 = vld [vmem:[#allocation2 + $0x7a] sm:$0xff] }
 0xb07   : > { %v11349_v45 = vpack.c.bf16 %v11289_v37, %v11288_v40  ;;  %v11332_v40 = vld [vmem:[#allocation3 + $0x10a] sm:$0xff]  ;;  %v11334_v37 = vld [vmem:[#allocation3 + $0x122] sm:$0xff] }
 0xb08   : > { %v11371_v35 = vpack.c.bf16 %v11333_v20, %v11332_v40 }
 0xb0d   : > { %14724 = vmatmul.mubr.msk.bf16.gmra.mrb[28].mxu1 %vm487_vm0, %v10789_v6  ;;  %v11325_v6 = vld [vmem:[#allocation3 + $0xb2] sm:$0xff] }
 0xb0e   : > { %14729 = vmatprep.mubr.msk.bf16.mxu1 %vm487_vm0, %v11346_v42  ;;  %v11367_v42 = vpack.c.bf16 %v11325_v6, %v11324_v44 }
 0xb15   : > { %14730 = vmatmul.mubr.msk.bf16.vlgmr.msra.gmra.mrb[0].mxu1 %vm487_vm0, %v11347_v46  ;;  %v11330_v46 = vld [vmem:[#allocation3 + $0xf2] sm:$0xff] }
 0xb16   : > { %14762 = vmatpush3.bf16.msra.mxu1 %v11675_v52  ;;  %14733 = vmatprep.mubr.msk.bf16.mxu1 %vm487_vm0, %v11348_v17  ;;  %v11331_v52 = vld [vmem:[#allocation3 + $0xfa] sm:$0xff] }
 0xb17   : > { %v11370_v17 = vpack.c.bf16 %v11331_v52, %v11330_v46 }
 0xb1d   : > { %14734 = vmatmul.mubr.msk.bf16.gmra.mrb[4].mxu1 %vm487_vm0, %v11349_v45  ;;  %v11335_v45 = vld [vmem:[#allocation3 + $0x12a] sm:$0xff] }
 0xb1e   : > { %14737 = vmatprep.mubr.msk.bf16.mxu1 %vm487_vm0, %v11350_v55  ;;  %v11372_v55 = vpack.c.bf16 %v11335_v45, %v11334_v37 }
 0xb25   : > { %14738 = vmatmul.mubr.msk.bf16.gmra.mrb[8].mxu1 %vm487_vm0, %v11351_v15  ;;  %v11339_v15 = vld [vmem:[#allocation3 + $0x15a] sm:$0xff] }
 0xb26   : > { %14741 = vmatprep.mubr.msk.bf16.mxu1 %vm487_vm0, %v11352_v30  ;;  %v11374_v30 = vpack.c.bf16 %v11339_v15, %v11338_v53 }
 0xb2d   : > { %14742 = vmatmul.mubr.msk.bf16.gmra.mrb[12].mxu1 %vm487_vm0, %v11353_v47  ;;  %v11344_v47 = vld [vmem:[#allocation3 + $0x19a] sm:$0xff] }
 0xb2e   : > { %14745 = vmatprep.mubr.msk.bf16.mxu1 %vm487_vm0, %v11354_v29  ;;  %v11377_v29 = vpack.c.bf16 %v11345_v58, %v11344_v47 }
 0xb35   : > { %14746 = vmatmul.mubr.msk.bf16.gmra.mrb[16].mxu1 %vm487_vm0, %v11355_v59 }
 0xb36   : > { %14749 = vmatprep.mubr.msk.bf16.mxu1 %vm487_vm0, %v11356_v24 }
 0xb3d   : > { %14750 = vmatmul.mubr.msk.bf16.gmra.mrb[20].mxu1 %vm487_vm0, %v11357_v1 }
 0xb3e   : > { %14753 = vmatprep.mubr.msk.bf16.mxu1 %vm487_vm0, %v11358_v2 }
 0xb45   : > { %14754 = vmatmul.mubr.msk.bf16.gmra.mrb[24].mxu1 %vm487_vm0, %v11359_v60 }
 0xb46   : > { %14757 = vmatprep.mubr.msk.bf16.mxu1 %vm487_vm0, %v19058_v36  ;;  %v11320_v36 = vld [vmem:[#allocation3 + $0x7a] sm:$0xff] }
 0xb47   : > { %v11365_v34 = vpack.c.bf16 %v11321_v33, %v11320_v36 }
 0xb4d   : > { %14758 = vmatmul.mubr.msk.bf16.gmra.mrb[28].mxu1 %vm487_vm0, %v11361_v31 }
 0xb4e   : > { %14763 = vmatprep.mubr.msk.bf16.mxu1 %vm487_vm0, %v11362_v63 }
 0xb55   : > { %14764 = vmatmul.mubr.msk.bf16.vlgmr.msra.gmra.mrb[0].mxu1 %vm487_vm0, %v11363_v14 }
 0xb56   : > { %14767 = vmatprep.mubr.msk.bf16.mxu1 %vm487_vm0, %v11364_v11 }
 0xb5d   : > { %14768 = vmatmul.mubr.msk.bf16.gmra.mrb[4].mxu1 %vm487_vm0, %v11365_v34 }
 0xb5e   : > { %14771 = vmatprep.mubr.msk.bf16.mxu1 %vm487_vm0, %v11366_v22 }
 0xb65   : > { %14772 = vmatmul.mubr.msk.bf16.gmra.mrb[8].mxu1 %vm487_vm0, %v11367_v42 }
 0xb66   : > { %14775 = vmatprep.mubr.msk.bf16.mxu1 %vm487_vm0, %v11368_v39 }
 0xb6d   : > { %14776 = vmatmul.mubr.msk.bf16.gmra.mrb[12].mxu1 %vm487_vm0, %v11369_v61 }
 0xb6e   : > { %14779 = vmatprep.mubr.msk.bf16.mxu1 %vm487_vm0, %v11370_v17 }
 0xb75   : > { %14780 = vmatmul.mubr.msk.bf16.gmra.mrb[16].mxu1 %vm487_vm0, %v11371_v35 }
 0xb76   : > { %14783 = vmatprep.mubr.msk.bf16.mxu1 %vm487_vm0, %v11372_v55 }
 0xb7d   : > { %14784 = vmatmul.mubr.msk.bf16.gmra.mrb[20].mxu1 %vm487_vm0, %v11373_v19 }
 0xb7e   : > { %14787 = vmatprep.mubr.msk.bf16.mxu1 %vm487_vm0, %v11374_v30 }
 0xb85   : > { %14788 = vmatmul.mubr.msk.bf16.gmra.mrb[24].mxu1 %vm487_vm0, %v11375_v50 }
 0xb86   : > { %14791 = vmatprep.mubr.msk.bf16.mxu1 %vm487_vm0, %v19094_v5 }
 0xb8d   : > { %14792 = vmatmul.mubr.msk.bf16.gmra.mrb[28].mxu1 %vm487_vm0, %v11377_v29 }
 0xc28   : > { %v14765_v43 = vpop.f32.mrb[0].mxu1 }
 0xc29   : > { %v11879_v16 = vadd.f32 %v14765_v43, %v19223_v28  ;;  %v11711_v59 = vpop.f32.mrb[1].mxu1 }
 0xc2a   : > { %v11877_v21 = vadd.f32 %v19223_v28, %v11711_v59  ;;  %v14766_v24 = vpop.f32.mrb[2].mxu1 }
 0xc2b   : > { %v11911_v32 = vmax.f32 %v11879_v16, 0.0  ;;  %v11880_v9 = vadd.f32 %v14766_v24, %v19223_v28  ;;  %v11714_v10 = vpop.f32.mrb[3].mxu1 }
 0xc2c   : > { %v11909_v5 = vmax.f32 %v11877_v21, 0.0  ;;  %v11878_v1 = vadd.f32 %v19223_v28, %v11714_v10 }
 0xc2d   : > { %11943 = vst.msk [vmem:[%s19230_s22 + $0x10] sm:$0xff] %vm487_vm0, %v11911_v32  ;;  %v11912_v23 = vmax.f32 %v11880_v9, 0.0 }
 0xc2e   : > { %11941 = vst.msk [vmem:[%s19230_s22] sm:$0xff] %vm487_vm0, %v11909_v5  ;;  %v11910_v2 = vmax.f32 %v11878_v1, 0.0 }
 0xc2f   : > { %11944 = vst.msk [vmem:[%s19230_s22 + $0x18] sm:$0xff] %vm487_vm0, %v11912_v23 }
 0xc30   : > { %11942 = vst.msk [vmem:[%s19230_s22 + $0x8] sm:$0xff] %vm487_vm0, %v11910_v2  ;;  %v14769_v12 = vpop.f32.mrb[4].mxu1 }
 0xc31   : > { %v11883_v51 = vadd.f32 %v14769_v12, %v19223_v28  ;;  %v11727_v60 = vpop.f32.mrb[5].mxu1 }
 0xc32   : > { %v11881_v0 = vadd.f32 %v19223_v28, %v11727_v60  ;;  %v14770_v62 = vpop.f32.mrb[6].mxu1 }
 0xc33   : > { %v11915_v31 = vmax.f32 %v11883_v51, 0.0  ;;  %v11884_v4 = vadd.f32 %v14770_v62, %v19223_v28  ;;  %v11730_v57 = vpop.f32.mrb[7].mxu1 }
 0xc34   : > { %v11913_v63 = vmax.f32 %v11881_v0, 0.0  ;;  %v11882_v18 = vadd.f32 %v19223_v28, %v11730_v57 }
 0xc35   : > { %11947 = vst.msk [vmem:[%s19230_s22 + $0x30] sm:$0xff] %vm487_vm0, %v11915_v31  ;;  %v11916_v54 = vmax.f32 %v11884_v4, 0.0 }
 0xc36   : > { %11945 = vst.msk [vmem:[%s19230_s22 + $0x20] sm:$0xff] %vm487_vm0, %v11913_v63  ;;  %v11914_v25 = vmax.f32 %v11882_v18, 0.0 }
 0xc37   : > { %11948 = vst.msk [vmem:[%s19230_s22 + $0x38] sm:$0xff] %vm487_vm0, %v11916_v54 }
 0xc38   : > { %11946 = vst.msk [vmem:[%s19230_s22 + $0x28] sm:$0xff] %vm487_vm0, %v11914_v25  ;;  %v14773_v56 = vpop.f32.mrb[8].mxu1 }
 0xc39   : > { %v11887_v14 = vadd.f32 %v14773_v56, %v19223_v28  ;;  %v11743_v11 = vpop.f32.mrb[9].mxu1 }
 0xc3a   : > { %v11885_v36 = vadd.f32 %v19223_v28, %v11743_v11  ;;  %v14774_v33 = vpop.f32.mrb[10].mxu1 }
 0xc3b   : > { %v11919_v27 = vmax.f32 %v11887_v14, 0.0  ;;  %v11888_v13 = vadd.f32 %v14774_v33, %v19223_v28  ;;  %v11746_v34 = vpop.f32.mrb[11].mxu1 }
 0xc3c   : > { %v11917_v22 = vmax.f32 %v11885_v36, 0.0  ;;  %v11886_v44 = vadd.f32 %v19223_v28, %v11746_v34 }
 0xc3d   : > { %11951 = vst.msk [vmem:[%s19230_s22 + $0x50] sm:$0xff] %vm487_vm0, %v11919_v27  ;;  %v11920_v6 = vmax.f32 %v11888_v13, 0.0 }
 0xc3e   : > { %11949 = vst.msk [vmem:[%s19230_s22 + $0x40] sm:$0xff] %vm487_vm0, %v11917_v22  ;;  %v11918_v49 = vmax.f32 %v11886_v44, 0.0 }
 0xc3f   : > { %11952 = vst.msk [vmem:[%s19230_s22 + $0x58] sm:$0xff] %vm487_vm0, %v11920_v6 }
 0xc40   : > { %11950 = vst.msk [vmem:[%s19230_s22 + $0x48] sm:$0xff] %vm487_vm0, %v11918_v49  ;;  %v14777_v3 = vpop.f32.mrb[12].mxu1 }
 0xc41   : > { %v11891_v42 = vadd.f32 %v14777_v3, %v19223_v28  ;;  %v11759_v39 = vpop.f32.mrb[13].mxu1 }
 0xc42   : > { %v11889_v7 = vadd.f32 %v19223_v28, %v11759_v39  ;;  %v14778_v41 = vpop.f32.mrb[14].mxu1 }
 0xc43   : > { %v11923_v46 = vmax.f32 %v11891_v42, 0.0  ;;  %v11892_v52 = vadd.f32 %v14778_v41, %v19223_v28  ;;  %v11762_v61 = vpop.f32.mrb[15].mxu1 }
 0xc44   : > { %v11921_v17 = vmax.f32 %v11889_v7, 0.0  ;;  %v11890_v40 = vadd.f32 %v19223_v28, %v11762_v61 }
 0xc45   : > { %11955 = vst.msk [vmem:[%s19230_s22 + $0x70] sm:$0xff] %vm487_vm0, %v11923_v46  ;;  %v11924_v20 = vmax.f32 %v11892_v52, 0.0 }
 0xc46   : > { %11953 = vst.msk [vmem:[%s19230_s22 + $0x60] sm:$0xff] %vm487_vm0, %v11921_v17  ;;  %v11922_v37 = vmax.f32 %v11890_v40, 0.0 }
 0xc47   : > { %11956 = vst.msk [vmem:[%s19230_s22 + $0x78] sm:$0xff] %vm487_vm0, %v11924_v20 }
 0xc48   : > { %11954 = vst.msk [vmem:[%s19230_s22 + $0x68] sm:$0xff] %vm487_vm0, %v11922_v37  ;;  %v14781_v45 = vpop.f32.mrb[16].mxu1 }
 0xc49   : > { %v11895_v35 = vadd.f32 %v14781_v45, %v19223_v28  ;;  %v11775_v55 = vpop.f32.mrb[17].mxu1 }
 0xc4a   : > { %v11893_v26 = vadd.f32 %v19223_v28, %v11775_v55  ;;  %v14782_v38 = vpop.f32.mrb[18].mxu1 }
 0xc4b   : > { %v11927_v53 = vmax.f32 %v11895_v35, 0.0  ;;  %v11896_v15 = vadd.f32 %v14782_v38, %v19223_v28  ;;  %v11778_v19 = vpop.f32.mrb[19].mxu1 }
 0xc4c   : > { %v11925_v30 = vmax.f32 %v11893_v26, 0.0  ;;  %v11894_v8 = vadd.f32 %v19223_v28, %v11778_v19 }
 0xc4d   : > { %11959 = vst.msk [vmem:[%s19230_s22 + $0x90] sm:$0xff] %vm487_vm0, %v11927_v53  ;;  %v11928_v48 = vmax.f32 %v11896_v15, 0.0 }
 0xc4e   : > { %11957 = vst.msk [vmem:[%s19230_s22 + $0x80] sm:$0xff] %vm487_vm0, %v11925_v30  ;;  %v11926_v50 = vmax.f32 %v11894_v8, 0.0 }
 0xc4f   : > { %11960 = vst.msk [vmem:[%s19230_s22 + $0x98] sm:$0xff] %vm487_vm0, %v11928_v48 }
 0xc50   : > { %11958 = vst.msk [vmem:[%s19230_s22 + $0x88] sm:$0xff] %vm487_vm0, %v11926_v50  ;;  %v14785_v47 = vpop.f32.mrb[20].mxu1 }
 0xc51   : > { %v11899_v58 = vadd.f32 %v14785_v47, %v19223_v28  ;;  %v11791_v29 = vpop.f32.mrb[21].mxu1 }
 0xc52   : > { %v11897_v43 = vadd.f32 %v19223_v28, %v11791_v29  ;;  %v14786_v16 = vpop.f32.mrb[22].mxu1 }
 0xc53   : > { %v11931_v59 = vmax.f32 %v11899_v58, 0.0  ;;  %v11900_v21 = vadd.f32 %v14786_v16, %v19223_v28  ;;  %v11794_v24 = vpop.f32.mrb[23].mxu1 }
 0xc54   : > { %v11929_v32 = vmax.f32 %v11897_v43, 0.0  ;;  %v11898_v9 = vadd.f32 %v19223_v28, %v11794_v24 }
 0xc55   : > { %11963 = vst.msk [vmem:[%s19230_s22 + $0xb0] sm:$0xff] %vm487_vm0, %v11931_v59  ;;  %v11932_v10 = vmax.f32 %v11900_v21, 0.0 }
 0xc56   : > { %11961 = vst.msk [vmem:[%s19230_s22 + $0xa0] sm:$0xff] %vm487_vm0, %v11929_v32  ;;  %v11930_v5 = vmax.f32 %v11898_v9, 0.0 }
 0xc57   : > { %11964 = vst.msk [vmem:[%s19230_s22 + $0xb8] sm:$0xff] %vm487_vm0, %v11932_v10 }
 0xc58   : > { %11962 = vst.msk [vmem:[%s19230_s22 + $0xa8] sm:$0xff] %vm487_vm0, %v11930_v5  ;;  %v14789_v1 = vpop.f32.mrb[24].mxu1 }
 0xc59   : > { %v11903_v23 = vadd.f32 %v14789_v1, %v19223_v28  ;;  %v11807_v2 = vpop.f32.mrb[25].mxu1 }
 0xc5a   : > { %v11901_v12 = vadd.f32 %v19223_v28, %v11807_v2  ;;  %v14790_v51 = vpop.f32.mrb[26].mxu1 }
 0xc5b   : > { %v11935_v60 = vmax.f32 %v11903_v23, 0.0  ;;  %v11904_v0 = vadd.f32 %v14790_v51, %v19223_v28  ;;  %v11810_v62 = vpop.f32.mrb[27].mxu1 }
 0xc5c   : > { %v11933_v31 = vmax.f32 %v11901_v12, 0.0  ;;  %v11902_v4 = vadd.f32 %v19223_v28, %v11810_v62 }
 0xc5d   : > { %11967 = vst.msk [vmem:[%s19230_s22 + $0xd0] sm:$0xff] %vm487_vm0, %v11935_v60  ;;  %v11936_v57 = vmax.f32 %v11904_v0, 0.0 }
 0xc5e   : > { %11965 = vst.msk [vmem:[%s19230_s22 + $0xc0] sm:$0xff] %vm487_vm0, %v11933_v31  ;;  %v11934_v63 = vmax.f32 %v11902_v4, 0.0 }
 0xc5f   : > { %11968 = vst.msk [vmem:[%s19230_s22 + $0xd8] sm:$0xff] %vm487_vm0, %v11936_v57 }
 0xc60   : > { %11966 = vst.msk [vmem:[%s19230_s22 + $0xc8] sm:$0xff] %vm487_vm0, %v11934_v63  ;;  %v14793_v18 = vpop.f32.mrb[28].mxu1 }
 0xc61   : > { %v11907_v54 = vadd.f32 %v14793_v18, %v19223_v28  ;;  %v11823_v25 = vpop.f32.mrb[29].mxu1 }
 0xc62   : > { %v11905_v56 = vadd.f32 %v19223_v28, %v11823_v25  ;;  %v14794_v14 = vpop.f32.mrb[30].mxu1 }
 0xc63   : > { %v11939_v11 = vmax.f32 %v11907_v54, 0.0  ;;  %v11908_v36 = vadd.f32 %v14794_v14, %v19223_v28  ;;  %v11826_v33 = vpop.f32.mrb[31].mxu1 }
 0xc64   : > { %v11937_v27 = vmax.f32 %v11905_v56, 0.0  ;;  %v11906_v13 = vadd.f32 %v19223_v28, %v11826_v33 }
 0xc65   : > { %11971 = vst.msk [vmem:[%s19230_s22 + $0xf0] sm:$0xff] %vm487_vm0, %v11939_v11  ;;  %v11940_v34 = vmax.f32 %v11908_v36, 0.0 }
 0xc66   : > { %11969 = vst.msk [vmem:[%s19230_s22 + $0xe0] sm:$0xff] %vm487_vm0, %v11937_v27  ;;  %v11938_v22 = vmax.f32 %v11906_v13, 0.0 }
 0xc67   : > { %11972 = vst.msk [vmem:[%s19230_s22 + $0xf8] sm:$0xff] %vm487_vm0, %v11940_v34 }
 0xc68   : > { %11970 = vst.msk [vmem:[%s19230_s22 + $0xe8] sm:$0xff] %vm487_vm0, %v11938_v22 }
 0xc69   : > { %16431 = shalt.err (!%p16428_p12)
}
 0xc6a   : > { %s16432_s15 = scalar_lea.hbm %s19323_s3, 4096  ;;  %s16436_s12 = scalar_lea.hbm %s19802_s13, 8192 }
 0xc6b   : > { %p16433_p8 = scmp.ne.s32.totalorder %s19323_s3, %s16432_s15  ;;  %p16437_p6 = scmp.lt.u32.totalorder %s19323_s3, %s19802_s13 }
 0xc6c   : > { %p16438_p2 = scmp.lt.u32.totalorder %s16436_s12, %s16432_s15  ;;  %p16440_p4 = scmp.lt.u32.totalorder %s16432_s15, %s19323_s3 }
 0xc6d   : > { %p16434_p3 = pnand %p16433_p8, %p19803_p9 }
 0xc6e   : > { %p16439_p13 = por %p16438_p2, %p16437_p6 }
 0xc6f   : > { %p16435_p11 = pneg %p16434_p3 }
 0xc70   : > { %p16441_p0 = por %p16440_p4, %p16439_p13 }
 0xc72   : > { %p16442_p7 = pnand %p16441_p0, %p16435_p11 }
 0xc74   : > { %16445 = shalt.err (!%p16442_p7)
}
 0xc75   : > { %s16538_s25 = smov 128   ;;  %s16539_s30 = smov 8  }
 0xc76   : > { %15947 = dma.vmem_to_hbm [thread:$0]  (%p19803_p9), %s19325_s18, 4096, %s19323_s3, %s11974_s14, %s16538_s25, %s16538_s25, %s16539_s30  }
 0xc77 PF: > { %s12003_s8 = sand.u32 1, %s16500_s27   ;;  %p19804_p5 = scmp.ne.s32.totalorder %s19580_s26, 0 }
 0xc78   : > { %p19805_p1 = scmp.ge.s32.totalorder %s16520_s10, 2  ;;  %s12004_s23 = scalar_lea.sflag [#allocation6], %s12003_s8 }
 0xc7a   : > { %p15976_p10 = pnand %p19805_p1, %p19804_p5 }
 0xc7c   : > { %16495 = dma.done.wait (!%p15976_p10), %s12004_s23, 4096  }
 0xc7d   : > { %16497 = vsyncadd (!%p15976_p10), %s12004_s23, 4294963200  ;;  %s30_s10 = sadd.s32 1, %s16520_s10   ;;  %s19806_s27 = smov %s16504_s28 }
 0xc7e   : > { %p27_p12 = scmp.ge.s32.totalorder %s30_s10, 4   ;;  %s19807_s28 = smov %s16508_s29 }
 0xc7f   : > { %s19808_s29 = smov %s16805_s24  ;;  %s19809_s30 = smov %s16516_s9 }
 0xc80   : > { %s19810_s9 = smov %s19812_s21  ;;  %29 = sbr.rel (!%p27_p12) target bundleno = 18 (0x12), region = 183 }
 0xc87   :  { %12009 = vsyncpa [#allocation5], 1 }
 0xc88   :  { %12011 = vsyncpa [#allocation5 + $0x1], 1 }
 0xc89   :  { %12012 = vsyncpa [#allocation8], 1 }
 0xc8a   :  { %12014 = vsyncpa [#allocation8 + $0x1], 1 }
 0xc8b   :  { %12015 = vsyncpa [#allocation11], 1 }
 0xc8c   :  { %12016 = vsyncpa [#allocation14], 1 }
 0xc8d   :  { %12017 = vsyncpa [#allocation17], 1 }
 0xc8e   :  { %12018 = vsyncpa [#allocation6], 1 }
 0xc8f   :  { %12020 = vsyncpa [#allocation6 + $0x1], 1 }

</bundles_post_ra>
